<compile_context>
chip_gen: v5e
topology: v5e:2x2
jax: 0.10.0
libtpu: 0.0.40
codegen_flags: <defaults>
</compile_context>

<pallas_src>
import functools

import jax
import jax.numpy as jnp
from jax import lax
from jax.experimental import pallas as pl
from jax.experimental.pallas import tpu as pltpu

EPS = 1e-5                     # nn.InstanceNorm2d default
_VMEM_LIMIT = 64 * 1024 * 1024


# ----------------------------------------------------------------------------
# In-kernel helpers
# ----------------------------------------------------------------------------
def _valid_mask(L, w_stride, r_lo, r_hi, c_lo, c_hi):
    """(1, L) f32 mask: 1.0 where flat index maps to a valid (row, col)."""
    idx = lax.broadcasted_iota(jnp.int32, (1, L), 1).astype(jnp.float32)
    r = jnp.floor((idx + 0.5) * (1.0 / w_stride))
    c = idx - r * w_stride
    ok = (r >= r_lo) & (r < r_hi) & (c >= c_lo) & (c < c_hi)
    return jnp.where(ok, 1.0, 0.0)


def _masked_inorm(y, mask, inv_n, g, b):
    """InstanceNorm over valid lanes only. y: (C, L) f32, mask: (1, L)."""
    ym = y * mask
    s = jnp.sum(ym, axis=-1, keepdims=True)
    ss = jnp.sum(ym * ym, axis=-1, keepdims=True)
    mean = s * inv_n
    var = jnp.maximum(ss * inv_n - mean * mean, 0.0)
    return (y - mean) * (lax.rsqrt(var + EPS) * g) + b


def _im2col(xe, shifts, L):
    """Stack shifted slices of the extended buffer xe along channels."""
    return jnp.concatenate([xe[:, s:s + L] for s in shifts], axis=0)


# ----------------------------------------------------------------------------
# Kernels
# ----------------------------------------------------------------------------
def _same_conv_kernel(*refs, pad, Hv, Wv, act, do_norm):
    """Stride-1 KxK conv on a padded-flat tile: one matmul + (IN) + act."""
    if do_norm:
        x_ref, w_ref, g_ref, b_ref, o_ref = refs
    else:
        x_ref, w_ref, o_ref = refs
    Cin, Lp = x_ref.shape[1], x_ref.shape[2]
    Wp = Wv + 2 * pad
    ext = pad * Wp + pad
    x = x_ref[0].astype(jnp.bfloat16)
    z = jnp.zeros((Cin, ext), jnp.bfloat16)
    xe = jnp.concatenate([z, x, z], axis=-1)
    shifts = [ext + dh * Wp + dw
              for dh in range(-pad, pad + 1) for dw in range(-pad, pad + 1)]
    y = jnp.dot(w_ref[...], _im2col(xe, shifts, Lp),
                preferred_element_type=jnp.float32)
    if do_norm:
        mask = _valid_mask(Lp, Wp, pad, pad + Hv, pad, pad + Wv)
        y = _masked_inorm(y, mask, 1.0 / (Hv * Wv), g_ref[...], b_ref[...])
    if act == "relu":
        y = jnp.maximum(y, 0.0)
    elif act == "tanh":
        y = jnp.tanh(y)
    o_ref[0] = y.astype(o_ref.dtype)


def _down_conv_kernel(x_ref, w_ref, g_ref, b_ref, o_ref, *, Wq, Hv, Wv):
    """4x4 stride-2 conv via 4-parity phase decomposition: one matmul + IN + ReLU."""
    C4, Lq = x_ref.shape[1], x_ref.shape[2]
    Cin = C4 // 4
    x = x_ref[0].astype(jnp.bfloat16)
    ext = Wq + 1
    xe = jnp.concatenate([x, jnp.zeros((C4, ext), jnp.bfloat16)], axis=-1)
    cols = []
    for g in range(4):                       # phase (p, q), p outer
        xg = xe[g * Cin:(g + 1) * Cin]
        for s in (0, 1, Wq, Wq + 1):         # tap (dy, dx), dy outer
            cols.append(xg[:, s:s + Lq])
    y = jnp.dot(w_ref[...], jnp.concatenate(cols, axis=0),
                preferred_element_type=jnp.float32)
    mask = _valid_mask(Lq, Wq, 0, Hv, 0, Wv)
    y = _masked_inorm(y, mask, 1.0 / (Hv * Wv), g_ref[...], b_ref[...])
    o_ref[0] = jnp.maximum(y, 0.0).astype(o_ref.dtype)


def _res_stack_kernel(h_ref, w_ref, g_ref, b_ref, o_ref, *, repeat, Hv, Wv):
    """All residual blocks fused: h <- h + IN(conv3(ReLU(IN(conv3(h))))).

    Activation stays in padded-flat (pad=1) layout with an exact zero halo, so
    the next block (and the following up-sample kernel) consumes it directly.
    """
    C, Lr = h_ref.shape[1], h_ref.shape[2]
    Wp = Wv + 2
    ext = Wp + 1
    shifts = [ext + dh * Wp + dw for dh in (-1, 0, 1) for dw in (-1, 0, 1)]
    mask = _valid_mask(Lr, Wp, 1, 1 + Hv, 1, 1 + Wv)
    inv_n = 1.0 / (Hv * Wv)

    def conv3(h, wmat):
        z = jnp.zeros((C, ext), jnp.bfloat16)
        he = jnp.concatenate([z, h.astype(jnp.bfloat16), z], axis=-1)
        return jnp.dot(wmat, _im2col(he, shifts, Lr),
                       preferred_element_type=jnp.float32)

    def body(r, h):
        t = conv3(h, w_ref[2 * r])
        t = jnp.maximum(
            _masked_inorm(t, mask, inv_n, g_ref[2 * r], b_ref[2 * r]), 0.0) * mask
        t = conv3(t, w_ref[2 * r + 1])
        t = _masked_inorm(t, mask, inv_n, g_ref[2 * r + 1], b_ref[2 * r + 1]) * mask
        return h + t

    h = lax.fori_loop(0, repeat, body, h_ref[0].astype(jnp.float32))
    o_ref[0] = h.astype(o_ref.dtype)


def _up_conv_kernel(h_ref, w_ref, g_ref, b_ref, o_ref, *, Hv, Wv):
    """ConvTranspose2d(k4,s2,p1) via 4 output-phase matmuls + IN + ReLU.

    Input is padded-flat (pad=1) with zero halo; output is phase-major
    (Cout, 4*Lp) — lane-dense store; XLA interleaves/crops afterwards.
    """
    Cin, Lp = h_ref.shape[1], h_ref.shape[2]
    Wp = Wv + 2
    x = h_ref[0].astype(jnp.bfloat16)
    ext = 2 * Wp + 2
    xe = jnp.concatenate([x, jnp.zeros((Cin, ext), jnp.bfloat16)], axis=-1)
    ys = []
    for pa in (0, 1):
        for pb in (0, 1):
            shifts = [(pa + ti) * Wp + (pb + tj) for ti in (0, 1) for tj in (0, 1)]
            ys.append(jnp.dot(w_ref[2 * pa + pb], _im2col(xe, shifts, Lp),
                              preferred_element_type=jnp.float32))
    y = jnp.concatenate(ys, axis=-1)                       # (Cout, 4*Lp)
    mask = _valid_mask(Lp, Wp, 0, Hv, 0, Wv)
    mask4 = jnp.concatenate([mask, mask, mask, mask], axis=-1)
    y = _masked_inorm(y, mask4, 1.0 / (4 * Hv * Wv), g_ref[...], b_ref[...])
    o_ref[0] = jnp.maximum(y, 0.0).astype(o_ref.dtype)


# ----------------------------------------------------------------------------
# pallas_call wrappers
# ----------------------------------------------------------------------------
def _cparams():
    return pltpu.CompilerParams(dimension_semantics=("parallel",),
                                vmem_limit_bytes=_VMEM_LIMIT)


def _cost(flops, trans, byts):
    return pl.CostEstimate(flops=int(flops), transcendentals=int(trans),
                           bytes_accessed=int(byts))


def same_conv(xf, wmat, gamma, beta, *, Hv, Wv, pad, act, do_norm,
              out_dtype=jnp.bfloat16):
    N, Cin, Lp = xf.shape
    Cout = wmat.shape[0]
    assert (Hv + 2 * pad) * (Wv + 2 * pad) == Lp
    inputs = [xf, wmat]
    in_specs = [pl.BlockSpec((1, Cin, Lp), lambda n: (n, 0, 0)),
                pl.BlockSpec(wmat.shape, lambda n: (0, 0))]
    if do_norm:
        inputs += [gamma, beta]
        in_specs += [pl.BlockSpec((Cout, 1), lambda n: (0, 0)),
                     pl.BlockSpec((Cout, 1), lambda n: (0, 0))]
    kern = functools.partial(_same_conv_kernel, pad=pad, Hv=Hv, Wv=Wv,
                             act=act, do_norm=do_norm)
    byts = (xf.size * xf.dtype.itemsize + wmat.size * 2
            + N * Cout * Lp * jnp.dtype(out_dtype).itemsize)
    trans = N * Cout * Lp if act == "tanh" else N * Cout
    return pl.pallas_call(
        kern, grid=(N,), in_specs=in_specs,
        out_specs=pl.BlockSpec((1, Cout, Lp), lambda n: (n, 0, 0)),
        out_shape=jax.ShapeDtypeStruct((N, Cout, Lp), out_dtype),
        compiler_params=_cparams(),
        cost_estimate=_cost(2 * N * Cout * wmat.shape[1] * Lp, trans, byts),
    )(*inputs)


def down_conv(xf, wmat, gamma, beta, *, Wq, Hv, Wv, out_dtype=jnp.bfloat16):
    N, C4, Lq = xf.shape
    Cout = wmat.shape[0]
    assert Lq == (Hv + 1) * (Wv + 1) and Wq == Wv + 1
    kern = functools.partial(_down_conv_kernel, Wq=Wq, Hv=Hv, Wv=Wv)
    byts = (xf.size * xf.dtype.itemsize + wmat.size * 2
            + N * Cout * Lq * jnp.dtype(out_dtype).itemsize)
    return pl.pallas_call(
        kern, grid=(N,),
        in_specs=[pl.BlockSpec((1, C4, Lq), lambda n: (n, 0, 0)),
                  pl.BlockSpec(wmat.shape, lambda n: (0, 0)),
                  pl.BlockSpec((Cout, 1), lambda n: (0, 0)),
                  pl.BlockSpec((Cout, 1), lambda n: (0, 0))],
        out_specs=pl.BlockSpec((1, Cout, Lq), lambda n: (n, 0, 0)),
        out_shape=jax.ShapeDtypeStruct((N, Cout, Lq), out_dtype),
        compiler_params=_cparams(),
        cost_estimate=_cost(2 * N * Cout * wmat.shape[1] * Lq, N * Cout, byts),
    )(xf, wmat, gamma, beta)


def res_stack(hf, w, g, b, *, Hv, Wv, out_dtype=jnp.bfloat16):
    N, C, Lr = hf.shape
    R = w.shape[0] // 2
    assert (Hv + 2) * (Wv + 2) == Lr
    kern = functools.partial(_res_stack_kernel, repeat=R, Hv=Hv, Wv=Wv)
    byts = (hf.size * hf.dtype.itemsize + w.size * 2
            + N * C * Lr * jnp.dtype(out_dtype).itemsize)
    return pl.pallas_call(
        kern, grid=(N,),
        in_specs=[pl.BlockSpec((1, C, Lr), lambda n: (n, 0, 0)),
                  pl.BlockSpec(w.shape, lambda n: (0, 0, 0)),
                  pl.BlockSpec(g.shape, lambda n: (0, 0, 0)),
                  pl.BlockSpec(b.shape, lambda n: (0, 0, 0))],
        out_specs=pl.BlockSpec((1, C, Lr), lambda n: (n, 0, 0)),
        out_shape=jax.ShapeDtypeStruct((N, C, Lr), out_dtype),
        compiler_params=_cparams(),
        cost_estimate=_cost(2 * N * 2 * R * C * w.shape[2] * Lr,
                            2 * R * N * C, byts),
    )(hf, w, g, b)


def up_conv(hf, w, gamma, beta, *, Hv, Wv, out_dtype=jnp.bfloat16):
    N, Cin, Lp = hf.shape
    Cout = w.shape[1]
    assert (Hv + 2) * (Wv + 2) == Lp
    kern = functools.partial(_up_conv_kernel, Hv=Hv, Wv=Wv)
    byts = (hf.size * hf.dtype.itemsize + w.size * 2
            + N * Cout * 4 * Lp * jnp.dtype(out_dtype).itemsize)
    return pl.pallas_call(
        kern, grid=(N,),
        in_specs=[pl.BlockSpec((1, Cin, Lp), lambda n: (n, 0, 0)),
                  pl.BlockSpec(w.shape, lambda n: (0, 0, 0)),
                  pl.BlockSpec((Cout, 1), lambda n: (0, 0)),
                  pl.BlockSpec((Cout, 1), lambda n: (0, 0))],
        out_specs=pl.BlockSpec((1, Cout, 4 * Lp), lambda n: (n, 0, 0)),
        out_shape=jax.ShapeDtypeStruct((N, Cout, 4 * Lp), out_dtype),
        compiler_params=_cparams(),
        cost_estimate=_cost(2 * N * 4 * Cout * w.shape[2] * Lp, N * Cout, byts),
    )(hf, w, gamma, beta)


# ----------------------------------------------------------------------------
# Plain-JAX glue (pads / crops / phase rearranges on small HBM tensors)
# ----------------------------------------------------------------------------
def pad_flat(x, pad):
    N, C, H, W = x.shape
    xp = jnp.pad(x, ((0, 0), (0, 0), (pad, pad), (pad, pad)))
    return xp.reshape(N, C, (H + 2 * pad) * (W + 2 * pad))


def crop_from_flat(y, Hv, Wv, pad):
    N, C, _ = y.shape
    Hp, Wp = Hv + 2 * pad, Wv + 2 * pad
    return y.reshape(N, C, Hp, Wp)[:, :, pad:pad + Hv, pad:pad + Wv]


def phase_split(x):
    """(N,C,H,W) -> (N,4C,(H/2+1)*(W/2+1)) parity phases of the pad-1 image."""
    N, C, H, W = x.shape
    xp = jnp.pad(x, ((0, 0), (0, 0), (1, 1), (1, 1)))
    Hq, Wq = H // 2 + 1, W // 2 + 1
    ph = [xp[:, :, p::2, q::2] for p in (0, 1) for q in (0, 1)]
    return jnp.concatenate(ph, axis=1).reshape(N, 4 * C, Hq * Wq), Hq, Wq


def up_deinterleave(y, Hv, Wv):
    """Phase-major (N,C,4*Lp) -> (N,C,2Hv,2Wv)."""
    N, C = y.shape[0], y.shape[1]
    Hp, Wp = Hv + 2, Wv + 2
    y = y.reshape(N, C, 2, 2, Hp, Wp)[:, :, :, :, :Hv, :Wv]
    return jnp.transpose(y, (0, 1, 4, 2, 5, 3)).reshape(N, C, 2 * Hv, 2 * Wv)


# ----------------------------------------------------------------------------
# Parameters (deterministic synthetic init) + one-time weight preprocessing
# ----------------------------------------------------------------------------
def init_params(key, conv_dim=8, repeat_num=2):
    keys = iter(jax.random.split(key, 64))

    def conv_p(cin, cout, k):
        scale = (1.0 / (cin * k * k)) ** 0.5
        return scale * jax.random.normal(next(keys), (cout, cin, k, k), jnp.float32)

    def convT_p(cin, cout, k):
        scale = (1.0 / (cin * k * k)) ** 0.5
        return scale * jax.random.normal(next(keys), (cin, cout, k, k), jnp.float32)

    def in_p(c):
        g = 1.0 + 0.1 * jax.random.normal(next(keys), (c,), jnp.float32)
        b = 0.1 * jax.random.normal(next(keys), (c,), jnp.float32)
        return g, b

    cd = conv_dim
    p = {}
    p["c0_w"] = conv_p(3, cd, 7); p["c0_g"], p["c0_b"] = in_p(cd)
    p["d1_w"] = conv_p(cd, 2 * cd, 4); p["d1_g"], p["d1_b"] = in_p(2 * cd)
    p["d2_w"] = conv_p(2 * cd, 4 * cd, 4); p["d2_g"], p["d2_b"] = in_p(4 * cd)
    res = []
    for _ in range(repeat_num):
        w1 = conv_p(4 * cd, 4 * cd, 3); g1, b1 = in_p(4 * cd)
        w2 = conv_p(4 * cd, 4 * cd, 3); g2, b2 = in_p(4 * cd)
        res.append((w1, g1, b1, w2, g2, b2))
    p["res"] = res
    p["u1_w"] = convT_p(4 * cd, 2 * cd, 4); p["u1_g"], p["u1_b"] = in_p(2 * cd)
    p["u2_w"] = convT_p(2 * cd, cd, 4); p["u2_g"], p["u2_b"] = in_p(cd)
    p["out_w"] = conv_p(cd, 3, 7)
    return p


def prepare_params(raw, stem_cin_pad=8):
    """Precompute kernel-ready (single-matmul) weight layouts once."""
    def same_mat(w, cin_pad=None):        # (Cout,Cin,K,K) -> (Cout, K*K*Cin) bf16
        co, ci, k, _ = w.shape
        if cin_pad is not None and cin_pad > ci:
            w = jnp.pad(w, ((0, 0), (0, cin_pad - ci), (0, 0), (0, 0)))
            ci = cin_pad
        return jnp.transpose(w, (0, 2, 3, 1)).reshape(co, k * k * ci).astype(jnp.bfloat16)

    def down_mat(w):                      # (Cout,Cin,4,4) -> (Cout, 16*Cin) bf16
        blocks = [w[:, :, 2 * dy + p, 2 * dx + q]
                  for p in (0, 1) for q in (0, 1)
                  for dy in (0, 1) for dx in (0, 1)]
        return jnp.concatenate(blocks, axis=1).astype(jnp.bfloat16)

    def up_mat(w):                        # ConvT (Cin,Cout,4,4) -> (4, Cout, 4*Cin) bf16
        kmap = ((3, 1), (2, 0))
        phases = []
        for a in (0, 1):
            for b in (0, 1):
                blocks = [jnp.transpose(w[:, :, kmap[a][ti], kmap[b][tj]], (1, 0))
                          for ti in (0, 1) for tj in (0, 1)]
                phases.append(jnp.concatenate(blocks, axis=1))
        return jnp.stack(phases, axis=0).astype(jnp.bfloat16)

    def cvec(v):
        return v.reshape(-1, 1).astype(jnp.float32)

    p = {
        "c0_w": same_mat(raw["c0_w"], cin_pad=stem_cin_pad),
        "c0_g": cvec(raw["c0_g"]), "c0_b": cvec(raw["c0_b"]),
        "d1_w": down_mat(raw["d1_w"]), "d1_g": cvec(raw["d1_g"]), "d1_b": cvec(raw["d1_b"]),
        "d2_w": down_mat(raw["d2_w"]), "d2_g": cvec(raw["d2_g"]), "d2_b": cvec(raw["d2_b"]),
        "u1_w": up_mat(raw["u1_w"]), "u1_g": cvec(raw["u1_g"]), "u1_b": cvec(raw["u1_b"]),
        "u2_w": up_mat(raw["u2_w"]), "u2_g": cvec(raw["u2_g"]), "u2_b": cvec(raw["u2_b"]),
        "out_w": same_mat(raw["out_w"]),
    }
    rw, rg, rb = [], [], []
    for (w1, g1, b1, w2, g2, b2) in raw["res"]:
        rw += [same_mat(w1), same_mat(w2)]
        rg += [cvec(g1), cvec(g2)]
        rb += [cvec(b1), cvec(b2)]
    p["res_w"] = jnp.stack(rw, axis=0)     # (R*2, C, 9C) bf16
    p["res_g"] = jnp.stack(rg, axis=0)     # (R*2, C, 1)  f32
    p["res_b"] = jnp.stack(rb, axis=0)
    return p


# ----------------------------------------------------------------------------
# Generator forward (mask_type='no', c=None)
# ----------------------------------------------------------------------------
def generator_forward(params, x_nchw):
    N, _, H, W = x_nchw.shape
    x = x_nchw.astype(jnp.float32)
    stem_cin = params["c0_w"].shape[1] // 49
    x = jnp.pad(x, ((0, 0), (0, stem_cin - x.shape[1]), (0, 0), (0, 0)))

    # stem: Conv7x7 s1 p3 + IN + ReLU
    h = same_conv(pad_flat(x, 3), params["c0_w"], params["c0_g"], params["c0_b"],
                  Hv=H, Wv=W, pad=3, act="relu", do_norm=True)
    h = crop_from_flat(h, H, W, 3)

    # downsampling x2: Conv4x4 s2 p1 + IN + ReLU (parity-phase decomposition)
    for name in ("d1", "d2"):
        Hc, Wc = h.shape[2], h.shape[3]
        ph, Hq, Wq = phase_split(h)
        y = down_conv(ph, params[name + "_w"], params[name + "_g"],
                      params[name + "_b"], Wq=Wq, Hv=Hc // 2, Wv=Wc // 2)
        h = y.reshape(N, -1, Hq, Wq)[:, :, :Hc // 2, :Wc // 2]

    # fused residual stack (padded-flat pad=1 in/out, zero halo maintained)
    Hb, Wb = h.shape[2], h.shape[3]
    hf = res_stack(pad_flat(h, 1), params["res_w"], params["res_g"],
                   params["res_b"], Hv=Hb, Wv=Wb)

    # upsampling x2: ConvTranspose2d k4 s2 p1 via 4 output phases
    Hc, Wc = Hb, Wb
    for name in ("u1", "u2"):
        y = up_conv(hf, params[name + "_w"], params[name + "_g"],
                    params[name + "_b"], Hv=Hc, Wv=Wc)
        h = up_deinterleave(y, Hc, Wc)
        Hc, Wc = 2 * Hc, 2 * Wc
        if name == "u1":
            hf = pad_flat(h, 1)

    # output head: Conv7x7 s1 p3 -> Tanh (no InstanceNorm)
    y = same_conv(pad_flat(h, 3), params["out_w"], None, None,
                  Hv=Hc, Wv=Wc, pad=3, act="tanh", do_norm=False,
                  out_dtype=jnp.float32)
    return crop_from_flat(y, Hc, Wc, 3)


if __name__ == "__main__":
    key = jax.random.PRNGKey(0)
    kp, kx = jax.random.split(key)
    # small config consistent with the module: conv_dim=8, repeat_num=2
    raw = init_params(kp, conv_dim=8, repeat_num=2)
    params = prepare_params(raw)
    x = jax.random.normal(kx, (2, 3, 16, 16), jnp.float32)  # NCHW, 3 input channels

    fwd = jax.jit(lambda xx: generator_forward(params, xx))
    out = jax.block_until_ready(fwd(x))

    assert out.shape == (2, 3, 16, 16), out.shape
    assert bool(jnp.all(jnp.isfinite(out)))
    assert bool(jnp.all(jnp.abs(out) <= 1.0 + 1e-6))  # tanh output range
    print("KERNEL_OK")
</pallas_src>

<mosaic_0001>
module attributes {stable_mosaic.version = 11 : i64} {
  func.func @_same_conv_kernel(%arg0: i32, %arg1: memref<1x8x484xf32, #tpu.memory_space<vmem>>, %arg2: memref<8x392xbf16, #tpu.memory_space<vmem>>, %arg3: memref<8x1xf32, #tpu.memory_space<vmem>>, %arg4: memref<8x1xf32, #tpu.memory_space<vmem>>, %arg5: memref<1x8x484xbf16, #tpu.memory_space<vmem>>) attributes {dimension_semantics = [#tpu.dimension_semantics<parallel>], iteration_bounds = array<i64: 2>, scalar_prefetch = 0 : i64, scratch_operands = 0 : i64, tpu.core_type = #tpu.core_type<tc>, window_params = [{transform_indices = @transform_0, window_bounds = array<i64: 1, 8, 484>}, {pipeline_mode = #tpu.pipeline_mode<synchronous>, transform_indices = @transform_1, window_bounds = array<i64: 8, 392>}, {pipeline_mode = #tpu.pipeline_mode<synchronous>, transform_indices = @transform_2, window_bounds = array<i64: 8, 1>}, {pipeline_mode = #tpu.pipeline_mode<synchronous>, transform_indices = @transform_3, window_bounds = array<i64: 8, 1>}, {transform_indices = @transform_4, window_bounds = array<i64: 1, 8, 484>}]} {
    %c0 = arith.constant 0 : index
    %c0_0 = arith.constant 0 : index
    %c0_1 = arith.constant 0 : index
    %0 = vector.load %arg1[%c0, %c0_0, %c0_1] : memref<1x8x484xf32, #tpu.memory_space<vmem>>, vector<1x8x484xf32>
    %1 = vector.shape_cast %0 : vector<1x8x484xf32> to vector<8x484xf32>
    %2 = arith.truncf %1 : vector<8x484xf32> to vector<8x484xbf16>
    %cst = arith.constant 0.000000e+00 : bf16
    %3 = vector.broadcast %cst : bf16 to vector<8x69xbf16>
    %4 = tpu.concatenate %3, %2, %3 in 1 : vector<8x69xbf16>, vector<8x484xbf16>, vector<8x69xbf16> -> vector<8x622xbf16>
    %c0_2 = arith.constant 0 : index
    %c0_3 = arith.constant 0 : index
    %5 = vector.load %arg2[%c0_2, %c0_3] : memref<8x392xbf16, #tpu.memory_space<vmem>>, vector<8x392xbf16>
    %6 = vector.extract_strided_slice %4 {offsets = [0, 0], sizes = [8, 484], strides = [1, 1]} : vector<8x622xbf16> to vector<8x484xbf16>
    %7 = vector.extract_strided_slice %4 {offsets = [0, 1], sizes = [8, 484], strides = [1, 1]} : vector<8x622xbf16> to vector<8x484xbf16>
    %8 = vector.extract_strided_slice %4 {offsets = [0, 2], sizes = [8, 484], strides = [1, 1]} : vector<8x622xbf16> to vector<8x484xbf16>
    %9 = vector.extract_strided_slice %4 {offsets = [0, 3], sizes = [8, 484], strides = [1, 1]} : vector<8x622xbf16> to vector<8x484xbf16>
    %10 = vector.extract_strided_slice %4 {offsets = [0, 4], sizes = [8, 484], strides = [1, 1]} : vector<8x622xbf16> to vector<8x484xbf16>
    %11 = vector.extract_strided_slice %4 {offsets = [0, 5], sizes = [8, 484], strides = [1, 1]} : vector<8x622xbf16> to vector<8x484xbf16>
    %12 = vector.extract_strided_slice %4 {offsets = [0, 6], sizes = [8, 484], strides = [1, 1]} : vector<8x622xbf16> to vector<8x484xbf16>
    %13 = vector.extract_strided_slice %4 {offsets = [0, 22], sizes = [8, 484], strides = [1, 1]} : vector<8x622xbf16> to vector<8x484xbf16>
    %14 = vector.extract_strided_slice %4 {offsets = [0, 23], sizes = [8, 484], strides = [1, 1]} : vector<8x622xbf16> to vector<8x484xbf16>
    %15 = vector.extract_strided_slice %4 {offsets = [0, 24], sizes = [8, 484], strides = [1, 1]} : vector<8x622xbf16> to vector<8x484xbf16>
    %16 = vector.extract_strided_slice %4 {offsets = [0, 25], sizes = [8, 484], strides = [1, 1]} : vector<8x622xbf16> to vector<8x484xbf16>
    %17 = vector.extract_strided_slice %4 {offsets = [0, 26], sizes = [8, 484], strides = [1, 1]} : vector<8x622xbf16> to vector<8x484xbf16>
    %18 = vector.extract_strided_slice %4 {offsets = [0, 27], sizes = [8, 484], strides = [1, 1]} : vector<8x622xbf16> to vector<8x484xbf16>
    %19 = vector.extract_strided_slice %4 {offsets = [0, 28], sizes = [8, 484], strides = [1, 1]} : vector<8x622xbf16> to vector<8x484xbf16>
    %20 = vector.extract_strided_slice %4 {offsets = [0, 44], sizes = [8, 484], strides = [1, 1]} : vector<8x622xbf16> to vector<8x484xbf16>
    %21 = vector.extract_strided_slice %4 {offsets = [0, 45], sizes = [8, 484], strides = [1, 1]} : vector<8x622xbf16> to vector<8x484xbf16>
    %22 = vector.extract_strided_slice %4 {offsets = [0, 46], sizes = [8, 484], strides = [1, 1]} : vector<8x622xbf16> to vector<8x484xbf16>
    %23 = vector.extract_strided_slice %4 {offsets = [0, 47], sizes = [8, 484], strides = [1, 1]} : vector<8x622xbf16> to vector<8x484xbf16>
    %24 = vector.extract_strided_slice %4 {offsets = [0, 48], sizes = [8, 484], strides = [1, 1]} : vector<8x622xbf16> to vector<8x484xbf16>
    %25 = vector.extract_strided_slice %4 {offsets = [0, 49], sizes = [8, 484], strides = [1, 1]} : vector<8x622xbf16> to vector<8x484xbf16>
    %26 = vector.extract_strided_slice %4 {offsets = [0, 50], sizes = [8, 484], strides = [1, 1]} : vector<8x622xbf16> to vector<8x484xbf16>
    %27 = vector.extract_strided_slice %4 {offsets = [0, 66], sizes = [8, 484], strides = [1, 1]} : vector<8x622xbf16> to vector<8x484xbf16>
    %28 = vector.extract_strided_slice %4 {offsets = [0, 67], sizes = [8, 484], strides = [1, 1]} : vector<8x622xbf16> to vector<8x484xbf16>
    %29 = vector.extract_strided_slice %4 {offsets = [0, 68], sizes = [8, 484], strides = [1, 1]} : vector<8x622xbf16> to vector<8x484xbf16>
    %30 = vector.extract_strided_slice %4 {offsets = [0, 69], sizes = [8, 484], strides = [1, 1]} : vector<8x622xbf16> to vector<8x484xbf16>
    %31 = vector.extract_strided_slice %4 {offsets = [0, 70], sizes = [8, 484], strides = [1, 1]} : vector<8x622xbf16> to vector<8x484xbf16>
    %32 = vector.extract_strided_slice %4 {offsets = [0, 71], sizes = [8, 484], strides = [1, 1]} : vector<8x622xbf16> to vector<8x484xbf16>
    %33 = vector.extract_strided_slice %4 {offsets = [0, 72], sizes = [8, 484], strides = [1, 1]} : vector<8x622xbf16> to vector<8x484xbf16>
    %34 = vector.extract_strided_slice %4 {offsets = [0, 88], sizes = [8, 484], strides = [1, 1]} : vector<8x622xbf16> to vector<8x484xbf16>
    %35 = vector.extract_strided_slice %4 {offsets = [0, 89], sizes = [8, 484], strides = [1, 1]} : vector<8x622xbf16> to vector<8x484xbf16>
    %36 = vector.extract_strided_slice %4 {offsets = [0, 90], sizes = [8, 484], strides = [1, 1]} : vector<8x622xbf16> to vector<8x484xbf16>
    %37 = vector.extract_strided_slice %4 {offsets = [0, 91], sizes = [8, 484], strides = [1, 1]} : vector<8x622xbf16> to vector<8x484xbf16>
    %38 = vector.extract_strided_slice %4 {offsets = [0, 92], sizes = [8, 484], strides = [1, 1]} : vector<8x622xbf16> to vector<8x484xbf16>
    %39 = vector.extract_strided_slice %4 {offsets = [0, 93], sizes = [8, 484], strides = [1, 1]} : vector<8x622xbf16> to vector<8x484xbf16>
    %40 = vector.extract_strided_slice %4 {offsets = [0, 94], sizes = [8, 484], strides = [1, 1]} : vector<8x622xbf16> to vector<8x484xbf16>
    %41 = vector.extract_strided_slice %4 {offsets = [0, 110], sizes = [8, 484], strides = [1, 1]} : vector<8x622xbf16> to vector<8x484xbf16>
    %42 = vector.extract_strided_slice %4 {offsets = [0, 111], sizes = [8, 484], strides = [1, 1]} : vector<8x622xbf16> to vector<8x484xbf16>
    %43 = vector.extract_strided_slice %4 {offsets = [0, 112], sizes = [8, 484], strides = [1, 1]} : vector<8x622xbf16> to vector<8x484xbf16>
    %44 = vector.extract_strided_slice %4 {offsets = [0, 113], sizes = [8, 484], strides = [1, 1]} : vector<8x622xbf16> to vector<8x484xbf16>
    %45 = vector.extract_strided_slice %4 {offsets = [0, 114], sizes = [8, 484], strides = [1, 1]} : vector<8x622xbf16> to vector<8x484xbf16>
    %46 = vector.extract_strided_slice %4 {offsets = [0, 115], sizes = [8, 484], strides = [1, 1]} : vector<8x622xbf16> to vector<8x484xbf16>
    %47 = vector.extract_strided_slice %4 {offsets = [0, 116], sizes = [8, 484], strides = [1, 1]} : vector<8x622xbf16> to vector<8x484xbf16>
    %48 = vector.extract_strided_slice %4 {offsets = [0, 132], sizes = [8, 484], strides = [1, 1]} : vector<8x622xbf16> to vector<8x484xbf16>
    %49 = vector.extract_strided_slice %4 {offsets = [0, 133], sizes = [8, 484], strides = [1, 1]} : vector<8x622xbf16> to vector<8x484xbf16>
    %50 = vector.extract_strided_slice %4 {offsets = [0, 134], sizes = [8, 484], strides = [1, 1]} : vector<8x622xbf16> to vector<8x484xbf16>
    %51 = vector.extract_strided_slice %4 {offsets = [0, 135], sizes = [8, 484], strides = [1, 1]} : vector<8x622xbf16> to vector<8x484xbf16>
    %52 = vector.extract_strided_slice %4 {offsets = [0, 136], sizes = [8, 484], strides = [1, 1]} : vector<8x622xbf16> to vector<8x484xbf16>
    %53 = vector.extract_strided_slice %4 {offsets = [0, 137], sizes = [8, 484], strides = [1, 1]} : vector<8x622xbf16> to vector<8x484xbf16>
    %54 = vector.extract_strided_slice %4 {offsets = [0, 138], sizes = [8, 484], strides = [1, 1]} : vector<8x622xbf16> to vector<8x484xbf16>
    %55 = tpu.concatenate %6, %7, %8, %9, %10, %11, %12, %13, %14, %15, %16, %17, %18, %19, %20, %21 in 0 : vector<8x484xbf16>, vector<8x484xbf16>, vector<8x484xbf16>, vector<8x484xbf16>, vector<8x484xbf16>, vector<8x484xbf16>, vector<8x484xbf16>, vector<8x484xbf16>, vector<8x484xbf16>, vector<8x484xbf16>, vector<8x484xbf16>, vector<8x484xbf16>, vector<8x484xbf16>, vector<8x484xbf16>, vector<8x484xbf16>, vector<8x484xbf16> -> vector<128x484xbf16>
    %56 = tpu.concatenate %22, %23, %24, %25, %26, %27, %28, %29, %30, %31, %32, %33, %34, %35, %36, %37 in 0 : vector<8x484xbf16>, vector<8x484xbf16>, vector<8x484xbf16>, vector<8x484xbf16>, vector<8x484xbf16>, vector<8x484xbf16>, vector<8x484xbf16>, vector<8x484xbf16>, vector<8x484xbf16>, vector<8x484xbf16>, vector<8x484xbf16>, vector<8x484xbf16>, vector<8x484xbf16>, vector<8x484xbf16>, vector<8x484xbf16>, vector<8x484xbf16> -> vector<128x484xbf16>
    %57 = tpu.concatenate %38, %39, %40, %41, %42, %43, %44, %45, %46, %47, %48, %49, %50, %51, %52, %53 in 0 : vector<8x484xbf16>, vector<8x484xbf16>, vector<8x484xbf16>, vector<8x484xbf16>, vector<8x484xbf16>, vector<8x484xbf16>, vector<8x484xbf16>, vector<8x484xbf16>, vector<8x484xbf16>, vector<8x484xbf16>, vector<8x484xbf16>, vector<8x484xbf16>, vector<8x484xbf16>, vector<8x484xbf16>, vector<8x484xbf16>, vector<8x484xbf16> -> vector<128x484xbf16>
    %58 = tpu.concatenate %55, %56, %57, %54 in 0 : vector<128x484xbf16>, vector<128x484xbf16>, vector<128x484xbf16>, vector<8x484xbf16> -> vector<392x484xbf16>
    %cst_4 = arith.constant dense<0.000000e+00> : vector<8x484xf32>
    %59 = tpu.matmul %5, %58, %cst_4 {dimension_numbers = #tpu.dot_dimension_numbers<[1], [0], [0], [1], [0, 0, 1, 1], [], []>} : vector<8x392xbf16>, vector<392x484xbf16>, vector<8x484xf32> -> vector<8x484xf32>
    %60 = tpu.iota {dimensions = array<i32: 1>} : vector<1x484xi32>
    %61 = arith.sitofp %60 : vector<1x484xi32> to vector<1x484xf32>
    %cst_5 = arith.constant 5.000000e-01 : f32
    %62 = vector.broadcast %cst_5 : f32 to vector<1x484xf32>
    %63 = arith.addf %61, %62 : vector<1x484xf32>
    %cst_6 = arith.constant 0.0454545468 : f32
    %64 = vector.broadcast %cst_6 : f32 to vector<1x484xf32>
    %65 = arith.mulf %63, %64 : vector<1x484xf32>
    %66 = math.floor %65 : vector<1x484xf32>
    %cst_7 = arith.constant 2.200000e+01 : f32
    %67 = vector.broadcast %cst_7 : f32 to vector<1x484xf32>
    %68 = arith.mulf %66, %67 : vector<1x484xf32>
    %69 = arith.subf %61, %68 : vector<1x484xf32>
    %cst_8 = arith.constant 3.000000e+00 : f32
    %70 = vector.broadcast %cst_8 : f32 to vector<1x484xf32>
    %71 = arith.cmpf oge, %66, %70 : vector<1x484xf32>
    %cst_9 = arith.constant 1.900000e+01 : f32
    %72 = vector.broadcast %cst_9 : f32 to vector<1x484xf32>
    %73 = arith.cmpf olt, %66, %72 : vector<1x484xf32>
    %74 = arith.andi %71, %73 : vector<1x484xi1>
    %cst_10 = arith.constant 3.000000e+00 : f32
    %75 = vector.broadcast %cst_10 : f32 to vector<1x484xf32>
    %76 = arith.cmpf oge, %69, %75 : vector<1x484xf32>
    %77 = arith.andi %74, %76 : vector<1x484xi1>
    %cst_11 = arith.constant 1.900000e+01 : f32
    %78 = vector.broadcast %cst_11 : f32 to vector<1x484xf32>
    %79 = arith.cmpf olt, %69, %78 : vector<1x484xf32>
    %80 = arith.andi %77, %79 : vector<1x484xi1>
    %cst_12 = arith.constant 1.000000e+00 : f32
    %cst_13 = arith.constant 0.000000e+00 : f32
    %81 = vector.broadcast %cst_12 : f32 to vector<1x484xf32>
    %82 = vector.broadcast %cst_13 : f32 to vector<1x484xf32>
    %83 = arith.select %80, %81, %82 : vector<1x484xi1>, vector<1x484xf32>
    %c0_14 = arith.constant 0 : index
    %c0_15 = arith.constant 0 : index
    %84 = vector.load %arg3[%c0_14, %c0_15] : memref<8x1xf32, #tpu.memory_space<vmem>>, vector<8x1xf32>
    %c0_16 = arith.constant 0 : index
    %c0_17 = arith.constant 0 : index
    %85 = vector.load %arg4[%c0_16, %c0_17] : memref<8x1xf32, #tpu.memory_space<vmem>>, vector<8x1xf32>
    %86 = vector.broadcast %83 : vector<1x484xf32> to vector<8x484xf32>
    %87 = arith.mulf %59, %86 : vector<8x484xf32>
    %cst_18 = arith.constant dense<0.000000e+00> : vector<8xf32>
    %88 = vector.multi_reduction <add>, %87, %cst_18 [1] : vector<8x484xf32> to vector<8xf32>
    %89 = vector.shape_cast %88 : vector<8xf32> to vector<8x1xf32>
    %90 = arith.mulf %87, %87 : vector<8x484xf32>
    %cst_19 = arith.constant dense<0.000000e+00> : vector<8xf32>
    %91 = vector.multi_reduction <add>, %90, %cst_19 [1] : vector<8x484xf32> to vector<8xf32>
    %92 = vector.shape_cast %91 : vector<8xf32> to vector<8x1xf32>
    %cst_20 = arith.constant 3.906250e-03 : f32
    %93 = vector.broadcast %cst_20 : f32 to vector<8x1xf32>
    %94 = arith.mulf %89, %93 : vector<8x1xf32>
    %cst_21 = arith.constant 3.906250e-03 : f32
    %95 = vector.broadcast %cst_21 : f32 to vector<8x1xf32>
    %96 = arith.mulf %92, %95 : vector<8x1xf32>
    %97 = arith.mulf %94, %94 : vector<8x1xf32>
    %98 = arith.subf %96, %97 : vector<8x1xf32>
    %cst_22 = arith.constant 0.000000e+00 : f32
    %99 = vector.broadcast %cst_22 : f32 to vector<8x1xf32>
    %100 = arith.maximumf %98, %99 : vector<8x1xf32>
    %101 = vector.broadcast %94 : vector<8x1xf32> to vector<8x484xf32>
    %102 = arith.subf %59, %101 : vector<8x484xf32>
    %cst_23 = arith.constant 9.99999974E-6 : f32
    %103 = vector.broadcast %cst_23 : f32 to vector<8x1xf32>
    %104 = arith.addf %100, %103 : vector<8x1xf32>
    %105 = math.rsqrt %104 : vector<8x1xf32>
    %106 = arith.mulf %105, %84 : vector<8x1xf32>
    %107 = vector.broadcast %106 : vector<8x1xf32> to vector<8x484xf32>
    %108 = arith.mulf %102, %107 : vector<8x484xf32>
    %109 = vector.broadcast %85 : vector<8x1xf32> to vector<8x484xf32>
    %110 = arith.addf %108, %109 : vector<8x484xf32>
    %cst_24 = arith.constant 0.000000e+00 : f32
    %111 = vector.broadcast %cst_24 : f32 to vector<8x484xf32>
    %112 = arith.maximumf %110, %111 : vector<8x484xf32>
    %113 = arith.truncf %112 : vector<8x484xf32> to vector<8x484xbf16>
    %c0_25 = arith.constant 0 : index
    %c0_26 = arith.constant 0 : index
    %c0_27 = arith.constant 0 : index
    %114 = vector.load %arg5[%c0_25, %c0_26, %c0_27] : memref<1x8x484xbf16, #tpu.memory_space<vmem>>, vector<1x8x484xbf16>
    %115 = vector.shape_cast %114 : vector<1x8x484xbf16> to vector<8x484xbf16>
    %116 = vector.shape_cast %113 : vector<8x484xbf16> to vector<1x8x484xbf16>
    tpu.vector_store %arg5[%c0_25, %c0_26, %c0_27], %116 {strides = array<i32>} : memref<1x8x484xbf16, #tpu.memory_space<vmem>>, vector<1x8x484xbf16>,
    return
  }
  func.func @transform_0(%arg0: i32) -> (i32, i32, i32) {
    %c0_i32 = arith.constant 0 : i32
    %c0_i32_0 = arith.constant 0 : i32
    %c0_i32_1 = arith.constant 0 : i32
    return %arg0, %c0_i32, %c0_i32_0 : i32, i32, i32
  }
  func.func @transform_1(%arg0: i32) -> (i32, i32) {
    %c0_i32 = arith.constant 0 : i32
    %c0_i32_0 = arith.constant 0 : i32
    %c0_i32_1 = arith.constant 0 : i32
    return %c0_i32, %c0_i32_0 : i32, i32
  }
  func.func @transform_2(%arg0: i32) -> (i32, i32) {
    %c0_i32 = arith.constant 0 : i32
    %c0_i32_0 = arith.constant 0 : i32
    %c0_i32_1 = arith.constant 0 : i32
    return %c0_i32, %c0_i32_0 : i32, i32
  }
  func.func @transform_3(%arg0: i32) -> (i32, i32) {
    %c0_i32 = arith.constant 0 : i32
    %c0_i32_0 = arith.constant 0 : i32
    %c0_i32_1 = arith.constant 0 : i32
    return %c0_i32, %c0_i32_0 : i32, i32
  }
  func.func @transform_4(%arg0: i32) -> (i32, i32, i32) {
    %c0_i32 = arith.constant 0 : i32
    %c0_i32_0 = arith.constant 0 : i32
    %c0_i32_1 = arith.constant 0 : i32
    return %arg0, %c0_i32, %c0_i32_0 : i32, i32, i32
  }
}

module attributes {stable_mosaic.version = 11 : i64} {
  func.func @_down_conv_kernel(%arg0: i32, %arg1: memref<1x32x81xbf16, #tpu.memory_space<vmem>>, %arg2: memref<16x128xbf16, #tpu.memory_space<vmem>>, %arg3: memref<16x1xf32, #tpu.memory_space<vmem>>, %arg4: memref<16x1xf32, #tpu.memory_space<vmem>>, %arg5: memref<1x16x81xbf16, #tpu.memory_space<vmem>>) attributes {dimension_semantics = [#tpu.dimension_semantics<parallel>], iteration_bounds = array<i64: 2>, scalar_prefetch = 0 : i64, scratch_operands = 0 : i64, tpu.core_type = #tpu.core_type<tc>, window_params = [{transform_indices = @transform_0, window_bounds = array<i64: 1, 32, 81>}, {pipeline_mode = #tpu.pipeline_mode<synchronous>, transform_indices = @transform_1, window_bounds = array<i64: 16, 128>}, {pipeline_mode = #tpu.pipeline_mode<synchronous>, transform_indices = @transform_2, window_bounds = array<i64: 16, 1>}, {pipeline_mode = #tpu.pipeline_mode<synchronous>, transform_indices = @transform_3, window_bounds = array<i64: 16, 1>}, {transform_indices = @transform_4, window_bounds = array<i64: 1, 16, 81>}]} {
    %c0 = arith.constant 0 : index
    %c0_0 = arith.constant 0 : index
    %c0_1 = arith.constant 0 : index
    %0 = vector.load %arg1[%c0, %c0_0, %c0_1] : memref<1x32x81xbf16, #tpu.memory_space<vmem>>, vector<1x32x81xbf16>
    %1 = vector.shape_cast %0 : vector<1x32x81xbf16> to vector<32x81xbf16>
    %cst = arith.constant 0.000000e+00 : bf16
    %2 = vector.broadcast %cst : bf16 to vector<32x10xbf16>
    %3 = tpu.concatenate %1, %2 in 1 : vector<32x81xbf16>, vector<32x10xbf16> -> vector<32x91xbf16>
    %4 = vector.extract_strided_slice %3 {offsets = [0, 0], sizes = [8, 91], strides = [1, 1]} : vector<32x91xbf16> to vector<8x91xbf16>
    %5 = vector.extract_strided_slice %4 {offsets = [0, 0], sizes = [8, 81], strides = [1, 1]} : vector<8x91xbf16> to vector<8x81xbf16>
    %6 = vector.extract_strided_slice %4 {offsets = [0, 1], sizes = [8, 81], strides = [1, 1]} : vector<8x91xbf16> to vector<8x81xbf16>
    %7 = vector.extract_strided_slice %4 {offsets = [0, 9], sizes = [8, 81], strides = [1, 1]} : vector<8x91xbf16> to vector<8x81xbf16>
    %8 = vector.extract_strided_slice %4 {offsets = [0, 10], sizes = [8, 81], strides = [1, 1]} : vector<8x91xbf16> to vector<8x81xbf16>
    %9 = vector.extract_strided_slice %3 {offsets = [8, 0], sizes = [8, 91], strides = [1, 1]} : vector<32x91xbf16> to vector<8x91xbf16>
    %10 = vector.extract_strided_slice %9 {offsets = [0, 0], sizes = [8, 81], strides = [1, 1]} : vector<8x91xbf16> to vector<8x81xbf16>
    %11 = vector.extract_strided_slice %9 {offsets = [0, 1], sizes = [8, 81], strides = [1, 1]} : vector<8x91xbf16> to vector<8x81xbf16>
    %12 = vector.extract_strided_slice %9 {offsets = [0, 9], sizes = [8, 81], strides = [1, 1]} : vector<8x91xbf16> to vector<8x81xbf16>
    %13 = vector.extract_strided_slice %9 {offsets = [0, 10], sizes = [8, 81], strides = [1, 1]} : vector<8x91xbf16> to vector<8x81xbf16>
    %14 = vector.extract_strided_slice %3 {offsets = [16, 0], sizes = [8, 91], strides = [1, 1]} : vector<32x91xbf16> to vector<8x91xbf16>
    %15 = vector.extract_strided_slice %14 {offsets = [0, 0], sizes = [8, 81], strides = [1, 1]} : vector<8x91xbf16> to vector<8x81xbf16>
    %16 = vector.extract_strided_slice %14 {offsets = [0, 1], sizes = [8, 81], strides = [1, 1]} : vector<8x91xbf16> to vector<8x81xbf16>
    %17 = vector.extract_strided_slice %14 {offsets = [0, 9], sizes = [8, 81], strides = [1, 1]} : vector<8x91xbf16> to vector<8x81xbf16>
    %18 = vector.extract_strided_slice %14 {offsets = [0, 10], sizes = [8, 81], strides = [1, 1]} : vector<8x91xbf16> to vector<8x81xbf16>
    %19 = vector.extract_strided_slice %3 {offsets = [24, 0], sizes = [8, 91], strides = [1, 1]} : vector<32x91xbf16> to vector<8x91xbf16>
    %20 = vector.extract_strided_slice %19 {offsets = [0, 0], sizes = [8, 81], strides = [1, 1]} : vector<8x91xbf16> to vector<8x81xbf16>
    %21 = vector.extract_strided_slice %19 {offsets = [0, 1], sizes = [8, 81], strides = [1, 1]} : vector<8x91xbf16> to vector<8x81xbf16>
    %22 = vector.extract_strided_slice %19 {offsets = [0, 9], sizes = [8, 81], strides = [1, 1]} : vector<8x91xbf16> to vector<8x81xbf16>
    %23 = vector.extract_strided_slice %19 {offsets = [0, 10], sizes = [8, 81], strides = [1, 1]} : vector<8x91xbf16> to vector<8x81xbf16>
    %c0_2 = arith.constant 0 : index
    %c0_3 = arith.constant 0 : index
    %24 = vector.load %arg2[%c0_2, %c0_3] : memref<16x128xbf16, #tpu.memory_space<vmem>>, vector<16x128xbf16>
    %25 = tpu.concatenate %5, %6, %7, %8, %10, %11, %12, %13, %15, %16, %17, %18, %20, %21, %22, %23 in 0 : vector<8x81xbf16>, vector<8x81xbf16>, vector<8x81xbf16>, vector<8x81xbf16>, vector<8x81xbf16>, vector<8x81xbf16>, vector<8x81xbf16>, vector<8x81xbf16>, vector<8x81xbf16>, vector<8x81xbf16>, vector<8x81xbf16>, vector<8x81xbf16>, vector<8x81xbf16>, vector<8x81xbf16>, vector<8x81xbf16>, vector<8x81xbf16> -> vector<128x81xbf16>
    %cst_4 = arith.constant dense<0.000000e+00> : vector<16x81xf32>
    %26 = tpu.matmul %24, %25, %cst_4 {dimension_numbers = #tpu.dot_dimension_numbers<[1], [0], [0], [1], [0, 0, 1, 1], [], []>} : vector<16x128xbf16>, vector<128x81xbf16>, vector<16x81xf32> -> vector<16x81xf32>
    %27 = tpu.iota {dimensions = array<i32: 1>} : vector<1x81xi32>
    %28 = arith.sitofp %27 : vector<1x81xi32> to vector<1x81xf32>
    %cst_5 = arith.constant 5.000000e-01 : f32
    %29 = vector.broadcast %cst_5 : f32 to vector<1x81xf32>
    %30 = arith.addf %28, %29 : vector<1x81xf32>
    %cst_6 = arith.constant 0.111111112 : f32
    %31 = vector.broadcast %cst_6 : f32 to vector<1x81xf32>
    %32 = arith.mulf %30, %31 : vector<1x81xf32>
    %33 = math.floor %32 : vector<1x81xf32>
    %cst_7 = arith.constant 9.000000e+00 : f32
    %34 = vector.broadcast %cst_7 : f32 to vector<1x81xf32>
    %35 = arith.mulf %33, %34 : vector<1x81xf32>
    %36 = arith.subf %28, %35 : vector<1x81xf32>
    %cst_8 = arith.constant 0.000000e+00 : f32
    %37 = vector.broadcast %cst_8 : f32 to vector<1x81xf32>
    %38 = arith.cmpf oge, %33, %37 : vector<1x81xf32>
    %cst_9 = arith.constant 8.000000e+00 : f32
    %39 = vector.broadcast %cst_9 : f32 to vector<1x81xf32>
    %40 = arith.cmpf olt, %33, %39 : vector<1x81xf32>
    %41 = arith.andi %38, %40 : vector<1x81xi1>
    %cst_10 = arith.constant 0.000000e+00 : f32
    %42 = vector.broadcast %cst_10 : f32 to vector<1x81xf32>
    %43 = arith.cmpf oge, %36, %42 : vector<1x81xf32>
    %44 = arith.andi %41, %43 : vector<1x81xi1>
    %cst_11 = arith.constant 8.000000e+00 : f32
    %45 = vector.broadcast %cst_11 : f32 to vector<1x81xf32>
    %46 = arith.cmpf olt, %36, %45 : vector<1x81xf32>
    %47 = arith.andi %44, %46 : vector<1x81xi1>
    %cst_12 = arith.constant 1.000000e+00 : f32
    %cst_13 = arith.constant 0.000000e+00 : f32
    %48 = vector.broadcast %cst_12 : f32 to vector<1x81xf32>
    %49 = vector.broadcast %cst_13 : f32 to vector<1x81xf32>
    %50 = arith.select %47, %48, %49 : vector<1x81xi1>, vector<1x81xf32>
    %c0_14 = arith.constant 0 : index
    %c0_15 = arith.constant 0 : index
    %51 = vector.load %arg3[%c0_14, %c0_15] : memref<16x1xf32, #tpu.memory_space<vmem>>, vector<16x1xf32>
    %c0_16 = arith.constant 0 : index
    %c0_17 = arith.constant 0 : index
    %52 = vector.load %arg4[%c0_16, %c0_17] : memref<16x1xf32, #tpu.memory_space<vmem>>, vector<16x1xf32>
    %53 = vector.broadcast %50 : vector<1x81xf32> to vector<16x81xf32>
    %54 = arith.mulf %26, %53 : vector<16x81xf32>
    %cst_18 = arith.constant dense<0.000000e+00> : vector<16xf32>
    %55 = vector.multi_reduction <add>, %54, %cst_18 [1] : vector<16x81xf32> to vector<16xf32>
    %56 = vector.shape_cast %55 : vector<16xf32> to vector<16x1xf32>
    %57 = arith.mulf %54, %54 : vector<16x81xf32>
    %cst_19 = arith.constant dense<0.000000e+00> : vector<16xf32>
    %58 = vector.multi_reduction <add>, %57, %cst_19 [1] : vector<16x81xf32> to vector<16xf32>
    %59 = vector.shape_cast %58 : vector<16xf32> to vector<16x1xf32>
    %cst_20 = arith.constant 1.562500e-02 : f32
    %60 = vector.broadcast %cst_20 : f32 to vector<16x1xf32>
    %61 = arith.mulf %56, %60 : vector<16x1xf32>
    %cst_21 = arith.constant 1.562500e-02 : f32
    %62 = vector.broadcast %cst_21 : f32 to vector<16x1xf32>
    %63 = arith.mulf %59, %62 : vector<16x1xf32>
    %64 = arith.mulf %61, %61 : vector<16x1xf32>
    %65 = arith.subf %63, %64 : vector<16x1xf32>
    %cst_22 = arith.constant 0.000000e+00 : f32
    %66 = vector.broadcast %cst_22 : f32 to vector<16x1xf32>
    %67 = arith.maximumf %65, %66 : vector<16x1xf32>
    %68 = vector.broadcast %61 : vector<16x1xf32> to vector<16x81xf32>
    %69 = arith.subf %26, %68 : vector<16x81xf32>
    %cst_23 = arith.constant 9.99999974E-6 : f32
    %70 = vector.broadcast %cst_23 : f32 to vector<16x1xf32>
    %71 = arith.addf %67, %70 : vector<16x1xf32>
    %72 = math.rsqrt %71 : vector<16x1xf32>
    %73 = arith.mulf %72, %51 : vector<16x1xf32>
    %74 = vector.broadcast %73 : vector<16x1xf32> to vector<16x81xf32>
    %75 = arith.mulf %69, %74 : vector<16x81xf32>
    %76 = vector.broadcast %52 : vector<16x1xf32> to vector<16x81xf32>
    %77 = arith.addf %75, %76 : vector<16x81xf32>
    %cst_24 = arith.constant 0.000000e+00 : f32
    %78 = vector.broadcast %cst_24 : f32 to vector<16x81xf32>
    %79 = arith.maximumf %77, %78 : vector<16x81xf32>
    %80 = arith.truncf %79 : vector<16x81xf32> to vector<16x81xbf16>
    %c0_25 = arith.constant 0 : index
    %c0_26 = arith.constant 0 : index
    %c0_27 = arith.constant 0 : index
    %81 = vector.load %arg5[%c0_25, %c0_26, %c0_27] : memref<1x16x81xbf16, #tpu.memory_space<vmem>>, vector<1x16x81xbf16>
    %82 = vector.shape_cast %81 : vector<1x16x81xbf16> to vector<16x81xbf16>
    %83 = vector.shape_cast %80 : vector<16x81xbf16> to vector<1x16x81xbf16>
    tpu.vector_store %arg5[%c0_25, %c0_26, %c0_27], %83 {strides = array<i32>} : memref<1x16x81xbf16, #tpu.memory_space<vmem>>, vector<1x16x81xbf16>,
    return
  }
  func.func @transform_0(%arg0: i32) -> (i32, i32, i32) {
    %c0_i32 = arith.constant 0 : i32
    %c0_i32_0 = arith.constant 0 : i32
    %c0_i32_1 = arith.constant 0 : i32
    return %arg0, %c0_i32, %c0_i32_0 : i32, i32, i32
  }
  func.func @transform_1(%arg0: i32) -> (i32, i32) {
    %c0_i32 = arith.constant 0 : i32
    %c0_i32_0 = arith.constant 0 : i32
    %c0_i32_1 = arith.constant 0 : i32
    return %c0_i32, %c0_i32_0 : i32, i32
  }
  func.func @transform_2(%arg0: i32) -> (i32, i32) {
    %c0_i32 = arith.constant 0 : i32
    %c0_i32_0 = arith.constant 0 : i32
    %c0_i32_1 = arith.constant 0 : i32
    return %c0_i32, %c0_i32_0 : i32, i32
  }
  func.func @transform_3(%arg0: i32) -> (i32, i32) {
    %c0_i32 = arith.constant 0 : i32
    %c0_i32_0 = arith.constant 0 : i32
    %c0_i32_1 = arith.constant 0 : i32
    return %c0_i32, %c0_i32_0 : i32, i32
  }
  func.func @transform_4(%arg0: i32) -> (i32, i32, i32) {
    %c0_i32 = arith.constant 0 : i32
    %c0_i32_0 = arith.constant 0 : i32
    %c0_i32_1 = arith.constant 0 : i32
    return %arg0, %c0_i32, %c0_i32_0 : i32, i32, i32
  }
}

module attributes {stable_mosaic.version = 11 : i64} {
  func.func @_down_conv_kernel(%arg0: i32, %arg1: memref<1x64x25xbf16, #tpu.memory_space<vmem>>, %arg2: memref<32x256xbf16, #tpu.memory_space<vmem>>, %arg3: memref<32x1xf32, #tpu.memory_space<vmem>>, %arg4: memref<32x1xf32, #tpu.memory_space<vmem>>, %arg5: memref<1x32x25xbf16, #tpu.memory_space<vmem>>) attributes {dimension_semantics = [#tpu.dimension_semantics<parallel>], iteration_bounds = array<i64: 2>, scalar_prefetch = 0 : i64, scratch_operands = 0 : i64, tpu.core_type = #tpu.core_type<tc>, window_params = [{transform_indices = @transform_0, window_bounds = array<i64: 1, 64, 25>}, {pipeline_mode = #tpu.pipeline_mode<synchronous>, transform_indices = @transform_1, window_bounds = array<i64: 32, 256>}, {pipeline_mode = #tpu.pipeline_mode<synchronous>, transform_indices = @transform_2, window_bounds = array<i64: 32, 1>}, {pipeline_mode = #tpu.pipeline_mode<synchronous>, transform_indices = @transform_3, window_bounds = array<i64: 32, 1>}, {transform_indices = @transform_4, window_bounds = array<i64: 1, 32, 25>}]} {
    %c0 = arith.constant 0 : index
    %c0_0 = arith.constant 0 : index
    %c0_1 = arith.constant 0 : index
    %0 = vector.load %arg1[%c0, %c0_0, %c0_1] : memref<1x64x25xbf16, #tpu.memory_space<vmem>>, vector<1x64x25xbf16>
    %1 = vector.shape_cast %0 : vector<1x64x25xbf16> to vector<64x25xbf16>
    %cst = arith.constant 0.000000e+00 : bf16
    %2 = vector.broadcast %cst : bf16 to vector<64x6xbf16>
    %3 = tpu.concatenate %1, %2 in 1 : vector<64x25xbf16>, vector<64x6xbf16> -> vector<64x31xbf16>
    %4 = vector.extract_strided_slice %3 {offsets = [0, 0], sizes = [16, 31], strides = [1, 1]} : vector<64x31xbf16> to vector<16x31xbf16>
    %5 = vector.extract_strided_slice %4 {offsets = [0, 0], sizes = [16, 25], strides = [1, 1]} : vector<16x31xbf16> to vector<16x25xbf16>
    %6 = vector.extract_strided_slice %4 {offsets = [0, 1], sizes = [16, 25], strides = [1, 1]} : vector<16x31xbf16> to vector<16x25xbf16>
    %7 = vector.extract_strided_slice %4 {offsets = [0, 5], sizes = [16, 25], strides = [1, 1]} : vector<16x31xbf16> to vector<16x25xbf16>
    %8 = vector.extract_strided_slice %4 {offsets = [0, 6], sizes = [16, 25], strides = [1, 1]} : vector<16x31xbf16> to vector<16x25xbf16>
    %9 = vector.extract_strided_slice %3 {offsets = [16, 0], sizes = [16, 31], strides = [1, 1]} : vector<64x31xbf16> to vector<16x31xbf16>
    %10 = vector.extract_strided_slice %9 {offsets = [0, 0], sizes = [16, 25], strides = [1, 1]} : vector<16x31xbf16> to vector<16x25xbf16>
    %11 = vector.extract_strided_slice %9 {offsets = [0, 1], sizes = [16, 25], strides = [1, 1]} : vector<16x31xbf16> to vector<16x25xbf16>
    %12 = vector.extract_strided_slice %9 {offsets = [0, 5], sizes = [16, 25], strides = [1, 1]} : vector<16x31xbf16> to vector<16x25xbf16>
    %13 = vector.extract_strided_slice %9 {offsets = [0, 6], sizes = [16, 25], strides = [1, 1]} : vector<16x31xbf16> to vector<16x25xbf16>
    %14 = vector.extract_strided_slice %3 {offsets = [32, 0], sizes = [16, 31], strides = [1, 1]} : vector<64x31xbf16> to vector<16x31xbf16>
    %15 = vector.extract_strided_slice %14 {offsets = [0, 0], sizes = [16, 25], strides = [1, 1]} : vector<16x31xbf16> to vector<16x25xbf16>
    %16 = vector.extract_strided_slice %14 {offsets = [0, 1], sizes = [16, 25], strides = [1, 1]} : vector<16x31xbf16> to vector<16x25xbf16>
    %17 = vector.extract_strided_slice %14 {offsets = [0, 5], sizes = [16, 25], strides = [1, 1]} : vector<16x31xbf16> to vector<16x25xbf16>
    %18 = vector.extract_strided_slice %14 {offsets = [0, 6], sizes = [16, 25], strides = [1, 1]} : vector<16x31xbf16> to vector<16x25xbf16>
    %19 = vector.extract_strided_slice %3 {offsets = [48, 0], sizes = [16, 31], strides = [1, 1]} : vector<64x31xbf16> to vector<16x31xbf16>
    %20 = vector.extract_strided_slice %19 {offsets = [0, 0], sizes = [16, 25], strides = [1, 1]} : vector<16x31xbf16> to vector<16x25xbf16>
    %21 = vector.extract_strided_slice %19 {offsets = [0, 1], sizes = [16, 25], strides = [1, 1]} : vector<16x31xbf16> to vector<16x25xbf16>
    %22 = vector.extract_strided_slice %19 {offsets = [0, 5], sizes = [16, 25], strides = [1, 1]} : vector<16x31xbf16> to vector<16x25xbf16>
    %23 = vector.extract_strided_slice %19 {offsets = [0, 6], sizes = [16, 25], strides = [1, 1]} : vector<16x31xbf16> to vector<16x25xbf16>
    %c0_2 = arith.constant 0 : index
    %c0_3 = arith.constant 0 : index
    %24 = vector.load %arg2[%c0_2, %c0_3] : memref<32x256xbf16, #tpu.memory_space<vmem>>, vector<32x256xbf16>
    %25 = tpu.concatenate %5, %6, %7, %8, %10, %11, %12, %13, %15, %16, %17, %18, %20, %21, %22, %23 in 0 : vector<16x25xbf16>, vector<16x25xbf16>, vector<16x25xbf16>, vector<16x25xbf16>, vector<16x25xbf16>, vector<16x25xbf16>, vector<16x25xbf16>, vector<16x25xbf16>, vector<16x25xbf16>, vector<16x25xbf16>, vector<16x25xbf16>, vector<16x25xbf16>, vector<16x25xbf16>, vector<16x25xbf16>, vector<16x25xbf16>, vector<16x25xbf16> -> vector<256x25xbf16>
    %cst_4 = arith.constant dense<0.000000e+00> : vector<32x25xf32>
    %26 = tpu.matmul %24, %25, %cst_4 {dimension_numbers = #tpu.dot_dimension_numbers<[1], [0], [0], [1], [0, 0, 1, 1], [], []>} : vector<32x256xbf16>, vector<256x25xbf16>, vector<32x25xf32> -> vector<32x25xf32>
    %27 = tpu.iota {dimensions = array<i32: 1>} : vector<1x25xi32>
    %28 = arith.sitofp %27 : vector<1x25xi32> to vector<1x25xf32>
    %cst_5 = arith.constant 5.000000e-01 : f32
    %29 = vector.broadcast %cst_5 : f32 to vector<1x25xf32>
    %30 = arith.addf %28, %29 : vector<1x25xf32>
    %cst_6 = arith.constant 2.000000e-01 : f32
    %31 = vector.broadcast %cst_6 : f32 to vector<1x25xf32>
    %32 = arith.mulf %30, %31 : vector<1x25xf32>
    %33 = math.floor %32 : vector<1x25xf32>
    %cst_7 = arith.constant 5.000000e+00 : f32
    %34 = vector.broadcast %cst_7 : f32 to vector<1x25xf32>
    %35 = arith.mulf %33, %34 : vector<1x25xf32>
    %36 = arith.subf %28, %35 : vector<1x25xf32>
    %cst_8 = arith.constant 0.000000e+00 : f32
    %37 = vector.broadcast %cst_8 : f32 to vector<1x25xf32>
    %38 = arith.cmpf oge, %33, %37 : vector<1x25xf32>
    %cst_9 = arith.constant 4.000000e+00 : f32
    %39 = vector.broadcast %cst_9 : f32 to vector<1x25xf32>
    %40 = arith.cmpf olt, %33, %39 : vector<1x25xf32>
    %41 = arith.andi %38, %40 : vector<1x25xi1>
    %cst_10 = arith.constant 0.000000e+00 : f32
    %42 = vector.broadcast %cst_10 : f32 to vector<1x25xf32>
    %43 = arith.cmpf oge, %36, %42 : vector<1x25xf32>
    %44 = arith.andi %41, %43 : vector<1x25xi1>
    %cst_11 = arith.constant 4.000000e+00 : f32
    %45 = vector.broadcast %cst_11 : f32 to vector<1x25xf32>
    %46 = arith.cmpf olt, %36, %45 : vector<1x25xf32>
    %47 = arith.andi %44, %46 : vector<1x25xi1>
    %cst_12 = arith.constant 1.000000e+00 : f32
    %cst_13 = arith.constant 0.000000e+00 : f32
    %48 = vector.broadcast %cst_12 : f32 to vector<1x25xf32>
    %49 = vector.broadcast %cst_13 : f32 to vector<1x25xf32>
    %50 = arith.select %47, %48, %49 : vector<1x25xi1>, vector<1x25xf32>
    %c0_14 = arith.constant 0 : index
    %c0_15 = arith.constant 0 : index
    %51 = vector.load %arg3[%c0_14, %c0_15] : memref<32x1xf32, #tpu.memory_space<vmem>>, vector<32x1xf32>
    %c0_16 = arith.constant 0 : index
    %c0_17 = arith.constant 0 : index
    %52 = vector.load %arg4[%c0_16, %c0_17] : memref<32x1xf32, #tpu.memory_space<vmem>>, vector<32x1xf32>
    %53 = vector.broadcast %50 : vector<1x25xf32> to vector<32x25xf32>
    %54 = arith.mulf %26, %53 : vector<32x25xf32>
    %cst_18 = arith.constant dense<0.000000e+00> : vector<32xf32>
    %55 = vector.multi_reduction <add>, %54, %cst_18 [1] : vector<32x25xf32> to vector<32xf32>
    %56 = vector.shape_cast %55 : vector<32xf32> to vector<32x1xf32>
    %57 = arith.mulf %54, %54 : vector<32x25xf32>
    %cst_19 = arith.constant dense<0.000000e+00> : vector<32xf32>
    %58 = vector.multi_reduction <add>, %57, %cst_19 [1] : vector<32x25xf32> to vector<32xf32>
    %59 = vector.shape_cast %58 : vector<32xf32> to vector<32x1xf32>
    %cst_20 = arith.constant 6.250000e-02 : f32
    %60 = vector.broadcast %cst_20 : f32 to vector<32x1xf32>
    %61 = arith.mulf %56, %60 : vector<32x1xf32>
    %cst_21 = arith.constant 6.250000e-02 : f32
    %62 = vector.broadcast %cst_21 : f32 to vector<32x1xf32>
    %63 = arith.mulf %59, %62 : vector<32x1xf32>
    %64 = arith.mulf %61, %61 : vector<32x1xf32>
    %65 = arith.subf %63, %64 : vector<32x1xf32>
    %cst_22 = arith.constant 0.000000e+00 : f32
    %66 = vector.broadcast %cst_22 : f32 to vector<32x1xf32>
    %67 = arith.maximumf %65, %66 : vector<32x1xf32>
    %68 = vector.broadcast %61 : vector<32x1xf32> to vector<32x25xf32>
    %69 = arith.subf %26, %68 : vector<32x25xf32>
    %cst_23 = arith.constant 9.99999974E-6 : f32
    %70 = vector.broadcast %cst_23 : f32 to vector<32x1xf32>
    %71 = arith.addf %67, %70 : vector<32x1xf32>
    %72 = math.rsqrt %71 : vector<32x1xf32>
    %73 = arith.mulf %72, %51 : vector<32x1xf32>
    %74 = vector.broadcast %73 : vector<32x1xf32> to vector<32x25xf32>
    %75 = arith.mulf %69, %74 : vector<32x25xf32>
    %76 = vector.broadcast %52 : vector<32x1xf32> to vector<32x25xf32>
    %77 = arith.addf %75, %76 : vector<32x25xf32>
    %cst_24 = arith.constant 0.000000e+00 : f32
    %78 = vector.broadcast %cst_24 : f32 to vector<32x25xf32>
    %79 = arith.maximumf %77, %78 : vector<32x25xf32>
    %80 = arith.truncf %79 : vector<32x25xf32> to vector<32x25xbf16>
    %c0_25 = arith.constant 0 : index
    %c0_26 = arith.constant 0 : index
    %c0_27 = arith.constant 0 : index
    %81 = vector.load %arg5[%c0_25, %c0_26, %c0_27] : memref<1x32x25xbf16, #tpu.memory_space<vmem>>, vector<1x32x25xbf16>
    %82 = vector.shape_cast %81 : vector<1x32x25xbf16> to vector<32x25xbf16>
    %83 = vector.shape_cast %80 : vector<32x25xbf16> to vector<1x32x25xbf16>
    tpu.vector_store %arg5[%c0_25, %c0_26, %c0_27], %83 {strides = array<i32>} : memref<1x32x25xbf16, #tpu.memory_space<vmem>>, vector<1x32x25xbf16>,
    return
  }
  func.func @transform_0(%arg0: i32) -> (i32, i32, i32) {
    %c0_i32 = arith.constant 0 : i32
    %c0_i32_0 = arith.constant 0 : i32
    %c0_i32_1 = arith.constant 0 : i32
    return %arg0, %c0_i32, %c0_i32_0 : i32, i32, i32
  }
  func.func @transform_1(%arg0: i32) -> (i32, i32) {
    %c0_i32 = arith.constant 0 : i32
    %c0_i32_0 = arith.constant 0 : i32
    %c0_i32_1 = arith.constant 0 : i32
    return %c0_i32, %c0_i32_0 : i32, i32
  }
  func.func @transform_2(%arg0: i32) -> (i32, i32) {
    %c0_i32 = arith.constant 0 : i32
    %c0_i32_0 = arith.constant 0 : i32
    %c0_i32_1 = arith.constant 0 : i32
    return %c0_i32, %c0_i32_0 : i32, i32
  }
  func.func @transform_3(%arg0: i32) -> (i32, i32) {
    %c0_i32 = arith.constant 0 : i32
    %c0_i32_0 = arith.constant 0 : i32
    %c0_i32_1 = arith.constant 0 : i32
    return %c0_i32, %c0_i32_0 : i32, i32
  }
  func.func @transform_4(%arg0: i32) -> (i32, i32, i32) {
    %c0_i32 = arith.constant 0 : i32
    %c0_i32_0 = arith.constant 0 : i32
    %c0_i32_1 = arith.constant 0 : i32
    return %arg0, %c0_i32, %c0_i32_0 : i32, i32, i32
  }
}

module attributes {stable_mosaic.version = 11 : i64} {
  func.func @_res_stack_kernel(%arg0: i32, %arg1: memref<1x32x36xbf16, #tpu.memory_space<vmem>>, %arg2: memref<4x32x288xbf16, #tpu.memory_space<vmem>>, %arg3: memref<4x32x1xf32, #tpu.memory_space<vmem>>, %arg4: memref<4x32x1xf32, #tpu.memory_space<vmem>>, %arg5: memref<1x32x36xbf16, #tpu.memory_space<vmem>>) attributes {dimension_semantics = [#tpu.dimension_semantics<parallel>], iteration_bounds = array<i64: 2>, scalar_prefetch = 0 : i64, scratch_operands = 0 : i64, tpu.core_type = #tpu.core_type<tc>, window_params = [{transform_indices = @transform_0, window_bounds = array<i64: 1, 32, 36>}, {pipeline_mode = #tpu.pipeline_mode<synchronous>, transform_indices = @transform_1, window_bounds = array<i64: 4, 32, 288>}, {pipeline_mode = #tpu.pipeline_mode<synchronous>, transform_indices = @transform_2, window_bounds = array<i64: 4, 32, 1>}, {pipeline_mode = #tpu.pipeline_mode<synchronous>, transform_indices = @transform_3, window_bounds = array<i64: 4, 32, 1>}, {transform_indices = @transform_4, window_bounds = array<i64: 1, 32, 36>}]} {
    %0 = tpu.iota {dimensions = array<i32: 1>} : vector<1x36xi32>
    %1 = arith.sitofp %0 : vector<1x36xi32> to vector<1x36xf32>
    %cst = arith.constant 5.000000e-01 : f32
    %2 = vector.broadcast %cst : f32 to vector<1x36xf32>
    %3 = arith.addf %1, %2 : vector<1x36xf32>
    %cst_0 = arith.constant 0.166666672 : f32
    %4 = vector.broadcast %cst_0 : f32 to vector<1x36xf32>
    %5 = arith.mulf %3, %4 : vector<1x36xf32>
    %6 = math.floor %5 : vector<1x36xf32>
    %cst_1 = arith.constant 6.000000e+00 : f32
    %7 = vector.broadcast %cst_1 : f32 to vector<1x36xf32>
    %8 = arith.mulf %6, %7 : vector<1x36xf32>
    %9 = arith.subf %1, %8 : vector<1x36xf32>
    %cst_2 = arith.constant 1.000000e+00 : f32
    %10 = vector.broadcast %cst_2 : f32 to vector<1x36xf32>
    %11 = arith.cmpf oge, %6, %10 : vector<1x36xf32>
    %cst_3 = arith.constant 5.000000e+00 : f32
    %12 = vector.broadcast %cst_3 : f32 to vector<1x36xf32>
    %13 = arith.cmpf olt, %6, %12 : vector<1x36xf32>
    %14 = arith.andi %11, %13 : vector<1x36xi1>
    %cst_4 = arith.constant 1.000000e+00 : f32
    %15 = vector.broadcast %cst_4 : f32 to vector<1x36xf32>
    %16 = arith.cmpf oge, %9, %15 : vector<1x36xf32>
    %17 = arith.andi %14, %16 : vector<1x36xi1>
    %cst_5 = arith.constant 5.000000e+00 : f32
    %18 = vector.broadcast %cst_5 : f32 to vector<1x36xf32>
    %19 = arith.cmpf olt, %9, %18 : vector<1x36xf32>
    %20 = arith.andi %17, %19 : vector<1x36xi1>
    %cst_6 = arith.constant 1.000000e+00 : f32
    %cst_7 = arith.constant 0.000000e+00 : f32
    %21 = vector.broadcast %cst_6 : f32 to vector<1x36xf32>
    %22 = vector.broadcast %cst_7 : f32 to vector<1x36xf32>
    %23 = arith.select %20, %21, %22 : vector<1x36xi1>, vector<1x36xf32>
    %c0 = arith.constant 0 : index
    %c0_8 = arith.constant 0 : index
    %c0_9 = arith.constant 0 : index
    %24 = vector.load %arg1[%c0, %c0_8, %c0_9] : memref<1x32x36xbf16, #tpu.memory_space<vmem>>, vector<1x32x36xbf16>
    %25 = vector.shape_cast %24 : vector<1x32x36xbf16> to vector<32x36xbf16>
    %26 = arith.extf %25 : vector<32x36xbf16> to vector<32x36xf32>
    %c0_i32 = arith.constant 0 : i32
    %c2_i32 = arith.constant 2 : i32
    %27 = arith.addi %c0_i32, %c2_i32 : i32
    %c1_i32 = arith.constant 1 : i32
    %28 = scf.for %arg6 = %c0_i32 to %27 step %c1_i32 iter_args(%arg7 = %26) -> (vector<32x36xf32>)  : i32 {
      %c2_i32_14 = arith.constant 2 : i32
      %33 = arith.muli %c2_i32_14, %arg6 : i32
      %34 = arith.index_cast %33 : i32 to index
      %c0_15 = arith.constant 0 : index
      %c0_16 = arith.constant 0 : index
      %35 = vector.load %arg2[%34, %c0_15, %c0_16] : memref<4x32x288xbf16, #tpu.memory_space<vmem>>, vector<1x32x288xbf16>
      %36 = vector.shape_cast %35 : vector<1x32x288xbf16> to vector<32x288xbf16>
      %cst_17 = arith.constant 0.000000e+00 : bf16
      %37 = vector.broadcast %cst_17 : bf16 to vector<32x7xbf16>
      %38 = arith.truncf %arg7 : vector<32x36xf32> to vector<32x36xbf16>
      %39 = tpu.concatenate %37, %38, %37 in 1 : vector<32x7xbf16>, vector<32x36xbf16>, vector<32x7xbf16> -> vector<32x50xbf16>
      %40 = vector.extract_strided_slice %39 {offsets = [0, 0], sizes = [32, 36], strides = [1, 1]} : vector<32x50xbf16> to vector<32x36xbf16>
      %41 = vector.extract_strided_slice %39 {offsets = [0, 1], sizes = [32, 36], strides = [1, 1]} : vector<32x50xbf16> to vector<32x36xbf16>
      %42 = vector.extract_strided_slice %39 {offsets = [0, 2], sizes = [32, 36], strides = [1, 1]} : vector<32x50xbf16> to vector<32x36xbf16>
      %43 = vector.extract_strided_slice %39 {offsets = [0, 6], sizes = [32, 36], strides = [1, 1]} : vector<32x50xbf16> to vector<32x36xbf16>
      %44 = vector.extract_strided_slice %39 {offsets = [0, 7], sizes = [32, 36], strides = [1, 1]} : vector<32x50xbf16> to vector<32x36xbf16>
      %45 = vector.extract_strided_slice %39 {offsets = [0, 8], sizes = [32, 36], strides = [1, 1]} : vector<32x50xbf16> to vector<32x36xbf16>
      %46 = vector.extract_strided_slice %39 {offsets = [0, 12], sizes = [32, 36], strides = [1, 1]} : vector<32x50xbf16> to vector<32x36xbf16>
      %47 = vector.extract_strided_slice %39 {offsets = [0, 13], sizes = [32, 36], strides = [1, 1]} : vector<32x50xbf16> to vector<32x36xbf16>
      %48 = vector.extract_strided_slice %39 {offsets = [0, 14], sizes = [32, 36], strides = [1, 1]} : vector<32x50xbf16> to vector<32x36xbf16>
      %49 = tpu.concatenate %40, %41, %42, %43, %44, %45, %46, %47, %48 in 0 : vector<32x36xbf16>, vector<32x36xbf16>, vector<32x36xbf16>, vector<32x36xbf16>, vector<32x36xbf16>, vector<32x36xbf16>, vector<32x36xbf16>, vector<32x36xbf16>, vector<32x36xbf16> -> vector<288x36xbf16>
      %cst_18 = arith.constant dense<0.000000e+00> : vector<32x36xf32>
      %50 = tpu.matmul %36, %49, %cst_18 {dimension_numbers = #tpu.dot_dimension_numbers<[1], [0], [0], [1], [0, 0, 1, 1], [], []>} : vector<32x288xbf16>, vector<288x36xbf16>, vector<32x36xf32> -> vector<32x36xf32>
      %c2_i32_19 = arith.constant 2 : i32
      %51 = arith.muli %c2_i32_19, %arg6 : i32
      %52 = arith.index_cast %51 : i32 to index
      %c0_20 = arith.constant 0 : index
      %c0_21 = arith.constant 0 : index
      %53 = vector.load %arg3[%52, %c0_20, %c0_21] : memref<4x32x1xf32, #tpu.memory_space<vmem>>, vector<1x32x1xf32>
      %54 = vector.shape_cast %53 : vector<1x32x1xf32> to vector<32x1xf32>
      %c2_i32_22 = arith.constant 2 : i32
      %55 = arith.muli %c2_i32_22, %arg6 : i32
      %56 = arith.index_cast %55 : i32 to index
      %c0_23 = arith.constant 0 : index
      %c0_24 = arith.constant 0 : index
      %57 = vector.load %arg4[%56, %c0_23, %c0_24] : memref<4x32x1xf32, #tpu.memory_space<vmem>>, vector<1x32x1xf32>
      %58 = vector.shape_cast %57 : vector<1x32x1xf32> to vector<32x1xf32>
      %59 = vector.broadcast %23 : vector<1x36xf32> to vector<32x36xf32>
      %60 = arith.mulf %50, %59 : vector<32x36xf32>
      %cst_25 = arith.constant dense<0.000000e+00> : vector<32xf32>
      %61 = vector.multi_reduction <add>, %60, %cst_25 [1] : vector<32x36xf32> to vector<32xf32>
      %62 = vector.shape_cast %61 : vector<32xf32> to vector<32x1xf32>
      %63 = arith.mulf %60, %60 : vector<32x36xf32>
      %cst_26 = arith.constant dense<0.000000e+00> : vector<32xf32>
      %64 = vector.multi_reduction <add>, %63, %cst_26 [1] : vector<32x36xf32> to vector<32xf32>
      %65 = vector.shape_cast %64 : vector<32xf32> to vector<32x1xf32>
      %cst_27 = arith.constant 6.250000e-02 : f32
      %66 = vector.broadcast %cst_27 : f32 to vector<32x1xf32>
      %67 = arith.mulf %62, %66 : vector<32x1xf32>
      %cst_28 = arith.constant 6.250000e-02 : f32
      %68 = vector.broadcast %cst_28 : f32 to vector<32x1xf32>
      %69 = arith.mulf %65, %68 : vector<32x1xf32>
      %70 = arith.mulf %67, %67 : vector<32x1xf32>
      %71 = arith.subf %69, %70 : vector<32x1xf32>
      %cst_29 = arith.constant 0.000000e+00 : f32
      %72 = vector.broadcast %cst_29 : f32 to vector<32x1xf32>
      %73 = arith.maximumf %71, %72 : vector<32x1xf32>
      %74 = vector.broadcast %67 : vector<32x1xf32> to vector<32x36xf32>
      %75 = arith.subf %50, %74 : vector<32x36xf32>
      %cst_30 = arith.constant 9.99999974E-6 : f32
      %76 = vector.broadcast %cst_30 : f32 to vector<32x1xf32>
      %77 = arith.addf %73, %76 : vector<32x1xf32>
      %78 = math.rsqrt %77 : vector<32x1xf32>
      %79 = arith.mulf %78, %54 : vector<32x1xf32>
      %80 = vector.broadcast %79 : vector<32x1xf32> to vector<32x36xf32>
      %81 = arith.mulf %75, %80 : vector<32x36xf32>
      %82 = vector.broadcast %58 : vector<32x1xf32> to vector<32x36xf32>
      %83 = arith.addf %81, %82 : vector<32x36xf32>
      %cst_31 = arith.constant 0.000000e+00 : f32
      %84 = vector.broadcast %cst_31 : f32 to vector<32x36xf32>
      %85 = arith.maximumf %83, %84 : vector<32x36xf32>
      %86 = vector.broadcast %23 : vector<1x36xf32> to vector<32x36xf32>
      %87 = arith.mulf %85, %86 : vector<32x36xf32>
      %c2_i32_32 = arith.constant 2 : i32
      %88 = arith.muli %c2_i32_32, %arg6 : i32
      %c1_i32_33 = arith.constant 1 : i32
      %89 = arith.addi %88, %c1_i32_33 : i32
      %90 = arith.index_cast %89 : i32 to index
      %c0_34 = arith.constant 0 : index
      %c0_35 = arith.constant 0 : index
      %91 = vector.load %arg2[%90, %c0_34, %c0_35] : memref<4x32x288xbf16, #tpu.memory_space<vmem>>, vector<1x32x288xbf16>
      %92 = vector.shape_cast %91 : vector<1x32x288xbf16> to vector<32x288xbf16>
      %cst_36 = arith.constant 0.000000e+00 : bf16
      %93 = vector.broadcast %cst_36 : bf16 to vector<32x7xbf16>
      %94 = arith.truncf %87 : vector<32x36xf32> to vector<32x36xbf16>
      %95 = tpu.concatenate %93, %94, %93 in 1 : vector<32x7xbf16>, vector<32x36xbf16>, vector<32x7xbf16> -> vector<32x50xbf16>
      %96 = vector.extract_strided_slice %95 {offsets = [0, 0], sizes = [32, 36], strides = [1, 1]} : vector<32x50xbf16> to vector<32x36xbf16>
      %97 = vector.extract_strided_slice %95 {offsets = [0, 1], sizes = [32, 36], strides = [1, 1]} : vector<32x50xbf16> to vector<32x36xbf16>
      %98 = vector.extract_strided_slice %95 {offsets = [0, 2], sizes = [32, 36], strides = [1, 1]} : vector<32x50xbf16> to vector<32x36xbf16>
      %99 = vector.extract_strided_slice %95 {offsets = [0, 6], sizes = [32, 36], strides = [1, 1]} : vector<32x50xbf16> to vector<32x36xbf16>
      %100 = vector.extract_strided_slice %95 {offsets = [0, 7], sizes = [32, 36], strides = [1, 1]} : vector<32x50xbf16> to vector<32x36xbf16>
      %101 = vector.extract_strided_slice %95 {offsets = [0, 8], sizes = [32, 36], strides = [1, 1]} : vector<32x50xbf16> to vector<32x36xbf16>
      %102 = vector.extract_strided_slice %95 {offsets = [0, 12], sizes = [32, 36], strides = [1, 1]} : vector<32x50xbf16> to vector<32x36xbf16>
      %103 = vector.extract_strided_slice %95 {offsets = [0, 13], sizes = [32, 36], strides = [1, 1]} : vector<32x50xbf16> to vector<32x36xbf16>
      %104 = vector.extract_strided_slice %95 {offsets = [0, 14], sizes = [32, 36], strides = [1, 1]} : vector<32x50xbf16> to vector<32x36xbf16>
      %105 = tpu.concatenate %96, %97, %98, %99, %100, %101, %102, %103, %104 in 0 : vector<32x36xbf16>, vector<32x36xbf16>, vector<32x36xbf16>, vector<32x36xbf16>, vector<32x36xbf16>, vector<32x36xbf16>, vector<32x36xbf16>, vector<32x36xbf16>, vector<32x36xbf16> -> vector<288x36xbf16>
      %cst_37 = arith.constant dense<0.000000e+00> : vector<32x36xf32>
      %106 = tpu.matmul %92, %105, %cst_37 {dimension_numbers = #tpu.dot_dimension_numbers<[1], [0], [0], [1], [0, 0, 1, 1], [], []>} : vector<32x288xbf16>, vector<288x36xbf16>, vector<32x36xf32> -> vector<32x36xf32>
      %c2_i32_38 = arith.constant 2 : i32
      %107 = arith.muli %c2_i32_38, %arg6 : i32
      %c1_i32_39 = arith.constant 1 : i32
      %108 = arith.addi %107, %c1_i32_39 : i32
      %109 = arith.index_cast %108 : i32 to index
      %c0_40 = arith.constant 0 : index
      %c0_41 = arith.constant 0 : index
      %110 = vector.load %arg3[%109, %c0_40, %c0_41] : memref<4x32x1xf32, #tpu.memory_space<vmem>>, vector<1x32x1xf32>
      %111 = vector.shape_cast %110 : vector<1x32x1xf32> to vector<32x1xf32>
      %c2_i32_42 = arith.constant 2 : i32
      %112 = arith.muli %c2_i32_42, %arg6 : i32
      %c1_i32_43 = arith.constant 1 : i32
      %113 = arith.addi %112, %c1_i32_43 : i32
      %114 = arith.index_cast %113 : i32 to index
      %c0_44 = arith.constant 0 : index
      %c0_45 = arith.constant 0 : index
      %115 = vector.load %arg4[%114, %c0_44, %c0_45] : memref<4x32x1xf32, #tpu.memory_space<vmem>>, vector<1x32x1xf32>
      %116 = vector.shape_cast %115 : vector<1x32x1xf32> to vector<32x1xf32>
      %117 = vector.broadcast %23 : vector<1x36xf32> to vector<32x36xf32>
      %118 = arith.mulf %106, %117 : vector<32x36xf32>
      %cst_46 = arith.constant dense<0.000000e+00> : vector<32xf32>
      %119 = vector.multi_reduction <add>, %118, %cst_46 [1] : vector<32x36xf32> to vector<32xf32>
      %120 = vector.shape_cast %119 : vector<32xf32> to vector<32x1xf32>
      %121 = arith.mulf %118, %118 : vector<32x36xf32>
      %cst_47 = arith.constant dense<0.000000e+00> : vector<32xf32>
      %122 = vector.multi_reduction <add>, %121, %cst_47 [1] : vector<32x36xf32> to vector<32xf32>
      %123 = vector.shape_cast %122 : vector<32xf32> to vector<32x1xf32>
      %cst_48 = arith.constant 6.250000e-02 : f32
      %124 = vector.broadcast %cst_48 : f32 to vector<32x1xf32>
      %125 = arith.mulf %120, %124 : vector<32x1xf32>
      %cst_49 = arith.constant 6.250000e-02 : f32
      %126 = vector.broadcast %cst_49 : f32 to vector<32x1xf32>
      %127 = arith.mulf %123, %126 : vector<32x1xf32>
      %128 = arith.mulf %125, %125 : vector<32x1xf32>
      %129 = arith.subf %127, %128 : vector<32x1xf32>
      %cst_50 = arith.constant 0.000000e+00 : f32
      %130 = vector.broadcast %cst_50 : f32 to vector<32x1xf32>
      %131 = arith.maximumf %129, %130 : vector<32x1xf32>
      %132 = vector.broadcast %125 : vector<32x1xf32> to vector<32x36xf32>
      %133 = arith.subf %106, %132 : vector<32x36xf32>
      %cst_51 = arith.constant 9.99999974E-6 : f32
      %134 = vector.broadcast %cst_51 : f32 to vector<32x1xf32>
      %135 = arith.addf %131, %134 : vector<32x1xf32>
      %136 = math.rsqrt %135 : vector<32x1xf32>
      %137 = arith.mulf %136, %111 : vector<32x1xf32>
      %138 = vector.broadcast %137 : vector<32x1xf32> to vector<32x36xf32>
      %139 = arith.mulf %133, %138 : vector<32x36xf32>
      %140 = vector.broadcast %116 : vector<32x1xf32> to vector<32x36xf32>
      %141 = arith.addf %139, %140 : vector<32x36xf32>
      %142 = vector.broadcast %23 : vector<1x36xf32> to vector<32x36xf32>
      %143 = arith.mulf %141, %142 : vector<32x36xf32>
      %144 = arith.addf %arg7, %143 : vector<32x36xf32>
      scf.yield %144 : vector<32x36xf32>
    }
    %c2_i32_10 = arith.constant 2 : i32
    %29 = arith.truncf %28 : vector<32x36xf32> to vector<32x36xbf16>
    %c0_11 = arith.constant 0 : index
    %c0_12 = arith.constant 0 : index
    %c0_13 = arith.constant 0 : index
    %30 = vector.load %arg5[%c0_11, %c0_12, %c0_13] : memref<1x32x36xbf16, #tpu.memory_space<vmem>>, vector<1x32x36xbf16>
    %31 = vector.shape_cast %30 : vector<1x32x36xbf16> to vector<32x36xbf16>
    %32 = vector.shape_cast %29 : vector<32x36xbf16> to vector<1x32x36xbf16>
    tpu.vector_store %arg5[%c0_11, %c0_12, %c0_13], %32 {strides = array<i32>} : memref<1x32x36xbf16, #tpu.memory_space<vmem>>, vector<1x32x36xbf16>,
    return
  }
  func.func @transform_0(%arg0: i32) -> (i32, i32, i32) {
    %c0_i32 = arith.constant 0 : i32
    %c0_i32_0 = arith.constant 0 : i32
    %c0_i32_1 = arith.constant 0 : i32
    return %arg0, %c0_i32, %c0_i32_0 : i32, i32, i32
  }
  func.func @transform_1(%arg0: i32) -> (i32, i32, i32) {
    %c0_i32 = arith.constant 0 : i32
    %c0_i32_0 = arith.constant 0 : i32
    %c0_i32_1 = arith.constant 0 : i32
    %c0_i32_2 = arith.constant 0 : i32
    return %c0_i32, %c0_i32_0, %c0_i32_1 : i32, i32, i32
  }
  func.func @transform_2(%arg0: i32) -> (i32, i32, i32) {
    %c0_i32 = arith.constant 0 : i32
    %c0_i32_0 = arith.constant 0 : i32
    %c0_i32_1 = arith.constant 0 : i32
    %c0_i32_2 = arith.constant 0 : i32
    return %c0_i32, %c0_i32_0, %c0_i32_1 : i32, i32, i32
  }
  func.func @transform_3(%arg0: i32) -> (i32, i32, i32) {
    %c0_i32 = arith.constant 0 : i32
    %c0_i32_0 = arith.constant 0 : i32
    %c0_i32_1 = arith.constant 0 : i32
    %c0_i32_2 = arith.constant 0 : i32
    return %c0_i32, %c0_i32_0, %c0_i32_1 : i32, i32, i32
  }
  func.func @transform_4(%arg0: i32) -> (i32, i32, i32) {
    %c0_i32 = arith.constant 0 : i32
    %c0_i32_0 = arith.constant 0 : i32
    %c0_i32_1 = arith.constant 0 : i32
    return %arg0, %c0_i32, %c0_i32_0 : i32, i32, i32
  }
}

module attributes {stable_mosaic.version = 11 : i64} {
  func.func @_up_conv_kernel(%arg0: i32, %arg1: memref<1x32x36xbf16, #tpu.memory_space<vmem>>, %arg2: memref<4x16x128xbf16, #tpu.memory_space<vmem>>, %arg3: memref<16x1xf32, #tpu.memory_space<vmem>>, %arg4: memref<16x1xf32, #tpu.memory_space<vmem>>, %arg5: memref<1x16x144xbf16, #tpu.memory_space<vmem>>) attributes {dimension_semantics = [#tpu.dimension_semantics<parallel>], iteration_bounds = array<i64: 2>, scalar_prefetch = 0 : i64, scratch_operands = 0 : i64, tpu.core_type = #tpu.core_type<tc>, window_params = [{transform_indices = @transform_0, window_bounds = array<i64: 1, 32, 36>}, {pipeline_mode = #tpu.pipeline_mode<synchronous>, transform_indices = @transform_1, window_bounds = array<i64: 4, 16, 128>}, {pipeline_mode = #tpu.pipeline_mode<synchronous>, transform_indices = @transform_2, window_bounds = array<i64: 16, 1>}, {pipeline_mode = #tpu.pipeline_mode<synchronous>, transform_indices = @transform_3, window_bounds = array<i64: 16, 1>}, {transform_indices = @transform_4, window_bounds = array<i64: 1, 16, 144>}]} {
    %c0 = arith.constant 0 : index
    %c0_0 = arith.constant 0 : index
    %c0_1 = arith.constant 0 : index
    %0 = vector.load %arg1[%c0, %c0_0, %c0_1] : memref<1x32x36xbf16, #tpu.memory_space<vmem>>, vector<1x32x36xbf16>
    %1 = vector.shape_cast %0 : vector<1x32x36xbf16> to vector<32x36xbf16>
    %cst = arith.constant 0.000000e+00 : bf16
    %2 = vector.broadcast %cst : bf16 to vector<32x14xbf16>
    %3 = tpu.concatenate %1, %2 in 1 : vector<32x36xbf16>, vector<32x14xbf16> -> vector<32x50xbf16>
    %c0_2 = arith.constant 0 : index
    %c0_3 = arith.constant 0 : index
    %c0_4 = arith.constant 0 : index
    %4 = vector.load %arg2[%c0_2, %c0_3, %c0_4] : memref<4x16x128xbf16, #tpu.memory_space<vmem>>, vector<1x16x128xbf16>
    %5 = vector.shape_cast %4 : vector<1x16x128xbf16> to vector<16x128xbf16>
    %6 = vector.extract_strided_slice %3 {offsets = [0, 0], sizes = [32, 36], strides = [1, 1]} : vector<32x50xbf16> to vector<32x36xbf16>
    %7 = vector.extract_strided_slice %3 {offsets = [0, 1], sizes = [32, 36], strides = [1, 1]} : vector<32x50xbf16> to vector<32x36xbf16>
    %8 = vector.extract_strided_slice %3 {offsets = [0, 6], sizes = [32, 36], strides = [1, 1]} : vector<32x50xbf16> to vector<32x36xbf16>
    %9 = vector.extract_strided_slice %3 {offsets = [0, 7], sizes = [32, 36], strides = [1, 1]} : vector<32x50xbf16> to vector<32x36xbf16>
    %10 = tpu.concatenate %6, %7, %8, %9 in 0 : vector<32x36xbf16>, vector<32x36xbf16>, vector<32x36xbf16>, vector<32x36xbf16> -> vector<128x36xbf16>
    %cst_5 = arith.constant dense<0.000000e+00> : vector<16x36xf32>
    %11 = tpu.matmul %5, %10, %cst_5 {dimension_numbers = #tpu.dot_dimension_numbers<[1], [0], [0], [1], [0, 0, 1, 1], [], []>} : vector<16x128xbf16>, vector<128x36xbf16>, vector<16x36xf32> -> vector<16x36xf32>
    %c1 = arith.constant 1 : index
    %c0_6 = arith.constant 0 : index
    %c0_7 = arith.constant 0 : index
    %12 = vector.load %arg2[%c1, %c0_6, %c0_7] : memref<4x16x128xbf16, #tpu.memory_space<vmem>>, vector<1x16x128xbf16>
    %13 = vector.shape_cast %12 : vector<1x16x128xbf16> to vector<16x128xbf16>
    %14 = vector.extract_strided_slice %3 {offsets = [0, 1], sizes = [32, 36], strides = [1, 1]} : vector<32x50xbf16> to vector<32x36xbf16>
    %15 = vector.extract_strided_slice %3 {offsets = [0, 2], sizes = [32, 36], strides = [1, 1]} : vector<32x50xbf16> to vector<32x36xbf16>
    %16 = vector.extract_strided_slice %3 {offsets = [0, 7], sizes = [32, 36], strides = [1, 1]} : vector<32x50xbf16> to vector<32x36xbf16>
    %17 = vector.extract_strided_slice %3 {offsets = [0, 8], sizes = [32, 36], strides = [1, 1]} : vector<32x50xbf16> to vector<32x36xbf16>
    %18 = tpu.concatenate %14, %15, %16, %17 in 0 : vector<32x36xbf16>, vector<32x36xbf16>, vector<32x36xbf16>, vector<32x36xbf16> -> vector<128x36xbf16>
    %cst_8 = arith.constant dense<0.000000e+00> : vector<16x36xf32>
    %19 = tpu.matmul %13, %18, %cst_8 {dimension_numbers = #tpu.dot_dimension_numbers<[1], [0], [0], [1], [0, 0, 1, 1], [], []>} : vector<16x128xbf16>, vector<128x36xbf16>, vector<16x36xf32> -> vector<16x36xf32>
    %c2 = arith.constant 2 : index
    %c0_9 = arith.constant 0 : index
    %c0_10 = arith.constant 0 : index
    %20 = vector.load %arg2[%c2, %c0_9, %c0_10] : memref<4x16x128xbf16, #tpu.memory_space<vmem>>, vector<1x16x128xbf16>
    %21 = vector.shape_cast %20 : vector<1x16x128xbf16> to vector<16x128xbf16>
    %22 = vector.extract_strided_slice %3 {offsets = [0, 6], sizes = [32, 36], strides = [1, 1]} : vector<32x50xbf16> to vector<32x36xbf16>
    %23 = vector.extract_strided_slice %3 {offsets = [0, 7], sizes = [32, 36], strides = [1, 1]} : vector<32x50xbf16> to vector<32x36xbf16>
    %24 = vector.extract_strided_slice %3 {offsets = [0, 12], sizes = [32, 36], strides = [1, 1]} : vector<32x50xbf16> to vector<32x36xbf16>
    %25 = vector.extract_strided_slice %3 {offsets = [0, 13], sizes = [32, 36], strides = [1, 1]} : vector<32x50xbf16> to vector<32x36xbf16>
    %26 = tpu.concatenate %22, %23, %24, %25 in 0 : vector<32x36xbf16>, vector<32x36xbf16>, vector<32x36xbf16>, vector<32x36xbf16> -> vector<128x36xbf16>
    %cst_11 = arith.constant dense<0.000000e+00> : vector<16x36xf32>
    %27 = tpu.matmul %21, %26, %cst_11 {dimension_numbers = #tpu.dot_dimension_numbers<[1], [0], [0], [1], [0, 0, 1, 1], [], []>} : vector<16x128xbf16>, vector<128x36xbf16>, vector<16x36xf32> -> vector<16x36xf32>
    %c3 = arith.constant 3 : index
    %c0_12 = arith.constant 0 : index
    %c0_13 = arith.constant 0 : index
    %28 = vector.load %arg2[%c3, %c0_12, %c0_13] : memref<4x16x128xbf16, #tpu.memory_space<vmem>>, vector<1x16x128xbf16>
    %29 = vector.shape_cast %28 : vector<1x16x128xbf16> to vector<16x128xbf16>
    %30 = vector.extract_strided_slice %3 {offsets = [0, 7], sizes = [32, 36], strides = [1, 1]} : vector<32x50xbf16> to vector<32x36xbf16>
    %31 = vector.extract_strided_slice %3 {offsets = [0, 8], sizes = [32, 36], strides = [1, 1]} : vector<32x50xbf16> to vector<32x36xbf16>
    %32 = vector.extract_strided_slice %3 {offsets = [0, 13], sizes = [32, 36], strides = [1, 1]} : vector<32x50xbf16> to vector<32x36xbf16>
    %33 = vector.extract_strided_slice %3 {offsets = [0, 14], sizes = [32, 36], strides = [1, 1]} : vector<32x50xbf16> to vector<32x36xbf16>
    %34 = tpu.concatenate %30, %31, %32, %33 in 0 : vector<32x36xbf16>, vector<32x36xbf16>, vector<32x36xbf16>, vector<32x36xbf16> -> vector<128x36xbf16>
    %cst_14 = arith.constant dense<0.000000e+00> : vector<16x36xf32>
    %35 = tpu.matmul %29, %34, %cst_14 {dimension_numbers = #tpu.dot_dimension_numbers<[1], [0], [0], [1], [0, 0, 1, 1], [], []>} : vector<16x128xbf16>, vector<128x36xbf16>, vector<16x36xf32> -> vector<16x36xf32>
    %36 = tpu.concatenate %11, %19, %27, %35 in 1 : vector<16x36xf32>, vector<16x36xf32>, vector<16x36xf32>, vector<16x36xf32> -> vector<16x144xf32>
    %37 = tpu.iota {dimensions = array<i32: 1>} : vector<1x36xi32>
    %38 = arith.sitofp %37 : vector<1x36xi32> to vector<1x36xf32>
    %cst_15 = arith.constant 5.000000e-01 : f32
    %39 = vector.broadcast %cst_15 : f32 to vector<1x36xf32>
    %40 = arith.addf %38, %39 : vector<1x36xf32>
    %cst_16 = arith.constant 0.166666672 : f32
    %41 = vector.broadcast %cst_16 : f32 to vector<1x36xf32>
    %42 = arith.mulf %40, %41 : vector<1x36xf32>
    %43 = math.floor %42 : vector<1x36xf32>
    %cst_17 = arith.constant 6.000000e+00 : f32
    %44 = vector.broadcast %cst_17 : f32 to vector<1x36xf32>
    %45 = arith.mulf %43, %44 : vector<1x36xf32>
    %46 = arith.subf %38, %45 : vector<1x36xf32>
    %cst_18 = arith.constant 0.000000e+00 : f32
    %47 = vector.broadcast %cst_18 : f32 to vector<1x36xf32>
    %48 = arith.cmpf oge, %43, %47 : vector<1x36xf32>
    %cst_19 = arith.constant 4.000000e+00 : f32
    %49 = vector.broadcast %cst_19 : f32 to vector<1x36xf32>
    %50 = arith.cmpf olt, %43, %49 : vector<1x36xf32>
    %51 = arith.andi %48, %50 : vector<1x36xi1>
    %cst_20 = arith.constant 0.000000e+00 : f32
    %52 = vector.broadcast %cst_20 : f32 to vector<1x36xf32>
    %53 = arith.cmpf oge, %46, %52 : vector<1x36xf32>
    %54 = arith.andi %51, %53 : vector<1x36xi1>
    %cst_21 = arith.constant 4.000000e+00 : f32
    %55 = vector.broadcast %cst_21 : f32 to vector<1x36xf32>
    %56 = arith.cmpf olt, %46, %55 : vector<1x36xf32>
    %57 = arith.andi %54, %56 : vector<1x36xi1>
    %cst_22 = arith.constant 1.000000e+00 : f32
    %cst_23 = arith.constant 0.000000e+00 : f32
    %58 = vector.broadcast %cst_22 : f32 to vector<1x36xf32>
    %59 = vector.broadcast %cst_23 : f32 to vector<1x36xf32>
    %60 = arith.select %57, %58, %59 : vector<1x36xi1>, vector<1x36xf32>
    %61 = tpu.concatenate %60, %60, %60, %60 in 1 : vector<1x36xf32>, vector<1x36xf32>, vector<1x36xf32>, vector<1x36xf32> -> vector<1x144xf32>
    %c0_24 = arith.constant 0 : index
    %c0_25 = arith.constant 0 : index
    %62 = vector.load %arg3[%c0_24, %c0_25] : memref<16x1xf32, #tpu.memory_space<vmem>>, vector<16x1xf32>
    %c0_26 = arith.constant 0 : index
    %c0_27 = arith.constant 0 : index
    %63 = vector.load %arg4[%c0_26, %c0_27] : memref<16x1xf32, #tpu.memory_space<vmem>>, vector<16x1xf32>
    %64 = vector.broadcast %61 : vector<1x144xf32> to vector<16x144xf32>
    %65 = arith.mulf %36, %64 : vector<16x144xf32>
    %cst_28 = arith.constant dense<0.000000e+00> : vector<16xf32>
    %66 = vector.multi_reduction <add>, %65, %cst_28 [1] : vector<16x144xf32> to vector<16xf32>
    %67 = vector.shape_cast %66 : vector<16xf32> to vector<16x1xf32>
    %68 = arith.mulf %65, %65 : vector<16x144xf32>
    %cst_29 = arith.constant dense<0.000000e+00> : vector<16xf32>
    %69 = vector.multi_reduction <add>, %68, %cst_29 [1] : vector<16x144xf32> to vector<16xf32>
    %70 = vector.shape_cast %69 : vector<16xf32> to vector<16x1xf32>
    %cst_30 = arith.constant 1.562500e-02 : f32
    %71 = vector.broadcast %cst_30 : f32 to vector<16x1xf32>
    %72 = arith.mulf %67, %71 : vector<16x1xf32>
    %cst_31 = arith.constant 1.562500e-02 : f32
    %73 = vector.broadcast %cst_31 : f32 to vector<16x1xf32>
    %74 = arith.mulf %70, %73 : vector<16x1xf32>
    %75 = arith.mulf %72, %72 : vector<16x1xf32>
    %76 = arith.subf %74, %75 : vector<16x1xf32>
    %cst_32 = arith.constant 0.000000e+00 : f32
    %77 = vector.broadcast %cst_32 : f32 to vector<16x1xf32>
    %78 = arith.maximumf %76, %77 : vector<16x1xf32>
    %79 = vector.broadcast %72 : vector<16x1xf32> to vector<16x144xf32>
    %80 = arith.subf %36, %79 : vector<16x144xf32>
    %cst_33 = arith.constant 9.99999974E-6 : f32
    %81 = vector.broadcast %cst_33 : f32 to vector<16x1xf32>
    %82 = arith.addf %78, %81 : vector<16x1xf32>
    %83 = math.rsqrt %82 : vector<16x1xf32>
    %84 = arith.mulf %83, %62 : vector<16x1xf32>
    %85 = vector.broadcast %84 : vector<16x1xf32> to vector<16x144xf32>
    %86 = arith.mulf %80, %85 : vector<16x144xf32>
    %87 = vector.broadcast %63 : vector<16x1xf32> to vector<16x144xf32>
    %88 = arith.addf %86, %87 : vector<16x144xf32>
    %cst_34 = arith.constant 0.000000e+00 : f32
    %89 = vector.broadcast %cst_34 : f32 to vector<16x144xf32>
    %90 = arith.maximumf %88, %89 : vector<16x144xf32>
    %91 = arith.truncf %90 : vector<16x144xf32> to vector<16x144xbf16>
    %c0_35 = arith.constant 0 : index
    %c0_36 = arith.constant 0 : index
    %c0_37 = arith.constant 0 : index
    %92 = vector.load %arg5[%c0_35, %c0_36, %c0_37] : memref<1x16x144xbf16, #tpu.memory_space<vmem>>, vector<1x16x144xbf16>
    %93 = vector.shape_cast %92 : vector<1x16x144xbf16> to vector<16x144xbf16>
    %94 = vector.shape_cast %91 : vector<16x144xbf16> to vector<1x16x144xbf16>
    tpu.vector_store %arg5[%c0_35, %c0_36, %c0_37], %94 {strides = array<i32>} : memref<1x16x144xbf16, #tpu.memory_space<vmem>>, vector<1x16x144xbf16>,
    return
  }
  func.func @transform_0(%arg0: i32) -> (i32, i32, i32) {
    %c0_i32 = arith.constant 0 : i32
    %c0_i32_0 = arith.constant 0 : i32
    %c0_i32_1 = arith.constant 0 : i32
    return %arg0, %c0_i32, %c0_i32_0 : i32, i32, i32
  }
  func.func @transform_1(%arg0: i32) -> (i32, i32, i32) {
    %c0_i32 = arith.constant 0 : i32
    %c0_i32_0 = arith.constant 0 : i32
    %c0_i32_1 = arith.constant 0 : i32
    %c0_i32_2 = arith.constant 0 : i32
    return %c0_i32, %c0_i32_0, %c0_i32_1 : i32, i32, i32
  }
  func.func @transform_2(%arg0: i32) -> (i32, i32) {
    %c0_i32 = arith.constant 0 : i32
    %c0_i32_0 = arith.constant 0 : i32
    %c0_i32_1 = arith.constant 0 : i32
    return %c0_i32, %c0_i32_0 : i32, i32
  }
  func.func @transform_3(%arg0: i32) -> (i32, i32) {
    %c0_i32 = arith.constant 0 : i32
    %c0_i32_0 = arith.constant 0 : i32
    %c0_i32_1 = arith.constant 0 : i32
    return %c0_i32, %c0_i32_0 : i32, i32
  }
  func.func @transform_4(%arg0: i32) -> (i32, i32, i32) {
    %c0_i32 = arith.constant 0 : i32
    %c0_i32_0 = arith.constant 0 : i32
    %c0_i32_1 = arith.constant 0 : i32
    return %arg0, %c0_i32, %c0_i32_0 : i32, i32, i32
  }
}

module attributes {stable_mosaic.version = 11 : i64} {
  func.func @_up_conv_kernel(%arg0: i32, %arg1: memref<1x16x100xbf16, #tpu.memory_space<vmem>>, %arg2: memref<4x8x64xbf16, #tpu.memory_space<vmem>>, %arg3: memref<8x1xf32, #tpu.memory_space<vmem>>, %arg4: memref<8x1xf32, #tpu.memory_space<vmem>>, %arg5: memref<1x8x400xbf16, #tpu.memory_space<vmem>>) attributes {dimension_semantics = [#tpu.dimension_semantics<parallel>], iteration_bounds = array<i64: 2>, scalar_prefetch = 0 : i64, scratch_operands = 0 : i64, tpu.core_type = #tpu.core_type<tc>, window_params = [{transform_indices = @transform_0, window_bounds = array<i64: 1, 16, 100>}, {pipeline_mode = #tpu.pipeline_mode<synchronous>, transform_indices = @transform_1, window_bounds = array<i64: 4, 8, 64>}, {pipeline_mode = #tpu.pipeline_mode<synchronous>, transform_indices = @transform_2, window_bounds = array<i64: 8, 1>}, {pipeline_mode = #tpu.pipeline_mode<synchronous>, transform_indices = @transform_3, window_bounds = array<i64: 8, 1>}, {transform_indices = @transform_4, window_bounds = array<i64: 1, 8, 400>}]} {
    %c0 = arith.constant 0 : index
    %c0_0 = arith.constant 0 : index
    %c0_1 = arith.constant 0 : index
    %0 = vector.load %arg1[%c0, %c0_0, %c0_1] : memref<1x16x100xbf16, #tpu.memory_space<vmem>>, vector<1x16x100xbf16>
    %1 = vector.shape_cast %0 : vector<1x16x100xbf16> to vector<16x100xbf16>
    %cst = arith.constant 0.000000e+00 : bf16
    %2 = vector.broadcast %cst : bf16 to vector<16x22xbf16>
    %3 = tpu.concatenate %1, %2 in 1 : vector<16x100xbf16>, vector<16x22xbf16> -> vector<16x122xbf16>
    %c0_2 = arith.constant 0 : index
    %c0_3 = arith.constant 0 : index
    %c0_4 = arith.constant 0 : index
    %4 = vector.load %arg2[%c0_2, %c0_3, %c0_4] : memref<4x8x64xbf16, #tpu.memory_space<vmem>>, vector<1x8x64xbf16>
    %5 = vector.shape_cast %4 : vector<1x8x64xbf16> to vector<8x64xbf16>
    %6 = vector.extract_strided_slice %3 {offsets = [0, 0], sizes = [16, 100], strides = [1, 1]} : vector<16x122xbf16> to vector<16x100xbf16>
    %7 = vector.extract_strided_slice %3 {offsets = [0, 1], sizes = [16, 100], strides = [1, 1]} : vector<16x122xbf16> to vector<16x100xbf16>
    %8 = vector.extract_strided_slice %3 {offsets = [0, 10], sizes = [16, 100], strides = [1, 1]} : vector<16x122xbf16> to vector<16x100xbf16>
    %9 = vector.extract_strided_slice %3 {offsets = [0, 11], sizes = [16, 100], strides = [1, 1]} : vector<16x122xbf16> to vector<16x100xbf16>
    %10 = tpu.concatenate %6, %7, %8, %9 in 0 : vector<16x100xbf16>, vector<16x100xbf16>, vector<16x100xbf16>, vector<16x100xbf16> -> vector<64x100xbf16>
    %cst_5 = arith.constant dense<0.000000e+00> : vector<8x100xf32>
    %11 = tpu.matmul %5, %10, %cst_5 {dimension_numbers = #tpu.dot_dimension_numbers<[1], [0], [0], [1], [0, 0, 1, 1], [], []>} : vector<8x64xbf16>, vector<64x100xbf16>, vector<8x100xf32> -> vector<8x100xf32>
    %c1 = arith.constant 1 : index
    %c0_6 = arith.constant 0 : index
    %c0_7 = arith.constant 0 : index
    %12 = vector.load %arg2[%c1, %c0_6, %c0_7] : memref<4x8x64xbf16, #tpu.memory_space<vmem>>, vector<1x8x64xbf16>
    %13 = vector.shape_cast %12 : vector<1x8x64xbf16> to vector<8x64xbf16>
    %14 = vector.extract_strided_slice %3 {offsets = [0, 1], sizes = [16, 100], strides = [1, 1]} : vector<16x122xbf16> to vector<16x100xbf16>
    %15 = vector.extract_strided_slice %3 {offsets = [0, 2], sizes = [16, 100], strides = [1, 1]} : vector<16x122xbf16> to vector<16x100xbf16>
    %16 = vector.extract_strided_slice %3 {offsets = [0, 11], sizes = [16, 100], strides = [1, 1]} : vector<16x122xbf16> to vector<16x100xbf16>
    %17 = vector.extract_strided_slice %3 {offsets = [0, 12], sizes = [16, 100], strides = [1, 1]} : vector<16x122xbf16> to vector<16x100xbf16>
    %18 = tpu.concatenate %14, %15, %16, %17 in 0 : vector<16x100xbf16>, vector<16x100xbf16>, vector<16x100xbf16>, vector<16x100xbf16> -> vector<64x100xbf16>
    %cst_8 = arith.constant dense<0.000000e+00> : vector<8x100xf32>
    %19 = tpu.matmul %13, %18, %cst_8 {dimension_numbers = #tpu.dot_dimension_numbers<[1], [0], [0], [1], [0, 0, 1, 1], [], []>} : vector<8x64xbf16>, vector<64x100xbf16>, vector<8x100xf32> -> vector<8x100xf32>
    %c2 = arith.constant 2 : index
    %c0_9 = arith.constant 0 : index
    %c0_10 = arith.constant 0 : index
    %20 = vector.load %arg2[%c2, %c0_9, %c0_10] : memref<4x8x64xbf16, #tpu.memory_space<vmem>>, vector<1x8x64xbf16>
    %21 = vector.shape_cast %20 : vector<1x8x64xbf16> to vector<8x64xbf16>
    %22 = vector.extract_strided_slice %3 {offsets = [0, 10], sizes = [16, 100], strides = [1, 1]} : vector<16x122xbf16> to vector<16x100xbf16>
    %23 = vector.extract_strided_slice %3 {offsets = [0, 11], sizes = [16, 100], strides = [1, 1]} : vector<16x122xbf16> to vector<16x100xbf16>
    %24 = vector.extract_strided_slice %3 {offsets = [0, 20], sizes = [16, 100], strides = [1, 1]} : vector<16x122xbf16> to vector<16x100xbf16>
    %25 = vector.extract_strided_slice %3 {offsets = [0, 21], sizes = [16, 100], strides = [1, 1]} : vector<16x122xbf16> to vector<16x100xbf16>
    %26 = tpu.concatenate %22, %23, %24, %25 in 0 : vector<16x100xbf16>, vector<16x100xbf16>, vector<16x100xbf16>, vector<16x100xbf16> -> vector<64x100xbf16>
    %cst_11 = arith.constant dense<0.000000e+00> : vector<8x100xf32>
    %27 = tpu.matmul %21, %26, %cst_11 {dimension_numbers = #tpu.dot_dimension_numbers<[1], [0], [0], [1], [0, 0, 1, 1], [], []>} : vector<8x64xbf16>, vector<64x100xbf16>, vector<8x100xf32> -> vector<8x100xf32>
    %c3 = arith.constant 3 : index
    %c0_12 = arith.constant 0 : index
    %c0_13 = arith.constant 0 : index
    %28 = vector.load %arg2[%c3, %c0_12, %c0_13] : memref<4x8x64xbf16, #tpu.memory_space<vmem>>, vector<1x8x64xbf16>
    %29 = vector.shape_cast %28 : vector<1x8x64xbf16> to vector<8x64xbf16>
    %30 = vector.extract_strided_slice %3 {offsets = [0, 11], sizes = [16, 100], strides = [1, 1]} : vector<16x122xbf16> to vector<16x100xbf16>
    %31 = vector.extract_strided_slice %3 {offsets = [0, 12], sizes = [16, 100], strides = [1, 1]} : vector<16x122xbf16> to vector<16x100xbf16>
    %32 = vector.extract_strided_slice %3 {offsets = [0, 21], sizes = [16, 100], strides = [1, 1]} : vector<16x122xbf16> to vector<16x100xbf16>
    %33 = vector.extract_strided_slice %3 {offsets = [0, 22], sizes = [16, 100], strides = [1, 1]} : vector<16x122xbf16> to vector<16x100xbf16>
    %34 = tpu.concatenate %30, %31, %32, %33 in 0 : vector<16x100xbf16>, vector<16x100xbf16>, vector<16x100xbf16>, vector<16x100xbf16> -> vector<64x100xbf16>
    %cst_14 = arith.constant dense<0.000000e+00> : vector<8x100xf32>
    %35 = tpu.matmul %29, %34, %cst_14 {dimension_numbers = #tpu.dot_dimension_numbers<[1], [0], [0], [1], [0, 0, 1, 1], [], []>} : vector<8x64xbf16>, vector<64x100xbf16>, vector<8x100xf32> -> vector<8x100xf32>
    %36 = tpu.concatenate %11, %19, %27, %35 in 1 : vector<8x100xf32>, vector<8x100xf32>, vector<8x100xf32>, vector<8x100xf32> -> vector<8x400xf32>
    %37 = tpu.iota {dimensions = array<i32: 1>} : vector<1x100xi32>
    %38 = arith.sitofp %37 : vector<1x100xi32> to vector<1x100xf32>
    %cst_15 = arith.constant 5.000000e-01 : f32
    %39 = vector.broadcast %cst_15 : f32 to vector<1x100xf32>
    %40 = arith.addf %38, %39 : vector<1x100xf32>
    %cst_16 = arith.constant 1.000000e-01 : f32
    %41 = vector.broadcast %cst_16 : f32 to vector<1x100xf32>
    %42 = arith.mulf %40, %41 : vector<1x100xf32>
    %43 = math.floor %42 : vector<1x100xf32>
    %cst_17 = arith.constant 1.000000e+01 : f32
    %44 = vector.broadcast %cst_17 : f32 to vector<1x100xf32>
    %45 = arith.mulf %43, %44 : vector<1x100xf32>
    %46 = arith.subf %38, %45 : vector<1x100xf32>
    %cst_18 = arith.constant 0.000000e+00 : f32
    %47 = vector.broadcast %cst_18 : f32 to vector<1x100xf32>
    %48 = arith.cmpf oge, %43, %47 : vector<1x100xf32>
    %cst_19 = arith.constant 8.000000e+00 : f32
    %49 = vector.broadcast %cst_19 : f32 to vector<1x100xf32>
    %50 = arith.cmpf olt, %43, %49 : vector<1x100xf32>
    %51 = arith.andi %48, %50 : vector<1x100xi1>
    %cst_20 = arith.constant 0.000000e+00 : f32
    %52 = vector.broadcast %cst_20 : f32 to vector<1x100xf32>
    %53 = arith.cmpf oge, %46, %52 : vector<1x100xf32>
    %54 = arith.andi %51, %53 : vector<1x100xi1>
    %cst_21 = arith.constant 8.000000e+00 : f32
    %55 = vector.broadcast %cst_21 : f32 to vector<1x100xf32>
    %56 = arith.cmpf olt, %46, %55 : vector<1x100xf32>
    %57 = arith.andi %54, %56 : vector<1x100xi1>
    %cst_22 = arith.constant 1.000000e+00 : f32
    %cst_23 = arith.constant 0.000000e+00 : f32
    %58 = vector.broadcast %cst_22 : f32 to vector<1x100xf32>
    %59 = vector.broadcast %cst_23 : f32 to vector<1x100xf32>
    %60 = arith.select %57, %58, %59 : vector<1x100xi1>, vector<1x100xf32>
    %61 = tpu.concatenate %60, %60, %60, %60 in 1 : vector<1x100xf32>, vector<1x100xf32>, vector<1x100xf32>, vector<1x100xf32> -> vector<1x400xf32>
    %c0_24 = arith.constant 0 : index
    %c0_25 = arith.constant 0 : index
    %62 = vector.load %arg3[%c0_24, %c0_25] : memref<8x1xf32, #tpu.memory_space<vmem>>, vector<8x1xf32>
    %c0_26 = arith.constant 0 : index
    %c0_27 = arith.constant 0 : index
    %63 = vector.load %arg4[%c0_26, %c0_27] : memref<8x1xf32, #tpu.memory_space<vmem>>, vector<8x1xf32>
    %64 = vector.broadcast %61 : vector<1x400xf32> to vector<8x400xf32>
    %65 = arith.mulf %36, %64 : vector<8x400xf32>
    %cst_28 = arith.constant dense<0.000000e+00> : vector<8xf32>
    %66 = vector.multi_reduction <add>, %65, %cst_28 [1] : vector<8x400xf32> to vector<8xf32>
    %67 = vector.shape_cast %66 : vector<8xf32> to vector<8x1xf32>
    %68 = arith.mulf %65, %65 : vector<8x400xf32>
    %cst_29 = arith.constant dense<0.000000e+00> : vector<8xf32>
    %69 = vector.multi_reduction <add>, %68, %cst_29 [1] : vector<8x400xf32> to vector<8xf32>
    %70 = vector.shape_cast %69 : vector<8xf32> to vector<8x1xf32>
    %cst_30 = arith.constant 3.906250e-03 : f32
    %71 = vector.broadcast %cst_30 : f32 to vector<8x1xf32>
    %72 = arith.mulf %67, %71 : vector<8x1xf32>
    %cst_31 = arith.constant 3.906250e-03 : f32
    %73 = vector.broadcast %cst_31 : f32 to vector<8x1xf32>
    %74 = arith.mulf %70, %73 : vector<8x1xf32>
    %75 = arith.mulf %72, %72 : vector<8x1xf32>
    %76 = arith.subf %74, %75 : vector<8x1xf32>
    %cst_32 = arith.constant 0.000000e+00 : f32
    %77 = vector.broadcast %cst_32 : f32 to vector<8x1xf32>
    %78 = arith.maximumf %76, %77 : vector<8x1xf32>
    %79 = vector.broadcast %72 : vector<8x1xf32> to vector<8x400xf32>
    %80 = arith.subf %36, %79 : vector<8x400xf32>
    %cst_33 = arith.constant 9.99999974E-6 : f32
    %81 = vector.broadcast %cst_33 : f32 to vector<8x1xf32>
    %82 = arith.addf %78, %81 : vector<8x1xf32>
    %83 = math.rsqrt %82 : vector<8x1xf32>
    %84 = arith.mulf %83, %62 : vector<8x1xf32>
    %85 = vector.broadcast %84 : vector<8x1xf32> to vector<8x400xf32>
    %86 = arith.mulf %80, %85 : vector<8x400xf32>
    %87 = vector.broadcast %63 : vector<8x1xf32> to vector<8x400xf32>
    %88 = arith.addf %86, %87 : vector<8x400xf32>
    %cst_34 = arith.constant 0.000000e+00 : f32
    %89 = vector.broadcast %cst_34 : f32 to vector<8x400xf32>
    %90 = arith.maximumf %88, %89 : vector<8x400xf32>
    %91 = arith.truncf %90 : vector<8x400xf32> to vector<8x400xbf16>
    %c0_35 = arith.constant 0 : index
    %c0_36 = arith.constant 0 : index
    %c0_37 = arith.constant 0 : index
    %92 = vector.load %arg5[%c0_35, %c0_36, %c0_37] : memref<1x8x400xbf16, #tpu.memory_space<vmem>>, vector<1x8x400xbf16>
    %93 = vector.shape_cast %92 : vector<1x8x400xbf16> to vector<8x400xbf16>
    %94 = vector.shape_cast %91 : vector<8x400xbf16> to vector<1x8x400xbf16>
    tpu.vector_store %arg5[%c0_35, %c0_36, %c0_37], %94 {strides = array<i32>} : memref<1x8x400xbf16, #tpu.memory_space<vmem>>, vector<1x8x400xbf16>,
    return
  }
  func.func @transform_0(%arg0: i32) -> (i32, i32, i32) {
    %c0_i32 = arith.constant 0 : i32
    %c0_i32_0 = arith.constant 0 : i32
    %c0_i32_1 = arith.constant 0 : i32
    return %arg0, %c0_i32, %c0_i32_0 : i32, i32, i32
  }
  func.func @transform_1(%arg0: i32) -> (i32, i32, i32) {
    %c0_i32 = arith.constant 0 : i32
    %c0_i32_0 = arith.constant 0 : i32
    %c0_i32_1 = arith.constant 0 : i32
    %c0_i32_2 = arith.constant 0 : i32
    return %c0_i32, %c0_i32_0, %c0_i32_1 : i32, i32, i32
  }
  func.func @transform_2(%arg0: i32) -> (i32, i32) {
    %c0_i32 = arith.constant 0 : i32
    %c0_i32_0 = arith.constant 0 : i32
    %c0_i32_1 = arith.constant 0 : i32
    return %c0_i32, %c0_i32_0 : i32, i32
  }
  func.func @transform_3(%arg0: i32) -> (i32, i32) {
    %c0_i32 = arith.constant 0 : i32
    %c0_i32_0 = arith.constant 0 : i32
    %c0_i32_1 = arith.constant 0 : i32
    return %c0_i32, %c0_i32_0 : i32, i32
  }
  func.func @transform_4(%arg0: i32) -> (i32, i32, i32) {
    %c0_i32 = arith.constant 0 : i32
    %c0_i32_0 = arith.constant 0 : i32
    %c0_i32_1 = arith.constant 0 : i32
    return %arg0, %c0_i32, %c0_i32_0 : i32, i32, i32
  }
}

module attributes {stable_mosaic.version = 11 : i64} {
  func.func @_same_conv_kernel(%arg0: i32, %arg1: memref<1x8x484xbf16, #tpu.memory_space<vmem>>, %arg2: memref<3x392xbf16, #tpu.memory_space<vmem>>, %arg3: memref<1x3x484xf32, #tpu.memory_space<vmem>>) attributes {dimension_semantics = [#tpu.dimension_semantics<parallel>], iteration_bounds = array<i64: 2>, scalar_prefetch = 0 : i64, scratch_operands = 0 : i64, tpu.core_type = #tpu.core_type<tc>, window_params = [{transform_indices = @transform_0, window_bounds = array<i64: 1, 8, 484>}, {pipeline_mode = #tpu.pipeline_mode<synchronous>, transform_indices = @transform_1, window_bounds = array<i64: 3, 392>}, {transform_indices = @transform_2, window_bounds = array<i64: 1, 3, 484>}]} {
    %c0 = arith.constant 0 : index
    %c0_0 = arith.constant 0 : index
    %c0_1 = arith.constant 0 : index
    %0 = vector.load %arg1[%c0, %c0_0, %c0_1] : memref<1x8x484xbf16, #tpu.memory_space<vmem>>, vector<1x8x484xbf16>
    %1 = vector.shape_cast %0 : vector<1x8x484xbf16> to vector<8x484xbf16>
    %cst = arith.constant 0.000000e+00 : bf16
    %2 = vector.broadcast %cst : bf16 to vector<8x69xbf16>
    %3 = tpu.concatenate %2, %1, %2 in 1 : vector<8x69xbf16>, vector<8x484xbf16>, vector<8x69xbf16> -> vector<8x622xbf16>
    %c0_2 = arith.constant 0 : index
    %c0_3 = arith.constant 0 : index
    %4 = vector.load %arg2[%c0_2, %c0_3] : memref<3x392xbf16, #tpu.memory_space<vmem>>, vector<3x392xbf16>
    %5 = vector.extract_strided_slice %3 {offsets = [0, 0], sizes = [8, 484], strides = [1, 1]} : vector<8x622xbf16> to vector<8x484xbf16>
    %6 = vector.extract_strided_slice %3 {offsets = [0, 1], sizes = [8, 484], strides = [1, 1]} : vector<8x622xbf16> to vector<8x484xbf16>
    %7 = vector.extract_strided_slice %3 {offsets = [0, 2], sizes = [8, 484], strides = [1, 1]} : vector<8x622xbf16> to vector<8x484xbf16>
    %8 = vector.extract_strided_slice %3 {offsets = [0, 3], sizes = [8, 484], strides = [1, 1]} : vector<8x622xbf16> to vector<8x484xbf16>
    %9 = vector.extract_strided_slice %3 {offsets = [0, 4], sizes = [8, 484], strides = [1, 1]} : vector<8x622xbf16> to vector<8x484xbf16>
    %10 = vector.extract_strided_slice %3 {offsets = [0, 5], sizes = [8, 484], strides = [1, 1]} : vector<8x622xbf16> to vector<8x484xbf16>
    %11 = vector.extract_strided_slice %3 {offsets = [0, 6], sizes = [8, 484], strides = [1, 1]} : vector<8x622xbf16> to vector<8x484xbf16>
    %12 = vector.extract_strided_slice %3 {offsets = [0, 22], sizes = [8, 484], strides = [1, 1]} : vector<8x622xbf16> to vector<8x484xbf16>
    %13 = vector.extract_strided_slice %3 {offsets = [0, 23], sizes = [8, 484], strides = [1, 1]} : vector<8x622xbf16> to vector<8x484xbf16>
    %14 = vector.extract_strided_slice %3 {offsets = [0, 24], sizes = [8, 484], strides = [1, 1]} : vector<8x622xbf16> to vector<8x484xbf16>
    %15 = vector.extract_strided_slice %3 {offsets = [0, 25], sizes = [8, 484], strides = [1, 1]} : vector<8x622xbf16> to vector<8x484xbf16>
    %16 = vector.extract_strided_slice %3 {offsets = [0, 26], sizes = [8, 484], strides = [1, 1]} : vector<8x622xbf16> to vector<8x484xbf16>
    %17 = vector.extract_strided_slice %3 {offsets = [0, 27], sizes = [8, 484], strides = [1, 1]} : vector<8x622xbf16> to vector<8x484xbf16>
    %18 = vector.extract_strided_slice %3 {offsets = [0, 28], sizes = [8, 484], strides = [1, 1]} : vector<8x622xbf16> to vector<8x484xbf16>
    %19 = vector.extract_strided_slice %3 {offsets = [0, 44], sizes = [8, 484], strides = [1, 1]} : vector<8x622xbf16> to vector<8x484xbf16>
    %20 = vector.extract_strided_slice %3 {offsets = [0, 45], sizes = [8, 484], strides = [1, 1]} : vector<8x622xbf16> to vector<8x484xbf16>
    %21 = vector.extract_strided_slice %3 {offsets = [0, 46], sizes = [8, 484], strides = [1, 1]} : vector<8x622xbf16> to vector<8x484xbf16>
    %22 = vector.extract_strided_slice %3 {offsets = [0, 47], sizes = [8, 484], strides = [1, 1]} : vector<8x622xbf16> to vector<8x484xbf16>
    %23 = vector.extract_strided_slice %3 {offsets = [0, 48], sizes = [8, 484], strides = [1, 1]} : vector<8x622xbf16> to vector<8x484xbf16>
    %24 = vector.extract_strided_slice %3 {offsets = [0, 49], sizes = [8, 484], strides = [1, 1]} : vector<8x622xbf16> to vector<8x484xbf16>
    %25 = vector.extract_strided_slice %3 {offsets = [0, 50], sizes = [8, 484], strides = [1, 1]} : vector<8x622xbf16> to vector<8x484xbf16>
    %26 = vector.extract_strided_slice %3 {offsets = [0, 66], sizes = [8, 484], strides = [1, 1]} : vector<8x622xbf16> to vector<8x484xbf16>
    %27 = vector.extract_strided_slice %3 {offsets = [0, 67], sizes = [8, 484], strides = [1, 1]} : vector<8x622xbf16> to vector<8x484xbf16>
    %28 = vector.extract_strided_slice %3 {offsets = [0, 68], sizes = [8, 484], strides = [1, 1]} : vector<8x622xbf16> to vector<8x484xbf16>
    %29 = vector.extract_strided_slice %3 {offsets = [0, 69], sizes = [8, 484], strides = [1, 1]} : vector<8x622xbf16> to vector<8x484xbf16>
    %30 = vector.extract_strided_slice %3 {offsets = [0, 70], sizes = [8, 484], strides = [1, 1]} : vector<8x622xbf16> to vector<8x484xbf16>
    %31 = vector.extract_strided_slice %3 {offsets = [0, 71], sizes = [8, 484], strides = [1, 1]} : vector<8x622xbf16> to vector<8x484xbf16>
    %32 = vector.extract_strided_slice %3 {offsets = [0, 72], sizes = [8, 484], strides = [1, 1]} : vector<8x622xbf16> to vector<8x484xbf16>
    %33 = vector.extract_strided_slice %3 {offsets = [0, 88], sizes = [8, 484], strides = [1, 1]} : vector<8x622xbf16> to vector<8x484xbf16>
    %34 = vector.extract_strided_slice %3 {offsets = [0, 89], sizes = [8, 484], strides = [1, 1]} : vector<8x622xbf16> to vector<8x484xbf16>
    %35 = vector.extract_strided_slice %3 {offsets = [0, 90], sizes = [8, 484], strides = [1, 1]} : vector<8x622xbf16> to vector<8x484xbf16>
    %36 = vector.extract_strided_slice %3 {offsets = [0, 91], sizes = [8, 484], strides = [1, 1]} : vector<8x622xbf16> to vector<8x484xbf16>
    %37 = vector.extract_strided_slice %3 {offsets = [0, 92], sizes = [8, 484], strides = [1, 1]} : vector<8x622xbf16> to vector<8x484xbf16>
    %38 = vector.extract_strided_slice %3 {offsets = [0, 93], sizes = [8, 484], strides = [1, 1]} : vector<8x622xbf16> to vector<8x484xbf16>
    %39 = vector.extract_strided_slice %3 {offsets = [0, 94], sizes = [8, 484], strides = [1, 1]} : vector<8x622xbf16> to vector<8x484xbf16>
    %40 = vector.extract_strided_slice %3 {offsets = [0, 110], sizes = [8, 484], strides = [1, 1]} : vector<8x622xbf16> to vector<8x484xbf16>
    %41 = vector.extract_strided_slice %3 {offsets = [0, 111], sizes = [8, 484], strides = [1, 1]} : vector<8x622xbf16> to vector<8x484xbf16>
    %42 = vector.extract_strided_slice %3 {offsets = [0, 112], sizes = [8, 484], strides = [1, 1]} : vector<8x622xbf16> to vector<8x484xbf16>
    %43 = vector.extract_strided_slice %3 {offsets = [0, 113], sizes = [8, 484], strides = [1, 1]} : vector<8x622xbf16> to vector<8x484xbf16>
    %44 = vector.extract_strided_slice %3 {offsets = [0, 114], sizes = [8, 484], strides = [1, 1]} : vector<8x622xbf16> to vector<8x484xbf16>
    %45 = vector.extract_strided_slice %3 {offsets = [0, 115], sizes = [8, 484], strides = [1, 1]} : vector<8x622xbf16> to vector<8x484xbf16>
    %46 = vector.extract_strided_slice %3 {offsets = [0, 116], sizes = [8, 484], strides = [1, 1]} : vector<8x622xbf16> to vector<8x484xbf16>
    %47 = vector.extract_strided_slice %3 {offsets = [0, 132], sizes = [8, 484], strides = [1, 1]} : vector<8x622xbf16> to vector<8x484xbf16>
    %48 = vector.extract_strided_slice %3 {offsets = [0, 133], sizes = [8, 484], strides = [1, 1]} : vector<8x622xbf16> to vector<8x484xbf16>
    %49 = vector.extract_strided_slice %3 {offsets = [0, 134], sizes = [8, 484], strides = [1, 1]} : vector<8x622xbf16> to vector<8x484xbf16>
    %50 = vector.extract_strided_slice %3 {offsets = [0, 135], sizes = [8, 484], strides = [1, 1]} : vector<8x622xbf16> to vector<8x484xbf16>
    %51 = vector.extract_strided_slice %3 {offsets = [0, 136], sizes = [8, 484], strides = [1, 1]} : vector<8x622xbf16> to vector<8x484xbf16>
    %52 = vector.extract_strided_slice %3 {offsets = [0, 137], sizes = [8, 484], strides = [1, 1]} : vector<8x622xbf16> to vector<8x484xbf16>
    %53 = vector.extract_strided_slice %3 {offsets = [0, 138], sizes = [8, 484], strides = [1, 1]} : vector<8x622xbf16> to vector<8x484xbf16>
    %54 = tpu.concatenate %5, %6, %7, %8, %9, %10, %11, %12, %13, %14, %15, %16, %17, %18, %19, %20 in 0 : vector<8x484xbf16>, vector<8x484xbf16>, vector<8x484xbf16>, vector<8x484xbf16>, vector<8x484xbf16>, vector<8x484xbf16>, vector<8x484xbf16>, vector<8x484xbf16>, vector<8x484xbf16>, vector<8x484xbf16>, vector<8x484xbf16>, vector<8x484xbf16>, vector<8x484xbf16>, vector<8x484xbf16>, vector<8x484xbf16>, vector<8x484xbf16> -> vector<128x484xbf16>
    %55 = tpu.concatenate %21, %22, %23, %24, %25, %26, %27, %28, %29, %30, %31, %32, %33, %34, %35, %36 in 0 : vector<8x484xbf16>, vector<8x484xbf16>, vector<8x484xbf16>, vector<8x484xbf16>, vector<8x484xbf16>, vector<8x484xbf16>, vector<8x484xbf16>, vector<8x484xbf16>, vector<8x484xbf16>, vector<8x484xbf16>, vector<8x484xbf16>, vector<8x484xbf16>, vector<8x484xbf16>, vector<8x484xbf16>, vector<8x484xbf16>, vector<8x484xbf16> -> vector<128x484xbf16>
    %56 = tpu.concatenate %37, %38, %39, %40, %41, %42, %43, %44, %45, %46, %47, %48, %49, %50, %51, %52 in 0 : vector<8x484xbf16>, vector<8x484xbf16>, vector<8x484xbf16>, vector<8x484xbf16>, vector<8x484xbf16>, vector<8x484xbf16>, vector<8x484xbf16>, vector<8x484xbf16>, vector<8x484xbf16>, vector<8x484xbf16>, vector<8x484xbf16>, vector<8x484xbf16>, vector<8x484xbf16>, vector<8x484xbf16>, vector<8x484xbf16>, vector<8x484xbf16> -> vector<128x484xbf16>
    %57 = tpu.concatenate %54, %55, %56, %53 in 0 : vector<128x484xbf16>, vector<128x484xbf16>, vector<128x484xbf16>, vector<8x484xbf16> -> vector<392x484xbf16>
    %cst_4 = arith.constant dense<0.000000e+00> : vector<3x484xf32>
    %58 = tpu.matmul %4, %57, %cst_4 {dimension_numbers = #tpu.dot_dimension_numbers<[1], [0], [0], [1], [0, 0, 1, 1], [], []>} : vector<3x392xbf16>, vector<392x484xbf16>, vector<3x484xf32> -> vector<3x484xf32>
    %59 = math.tanh %58 : vector<3x484xf32>
    %c0_5 = arith.constant 0 : index
    %c0_6 = arith.constant 0 : index
    %c0_7 = arith.constant 0 : index
    %60 = vector.load %arg3[%c0_5, %c0_6, %c0_7] : memref<1x3x484xf32, #tpu.memory_space<vmem>>, vector<1x3x484xf32>
    %61 = vector.shape_cast %60 : vector<1x3x484xf32> to vector<3x484xf32>
    %62 = vector.shape_cast %59 : vector<3x484xf32> to vector<1x3x484xf32>
    tpu.vector_store %arg3[%c0_5, %c0_6, %c0_7], %62 {strides = array<i32>} : memref<1x3x484xf32, #tpu.memory_space<vmem>>, vector<1x3x484xf32>,
    return
  }
  func.func @transform_0(%arg0: i32) -> (i32, i32, i32) {
    %c0_i32 = arith.constant 0 : i32
    %c0_i32_0 = arith.constant 0 : i32
    %c0_i32_1 = arith.constant 0 : i32
    return %arg0, %c0_i32, %c0_i32_0 : i32, i32, i32
  }
  func.func @transform_1(%arg0: i32) -> (i32, i32) {
    %c0_i32 = arith.constant 0 : i32
    %c0_i32_0 = arith.constant 0 : i32
    %c0_i32_1 = arith.constant 0 : i32
    return %c0_i32, %c0_i32_0 : i32, i32
  }
  func.func @transform_2(%arg0: i32) -> (i32, i32, i32) {
    %c0_i32 = arith.constant 0 : i32
    %c0_i32_0 = arith.constant 0 : i32
    %c0_i32_1 = arith.constant 0 : i32
    return %arg0, %c0_i32, %c0_i32_0 : i32, i32, i32
  }
}

</mosaic_0001>

<bundles_post_ra>
// kernel: _lambda_.7
= control target key start
LH: loop header
LB: loop body
LE: loop exit
PB: predicated region body
PF: predicated region fallthrough
CT: control target
= control target key end

     0   :  { %s1707_s15 = smov 0   ;;  %s2948_s0 = inlined_call_operand.vmem [shape: f32[2,8,484], index: 0, kind: input, shape index: {}]   ;;  %s2949_s1 = inlined_call_operand.vmem [shape: bf16[8,392], index: 1, kind: input, shape index: {}]   ;;  %s2950_s2 = inlined_call_operand.vmem [shape: f32[8,1], index: 2, kind: input, shape index: {}]   ;;  %s2951_s3 = inlined_call_operand.vmem [shape: f32[8,1], index: 3, kind: input, shape index: {}]   ;;  %s2952_s4 = inlined_call_operand.vmem [shape: bf16[2,8,484], index: 4, kind: output, shape index: {}]  }
   0x1 LB: > { %s1587_s16 = sadd.s32 4294967295, %s1651_s15   ;;  %p1591_p0 = scmp.ge.s32.totalorder %s1651_s15, 1  ;;  %s1651_s15 = sphi %s1707_s15, %s14_s15  }
   0x2   : > { %p162_p1 = scmp.lt.s32.totalorder %s1651_s15, 3 }
   0x4   : > { %p163_p2 = pnand %p1591_p0, %p162_p1 }
   0x6   : > { %166 = sbr.rel (%p163_p2) target bundleno = 1212 (0x4bc), region = 36 }
   0xb   : > { %p188_p3 = scmp.lt.s32.totalorder %s1587_s16, 1  ;;  %s1653_s21 = smov 69   ;;  %vm223_vm0 = vcmask 564224   ;;  %vm231_vm1 = vcmask 334848   ;;  %vm2965_vm2 = vcmask 818176   ;;  %vm408_vm3 = vcmask 687104  }
   0xc   : > { %s1654_s22 = smov 126   ;;  %s1655_s23 = smov 124   ;;  %vm2977_vm4 = vcmask 1043456   ;;  %vm424_vm5 = vcmask 678912   ;;  %vm2970_vm6 = vcmask 826368   ;;  %vm369_vm7 = vcmask 834560  }
   0xd   : > { %s3029_s16 = smov (!%p188_p3, %s1587_s16), 1  ;;  %s1656_s24 = smov 122   ;;  %vm357_vm8 = vcmask 842752   ;;  %vm345_vm9 = vcmask 850944   ;;  %vm333_vm10 = vcmask 859136   ;;  %vm321_vm11 = vcmask 867328  }
   0xe   : > { %s1602_s17 = sshll.u32 %s3029_s16, 5  ;;  %s1657_s25 = smov 105   ;;  %vm2969_vm12 = vcmask 998400   ;;  %vm2968_vm13 = vcmask 1006592   ;;  %vm285_vm14 = vcmask 1014784   ;;  %vm273_vm15 = vcmask 1022976  }
   0xf   : > { %s192_s20 = scalar_lea.vmem %s2948_s0, %s1602_s17  ;;  %s1658_s26 = smov 103  }
  0x10   : > { %v201_v0 = vld [vmem:[%s192_s20 + $0x10] sm:$0xff]  ;;  %v202_v1 = vld [vmem:[%s192_s20 + $0x18] sm:$0xff]  ;;  %v199_v2 = vld [vmem:[%s192_s20] sm:$0xff]  ;;  %s1659_s27 = smov 101   ;;  %s1660_s28 = smov 127  }
  0x11   : > { %v204_v3 = vpack.c.bf16 %v202_v1, %v201_v0  ;;  %v200_v4 = vld [vmem:[%s192_s20 + $0x8] sm:$0xff]  ;;  %s1661_s29 = smov 125   ;;  %s1662_s30 = smov 123  }
  0x12   : > { %v203_v5 = vpack.c.bf16 %v200_v4, %v199_v2  ;;  %s1663_s5 = smov 106   ;;  %s1664_s6 = smov 104  }
  0x13   : > { %v209_v6 = vunpack.c.l.b16 %v204_v3  ;;  %v210_v10 = vunpack.c.h.b16 %v204_v3  ;;  %s1665_s7 = smov 102   ;;  %s1666_s8 = smov 100  }
  0x14   : > { %v207_v7 = vunpack.c.l.b16 %v203_v5  ;;  %v208_v11 = vunpack.c.h.b16 %v203_v5  ;;  %s1667_s9 = smov 84   ;;  %s1668_s10 = smov 83  }
  0x15   : > { %v213_v8 = vpack.c.b16 %v209_v6, %v209_v6  ;;  %v214_v12 = vpack.c.b16 %v210_v10, %v210_v10  ;;  %s1669_s11 = smov 108   ;;  %s1670_s12 = smov 86  }
  0x16   : > { %v211_v9 = vpack.c.b16 %v207_v7, %v207_v7  ;;  %v212_v13 = vpack.c.b16 %v208_v11, %v208_v11  ;;  %s1671_s13 = smov 85   ;;  %s1672_s14 = smov 88  }
  0x17   : > { %219 = vrot.lane.b32.xlu1 %v213_v8, %s1653_s21  ;;  %s1673_s17 = smov 107   ;;  %s1674_s18 = smov 87  }
  0x18   : > { %215 = vrot.lane.b32.xlu0 %v211_v9, %s1653_s21  ;;  %s1675_s19 = smov 109   ;;  %s1676_s20 = smov 110  }
  0x1f   : > { %221 = vrot.lane.b32.xlu1 %v214_v12, %s1653_s21 }
  0x20   : > { %217 = vrot.lane.b32.xlu0 %v212_v13, %s1653_s21  ;;  %s1677_s21 = smov 36  }
  0x89   : > { %v220_v14 = vpop.permute.xlu1 %219 }
  0x8a   : > { %v216_v15 = vpop.permute.xlu0 %215 }
  0x8b   : > { %v1721_v16 = vsel %vm223_vm0, 0, %v216_v15 }
  0x8c   : > { %253 = vrot.lane.b32.xlu2 %v1721_v16, %s1654_s22  ;;  %v1773_v22 = vrot.slane %v1721_v16, 4 }
  0x91   : > { %v1725_v17 = vpop.permute.xlu1 %221 }
  0x92   : > { %v1728_v18 = vsel %vm223_vm0, %v220_v14, %v1725_v17  ;;  %v218_v19 = vpop.permute.xlu0 %217  ;;  %v1872_v42 = vsel %vm231_vm1, %v1725_v17, 0  ;;  %vm579_vm1 = vcmask 883712  }
  0x93   : > { %2978 = vst [vmem:[#allocation2_spill] sm:$0xff] %v1728_v18  ;;  %v1730_v20 = vsel %vm223_vm0, %v216_v15, %v218_v19  ;;  %v1732_v21 = vsel %vm223_vm0, %v218_v19, %v220_v14  ;;  %v1785_v24 = vrot.slane %v1728_v18, 4  ;;  %v1893_v49 = vrot.slane %v1872_v42, 4 }
  0x94   : > { %259 = vrot.lane.b32.xlu2 %v1728_v18, %s1654_s22  ;;  %257 = vrot.lane.b32.xlu1 %v1732_v21, %s1654_s22  ;;  %v1776_v23 = vrot.slane %v1732_v21, 4  ;;  %v1788_v25 = vrot.slane %v1730_v20, 4  ;;  %vm261_vm0 = vcmask 1031168  }
  0x95   : > { %255 = vrot.lane.b32.xlu0 %v1730_v20, %s1654_s22 }
  0x9c   : > { %277 = vrot.lane.b32.xlu1 %v1721_v16, %s1655_s23  ;;  %279 = vrot.lane.b32.xlu2 %v1730_v20, %s1655_s23 }
  0x9d   : > { %281 = vrot.lane.b32.xlu0 %v1732_v21, %s1655_s23 }
  0xa4   : > { %283 = vrot.lane.b32.xlu1 %v1728_v18, %s1655_s23  ;;  %305 = vrot.lane.b32.xlu2 %v1732_v21, %s1656_s24 }
  0xa5   : > { %301 = vrot.lane.b32.xlu0 %v1721_v16, %s1656_s24 }
  0xac   : > { %303 = vrot.lane.b32.xlu1 %v1730_v20, %s1656_s24  ;;  %325 = vrot.lane.b32.xlu2 %v1721_v16, %s1657_s25 }
  0xad   : > { %307 = vrot.lane.b32.xlu0 %v1728_v18, %s1656_s24 }
  0xb4   : > { %329 = vrot.lane.b32.xlu1 %v1732_v21, %s1657_s25  ;;  %331 = vrot.lane.b32.xlu2 %v1728_v18, %s1657_s25 }
  0xb5   : > { %327 = vrot.lane.b32.xlu0 %v1730_v20, %s1657_s25 }
  0xbc   : > { %349 = vrot.lane.b32.xlu1 %v1721_v16, %s1658_s26  ;;  %351 = vrot.lane.b32.xlu2 %v1730_v20, %s1658_s26 }
  0xbd   : > { %353 = vrot.lane.b32.xlu0 %v1732_v21, %s1658_s26 }
  0xc4   : > { %355 = vrot.lane.b32.xlu1 %v1728_v18, %s1658_s26  ;;  %377 = vrot.lane.b32.xlu2 %v1732_v21, %s1659_s27 }
  0xc5   : > { %373 = vrot.lane.b32.xlu0 %v1721_v16, %s1659_s27 }
  0xcc   : > { %375 = vrot.lane.b32.xlu1 %v1730_v20, %s1659_s27  ;;  %241 = vrot.lane.b32.xlu2 %v1773_v22, %s1660_s28 }
  0xcd   : > { %245 = vrot.lane.b32.xlu0 %v1776_v23, %s1660_s28 }
  0xd4   : > { %247 = vrot.lane.b32.xlu1 %v1785_v24, %s1660_s28  ;;  %243 = vrot.lane.b32.xlu2 %v1788_v25, %s1660_s28 }
  0xd5   : > { %265 = vrot.lane.b32.xlu0 %v1773_v22, %s1661_s29 }
  0xdc   : > { %267 = vrot.lane.b32.xlu1 %v1788_v25, %s1661_s29  ;;  %269 = vrot.lane.b32.xlu2 %v1776_v23, %s1661_s29 }
  0xdd   : > { %271 = vrot.lane.b32.xlu0 %v1785_v24, %s1661_s29 }
  0xe4   : > { %293 = vrot.lane.b32.xlu1 %v1776_v23, %s1662_s30  ;;  %289 = vrot.lane.b32.xlu2 %v1773_v22, %s1662_s30 }
  0xe5   : > { %291 = vrot.lane.b32.xlu0 %v1788_v25, %s1662_s30 }
  0xe6   : > { %v1805_v26 = vpop.permute.xlu2 %253 }
  0xec   : > { %313 = vrot.lane.b32.xlu1 %v1773_v22, %s1663_s5  ;;  %295 = vrot.lane.b32.xlu2 %v1785_v24, %s1662_s30 }
  0xed   : > { %317 = vrot.lane.b32.xlu0 %v1776_v23, %s1663_s5 }
  0xee   : > { %v1812_v27 = vpop.permute.xlu2 %259 }
  0xef   : > { %2979 = vst [vmem:[#allocation3_spill] sm:$0xff] %v1812_v27 }
  0xf4   : > { %319 = vrot.lane.b32.xlu1 %v1785_v24, %s1663_s5  ;;  %315 = vrot.lane.b32.xlu2 %v1788_v25, %s1663_s5 }
  0xf5   : > { %337 = vrot.lane.b32.xlu0 %v1773_v22, %s1664_s6 }
  0xf6   : > { %v1820_v28 = vpop.permute.xlu2 %279 }
  0xfc   : > { %339 = vrot.lane.b32.xlu1 %v1788_v25, %s1664_s6  ;;  %341 = vrot.lane.b32.xlu2 %v1776_v23, %s1664_s6 }
  0xfd   : > { %343 = vrot.lane.b32.xlu0 %v1785_v24, %s1664_s6 }
  0xfe   : > { %v1828_v29 = vpop.permute.xlu2 %305 }
  0xff   : > { %2980 = vst [vmem:[#allocation4_spill] sm:$0xff] %v1828_v29 }
 0x104   : > { %365 = vrot.lane.b32.xlu1 %v1776_v23, %s1665_s7  ;;  %361 = vrot.lane.b32.xlu2 %v1773_v22, %s1665_s7 }
 0x105   : > { %363 = vrot.lane.b32.xlu0 %v1788_v25, %s1665_s7 }
 0x106   : > { %v1836_v30 = vpop.permute.xlu1 %257  ;;  %v1838_v31 = vpop.permute.xlu2 %325 }
 0x107   : > { %v1840_v32 = vpop.permute.xlu0 %255 }
 0x10c   : > { %385 = vrot.lane.b32.xlu1 %v1773_v22, %s1666_s8  ;;  %367 = vrot.lane.b32.xlu2 %v1785_v24, %s1665_s7 }
 0x10d   : > { %379 = vrot.lane.b32.xlu0 %v1728_v18, %s1659_s27 }
 0x10e   : > { %v1847_v33 = vpop.permute.xlu1 %277  ;;  %v1849_v34 = vpop.permute.xlu2 %331 }
 0x10f   : > { %2981 = vst [vmem:[#allocation5_spill] sm:$0xff] %v1849_v34  ;;  %v1851_v35 = vpop.permute.xlu0 %281 }
 0x114   : > { %391 = vrot.lane.b32.xlu1 %v1785_v24, %s1666_s8  ;;  %387 = vrot.lane.b32.xlu2 %v1788_v25, %s1666_s8 }
 0x115   : > { %389 = vrot.lane.b32.xlu0 %v1776_v23, %s1666_s8 }
 0x116   : > { %v1856_v36 = vpop.permute.xlu1 %283  ;;  %v1858_v37 = vpop.permute.xlu2 %351 }
 0x117   : > { %v1860_v38 = vpop.permute.xlu0 %301 }
 0x11c   : > { %402 = vrot.lane.b32.xlu1 %v1732_v21, %s1667_s9  ;;  %398 = vrot.lane.b32.xlu2 %v1721_v16, %s1667_s9 }
 0x11d   : > { %400 = vrot.lane.b32.xlu0 %v1730_v20, %s1667_s9 }
 0x11e   : > { %v1865_v39 = vpop.permute.xlu1 %303  ;;  %v1867_v40 = vpop.permute.xlu2 %377 }
 0x11f   : > { %2982 = vst [vmem:[#allocation6_spill] sm:$0xff] %v1865_v39  ;;  %v1869_v41 = vpop.permute.xlu0 %307 }
 0x120   : > { %2983 = vst [vmem:[#allocation7_spill] sm:$0xff] %v1867_v40 }
 0x121   : > { %2984 = vst [vmem:[#allocation8_spill] sm:$0xff] %v1869_v41 }
 0x124   : > { %414 = vrot.lane.b32.xlu1 %v1773_v22, %s1668_s10  ;;  %404 = vrot.lane.b32.xlu2 %v1728_v18, %s1667_s9 }
 0x125   : > { %406 = vrot.lane.b32.xlu0 %v1872_v42, %s1667_s9 }
 0x126   : > { %v1877_v43 = vpop.permute.xlu1 %329  ;;  %v1879_v44 = vpop.permute.xlu2 %241 }
 0x127   : > { %v1881_v45 = vpop.permute.xlu0 %327 }
 0x12c   : > { %420 = vrot.lane.b32.xlu1 %v1785_v24, %s1668_s10  ;;  %416 = vrot.lane.b32.xlu2 %v1788_v25, %s1668_s10 }
 0x12d   : > { %418 = vrot.lane.b32.xlu0 %v1776_v23, %s1668_s10 }
 0x12e   : > { %v1886_v46 = vpop.permute.xlu1 %349  ;;  %v1888_v47 = vpop.permute.xlu2 %243 }
 0x12f   : > { %v1890_v48 = vpop.permute.xlu0 %353 }
 0x134   : > { %560 = vrot.lane.b32.xlu1 %v1872_v42, %s1654_s22  ;;  %422 = vrot.lane.b32.xlu2 %v1893_v49, %s1668_s10  ;;  %s1678_s22 = smov 82  }
 0x135   : > { %557 = vrot.lane.b32.xlu0 %v1893_v49, %s1660_s28 }
 0x136   : > { %v1900_v50 = vpop.permute.xlu1 %355  ;;  %v1902_v51 = vpop.permute.xlu2 %269 }
 0x137   : > { %v1904_v52 = vpop.permute.xlu0 %373 }
 0x13c   : > { %569 = vrot.lane.b32.xlu1 %v1773_v22, %s1669_s11  ;;  %563 = vrot.lane.b32.xlu2 %v1893_v49, %s1661_s29 }
 0x13d   : > { %566 = vrot.lane.b32.xlu0 %v1872_v42, %s1655_s23  ;;  %s1679_s23 = smov 118  }
 0x13e   : > { %v1912_v53 = vpop.permute.xlu1 %375  ;;  %v1914_v54 = vpop.permute.xlu2 %289 }
 0x13f   : > { %v1916_v55 = vpop.permute.xlu0 %245 }
 0x144   : > { %618 = vrot.lane.b32.xlu1 %v1732_v21, %s1670_s12  ;;  %571 = vrot.lane.b32.xlu2 %v1788_v25, %s1669_s11 }
 0x145   : > { %616 = vrot.lane.b32.xlu0 %v1730_v20, %s1670_s12 }
 0x146   : > { %v1924_v56 = vpop.permute.xlu1 %247  ;;  %v1926_v57 = vpop.permute.xlu2 %295 }
 0x147   : > { %2985 = vst [vmem:[#allocation9_spill] sm:$0xff] %v1924_v56  ;;  %v1928_v58 = vpop.permute.xlu0 %265 }
 0x148   : > { %2986 = vst [vmem:[#allocation10_spill] sm:$0xff] %v1926_v57 }
 0x14c   : > { %614 = vrot.lane.b32.xlu1 %v1721_v16, %s1670_s12  ;;  %631 = vrot.lane.b32.xlu2 %v1788_v25, %s1671_s13 }
 0x14d   : > { %633 = vrot.lane.b32.xlu0 %v1776_v23, %s1671_s13 }
 0x14e   : > { %v1936_v59 = vpop.permute.xlu1 %267  ;;  %v1938_v60 = vpop.permute.xlu2 %315 }
 0x14f   : > { %v1940_v61 = vpop.permute.xlu0 %271 }
 0x150   : > { %2987 = vst [vmem:[#allocation11_spill] sm:$0xff] %v1940_v61 }
 0x154   : > { %740 = vrot.lane.b32.xlu1 %v1732_v21, %s1672_s14  ;;  %629 = vrot.lane.b32.xlu2 %v1773_v22, %s1671_s13 }
 0x155   : > { %738 = vrot.lane.b32.xlu0 %v1730_v20, %s1672_s14 }
 0x156   : > { %v1948_v62 = vpop.permute.xlu1 %293  ;;  %v1950_v63 = vpop.permute.xlu2 %341 }
 0x157   : > { %2988 = vst [vmem:[#allocation12_spill] sm:$0xff] %v1948_v62  ;;  %v1952_v0 = vpop.permute.xlu0 %291 }
 0x158   : > { %2989 = vst [vmem:[#allocation13_spill] sm:$0xff] %v1952_v0 }
 0x15c   : > { %584 = vrot.lane.b32.xlu1 %v1721_v16, %s1673_s17  ;;  %750 = vrot.lane.b32.xlu2 %v1788_v25, %s1674_s18 }
 0x15d   : > { %752 = vrot.lane.b32.xlu0 %v1776_v23, %s1674_s18 }
 0x15e   : > { %v1960_v1 = vpop.permute.xlu1 %313  ;;  %v1962_v2 = vpop.permute.xlu2 %361 }
 0x15f   : > { %v1964_v3 = vpop.permute.xlu0 %317 }
 0x164   : > { %573 = vrot.lane.b32.xlu1 %v1776_v23, %s1669_s11  ;;  %586 = vrot.lane.b32.xlu2 %v1730_v20, %s1673_s17 }
 0x165   : > { %588 = vrot.lane.b32.xlu0 %v1732_v21, %s1673_s17 }
 0x166   : > { %v1972_v4 = vpop.permute.xlu1 %319  ;;  %v1974_v5 = vpop.permute.xlu2 %367 }
 0x167   : > { %v1976_v6 = vpop.permute.xlu0 %337 }
 0x16c   : > { %727 = vrot.lane.b32.xlu1 %v1732_v21, %s1675_s19  ;;  %723 = vrot.lane.b32.xlu2 %v1721_v16, %s1675_s19 }
 0x16d   : > { %725 = vrot.lane.b32.xlu0 %v1730_v20, %s1675_s19 }
 0x16e   : > { %v1984_v7 = vpop.permute.xlu1 %339  ;;  %v388_v8 = vpop.permute.xlu2 %387 }
 0x16f   : > { %v1986_v9 = vpop.permute.xlu0 %343 }
 0x174   : > { %708 = vrot.lane.b32.xlu1 %v1773_v22, %s1676_s20  ;;  %620 = vrot.lane.b32.xlu2 %v1728_v18, %s1670_s12 }
 0x175   : > { %635 = vrot.lane.b32.xlu0 %v1785_v24, %s1671_s13 }
 0x176   : > { %v1994_v10 = vpop.permute.xlu1 %365  ;;  %v399_v11 = vpop.permute.xlu2 %398 }
 0x177   : > { %v1996_v12 = vpop.permute.xlu0 %363 }
 0x17c   : > { %742 = vrot.lane.b32.xlu1 %v1728_v18, %s1672_s14  ;;  %710 = vrot.lane.b32.xlu2 %v1788_v25, %s1676_s20 }
 0x17d   : > { %712 = vrot.lane.b32.xlu0 %v1776_v23, %s1676_s20 }
 0x17e   : > { %v386_v13 = vpop.permute.xlu1 %385  ;;  %v405_v14 = vpop.permute.xlu2 %404 }
 0x17f   : > { %v2004_v15 = vpop.permute.xlu0 %379  ;;  %v394_v56 = vsel %vm2965_vm2, %v386_v13, %v388_v8 }
 0x180   : > { %2990 = vst [vmem:[#allocation14_spill] sm:$0xff] %v2004_v15 }
 0x184   : > { %622 = vrot.lane.b32.xlu1 %v1872_v42, %s1670_s12  ;;  %754 = vrot.lane.b32.xlu2 %v1785_v24, %s1674_s18 }
 0x185   : > { %590 = vrot.lane.b32.xlu0 %v1728_v18, %s1673_s17 }
 0x186   : > { %v2012_v17 = vpop.permute.xlu1 %391  ;;  %v417_v19 = vpop.permute.xlu2 %416 }
 0x187   : > { %2991 = vst [vmem:[#allocation15_spill] sm:$0xff] %v2012_v17  ;;  %v2014_v22 = vpop.permute.xlu0 %389 }
 0x188   : > { %2992 = vst [vmem:[#allocation16_spill] sm:$0xff] %v2014_v22  ;;  %v2018_v23 = vsel %vm2965_vm2, %v388_v8, %v2014_v22  ;;  %vm639_vm2 = vcmask 695296  }
 0x189   : > { %2993 = vst [vmem:[#allocation17_spill] sm:$0xff] %v2018_v23 }
 0x18c   : > { %608 = vrot.lane.b32.xlu1 %v1872_v42, %s1658_s26  ;;  %637 = vrot.lane.b32.xlu2 %v1893_v49, %s1671_s13 }
 0x18d   : > { %575 = vrot.lane.b32.xlu0 %v1785_v24, %s1669_s11 }
 0x18e   : > { %v403_v25 = vpop.permute.xlu1 %402  ;;  %v423_v57 = vpop.permute.xlu2 %422 }
 0x18f   : > { %v401_v41 = vpop.permute.xlu0 %400  ;;  %v411_v15 = vsel %vm408_vm3, %v403_v25, %v405_v14 }
 0x190   : > { %v802_v17 = vsel %vm2977_vm4, %v401_v41, %v417_v19  ;;  %v409_v40 = vsel %vm408_vm3, %v399_v11, %v401_v41 }
 0x194   : > { %611 = vrot.lane.b32.xlu2 %v1893_v49, %s1665_s7  ;;  %1075 = vrot.lane.b32.xlu1 %v802_v17, %s1677_s21 }
 0x195   : > { %729 = vrot.lane.b32.xlu0 %v1728_v18, %s1675_s19 }
 0x196   : > { %v415_v22 = vpop.permute.xlu1 %414  ;;  %v2033_v62 = vpop.permute.xlu2 %563 }
 0x197   : > { %2994 = vst [vmem:[#allocation18_spill] sm:$0xff] %v2033_v62  ;;  %v407_v29 = vpop.permute.xlu0 %406  ;;  %v425_v23 = vsel %vm424_vm5, %v415_v22, %v417_v19  ;;  %v382_v62 = vsel %vm2970_vm6, %v1904_v52, %v1912_v53  ;;  %vm2971_vm6 = vcmask 875520  }
 0x198   : > { %v412_v27 = vsel %vm408_vm3, %v405_v14, %v407_v29  ;;  %v2039_v61 = vsel %vm2977_vm4, %v407_v29, %v423_v57  ;;  %v543_v17 = vsel %vm2977_vm4, %v409_v40, %v425_v23  ;;  %v527_v11 = vsel %vm2977_vm4, %v382_v62, %v394_v56 }
 0x199   : > { %1191 = vmatpush.bf16.msra.mxu0 %v543_v17  ;;  %v370_v29 = vsel %vm369_vm7, %v1962_v2, %v1996_v12  ;;  %v358_v40 = vsel %vm357_vm8, %v1886_v46, %v1858_v37  ;;  %v410_v2 = vsel %vm408_vm3, %v401_v41, %v403_v25  ;;  %v346_v46 = vsel %vm345_vm9, %v1976_v6, %v1984_v7 }
 0x19a   : > { %v2061_v62 = vsel %vm2977_vm4, %v358_v40, %v370_v29  ;;  %v2092_v6 = vsel %vm321_vm11, %v1960_v1, %v1938_v60  ;;  %v310_v25 = vsel %vm2969_vm12, %v1860_v38, %v1865_v39  ;;  %v298_v1 = vsel %vm2968_vm13, %v1914_v54, %v1952_v0 }
 0x19b   : > { %v479_v29 = vsel %vm2977_vm4, %v310_v25, %v2092_v6  ;;  %v274_v54 = vsel %vm273_vm15, %v1928_v58, %v1936_v59  ;;  %vm249_vm3 = vcmask 1039360   ;;  %vm746_vm13 = vcmask 719872  }
 0x19c   : > { %605 = vrot.lane.b32.xlu1 %v1893_v49, %s1664_s6  ;;  %v250_v58 = vsel %vm249_vm3, %v1879_v44, %v1888_v47  ;;  %vm758_vm12 = vcmask 711680   ;;  %s1603_s6 = sshll.u32 %s3029_s16, 4 }
 0x19d   : > { %602 = vrot.lane.b32.xlu0 %v1872_v42, %s1657_s25  ;;  %1192 = vmatpush.bf16.msra.mxu0 %v527_v11  ;;  %s197_s9 = scalar_lea.vmem %s2952_s4, %s1603_s6 }
 0x19e   : > { %v421_v8 = vpop.permute.xlu1 %420  ;;  %v2057_v52 = vpop.permute.xlu2 %571 }
 0x19f   : > { %v419_v13 = vpop.permute.xlu0 %418  ;;  %v428_v56 = vsel %vm424_vm5, %v421_v8, %v423_v57 }
 0x1a0   : > { %v426_v14 = vsel %vm424_vm5, %v417_v19, %v419_v13  ;;  %v427_v22 = vsel %vm424_vm5, %v419_v13, %v421_v8  ;;  %v2067_v23 = vsel %vm2977_vm4, %v412_v27, %v428_v56  ;;  %v334_v27 = vsel %vm333_vm10, %v1838_v31, %v1881_v45 }
 0x1a1   : > { %v2073_v11 = vsel %vm2977_vm4, %v410_v2, %v426_v14  ;;  %1193 = vmatpush.bf16.msra.mxu0 %v2061_v62  ;;  %v2077_v57 = vsel %vm2977_vm4, %v411_v15, %v427_v22  ;;  %v2087_v41 = vsel %vm2977_vm4, %v334_v27, %v346_v46  ;;  %v2131_v13 = vsel %vm261_vm0, %v1805_v26, %v1840_v32 }
 0x1a2   : > { %1077 = vrot.lane.b32.xlu2 %v2073_v11, %s1677_s21  ;;  %v2135_v56 = vsel %vm2977_vm4, %v2131_v13, %v274_v54  ;;  %v2145_v2 = vsel %vm2977_vm4, %v1721_v16, %v250_v58  ;;  %vm624_vm5 = vcmask 703488  }
 0x1a4   : > { %915 = vrot.lane.b32.xlu1 %v2073_v11, %s1678_s22 }
 0x1a5   : > { %913 = vrot.lane.b32.xlu0 %v543_v17, %s1678_s22  ;;  %1194 = vmatpush.bf16.msra.mxu0 %v2087_v41  ;;  %v2113_v17 = vsel %vm285_vm14, %v1847_v33, %v1820_v28 }
 0x1a6   : > { %v2096_v15 = vpop.permute.xlu1 %560  ;;  %v632_v31 = vpop.permute.xlu2 %631  ;;  %v463_v38 = vsel %vm2977_vm4, %v2113_v17, %v298_v1 }
 0x1a7   : > { %v2098_v19 = vpop.permute.xlu0 %557 }
 0x1a9   : > { %1195 = vmatpush.bf16.msra.mxu0 %v479_v29 }
 0x1aa   : > { %714 = vrot.lane.b32.xlu2 %v1785_v24, %s1676_s20 }
 0x1ac   : > { %592 = vrot.lane.b32.xlu1 %v1872_v42, %s1673_s17 }
 0x1ad   : > { %1196 = vmatpush.bf16.msra.mxu0 %v463_v38 }
 0x1ae   : > { %v570_v24 = vpop.permute.xlu1 %569  ;;  %v630_v40 = vpop.permute.xlu2 %629 }
 0x1af   : > { %v2122_v8 = vpop.permute.xlu0 %566  ;;  %v2126_v33 = vsel %vm579_vm1, %v570_v24, %v2057_v52  ;;  %v640_v58 = vsel %vm639_vm2, %v630_v40, %v632_v31 }
 0x1b1   : > { %1197 = vmatpush.bf16.msra.mxu0 %v2135_v56 }
 0x1b4   : > { %756 = vrot.lane.b32.xlu1 %v1893_v49, %s1674_s18 }
 0x1b5   : > { %1198 = vmatpush.bf16.msra.mxu0 %v2145_v2 }
 0x1b6   : > { %v619_v26 = vpop.permute.xlu1 %618  ;;  %v751_v14 = vpop.permute.xlu2 %750 }
 0x1b7   : > { %v617_v22 = vpop.permute.xlu0 %616 }
 0x1b8   : > { %v799_v46 = vsel %vm2977_vm4, %v617_v22, %v632_v31  ;;  %v626_v29 = vsel %vm624_vm5, %v617_v22, %v619_v26 }
 0x1b9   : > { %1065 = vrot.lane.b32.xlu2 %v799_v46, %s1677_s21 }
 0x1be   : > { %v615_v44 = vpop.permute.xlu1 %614  ;;  %v587_v27 = vpop.permute.xlu2 %586 }
 0x1bf   : > { %v634_v25 = vpop.permute.xlu0 %633  ;;  %v625_v38 = vsel %vm624_vm5, %v615_v44, %v617_v22 }
 0x1c0   : > { %v641_v1 = vsel %vm639_vm2, %v632_v31, %v634_v25  ;;  %v692_v0 = vsel %vm2977_vm4, %v625_v38, %v640_v58 }
 0x1c1   : > { %599 = vrot.lane.b32.xlu2 %v1893_v49, %s1663_s5  ;;  %v695_v16 = vsel %vm2977_vm4, %v626_v29, %v641_v1 }
 0x1c2   : > { %1067 = vrot.lane.b32.xlu0 %v695_v16, %s1677_s21 }
 0x1c6   : > { %v741_v54 = vpop.permute.xlu1 %740  ;;  %v2157_v24 = vpop.permute.xlu2 %723 }
 0x1c7   : > { %v739_v46 = vpop.permute.xlu0 %738 }
 0x1c8   : > { %v784_v39 = vsel %vm2977_vm4, %v739_v46, %v751_v14  ;;  %v747_v31 = vsel %vm746_vm13, %v739_v46, %v741_v54 }
 0x1c9   : > { %903 = vrot.lane.b32.xlu2 %v692_v0, %s1678_s22  ;;  %1055 = vrot.lane.b32.xlu1 %v784_v39, %s1677_s21  ;;  %v347_v39 = vsel %vm345_vm9, %v1984_v7, %v1950_v63 }
 0x1ca   : > { %744 = vrot.lane.b32.xlu0 %v1872_v42, %s1672_s14 }
 0x1ce   : > { %v585_v22 = vpop.permute.xlu1 %584  ;;  %v621_v44 = vpop.permute.xlu2 %620 }
 0x1cf   : > { %v753_v29 = vpop.permute.xlu0 %752  ;;  %v627_v1 = vsel %vm624_vm5, %v619_v26, %v621_v44  ;;  %v371_v26 = vsel %vm369_vm7, %v1996_v12, %v1994_v10 }
 0x1d0   : > { %v759_v40 = vsel %vm758_vm12, %v751_v14, %v753_v29 }
 0x1d1   : > { %893 = vrot.lane.b32.xlu1 %v2061_v62, %s1678_s22  ;;  %v787_v0 = vsel %vm2977_vm4, %v747_v31, %v759_v40  ;;  %v335_v62 = vsel %vm333_vm10, %v1881_v45, %v1877_v43  ;;  %v595_v45 = vsel %vm2971_vm6, %v585_v22, %v587_v27 }
 0x1d2   : > { %905 = vrot.lane.b32.xlu0 %v695_v16, %s1678_s22  ;;  %1057 = vrot.lane.b32.xlu2 %v787_v0, %s1677_s21  ;;  %v359_v16 = vsel %vm357_vm8, %v1858_v37, %v1890_v48  ;;  %v2193_v7 = vsel %vm2977_vm4, %v335_v62, %v347_v39  ;;  %v667_v40 = vsel %vm2977_vm4, %v595_v45, %v2092_v6 }
 0x1d3   : > { %v2198_v12 = vsel %vm2977_vm4, %v359_v16, %v371_v26  ;;  %v2221_v62 = vsel %vm321_vm11, %v1938_v60, %v1964_v3 }
 0x1d4   : > { %2995 = vst [vmem:[#allocation19_spill] sm:$0xff] %v2221_v62 }
 0x1d6   : > { %v2180_v38 = vpop.permute.xlu1 %573  ;;  %v2182_v14 = vpop.permute.xlu2 %710 }
 0x1d7   : > { %v2187_v58 = vpop.permute.xlu0 %588 }
 0x1d8   : > { %v596_v0 = vsel %vm2971_vm6, %v587_v27, %v2187_v58  ;;  %vm2973_vm6 = vcmask 891904  }
 0x1d9   : > { %1047 = vrot.lane.b32.xlu1 %v2193_v7, %s1677_s21 }
 0x1da   : > { %577 = vrot.lane.b32.xlu0 %v1893_v49, %s1669_s11  ;;  %895 = vrot.lane.b32.xlu2 %v2198_v12, %s1678_s22 }
 0x1de   : > { %v2205_v46 = vpop.permute.xlu1 %727  ;;  %v2207_v37 = vpop.permute.xlu2 %754 }
 0x1df   : > { %v726_v31 = vpop.permute.xlu0 %725 }
 0x1e0   : > { %v735_v60 = vsel %vm2973_vm6, %v726_v31, %v2205_v46 }
 0x1e1   : > { %1035 = vrot.lane.b32.xlu1 %v667_v40, %s1677_s21 }
 0x1e2   : > { %1045 = vrot.lane.b32.xlu0 %v2087_v41, %s1677_s21  ;;  %883 = vrot.lane.b32.xlu2 %v2087_v41, %s1678_s22  ;;  %v669_v41 = vsel %vm2977_vm4, %v596_v0, %v2221_v62 }
 0x1e6   : > { %v709_v22 = vpop.permute.xlu1 %708  ;;  %v638_v39 = vpop.permute.xlu2 %637 }
 0x1e7   : > { %v636_v26 = vpop.permute.xlu0 %635 }
 0x1e8   : > { %v642_v6 = vsel %vm639_vm2, %v634_v25, %v636_v26  ;;  %v643_v16 = vsel %vm639_vm2, %v636_v26, %v638_v39  ;;  %v581_v25 = vsel %vm579_vm1, %v2057_v52, %v2180_v38  ;;  %v734_v52 = vsel %vm2973_vm6, %v2157_v24, %v726_v31 }
 0x1e9   : > { %873 = vrot.lane.b32.xlu1 %v667_v40, %s1678_s22  ;;  %v2229_v45 = vsel %vm2977_vm4, %v627_v1, %v642_v6  ;;  %v760_v40 = vsel %vm758_vm12, %v753_v29, %v2207_v37  ;;  %v775_v26 = vsel %vm2977_vm4, %v735_v60, %v581_v25  ;;  %v773_v24 = vsel %vm2977_vm4, %v734_v52, %v2126_v33 }
 0x1ea   : > { %885 = vrot.lane.b32.xlu0 %v2193_v7, %s1678_s22  ;;  %1037 = vrot.lane.b32.xlu2 %v669_v41, %s1677_s21  ;;  %vm718_vm2 = vcmask 900096  }
 0x1ee   : > { %v2236_v27 = vpop.permute.xlu1 %742 }
 0x1ef   : > { %v2243_v1 = vpop.permute.xlu0 %712  ;;  %v748_v0 = vsel %vm746_vm13, %v741_v54, %v2236_v27 }
 0x1f0   : > { %v2249_v6 = vsel %vm2977_vm4, %v748_v0, %v760_v40  ;;  %v655_v40 = vsel %vm2977_vm4, %v2113_v17, %v2126_v33 }
 0x1f1   : > { %1027 = vrot.lane.b32.xlu1 %v775_v26, %s1677_s21  ;;  %v612_v26 = vpop.permute.xlu2 %611 }
 0x1f2   : > { %731 = vrot.lane.b32.xlu0 %v1872_v42, %s1675_s19  ;;  %875 = vrot.lane.b32.xlu2 %v669_v41, %s1678_s22  ;;  %v613_v17 = vsel %vm369_vm7, %v1974_v5, %v612_v26  ;;  %v2289_v41 = vsel %vm285_vm14, %v1820_v28, %v1851_v35  ;;  %v720_v28 = vsel %vm718_vm2, %v2182_v14, %v2243_v1 }
 0x1f6   : > { %v623_v29 = vpop.permute.xlu1 %622 }
 0x1f7   : > { %v2257_v62 = vpop.permute.xlu0 %590  ;;  %v628_v54 = vsel %vm624_vm5, %v621_v44, %v623_v29  ;;  %v2261_v60 = vsel %vm2977_vm4, %v623_v29, %v638_v39  ;;  %v719_v44 = vsel %vm718_vm2, %v709_v22, %v2182_v14  ;;  %vm1085_vm5 = vcmask 293888  }
 0x1f8   : > { %v2267_v0 = vsel %vm2977_vm4, %v628_v54, %v643_v16  ;;  %v763_v22 = vsel %vm2977_vm4, %v2131_v13, %v719_v44  ;;  %v657_v54 = vsel %vm2977_vm4, %v2289_v41, %v581_v25  ;;  %v263_v25 = vsel %vm261_vm0, %v1840_v32, %v1836_v30 }
 0x1f9   : > { %863 = vrot.lane.b32.xlu1 %v655_v40, %s1678_s22  ;;  %v765_v14 = vsel %vm2977_vm4, %v263_v25, %v720_v28 }
 0x1fa   : > { %1079 = vrot.lane.b32.xlu2 %v2077_v57, %s1677_s21  ;;  %1025 = vrot.lane.b32.xlu0 %v773_v24, %s1677_s21 }
 0x1fc   : > { %v2296_v29 = vpop.permute.xlu2 %1077 }
 0x1fe   : > { %v609_v31 = vpop.permute.xlu1 %608 }
 0x1ff   : > { %v2279_v39 = vpop.permute.xlu0 %575  ;;  %v610_v16 = vsel %vm357_vm8, %v1900_v50, %v609_v31  ;;  %v2284_v33 = vsel %vm2977_vm4, %v609_v31, %v612_v26 }
 0x200   : > { %v2294_v52 = vsel %vm2977_vm4, %v610_v16, %v613_v17  ;;  %v2317_v24 = vsel %vm579_vm1, %v2180_v38, %v2279_v39  ;;  %v275_v38 = vsel %vm273_vm15, %v1936_v59, %v1902_v51 }
 0x201   : > { %1015 = vrot.lane.b32.xlu1 %v763_v22, %s1677_s21  ;;  %v2345_v16 = vsel %vm2977_vm4, %v263_v25, %v275_v38  ;;  %v251_v22 = vsel %vm249_vm3, %v1888_v47, %v1916_v55 }
 0x202   : > { %865 = vrot.lane.b32.xlu2 %v657_v54, %s1678_s22  ;;  %716 = vrot.lane.b32.xlu0 %v1893_v49, %s1676_s20 }
 0x204   : > { %v2330_v32 = vpop.permute.xlu2 %714 }
 0x206   : > { %v1076_v13 = vpop.permute.xlu1 %1075 }
 0x207   : > { %v2307_v40 = vpop.permute.xlu0 %729  ;;  %v1114_v26 = vsel %vm1085_vm5, %v1076_v13, %v2296_v29 }
 0x208   : > { %v736_v49 = vsel %vm2973_vm6, %v2205_v46, %v2307_v40  ;;  %1217 = vmatpush.bf16.msra.mxu2 %v1114_v26  ;;  %vm923_vm6 = vcmask 670720   ;;  %v2362_v26 = vsel %vm2977_vm4, %v1730_v20, %v251_v22 }
 0x209   : > { %1150 = vrot.lane.b32.xlu1 %v1730_v20, %s1679_s23  ;;  %v777_v44 = vsel %vm2977_vm4, %v736_v49, %v2317_v24 }
 0x20a   : > { %917 = vrot.lane.b32.xlu0 %v2077_v57, %s1678_s22  ;;  %1017 = vrot.lane.b32.xlu2 %v765_v14, %s1677_s21  ;;  %v336_v14 = vsel %vm333_vm10, %v1877_v43, %v1849_v34 }
 0x20e   : > { %v2335_v46 = vpop.permute.xlu1 %605 }
 0x20f   : > { %v2337_v31 = vpop.permute.xlu0 %602 }
 0x210   : > { %v2342_v17 = vsel %vm2977_vm4, %v2337_v31, %v2335_v46 }
 0x211   : > { %855 = vrot.lane.b32.xlu1 %v2345_v16, %s1678_s22 }
 0x212   : > { %1069 = vrot.lane.b32.xlu0 %v2229_v45, %s1677_s21  ;;  %1152 = vrot.lane.b32.xlu2 %v1732_v21, %s1679_s23 }
 0x213   : > { %v1066_v59 = vpop.permute.xlu2 %1065 }
 0x216   : > { %v2356_v54 = vpop.permute.xlu1 %915 }
 0x217   : > { %v914_v28 = vpop.permute.xlu0 %913 }
 0x218   : > { %v952_v13 = vsel %vm923_vm6, %v914_v28, %v2356_v54 }
 0x219   : > { %1204 = vmatpush.bf16.msra.mxu1 %v952_v13  ;;  %1007 = vrot.lane.b32.xlu1 %v2362_v26, %s1677_s21 }
 0x21a   : > { %853 = vrot.lane.b32.xlu0 %v2135_v56, %s1678_s22  ;;  %907 = vrot.lane.b32.xlu2 %v2229_v45, %s1678_s22  ;;  %v348_v56 = vsel %vm345_vm9, %v1950_v63, %v1986_v9  ;;  %v372_v45 = vsel %vm369_vm7, %v1994_v10, %v1974_v5  ;;  %vm2996_vm7 = vcmask 875520  }
 0x21b   : > { %v2370_v47 = vpop.permute.xlu2 %599  ;;  %v2395_v38 = vsel %vm2977_vm4, %v336_v14, %v348_v56  ;;  %v597_v10 = vsel %vm2996_vm7, %v2187_v58, %v2257_v62 }
 0x21e   : > { %v2372_v25 = vpop.permute.xlu1 %592 }
 0x21f   : > { %v2377_v49 = vsel %vm2977_vm4, %v2372_v25, %v2370_v47 }
 0x221   : > { %845 = vrot.lane.b32.xlu1 %v2362_v26, %s1678_s22 }
 0x222   : > { %1005 = vrot.lane.b32.xlu0 %v2145_v2, %s1677_s21  ;;  %1059 = vrot.lane.b32.xlu2 %v2249_v6, %s1677_s21  ;;  %v360_v6 = vsel %vm357_vm8, %v1890_v48, %v1900_v50  ;;  %v2417_v48 = vsel %vm321_vm11, %v1964_v3, %v1972_v4  ;;  %vm3000_vm8 = vmmov %vm2996_vm7 }
 0x223   : > { %v904_v20 = vpop.permute.xlu2 %903  ;;  %v2403_v63 = vsel %vm2977_vm4, %v360_v6, %v372_v45  ;;  %v671_v22 = vsel %vm2977_vm4, %v597_v10, %v2417_v48 }
 0x229   : > { %1049 = vrot.lane.b32.xlu1 %v2395_v38, %s1677_s21 }
 0x22a   : > { %843 = vrot.lane.b32.xlu0 %v2145_v2, %s1678_s22  ;;  %897 = vrot.lane.b32.xlu2 %v2403_v63, %s1678_s22  ;;  %v2426_v2 = vpop.permute.xlu1 %756 }
 0x22c   : > { %v2409_v43 = vpop.permute.xlu2 %1057 }
 0x231   : > { %1039 = vrot.lane.b32.xlu1 %v671_v22, %s1677_s21 }
 0x232   : > { %919 = vrot.lane.b32.xlu0 %v2067_v23, %s1678_s22  ;;  %887 = vrot.lane.b32.xlu2 %v2395_v38, %s1678_s22 }
 0x234   : > { %v2428_v28 = vpop.permute.xlu0 %1067  ;;  %v2430_v58 = vpop.permute.xlu2 %895 }
 0x235   : > { %v1110_v3 = vsel %vm1085_vm5, %v1066_v59, %v2428_v28  ;;  %v2445_v59 = vsel %vm285_vm14, %v1851_v35, %v1856_v36 }
 0x236   : > { %1218 = vmatpush.bf16.msra.mxu2 %v1110_v3  ;;  %v607_v3 = vsel %vm345_vm9, %v1986_v9, %v2335_v46  ;;  %vm1158_vm9 = vcmask 965632  }
 0x239   : > { %1029 = vrot.lane.b32.xlu1 %v777_v44, %s1677_s21  ;;  %v659_v44 = vsel %vm2977_vm4, %v2445_v59, %v2317_v24  ;;  %v604_v24 = vsel %vm333_vm10, %v1849_v34, %v2337_v31  ;;  %vm3002_vm10 = vcmask 891904  }
 0x23a   : > { %877 = vrot.lane.b32.xlu2 %v671_v22, %s1678_s22  ;;  %909 = vrot.lane.b32.xlu0 %v2267_v0, %s1678_s22 }
 0x23b   : > { %v1056_v13 = vpop.permute.xlu1 %1055 }
 0x23c   : > { %v2438_v56 = vpop.permute.xlu0 %744  ;;  %v884_v45 = vpop.permute.xlu2 %883  ;;  %v1106_v14 = vsel %vm1085_vm5, %v1056_v13, %v2409_v43 }
 0x23d   : > { %1219 = vmatpush.bf16.msra.mxu2 %v1106_v14  ;;  %v2997_v14 = vld [vmem:[#allocation9_spill] sm:$0xff] }
 0x241   : > { %867 = vrot.lane.b32.xlu1 %v659_v44, %s1678_s22  ;;  %v721_v44 = vsel %vm718_vm2, %v2243_v1, %v2330_v32 }
 0x242   : > { %1081 = vrot.lane.b32.xlu2 %v2067_v23, %s1677_s21  ;;  %899 = vrot.lane.b32.xlu0 %v2294_v52, %s1678_s22  ;;  %v680_v52 = vsel %vm2977_vm4, %v604_v24, %v607_v3 }
 0x243   : > { %v894_v6 = vpop.permute.xlu1 %893 }
 0x244   : > { %v2455_v10 = vpop.permute.xlu0 %905  ;;  %v2457_v22 = vpop.permute.xlu2 %1037 }
 0x245   : > { %v948_v35 = vsel %vm923_vm6, %v904_v20, %v2455_v10  ;;  %v944_v20 = vsel %vm923_vm6, %v894_v6, %v2430_v58  ;;  %v2999_v6 = vld [vmem:[#allocation3_spill] sm:$0xff] }
 0x246   : > { %1205 = vmatpush.bf16.msra.mxu1 %v948_v35  ;;  %v2998_v35 = vld [vmem:[#allocation11_spill] sm:$0xff]  ;;  %v264_v3 = vsel %vm261_vm0, %v1836_v30, %v2999_v6 }
 0x247   : > { %v276_v24 = vsel %vm273_vm15, %v1902_v51, %v2998_v35  ;;  %v767_v1 = vsel %vm2977_vm4, %v264_v3, %v721_v44  ;;  %v749_v44 = vsel %vm746_vm13, %v2236_v27, %v2438_v56  ;;  %vm3008_vm13 = vcmask 998400  }
 0x249   : > { %1071 = vrot.lane.b32.xlu1 %v2267_v0, %s1677_s21  ;;  %v252_v0 = vsel %vm249_vm3, %v1916_v55, %v2997_v14  ;;  %v2500_v55 = vsel %vm2977_vm4, %v264_v3, %v276_v24  ;;  %v601_v24 = vsel %vm321_vm11, %v1972_v4, %v2370_v47  ;;  %v761_v3 = vsel %vm758_vm12, %v2207_v37, %v2426_v2 }
 0x24a   : > { %889 = vrot.lane.b32.xlu2 %v680_v52, %s1678_s22  ;;  %1154 = vrot.lane.b32.xlu0 %v1728_v18, %s1679_s23  ;;  %vm1175_vm11 = vcmask 64512   ;;  %vm3004_vm12 = vcmask 826368  }
 0x24b   : > { %1206 = vmatpush.bf16.msra.mxu1 %v944_v20  ;;  %v2475_v31 = vpop.permute.xlu1 %1047  ;;  %v2495_v20 = vsel %vm2977_vm4, %v1732_v21, %v252_v0  ;;  %v598_v0 = vsel %vm3000_vm8, %v2257_v62, %v2372_v25 }
 0x24c   : > { %v2477_v13 = vpop.permute.xlu0 %577  ;;  %v2479_v46 = vpop.permute.xlu2 %875  ;;  %v674_v62 = vsel %vm2977_vm4, %v598_v0, %v601_v24  ;;  %v568_v0 = vsel %vm285_vm14, %v1856_v36, %v2122_v8  ;;  %vm3012_vm14 = vcmask 1006592  }
 0x251   : > { %1009 = vrot.lane.b32.xlu1 %v2495_v20, %s1677_s21 }
 0x252   : > { %857 = vrot.lane.b32.xlu2 %v2500_v55, %s1678_s22  ;;  %1019 = vrot.lane.b32.xlu0 %v767_v1, %s1677_s21 }
 0x253   : > { %v1036_v51 = vpop.permute.xlu1 %1035 }
 0x254   : > { %v1046_v34 = vpop.permute.xlu0 %1045  ;;  %v2506_v30 = vpop.permute.xlu2 %1079  ;;  %v1098_v27 = vsel %vm1085_vm5, %v1036_v51, %v2457_v22 }
 0x255   : > { %v1102_v21 = vsel %vm1085_vm5, %v1046_v34, %v2475_v31  ;;  %v793_v34 = vsel %vm2977_vm4, %v749_v44, %v761_v3 }
 0x256   : > { %1220 = vmatpush.bf16.msra.mxu2 %v1102_v21  ;;  %v583_v21 = vsel %vm579_vm1, %v2279_v39, %v2477_v13  ;;  %vm3019_vm1 = vmmov %vm3008_vm13 }
 0x257   : > { %v662_v51 = vsel %vm2977_vm4, %v568_v0, %v583_v21 }
 0x259   : > { %847 = vrot.lane.b32.xlu1 %v2495_v20, %s1678_s22 }
 0x25a   : > { %1061 = vrot.lane.b32.xlu2 %v793_v34, %s1677_s21  ;;  %879 = vrot.lane.b32.xlu0 %v674_v62, %s1678_s22 }
 0x25b   : > { %1221 = vmatpush.bf16.msra.mxu2 %v1098_v27  ;;  %v874_v47 = vpop.permute.xlu1 %873 }
 0x25c   : > { %v2530_v25 = vpop.permute.xlu0 %885  ;;  %v2532_v1 = vpop.permute.xlu2 %865 }
 0x25d   : > { %v940_v37 = vsel %vm923_vm6, %v884_v45, %v2530_v25  ;;  %v936_v45 = vsel %vm923_vm6, %v874_v47, %v2479_v46  ;;  %v559_v47 = vsel %vm249_vm3, %v2997_v14, %v2098_v19  ;;  %vm3021_vm3 = vmmov %vm3012_vm14 }
 0x25e   : > { %1207 = vmatpush.bf16.msra.mxu1 %v940_v37 }
 0x261   : > { %1051 = vrot.lane.b32.xlu1 %v680_v52, %s1677_s21 }
 0x262   : > { %869 = vrot.lane.b32.xlu2 %v662_v51, %s1678_s22  ;;  %1083 = vrot.lane.b32.xlu0 %v2039_v61, %s1677_s21  ;;  %v645_v51 = vsel %vm2977_vm4, %v1728_v18, %v559_v47  ;;  %v2589_v47 = vld [vmem:[%s2949_s1 + $0x8] sm:$0xff] }
 0x263   : > { %1208 = vmatpush.bf16.msra.mxu1 %v936_v45  ;;  %v2549_v44 = vpop.permute.xlu1 %1027 }
 0x264   : > { %v2551_v39 = vpop.permute.xlu0 %731  ;;  %v2553_v24 = vpop.permute.xlu2 %1017 }
 0x269   : > { %911 = vrot.lane.b32.xlu1 %v2261_v60, %s1678_s22 }
 0x26a   : > { %1073 = vrot.lane.b32.xlu2 %v2261_v60, %s1677_s21  ;;  %921 = vrot.lane.b32.xlu0 %v2039_v61, %s1678_s22  ;;  %v562_v60 = vsel %vm261_vm0, %v2999_v6, %v2096_v15  ;;  %v3001_v61 = vld [vmem:[#allocation18_spill] sm:$0xff]  ;;  %vm3017_vm0 = vmmov %vm3004_vm12 }
 0x26b   : > { %v864_v52 = vpop.permute.xlu1 %863  ;;  %v565_v0 = vsel %vm273_vm15, %v2998_v35, %v3001_v61  ;;  %vm3015_vm15 = vcmask 818176  }
 0x26c   : > { %v1026_v3 = vpop.permute.xlu0 %1025  ;;  %v2561_v34 = vpop.permute.xlu2 %1152  ;;  %v932_v27 = vsel %vm923_vm6, %v864_v52, %v2532_v1  ;;  %v650_v45 = vsel %vm2977_vm4, %v562_v60, %v565_v0  ;;  %v796_v0 = vsel %vm2977_vm4, %v2438_v56, %v2426_v2 }
 0x26d   : > { %1209 = vmatpush.bf16.msra.mxu1 %v932_v27  ;;  %v1094_v37 = vsel %vm1085_vm5, %v1026_v3, %v2549_v44 }
 0x26e   : > { %1222 = vmatpush.bf16.msra.mxu2 %v1094_v37 }
 0x271   : > { %849 = vrot.lane.b32.xlu1 %v645_v51, %s1678_s22 }
 0x272   : > { %1041 = vrot.lane.b32.xlu2 %v674_v62, %s1677_s21  ;;  %859 = vrot.lane.b32.xlu0 %v650_v45, %s1678_s22  ;;  %v1167_v62 = vunpack.c.h.b16 %v2589_v47 }
 0x273   : > { %v1016_v52 = vpop.permute.xlu1 %1015 }
 0x274   : > { %v717_v3 = vpop.permute.xlu0 %716  ;;  %v2582_v27 = vpop.permute.xlu2 %907  ;;  %v1090_v37 = vsel %vm1085_vm5, %v1016_v52, %v2553_v24 }
 0x275   : > { %1223 = vmatpush.bf16.msra.mxu2 %v1090_v37  ;;  %v722_v2 = vsel %vm718_vm2, %v2330_v32, %v717_v3  ;;  %v3003_v32 = vld [vmem:[#allocation7_spill] sm:$0xff] }
 0x279   : > { %1053 = vrot.lane.b32.xlu1 %v2342_v17, %s1677_s21 }
 0x27a   : > { %901 = vrot.lane.b32.xlu2 %v2284_v33, %s1678_s22  ;;  %1063 = vrot.lane.b32.xlu0 %v796_v0, %s1677_s21  ;;  %v2612_v33 = vpack.c.b16 %v1167_v62, %v1167_v62  ;;  %v737_v0 = vsel %vm3002_vm10, %v2307_v40, %v2551_v39  ;;  %v3005_v40 = vld [vmem:[#allocation17_spill] sm:$0xff] }
 0x27b   : > { %v1151_v45 = vpop.permute.xlu1 %1150 }
 0x27c   : > { %v2600_v52 = vpop.permute.xlu0 %917  ;;  %v2602_v37 = vpop.permute.xlu2 %1059  ;;  %v1159_v18 = vsel %vm1158_vm9, %v1151_v45, %v2561_v34  ;;  %v769_v45 = vsel %vm2977_vm4, %v562_v60, %v722_v2 }
 0x27d   : > { %v1180_v56 = vsel %vm2977_vm4, %v1159_v18, 0  ;;  %v953_v14 = vsel %vm923_vm6, %v2356_v54, %v2600_v52  ;;  %v779_v18 = vsel %vm2977_vm4, %v737_v0, %v583_v21  ;;  %v383_v54 = vsel %vm3004_vm12, %v1912_v53, %v3003_v32  ;;  %v3007_v0 = vld [vmem:[#allocation6_spill] sm:$0xff] }
 0x27e   : > { %1237 = vmatpush.bf16.msra.mxu3 %v1180_v56  ;;  %1256 = vmatpush.bf16.msrb.mxu0 %v953_v14  ;;  %v531_v14 = vsel %vm2977_vm4, %v383_v54, %v3005_v40  ;;  %v3011_v54 = vld [vmem:[#allocation13_spill] sm:$0xff]  ;;  %v771_v40 = vsel %vm2977_vm4, %v2096_v15, %v717_v3 }
 0x281   : > { %1021 = vrot.lane.b32.xlu1 %v769_v45, %s1677_s21  ;;  %1596 = vmatmul.msk.bf16.vlgmr.msra.gmra.mxu3 %vm1175_vm11, %v2612_v33 }
 0x282   : > { %1243 = vmatpush.bf16.msrb.mxu3 %v2073_v11  ;;  %1156 = vrot.lane.b32.xlu2 %v1872_v42, %s1679_s23  ;;  %v949_v11 = vsel %vm923_vm6, %v2455_v10, %v2582_v27 }
 0x283   : > { %1031 = vrot.lane.b32.xlu0 %v779_v18, %s1677_s21  ;;  %1257 = vmatpush.bf16.msrb.mxu0 %v949_v11  ;;  %v2634_v21 = vpop.permute.xlu1 %855 }
 0x284   : > { %v2636_v53 = vpop.permute.xlu0 %1069  ;;  %v2638_v60 = vpop.permute.xlu2 %897 }
 0x285   : > { %v945_v62 = vsel %vm923_vm6, %v2430_v58, %v2638_v60 }
 0x286   : > { %1244 = vmatpush.bf16.msrb.mxu3 %v531_v14 }
 0x287   : > { %1258 = vmatpush.bf16.msrb.mxu0 %v945_v62 }
 0x289   : > { %1011 = vrot.lane.b32.xlu1 %v645_v51, %s1677_s21  ;;  %v3006_v51 = vld [vmem:[#allocation4_spill] sm:$0xff] }
 0x28a   : > { %1245 = vmatpush.bf16.msrb.mxu3 %v2198_v12  ;;  %1043 = vrot.lane.b32.xlu2 %v2377_v49, %s1677_s21  ;;  %v311_v45 = vsel %vm3008_vm13, %v3007_v0, %v3006_v51  ;;  %v653_v0 = vsel %vm2977_vm4, %v2096_v15, %v3001_v61 }
 0x28b   : > { %891 = vrot.lane.b32.xlu0 %v2342_v17, %s1678_s22  ;;  %v2649_v10 = vpop.permute.xlu1 %1007  ;;  %v3009_v17 = vld [vmem:[#allocation19_spill] sm:$0xff] }
 0x28c   : > { %v854_v2 = vpop.permute.xlu0 %853  ;;  %v2652_v56 = vpop.permute.xlu2 %887  ;;  %v483_v18 = vsel %vm2977_vm4, %v311_v45, %v3009_v17  ;;  %v1166_v17 = vunpack.c.l.b16 %v2589_v47  ;;  %v1111_v47 = vsel %vm1085_vm5, %v2428_v28, %v2636_v53 }
 0x28d   : > { %v928_v58 = vsel %vm923_vm6, %v854_v2, %v2634_v21  ;;  %v941_v12 = vsel %vm923_vm6, %v2530_v25, %v2652_v56  ;;  %v781_v25 = vsel %vm2977_vm4, %v2551_v39, %v2477_v13 }
 0x28e   : > { %1246 = vmatpush.bf16.msrb.mxu3 %v2193_v7  ;;  %1210 = vmatpush.bf16.msra.mxu1 %v928_v58  ;;  %v3010_v7 = vld [vmem:[#allocation12_spill] sm:$0xff] }
 0x28f   : > { %1259 = vmatpush.bf16.msrb.mxu0 %v941_v12  ;;  %v299_v11 = vsel %vm3012_vm14, %v3011_v54, %v3010_v7  ;;  %v647_v12 = vsel %vm2977_vm4, %v1872_v42, %v2098_v19  ;;  %v3013_v42 = vld [vmem:[#allocation15_spill] sm:$0xff]  ;;  %v3014_v19 = vld [vmem:[#allocation16_spill] sm:$0xff]  ;;  %v1115_v54 = vsel %vm1085_vm5, %v2296_v29, %v2506_v30 }
 0x290   : > { %v467_v14 = vsel %vm2977_vm4, %v2289_v41, %v299_v11  ;;  %v396_v15 = vsel %vm3015_vm15, %v3014_v19, %v3013_v42  ;;  %v2726_v11 = vpack.c.b16 %v1166_v17, %v1166_v17 }
 0x291   : > { %1023 = vrot.lane.b32.xlu1 %v771_v40, %s1677_s21 }
 0x292   : > { %1247 = vmatpush.bf16.msrb.mxu3 %v483_v18  ;;  %1033 = vrot.lane.b32.xlu2 %v781_v25, %s1677_s21  ;;  %v3016_v18 = vld [vmem:[#allocation14_spill] sm:$0xff]  ;;  %v1107_v25 = vsel %vm1085_vm5, %v2409_v43, %v2602_v37 }
 0x293   : > { %881 = vrot.lane.b32.xlu0 %v2377_v49, %s1678_s22  ;;  %v2678_v62 = vpop.permute.xlu1 %845  ;;  %v234_v49 = vld [vmem:[%s2949_s1] sm:$0xff] }
 0x294   : > { %v1006_v2 = vpop.permute.xlu0 %1005  ;;  %v2680_v58 = vpop.permute.xlu2 %877  ;;  %v1164_v41 = vunpack.c.l.b16 %v234_v49 }
 0x295   : > { %v1086_v3 = vsel %vm1085_vm5, %v1006_v2, %v2649_v10  ;;  %v937_v39 = vsel %vm923_vm6, %v2479_v46, %v2680_v58  ;;  %v665_v46 = vsel %vm2977_vm4, %v2122_v8, %v2477_v13 }
 0x296   : > { %1248 = vmatpush.bf16.msrb.mxu3 %v467_v14  ;;  %1224 = vmatpush.bf16.msra.mxu2 %v1086_v3  ;;  %v2701_v45 = vpack.c.b16 %v1164_v41, %v1164_v41  ;;  %v3018_v14 = vld [vmem:[#allocation8_spill] sm:$0xff] }
 0x297   : > { %1260 = vmatpush.bf16.msrb.mxu0 %v937_v39  ;;  %v312_v28 = vsel %vm3019_vm1, %v3006_v51, %v3018_v14  ;;  %v3020_v39 = vld [vmem:[#allocation10_spill] sm:$0xff]  ;;  %v1165_v51 = vunpack.c.h.b16 %v234_v49 }
 0x298   : > { %1199 = vmatmul.bf16.vlgmr.msra.gmra.mxu0 %v2701_v45  ;;  %v300_v43 = vsel %vm3021_vm3, %v3010_v7, %v3020_v39 }
 0x299   : > { %851 = vrot.lane.b32.xlu1 %v647_v12, %s1678_s22  ;;  %1225 = vmatmul.bf16.vlgmr.msra.gmra.mxu2 %v2726_v11 }
 0x29a   : > { %1249 = vmatpush.bf16.msrb.mxu3 %v2345_v16  ;;  %861 = vrot.lane.b32.xlu2 %v653_v0, %s1678_s22 }
 0x29b   : > { %871 = vrot.lane.b32.xlu0 %v665_v46, %s1678_s22  ;;  %v2705_v16 = vpop.permute.xlu1 %1049 }
 0x29c   : > { %v844_v61 = vpop.permute.xlu0 %843  ;;  %v2713_v8 = vpop.permute.xlu2 %1081  ;;  %v1103_v2 = vsel %vm1085_vm5, %v2475_v31, %v2705_v16 }
 0x29d   : > { %v924_v13 = vsel %vm923_vm6, %v844_v61, %v2678_v62 }
 0x29e   : > { %1250 = vmatpush.bf16.msrb.mxu3 %v2362_v26  ;;  %v384_v26 = vsel %vm3017_vm0, %v3003_v32, %v3016_v18  ;;  %1211 = vmatpush.bf16.msra.mxu1 %v924_v13  ;;  %v3022_v13 = vld [vmem:[#allocation5_spill] sm:$0xff] }
 0x29f   : > { %v507_v17 = vsel %vm2977_vm4, %v3022_v13, %v1986_v9 }
 0x2a1   : > { %1251 = vmatmul.bf16.vlgmr.msrb.gmra.mxu3 %v2701_v45 }
 0x2a2   : > { %1295 = vmatpush.bf16.msra.mxu3 %v2077_v57  ;;  %1269 = vmatpush.bf16.msrb.mxu1 %v1115_v54  ;;  %v535_v57 = vsel %vm2977_vm4, %v384_v26, %v396_v15  ;;  %v523_v15 = vsel %vm2977_vm4, %v1900_v50, %v1974_v5 }
 0x2a3   : > { %1013 = vrot.lane.b32.xlu0 %v647_v12, %s1677_s21  ;;  %v2733_v32 = vpop.permute.xlu1 %1039  ;;  %v2764_v12 = vpack.c.b16 %v1165_v51, %v1165_v51 }
 0x2a4   : > { %v2735_v29 = vpop.permute.xlu0 %919  ;;  %v2738_v40 = vpop.permute.xlu2 %889  ;;  %v1099_v31 = vsel %vm1085_vm5, %v2457_v22, %v2733_v32 }
 0x2a5   : > { %1212 = vmatmul.bf16.vlgmr.msra.gmra.mxu1 %v2764_v12 }
 0x2a6   : > { %1296 = vmatpush.bf16.msra.mxu3 %v535_v57  ;;  %1270 = vmatpush.bf16.msrb.mxu1 %v1111_v47 }
 0x2aa   : > { %1297 = vmatpush.bf16.msra.mxu3 %v2403_v63  ;;  %1271 = vmatpush.bf16.msrb.mxu1 %v1107_v25  ;;  %v487_v63 = vsel %vm2977_vm4, %v312_v28, %v2417_v48  ;;  %v471_v48 = vsel %vm2977_vm4, %v2445_v59, %v300_v43  ;;  %v3023_v25 = vld [vmem:[#allocation9_spill] sm:$0xff] }
 0x2ab   : > { %v2750_v3 = vpop.permute.xlu1 %1029 }
 0x2ac   : > { %v2757_v41 = vpop.permute.xlu0 %909  ;;  %v1095_v7 = vsel %vm1085_vm5, %v2549_v44, %v2750_v3 }
 0x2ae   : > { %1298 = vmatpush.bf16.msra.mxu3 %v2395_v38  ;;  %1272 = vmatpush.bf16.msrb.mxu1 %v1103_v2  ;;  %v2759_v38 = vpop.permute.xlu2 %857 }
 0x2af   : > { %v929_v59 = vsel %vm923_vm6, %v2634_v21, %v2759_v38 }
 0x2b2   : > { %1299 = vmatpush.bf16.msra.mxu3 %v487_v63  ;;  %1273 = vmatpush.bf16.msrb.mxu1 %v1099_v31 }
 0x2b3   : > { %v868_v0 = vpop.permute.xlu1 %867 }
 0x2b4   : > { %v2772_v49 = vpop.permute.xlu0 %899  ;;  %v933_v46 = vsel %vm923_vm6, %v2532_v1, %v868_v0  ;;  %v539_v1 = vsel %vm2977_vm4, %v3016_v18, %v3013_v42 }
 0x2b5   : > { %1261 = vmatpush.bf16.msrb.mxu0 %v933_v46  ;;  %v946_v5 = vsel %vm923_vm6, %v2638_v60, %v2772_v49 }
 0x2b6   : > { %1300 = vmatpush.bf16.msra.mxu3 %v471_v48  ;;  %1274 = vmatpush.bf16.msrb.mxu1 %v1095_v7  ;;  %v2775_v22 = vpop.permute.xlu2 %1061 }
 0x2b9   : > { %1262 = vmatpush.bf16.msrb.mxu0 %v929_v59 }
 0x2ba   : > { %1301 = vmatpush.bf16.msra.mxu3 %v2500_v55 }
 0x2bb   : > { %v2784_v44 = vpop.permute.xlu1 %1071 }
 0x2bc   : > { %v1155_v55 = vpop.permute.xlu0 %1154 }
 0x2be   : > { %1302 = vmatpush.bf16.msra.mxu3 %v2495_v20  ;;  %v2787_v19 = vpop.permute.xlu2 %869  ;;  %v1160_v20 = vsel %vm1158_vm9, %v2561_v34, %v1155_v55  ;;  %v950_v34 = vsel %vm923_vm6, %v2582_v27, %v2757_v41  ;;  %v491_v27 = vsel %vm2977_vm4, %v3018_v14, %v1972_v4  ;;  %v475_v4 = vsel %vm2977_vm4, %v1856_v36, %v3020_v39  ;;  %v3024_v14 = vld [vmem:[#allocation2_spill] sm:$0xff] }
 0x2bf   : > { %v1183_v21 = vsel %vm2977_vm4, %v1160_v20, 0  ;;  %v1112_v36 = vsel %vm1085_vm5, %v2636_v53, %v2784_v44  ;;  %v934_v57 = vsel %vm923_vm6, %v868_v0, %v2787_v19  ;;  %v443_v28 = vsel %vm2977_vm4, %v3024_v14, %v3023_v25 }
 0x2c0   : > { %1289 = vmatpush.bf16.msrb.mxu2 %v1183_v21 }
 0x2c1   : > { %1303 = vmatmul.bf16.vlgmr.msra.gmra.mxu3 %v2701_v45 }
 0x2c2   : > { %1347 = vmatpush.bf16.msrb.mxu3 %v2067_v23  ;;  %v954_v23 = vsel %vm923_vm6, %v2600_v52, %v2735_v29 }
 0x2c3   : > { %1597 = vmatmul.msk.bf16.vlgmr.msrb.gmra.mxu2 %vm1175_vm11, %v2612_v33  ;;  %v2803_v42 = vpop.permute.xlu1 %1009 }
 0x2c4   : > { %1308 = vmatpush.bf16.msra.mxu2 %v954_v23  ;;  %v2808_v61 = vpop.permute.xlu0 %1019  ;;  %v1087_v9 = vsel %vm1085_vm5, %v2649_v10, %v2803_v42  ;;  %v1116_v10 = vsel %vm1085_vm5, %v2506_v30, %v2713_v8 }
 0x2c5   : > { %v1091_v50 = vsel %vm1085_vm5, %v2553_v24, %v2808_v61  ;;  %v942_v24 = vsel %vm923_vm6, %v2652_v56, %v2738_v40 }
 0x2c6   : > { %1348 = vmatpush.bf16.msrb.mxu3 %v539_v1  ;;  %v2810_v52 = vpop.permute.xlu2 %1073  ;;  %1275 = vmatpush.bf16.msrb.mxu1 %v1091_v50 }
 0x2c8   : > { %1309 = vmatpush.bf16.msra.mxu2 %v950_v34 }
 0x2ca   : > { %1349 = vmatpush.bf16.msrb.mxu3 %v523_v15  ;;  %1276 = vmatpush.bf16.msrb.mxu1 %v1087_v9 }
 0x2cb   : > { %v848_v18 = vpop.permute.xlu1 %847 }
 0x2cc   : > { %1310 = vmatpush.bf16.msra.mxu2 %v946_v5  ;;  %v2830_v26 = vpop.permute.xlu0 %879  ;;  %v925_v54 = vsel %vm923_vm6, %v2678_v62, %v848_v18  ;;  %v459_v62 = vsel %vm2977_vm4, %v2999_v6, %v2998_v35  ;;  %v1108_v35 = vsel %vm1085_vm5, %v2602_v37, %v2775_v22 }
 0x2cd   : > { %1263 = vmatpush.bf16.msrb.mxu0 %v925_v54  ;;  %1277 = vmatmul.bf16.vlgmr.msrb.gmra.mxu1 %v2726_v11  ;;  %v938_v56 = vsel %vm923_vm6, %v2680_v58, %v2830_v26 }
 0x2ce   : > { %1350 = vmatpush.bf16.msrb.mxu3 %v507_v17  ;;  %v2832_v60 = vpop.permute.xlu2 %1041 }
 0x2cf   : > { %v1100_v43 = vsel %vm1085_vm5, %v2733_v32, %v2832_v60 }
 0x2d0   : > { %1311 = vmatpush.bf16.msra.mxu2 %v942_v24  ;;  %1264 = vmatmul.bf16.vlgmr.msrb.gmra.mxu0 %v2764_v12 }
 0x2d1   : > { %1321 = vmatpush.bf16.msra.mxu0 %v1116_v10 }
 0x2d2   : > { %1351 = vmatpush.bf16.msrb.mxu3 %v491_v27 }
 0x2d3   : > { %v1052_v30 = vpop.permute.xlu1 %1051 }
 0x2d4   : > { %1312 = vmatpush.bf16.msra.mxu2 %v938_v56  ;;  %v1084_v47 = vpop.permute.xlu0 %1083  ;;  %v1104_v6 = vsel %vm1085_vm5, %v2705_v16, %v1052_v30 }
 0x2d5   : > { %1322 = vmatpush.bf16.msra.mxu0 %v1112_v36  ;;  %v1117_v7 = vsel %vm1085_vm5, %v2713_v8, %v1084_v47 }
 0x2d6   : > { %1352 = vmatpush.bf16.msrb.mxu3 %v475_v4  ;;  %v902_v58 = vpop.permute.xlu2 %901 }
 0x2d7   : > { %v947_v48 = vsel %vm923_vm6, %v2772_v49, %v902_v58 }
 0x2d8   : > { %1313 = vmatpush.bf16.msra.mxu2 %v934_v57 }
 0x2d9   : > { %1323 = vmatpush.bf16.msra.mxu0 %v1108_v35 }
 0x2da   : > { %1353 = vmatpush.bf16.msrb.mxu3 %v459_v62 }
 0x2db   : > { %v912_v53 = vpop.permute.xlu1 %911 }
 0x2dc   : > { %v922_v2 = vpop.permute.xlu0 %921  ;;  %v951_v16 = vsel %vm923_vm6, %v2757_v41, %v912_v53  ;;  %v1113_v41 = vsel %vm1085_vm5, %v2784_v44, %v2810_v52 }
 0x2dd   : > { %1324 = vmatpush.bf16.msra.mxu0 %v1104_v6  ;;  %v955_v37 = vsel %vm923_vm6, %v2735_v29, %v922_v2 }
 0x2de   : > { %1354 = vmatpush.bf16.msrb.mxu3 %v443_v28  ;;  %v1157_v63 = vpop.permute.xlu2 %1156 }
 0x2df   : > { %v1161_v39 = vsel %vm1158_vm9, %v1155_v55, %v1157_v63  ;;  %v1189_v34 = vsel %vm2977_vm4, %v1157_v63, 0 }
 0x2e0   : > { %v1186_v51 = vsel %vm2977_vm4, %v1161_v39, 0 }
 0x2e1   : > { %1355 = vmatmul.bf16.vlgmr.msrb.gmra.mxu3 %v2701_v45  ;;  %1325 = vmatpush.bf16.msra.mxu0 %v1100_v43 }
 0x2e2   : > { %1341 = vmatpush.bf16.msra.mxu1 %v1186_v51 }
 0x2e3   : > { %v850_v45 = vpop.permute.xlu1 %849 }
 0x2e4   : > { %v860_v31 = vpop.permute.xlu0 %859  ;;  %v926_v29 = vsel %vm923_vm6, %v848_v18, %v850_v45 }
 0x2e5   : > { %1598 = vmatmul.msk.bf16.vlgmr.msra.gmra.mxu1 %vm1175_vm11, %v2612_v33  ;;  %v930_v32 = vsel %vm923_vm6, %v2759_v38, %v860_v31 }
 0x2e6   : > { %1360 = vmatpush.bf16.msrb.mxu1 %v955_v37  ;;  %1314 = vmatpush.bf16.msra.mxu2 %v930_v32  ;;  %v1044_v49 = vpop.permute.xlu2 %1043 }
 0x2e7   : > { %v1101_v44 = vsel %vm1085_vm5, %v2832_v60, %v1044_v49 }
 0x2ea   : > { %1361 = vmatpush.bf16.msrb.mxu1 %v951_v16  ;;  %1315 = vmatpush.bf16.msra.mxu2 %v926_v29 }
 0x2eb   : > { %v1054_v0 = vpop.permute.xlu1 %1053 }
 0x2ec   : > { %v1064_v46 = vpop.permute.xlu0 %1063  ;;  %v1105_v1 = vsel %vm1085_vm5, %v1052_v30, %v1054_v0 }
 0x2ed   : > { %1316 = vmatmul.bf16.vlgmr.msra.gmra.mxu2 %v2764_v12  ;;  %v1109_v38 = vsel %vm1085_vm5, %v2775_v22, %v1064_v46 }
 0x2ee   : > { %1362 = vmatpush.bf16.msrb.mxu1 %v947_v48  ;;  %1373 = vmatpush.bf16.msrb.mxu2 %v1117_v7  ;;  %v1034_v15 = vpop.permute.xlu2 %1033 }
 0x2f2   : > { %1374 = vmatpush.bf16.msrb.mxu2 %v1113_v41 }
 0x2f3   : > { %v1022_v59 = vpop.permute.xlu1 %1021 }
 0x2f4   : > { %v1092_v20 = vsel %vm1085_vm5, %v2808_v61, %v1022_v59 }
 0x2f5   : > { %v1032_v55 = vpop.permute.xlu0 %1031 }
 0x2f6   : > { %1375 = vmatpush.bf16.msrb.mxu2 %v1109_v38  ;;  %v1096_v8 = vsel %vm1085_vm5, %v2750_v3, %v1032_v55  ;;  %v1097_v61 = vsel %vm1085_vm5, %v1032_v55, %v1034_v15  ;;  %v862_v9 = vpop.permute.xlu2 %861 }
 0x2f7   : > { %1326 = vmatpush.bf16.msra.mxu0 %v1096_v8  ;;  %v931_v18 = vsel %vm923_vm6, %v860_v31, %v862_v9 }
 0x2fa   : > { %1376 = vmatpush.bf16.msrb.mxu2 %v1105_v1 }
 0x2fb   : > { %1327 = vmatpush.bf16.msra.mxu0 %v1092_v20  ;;  %v1012_v21 = vpop.permute.xlu1 %1011 }
 0x2fc   : > { %v1088_v23 = vsel %vm1085_vm5, %v2803_v42, %v1012_v21 }
 0x2fd   : > { %v892_v22 = vpop.permute.xlu0 %891 }
 0x2fe   : > { %1377 = vmatpush.bf16.msrb.mxu2 %v1101_v44  ;;  %v943_v3 = vsel %vm923_vm6, %v2738_v40, %v892_v22 }
 0x2ff   : > { %1328 = vmatpush.bf16.msra.mxu0 %v1088_v23  ;;  %1363 = vmatpush.bf16.msrb.mxu1 %v943_v3 }
 0x302   : > { %1378 = vmatpush.bf16.msrb.mxu2 %v1097_v61  ;;  %1329 = vmatmul.bf16.vlgmr.msra.gmra.mxu0 %v2726_v11 }
 0x303   : > { %1393 = vmatpush.bf16.msrb.mxu0 %v1189_v34  ;;  %v1024_v52 = vpop.permute.xlu1 %1023 }
 0x304   : > { %v1093_v17 = vsel %vm1085_vm5, %v1022_v59, %v1024_v52  ;;  %v1239_v50 = vpop.f32.mrf.mxu3 }
 0x305   : > { %v882_v13 = vpop.permute.xlu0 %881 }
 0x306   : > { %1379 = vmatpush.bf16.msrb.mxu2 %v1093_v17  ;;  %v939_v42 = vsel %vm923_vm6, %v2830_v26, %v882_v13 }
 0x307   : > { %1364 = vmatpush.bf16.msrb.mxu1 %v939_v42 }
 0x30b   : > { %v852_v24 = vpop.permute.xlu1 %851 }
 0x30c   : > { %v1241_v5 = vpop.f32.mrf.mxu3  ;;  %v927_v54 = vsel %vm923_vm6, %v850_v45, %v852_v24  ;;  %v1399_v45 = vlaneseq }
 0x30d   : > { %v872_v40 = vpop.permute.xlu0 %871 }
 0x30e   : > { %v935_v27 = vsel %vm923_vm6, %v2787_v19, %v872_v40  ;;  %v1400_v16 = vand.u32 127, %v1399_v45 }
 0x30f   : > { %1365 = vmatpush.bf16.msrb.mxu1 %v935_v27 }
 0x310   : > { %v1401_v48 = vadd.s32 128, %v1400_v16  ;;  %v1404_v29 = vcvt.s32.f32 %v1400_v16  ;;  %v1402_v7 = vadd.s32 256, %v1400_v16  ;;  %v1403_v49 = vadd.s32 384, %v1400_v16 }
 0x312   : > { %1599 = vmatmul.msk.bf16.vlgmr.msrb.gmra.mxu0 %vm1175_vm11, %v2612_v33  ;;  %v1405_v0 = vcvt.s32.f32 %v1401_v48  ;;  %v1408_v46 = vadd.f32 0.5, %v1404_v29  ;;  %v1406_v41 = vcvt.s32.f32 %v1402_v7  ;;  %v1407_v1 = vcvt.s32.f32 %v1403_v49 }
 0x313   : > { %1366 = vmatpush.bf16.msrb.mxu1 %v931_v18 }
 0x314   : > { %v1409_v59 = vadd.f32 0.5, %v1405_v0  ;;  %v1412_v55 = vmul.f32 0.045454547, %v1408_v46  ;;  %v1410_v8 = vadd.f32 0.5, %v1406_v41  ;;  %v1411_v23 = vadd.f32 0.5, %v1407_v1 }
 0x315   : > { %v1014_v60 = vpop.permute.xlu0 %1013  ;;  %v1200_v4 = vpop.f32.mrf.mxu0 }
 0x316   : > { %v1089_v26 = vsel %vm1085_vm5, %v1012_v21, %v1014_v60  ;;  %v1413_v20 = vmul.f32 0.045454547, %v1409_v59  ;;  %v1416_v21 = vfloor.f32 %v1412_v55  ;;  %v1414_v22 = vmul.f32 0.045454547, %v1410_v8 }
 0x317   : > { %1367 = vmatpush.bf16.msrb.mxu1 %v927_v54  ;;  %1380 = vmatpush.bf16.msrb.mxu2 %v1089_v26  ;;  %v1415_v61 = vmul.f32 0.045454547, %v1411_v23  ;;  %v1460_v23 = vld [vmem:[%s2950_s2] sm:$0xff] }
 0x318   : > { %v1417_v15 = vfloor.f32 %v1413_v20  ;;  %v1420_v3 = vmul.f32 22.0, %v1416_v21  ;;  %v1418_v34 = vfloor.f32 %v1414_v22  ;;  %vm1428_vm6 = vcmp.ge.f32.partialorder %v1416_v21, 3.0 }
 0x319   : > { %vm1432_vm2 = vcmp.lt.f32.partialorder %v1416_v21, 19.0  ;;  %v1419_v42 = vfloor.f32 %v1415_v61 }
 0x31a   : > { %1368 = vmatmul.bf16.vlgmr.msrb.gmra.mxu1 %v2764_v12  ;;  %1381 = vmatmul.bf16.vlgmr.msrb.gmra.mxu2 %v2726_v11  ;;  %v1421_v52 = vmul.f32 22.0, %v1417_v15  ;;  %v1424_v17 = vsub.f32 %v1404_v29, %v1420_v3  ;;  %vm1429_vm5 = vcmp.ge.f32.partialorder %v1417_v15, 3.0  ;;  %vm1433_vm7 = vcmp.lt.f32.partialorder %v1417_v15, 19.0  ;;  %vm1436_vm8 = vmand %vm1428_vm6, %vm1432_vm2 }
 0x31b   : > { %vm1430_vm10 = vcmp.ge.f32.partialorder %v1418_v34, 3.0  ;;  %vm1434_vm11 = vcmp.lt.f32.partialorder %v1418_v34, 19.0  ;;  %v1423_v27 = vmul.f32 22.0, %v1419_v42  ;;  %vm1437_vm12 = vmand %vm1429_vm5, %vm1433_vm7  ;;  %vm1431_vm6 = vcmp.ge.f32.partialorder %v1419_v42, 3.0 }
 0x31c   : > { %v1226_v56 = vpop.f32.mrf.mxu2  ;;  %v1425_v40 = vsub.f32 %v1405_v0, %v1421_v52  ;;  %vm1440_vm9 = vcmp.ge.f32.partialorder %v1424_v17, 3.0  ;;  %vm1448_vm15 = vcmp.lt.f32.partialorder %v1424_v17, 19.0  ;;  %vm1438_vm0 = vmand %vm1430_vm10, %vm1434_vm11  ;;  %vm1435_vm5 = vcmp.lt.f32.partialorder %v1419_v42, 19.0 }
 0x31d   : > { %v1202_v19 = vpop.f32.mrf.mxu0  ;;  %vm1444_vm14 = vmand %vm1436_vm8, %vm1440_vm9  ;;  %v1427_v24 = vsub.f32 %v1407_v1, %v1423_v27  ;;  %v1681_v29 = vmov 0  }
 0x31e   : > { %vm1441_vm13 = vcmp.ge.f32.partialorder %v1425_v40, 3.0  ;;  %vm1449_vm4 = vcmp.lt.f32.partialorder %v1425_v40, 19.0  ;;  %vm1452_vm2 = vmand %vm1444_vm14, %vm1448_vm15  ;;  %vm3025_vm15 = vcmask 818176   ;;  %1641 = vset.pattern.permute.xlu1 %v1681_v29  ;;  %1642 = vset.pattern.permute.xlu0 %v1681_v29 }
 0x31f   : > { %vm1445_vm3 = vmand %vm1437_vm12, %vm1441_vm13  ;;  %vm1443_vm11 = vcmp.ge.f32.partialorder %v1427_v24, 3.0  ;;  %vm1451_vm14 = vcmp.lt.f32.partialorder %v1427_v24, 19.0 }
 0x320   : > { %vm1453_vm9 = vmand %vm1445_vm3, %vm1449_vm4 }
 0x321   : > { %vm1439_vm10 = vmand %vm1431_vm6, %vm1435_vm5  ;;  %vm1529_vm6 = vcmask 818180   ;;  %vm3027_vm5 = vcmask 1043456  }
 0x322   : > { %v1213_v33 = vpop.f32.mrf.mxu1  ;;  %vm1447_vm13 = vmand %vm1439_vm10, %vm1443_vm11 }
 0x323   : > { %v1214_v30 = vadd.f32 %v1213_v33, %v1200_v4  ;;  %v1680_v4 = vmov 0.0   ;;  %vm1455_vm4 = vmand %vm1447_vm13, %vm1451_vm14 }
 0x324   : > { %v1252_v10 = vpop.f32.mrf.mxu3  ;;  %v1228_v36 = vpop.f32.mrf.mxu2  ;;  %v1456_v19 = vsel %vm1452_vm2, 1.0, %v1680_v4 }
 0x325   : > { %v1227_v57 = vadd.f32 %v1226_v56, %v1214_v30 }
 0x327   : > { %v2914_v47 = vadd.f32 %v1239_v50, %v1227_v57  ;;  %v1422_v50 = vmul.f32 22.0, %v1418_v34  ;;  %v1461_v34 = vld [vmem:[%s2951_s3] sm:$0xff] }
 0x329   : > { %v1426_v5 = vsub.f32 %v1406_v41, %v1422_v50  ;;  %v1462_v33 = vmul.f32 %v1456_v19, %v2914_v47 }
 0x32a   : > { %v1215_v58 = vpop.f32.mrf.mxu1 }
 0x32b   : > { %vm1442_vm1 = vcmp.ge.f32.partialorder %v1426_v5, 3.0  ;;  %vm1450_vm8 = vcmp.lt.f32.partialorder %v1426_v5, 19.0 }
 0x32c   : > { %v1254_v62 = vpop.f32.mrf.mxu3  ;;  %vm1446_vm7 = vmand %vm1438_vm0, %vm1442_vm1 }
 0x32d   : > { %vm1454_vm12 = vmand %vm1446_vm7, %vm1450_vm8 }
 0x32e   : > { %v1458_v62 = vsel %vm1454_vm12, 1.0, %v1680_v4  ;;  %vm3026_vm0 = vmmov %vm3025_vm15 }
 0x32f   : > { %vm1530_vm7 = vmor %vm1529_vm6, %vm3027_vm5 }
 0x344   : > { %v1304_v25 = vpop.f32.mrf.mxu3 }
 0x346   : > { %v1291_v14 = vpop.f32.mrf.mxu2 }
 0x34a   : > { %v1278_v35 = vpop.f32.mrf.mxu1 }
 0x34c   : > { %v1306_v28 = vpop.f32.mrf.mxu3 }
 0x34d   : > { %v1265_v6 = vpop.f32.mrf.mxu0 }
 0x34e   : > { %v1293_v53 = vpop.f32.mrf.mxu2  ;;  %v1266_v12 = vadd.f32 %v1265_v6, %v1252_v10  ;;  %v1457_v10 = vsel %vm1453_vm9, 1.0, %v1680_v4 }
 0x350   : > { %v1279_v2 = vadd.f32 %v1278_v35, %v1266_v12  ;;  %v1459_v35 = vsel %vm1455_vm4, 1.0, %v1680_v4 }
 0x352   : > { %v2916_v11 = vadd.f32 %v1291_v14, %v1279_v2  ;;  %v1280_v63 = vpop.f32.mrf.mxu1  ;;  %v1473_v14 = vmul.f32 %v1462_v33, %v1462_v33 }
 0x354   : > { %v1463_v30 = vmul.f32 %v1457_v10, %v2916_v11 }
 0x355   : > { %v1267_v39 = vpop.f32.mrf.mxu0 }
 0x356   : > { %v1474_v28 = vmul.f32 %v1463_v30, %v1463_v30  ;;  %v1466_v12 = vadd.f32 %v1463_v30, %v1462_v33 }
 0x358   : > { %v1477_v39 = vadd.f32 %v1474_v28, %v1473_v14 }
 0x362   : > { %v2918_v43 = vpop.f32.mrf.mxu1 }
 0x364   : > { %v2920_v51 = vpop.f32.mrf.mxu3 }
 0x36a   : > { %v1345_v37 = vpop.f32.mrf.mxu1 }
 0x36c   : > { %v1358_v31 = vpop.f32.mrf.mxu3 }
 0x370   : > { %v1317_v32 = vpop.f32.mrf.mxu2 }
 0x371   : > { %v1318_v18 = vadd.f32 %v1317_v32, %v1304_v25 }
 0x378   : > { %v1319_v38 = vpop.f32.mrf.mxu2 }
 0x37f   : > { %v1330_v44 = vpop.f32.mrf.mxu0 }
 0x380   : > { %v1331_v60 = vadd.f32 %v1330_v44, %v1318_v18 }
 0x382   : > { %v2923_v56 = vadd.f32 %v2918_v43, %v1331_v60 }
 0x384   : > { %v1464_v57 = vmul.f32 %v1458_v62, %v2923_v56 }
 0x386   : > { %v1475_v2 = vmul.f32 %v1464_v57, %v1464_v57  ;;  %v1467_v43 = vadd.f32 %v1466_v12, %v1464_v57 }
 0x387   : > { %v1332_v13 = vpop.f32.mrf.mxu0 }
 0x388   : > { %v1478_v31 = vadd.f32 %v1477_v39, %v1475_v2 }
 0x38f   : > { %v1395_v9 = vpop.f32.mrf.mxu0 }
 0x397   : > { %v1369_v54 = vpop.f32.mrf.mxu1  ;;  %v1397_v26 = vpop.f32.mrf.mxu0 }
 0x398   : > { %v1370_v36 = vadd.f32 %v1369_v54, %v2920_v51 }
 0x39d   : > { %v1382_v58 = vpop.f32.mrf.mxu2 }
 0x39e   : > { %v1383_v25 = vadd.f32 %v1382_v58, %v1370_v36 }
 0x39f   : > { %v1371_v6 = vpop.f32.mrf.mxu1 }
 0x3a0   : > { %v1396_v53 = vadd.f32 %v1395_v9, %v1383_v25 }
 0x3a2   : > { %v1465_v63 = vmul.f32 %v1459_v35, %v1396_v53 }
 0x3a4   : > { %v1476_v51 = vmul.f32 %v1465_v63, %v1465_v63  ;;  %v1469_v37 = vsel %vm3025_vm15, %v1465_v63, 0.0 }
 0x3a5   : > { %v1384_v45 = vpop.f32.mrf.mxu2  ;;  %v1470_v16 = vadd.f32 %v1469_v37, %v1467_v43 }
 0x3a6   : > { %v1479_v32 = vsel %vm3026_vm0, %v1476_v51, 0.0 }
 0x3a7   : > { %1471 = vadd.xlane.f32.xlu2 %v1470_v16  ;;  %v1480_v48 = vadd.f32 %v1479_v32, %v1478_v31 }
 0x3a9   : > { %1481 = vadd.xlane.f32.xlu0 %v1480_v48 }
 0x41a   : > { %v1472_v7 = vpop.xlane.xlu2 %1471 }
 0x41b   : > { %v1483_v0 = vmul.f32 0.00390625, %v1472_v7 }
 0x41c   : > { %v1482_v46 = vpop.xlane.xlu0 %1481 }
 0x41d   : > { %v1484_v41 = vmul.f32 0.00390625, %v1482_v46  ;;  %v1485_v38 = vmul.f32 %v1483_v0, %v1483_v0  ;;  %v1488_v52 = vsub.f32 %v2914_v47, %v1483_v0  ;;  %v1489_v13 = vsub.f32 %v2916_v11, %v1483_v0 }
 0x41e   : > { %v1490_v17 = vsub.f32 %v2923_v56, %v1483_v0  ;;  %v1491_v50 = vsub.f32 %v1396_v53, %v1483_v0 }
 0x41f   : > { %v1486_v49 = vsub.f32 %v1484_v41, %v1485_v38 }
 0x421   : > { %v1487_v59 = vmax.f32 %v1486_v49, 0.0 }
 0x423   : > { %v1492_v55 = vadd.f32 1e-05, %v1487_v59 }
 0x425   : > { %1643 = vrsqrt.f32 %v1492_v55  ;;  %vm1499_vm3 = vweird.f32 %v1492_v55 }
 0x42b   : > { %v1644_v8 = vpop.eup %1643 }
 0x42c   : > { %v1494_v1 = vmul.f32 %v1644_v8, %v1492_v55  ;;  %vm1500_vm1 = vweird.f32 %v1644_v8 }
 0x42d   : > { %vm1501_vm2 = vmor %vm1499_vm3, %vm1500_vm1 }
 0x42e   : > { %v1495_v20 = vmul.f32 %v1644_v8, %v1494_v1 }
 0x430   : > { %v1496_v44 = vmul.f32 0.5, %v1495_v20 }
 0x432   : > { %v1497_v21 = vsub.f32 1.5, %v1496_v44 }
 0x434   : > { %v1498_v22 = vmul.f32 %v1644_v8, %v1497_v21 }
 0x436   : > { %v1502_v15 = vsel %vm1501_vm2, %v1644_v8, %v1498_v22 }
 0x437   : > { %v1503_v3 = vmul.f32 %v1502_v15, %v1460_v23 }
 0x439   : > { %1506 = vperm.xlu1 %1641, %v1503_v3  }
 0x441   : > { %1515 = vperm.xlu1 %1641, %v1461_v34  }
 0x4ab   : > { %v1507_v61 = vpop.permute.xlu1 %1506 }
 0x4ac   : > { %v1509_v42 = vmul.f32 %v1507_v61, %v1488_v52  ;;  %v1510_v40 = vmul.f32 %v1507_v61, %v1489_v13  ;;  %v1511_v5 = vmul.f32 %v1507_v61, %v1490_v17  ;;  %v1512_v27 = vmul.f32 %v1507_v61, %v1491_v50 }
 0x4b3   : > { %v1516_v9 = vpop.permute.xlu1 %1515 }
 0x4b4   : > { %v1518_v18 = vadd.f32 %v1516_v9, %v1509_v42  ;;  %v1519_v24 = vadd.f32 %v1516_v9, %v1510_v40  ;;  %v1520_v60 = vadd.f32 %v1516_v9, %v1511_v5  ;;  %v1521_v54 = vadd.f32 %v1516_v9, %v1512_v27 }
 0x4b6   : > { %v1522_v26 = vmax.f32 %v1518_v18, 0.0  ;;  %v1523_v4 = vmax.f32 %v1519_v24, 0.0  ;;  %v1524_v19 = vmax.f32 %v1520_v60, 0.0  ;;  %v1525_v47 = vmax.f32 %v1521_v54, 0.0 }
 0x4b8   : > { %v1526_v11 = vpack.c.bf16 %v1523_v4, %v1522_v26  ;;  %v1527_v10 = vpack.c.bf16 %v1525_v47, %v1524_v19 }
 0x4ba   : > { %1528 = vst [vmem:[%s197_s9] sm:$0xff] %v1526_v11 }
 0x4bb   : > { %1531 = vst.msk [vmem:[%s197_s9 + $0x8] sm:$0xff] %vm1530_vm7, %v1527_v10 }
 0x4bc PF: > { %s14_s15 = sadd.s32 1, %s1651_s15  }
 0x4bd   : > { %p11_p4 = scmp.ge.s32.totalorder %s14_s15, 4  }
 0x4bf   :  { %13 = sbr.rel (!%p11_p4) target bundleno = 1 (0x1), region = 66 }

// kernel: _lambda_.8
= control target key start
LH: loop header
LB: loop body
LE: loop exit
PB: predicated region body
PF: predicated region fallthrough
CT: control target
= control target key end

     0   :  { %s544_s15 = smov 0   ;;  %s602_s0 = inlined_call_operand.vmem [shape: bf16[2,32,81], index: 0, kind: input, shape index: {}]   ;;  %s603_s1 = inlined_call_operand.vmem [shape: bf16[16,128], index: 1, kind: input, shape index: {}]   ;;  %s604_s2 = inlined_call_operand.vmem [shape: f32[16,1], index: 2, kind: input, shape index: {}]   ;;  %s605_s3 = inlined_call_operand.vmem [shape: f32[16,1], index: 3, kind: input, shape index: {}]   ;;  %s606_s4 = inlined_call_operand.vmem [shape: bf16[2,16,81], index: 4, kind: output, shape index: {}]  }
   0x1 LB: > { %s458_s16 = sadd.s32 4294967295, %s512_s15   ;;  %p462_p0 = scmp.ge.s32.totalorder %s512_s15, 1  ;;  %s512_s15 = sphi %s544_s15, %s14_s15  }
   0x2   : > { %p162_p1 = scmp.lt.s32.totalorder %s512_s15, 3 }
   0x4   : > { %p163_p2 = pnand %p462_p0, %p162_p1 }
   0x5   : > { %p188_p3 = scmp.lt.s32.totalorder (!%p163_p2), %s458_s16, 1  ;;  %s514_s21 = smov (!%p163_p2), 127  }
   0x6   : > { %166 = sbr.rel (%p163_p2) target bundleno = 586 (0x24a), region = 36  ;;  %s515_s22 = smov (!%p163_p2), 119  }
   0x7   : > { %s516_s23 = smov (!%p163_p2), 118  }
   0xb   : > { %s608_s16 = smov (!%p188_p3, %s458_s16), 1  ;;  %vm213_vm0 = vcmask 662528   ;;  %vm249_vm1 = vcmask 1043456   ;;  %v485_v26 = vld [vmem:[%s603_s1] sm:$0xff]  ;;  %v300_v27 = vlaneseq  ;;  %v517_v35 = vmov 0.0  }
   0xc   : > { %s481_s17 = sshll.u32 %s608_s16, 4  ;;  %v518_v47 = vmov 0   ;;  %v318_v63 = vld [vmem:[%s605_s3] sm:$0xff]  ;;  %s482_s8 = sshll.u32 %s608_s16, 3  ;;  %vm400_vm15 = vcmask 658432  }
   0xd   : > { %s192_s20 = scalar_lea.vmem %s602_s0, %s481_s17  ;;  %v301_v28 = vand.u32 127, %v300_v27  ;;  %499 = vset.pattern.permute.xlu0 %v518_v47  ;;  %500 = vset.pattern.permute.xlu1 %v518_v47  ;;  %s197_s11 = scalar_lea.vmem %s606_s4, %s482_s8 }
   0xe   : > { %v484_v0 = vld [vmem:[%s192_s20 + $0x8] sm:$0xff]  ;;  %v483_v3 = vld [vmem:[%s192_s20] sm:$0xff]  ;;  %501 = vset.pattern.permute.xlu2 %v518_v47 }
   0xf   : > { %v218_v1 = vsel %vm213_vm0, %v484_v0, 0  ;;  %v216_v4 = vsel %vm213_vm0, %v483_v3, 0  ;;  %v302_v29 = vcvt.s32.f32 %v301_v28 }
  0x10   : > { %v236_v2 = vrot.slane %v218_v1, 4  ;;  %243 = vrot.lane.b32.xlu1 %v218_v1, %s514_s21  ;;  %v222_v5 = vrot.slane %v216_v4, 4 }
  0x11   : > { %v303_v30 = vadd.f32 0.5, %v302_v29 }
  0x12   : > { %245 = vrot.lane.b32.xlu0 %v236_v2, %s515_s22  ;;  %241 = vrot.lane.b32.xlu2 %v236_v2, %s516_s23 }
  0x13   : > { %v304_v31 = vmul.f32 0.11111111, %v303_v30 }
  0x15   : > { %v305_v32 = vfloor.f32 %v304_v31 }
  0x17   : > { %v306_v33 = vmul.f32 9.0, %v305_v32  ;;  %vm308_vm2 = vcmp.ge.f32.partialorder %v305_v32, 0.0  ;;  %vm309_vm3 = vcmp.lt.f32.partialorder %v305_v32, 8.0 }
  0x18   : > { %239 = vrot.lane.b32.xlu1 %v218_v1, %s515_s22  ;;  %vm310_vm4 = vmand %vm308_vm2, %vm309_vm3 }
  0x19   : > { %v307_v34 = vsub.f32 %v302_v29, %v306_v33 }
  0x1a   : > { %247 = vrot.lane.b32.xlu0 %v218_v1, %s516_s23  ;;  %237 = vrot.lane.b32.xlu2 %v236_v2, %s514_s21 }
  0x1b   : > { %vm311_vm5 = vcmp.ge.f32.partialorder %v307_v34, 0.0  ;;  %vm313_vm7 = vcmp.lt.f32.partialorder %v307_v34, 8.0 }
  0x1c   : > { %vm312_vm6 = vmand %vm310_vm4, %vm311_vm5 }
  0x1d   : > { %vm314_vm8 = vmand %vm312_vm6, %vm313_vm7 }
  0x1e   : > { %v315_v36 = vsel %vm314_vm8, 1.0, %v517_v35 }
  0x20   : > { %233 = vrot.lane.b32.xlu1 %v216_v4, %s516_s23 }
  0x22   : > { %231 = vrot.lane.b32.xlu0 %v222_v5, %s515_s22  ;;  %229 = vrot.lane.b32.xlu2 %v216_v4, %s514_s21 }
  0x28   : > { %227 = vrot.lane.b32.xlu1 %v222_v5, %s516_s23 }
  0x2a   : > { %225 = vrot.lane.b32.xlu0 %v216_v4, %s515_s22  ;;  %223 = vrot.lane.b32.xlu2 %v222_v5, %s514_s21 }
  0x6c   : > { %v242_v8 = vpop.permute.xlu2 %241 }
  0x74   : > { %v238_v12 = vpop.permute.xlu2 %237 }
  0x75   : > { %v266_v17 = vsel %vm249_vm1, %v218_v1, %v238_v12 }
  0x7c   : > { %v230_v18 = vpop.permute.xlu2 %229 }
  0x7d   : > { %v259_v20 = vsel %vm249_vm1, %v222_v5, %v230_v18 }
  0x82   : > { %v244_v7 = vpop.permute.xlu1 %243 }
  0x83   : > { %v274_v13 = vsel %vm249_vm1, %v236_v2, %v244_v7 }
  0x84   : > { %v246_v6 = vpop.permute.xlu0 %245  ;;  %v224_v24 = vpop.permute.xlu2 %223 }
  0x85   : > { %v251_v25 = vsel %vm249_vm1, %v216_v4, %v224_v24 }
  0x8a   : > { %v240_v11 = vpop.permute.xlu1 %239 }
  0x8b   : > { %v270_v14 = vsel %vm249_vm1, %v240_v11, %v242_v8  ;;  %v316_v8 = vld [vmem:[%s604_s2] sm:$0xff] }
  0x8c   : > { %v248_v9 = vpop.permute.xlu0 %247 }
  0x8d   : > { %v278_v10 = vsel %vm249_vm1, %v246_v6, %v248_v9 }
  0x8e   : > { %286 = vmatpush.bf16.msra.mxu0 %v278_v10 }
  0x92   : > { %287 = vmatpush.bf16.msra.mxu0 %v274_v13  ;;  %v234_v15 = vpop.permute.xlu1 %233 }
  0x94   : > { %v232_v16 = vpop.permute.xlu0 %231 }
  0x95   : > { %v263_v19 = vsel %vm249_vm1, %v232_v16, %v234_v15  ;;  %v317_v15 = vld [vmem:[%s604_s2 + $0x8] sm:$0xff] }
  0x96   : > { %288 = vmatpush.bf16.msra.mxu0 %v270_v14 }
  0x9a   : > { %289 = vmatpush.bf16.msra.mxu0 %v266_v17  ;;  %v228_v21 = vpop.permute.xlu1 %227 }
  0x9c   : > { %v226_v22 = vpop.permute.xlu0 %225 }
  0x9d   : > { %v255_v23 = vsel %vm249_vm1, %v226_v22, %v228_v21 }
  0x9e   : > { %290 = vmatpush.bf16.msra.mxu0 %v263_v19  ;;  %v319_v19 = vld [vmem:[%s605_s3 + $0x8] sm:$0xff] }
  0xa2   : > { %291 = vmatpush.bf16.msra.mxu0 %v259_v20 }
  0xa6   : > { %292 = vmatpush.bf16.msra.mxu0 %v255_v23 }
  0xaa   : > { %293 = vmatpush.bf16.msra.mxu0 %v251_v25 }
  0xad   : > { %294 = vmatmul.bf16.vlgmr.msra.gmra.mxu0 %v485_v26 }
 0x12a   : > { %v571_v37 = vpop.f32.mrf.mxu0 }
 0x12b   : > { %v320_v38 = vmul.f32 %v315_v36, %v571_v37 }
 0x12d   : > { %v322_v39 = vsel %vm213_vm0, %v320_v38, 0.0  ;;  %v328_v40 = vmul.f32 %v320_v38, %v320_v38 }
 0x12e   : > { %323 = vadd.xlane.f32.xlu0 %v322_v39 }
 0x12f   : > { %v330_v41 = vsel %vm213_vm0, %v328_v40, 0.0 }
 0x130   : > { %331 = vadd.xlane.f32.xlu2 %v330_v41 }
 0x132   : > { %v576_v42 = vpop.f32.mrf.mxu0 }
 0x133   : > { %v321_v43 = vmul.f32 %v315_v36, %v576_v42 }
 0x135   : > { %v325_v44 = vsel %vm213_vm0, %v321_v43, 0.0  ;;  %v329_v45 = vmul.f32 %v321_v43, %v321_v43 }
 0x136   : > { %326 = vadd.xlane.f32.xlu1 %v325_v44 }
 0x137   : > { %v333_v46 = vsel %vm213_vm0, %v329_v45, 0.0 }
 0x138   : > { %334 = vadd.xlane.f32.xlu2 %v333_v46 }
 0x150   : > { %386 = vperm.xlu2 %501, %v318_v63  }
 0x1a1   : > { %v324_v48 = vpop.xlane.xlu0 %323 }
 0x1a2   : > { %v336_v49 = vmul.f32 0.015625, %v324_v48 }
 0x1a3   : > { %v332_v50 = vpop.xlane.xlu2 %331 }
 0x1a4   : > { %v340_v51 = vmul.f32 %v336_v49, %v336_v49  ;;  %v338_v52 = vmul.f32 0.015625, %v332_v50  ;;  %v346_v20 = vsub.f32 %v571_v37, %v336_v49 }
 0x1a6   : > { %v342_v53 = vsub.f32 %v338_v52, %v340_v51 }
 0x1a8   : > { %v344_v54 = vmax.f32 %v342_v53, 0.0 }
 0x1a9   : > { %v327_v55 = vpop.xlane.xlu1 %326 }
 0x1aa   : > { %v348_v56 = vadd.f32 1e-05, %v344_v54  ;;  %v337_v57 = vmul.f32 0.015625, %v327_v55 }
 0x1ab   : > { %v335_v58 = vpop.xlane.xlu2 %334 }
 0x1ac   : > { %502 = vrsqrt.f32 %v348_v56  ;;  %v341_v59 = vmul.f32 %v337_v57, %v337_v57  ;;  %v339_v60 = vmul.f32 0.015625, %v335_v58  ;;  %vm356_vm10 = vweird.f32 %v348_v56 }
 0x1ad   : > { %v347_v28 = vsub.f32 %v576_v42, %v337_v57 }
 0x1ae   : > { %v343_v61 = vsub.f32 %v339_v60, %v341_v59 }
 0x1b0   : > { %v345_v62 = vmax.f32 %v343_v61, 0.0 }
 0x1b2   : > { %v503_v0 = vpop.eup %502  ;;  %v349_v1 = vadd.f32 1e-05, %v345_v62 }
 0x1b3   : > { %v351_v2 = vmul.f32 %v503_v0, %v348_v56  ;;  %vm357_vm9 = vweird.f32 %v503_v0  ;;  %v387_v22 = vpop.permute.xlu2 %386 }
 0x1b4   : > { %504 = vrsqrt.f32 %v349_v1  ;;  %vm358_vm11 = vmor %vm356_vm10, %vm357_vm9  ;;  %vm366_vm13 = vweird.f32 %v349_v1 }
 0x1b5   : > { %v352_v3 = vmul.f32 %v503_v0, %v351_v2 }
 0x1b7   : > { %v353_v4 = vmul.f32 0.5, %v352_v3 }
 0x1b9   : > { %v354_v5 = vsub.f32 1.5, %v353_v4 }
 0x1ba   : > { %v505_v6 = vpop.eup %504 }
 0x1bb   : > { %v361_v7 = vmul.f32 %v505_v6, %v349_v1  ;;  %v355_v9 = vmul.f32 %v503_v0, %v354_v5  ;;  %vm367_vm12 = vweird.f32 %v505_v6 }
 0x1bc   : > { %vm368_vm14 = vmor %vm366_vm13, %vm367_vm12 }
 0x1bd   : > { %v362_v10 = vmul.f32 %v505_v6, %v361_v7  ;;  %v359_v11 = vsel %vm358_vm11, %v503_v0, %v355_v9 }
 0x1be   : > { %v370_v12 = vmul.f32 %v359_v11, %v316_v8 }
 0x1bf   : > { %v363_v13 = vmul.f32 0.5, %v362_v10 }
 0x1c0   : > { %374 = vperm.xlu0 %499, %v370_v12  }
 0x1c1   : > { %v364_v14 = vsub.f32 1.5, %v363_v13 }
 0x1c3   : > { %v365_v16 = vmul.f32 %v505_v6, %v364_v14 }
 0x1c5   : > { %v369_v17 = vsel %vm368_vm14, %v505_v6, %v365_v16 }
 0x1c6   : > { %v371_v18 = vmul.f32 %v369_v17, %v317_v15 }
 0x1c8   : > { %379 = vperm.xlu1 %500, %v371_v18  }
 0x1d0   : > { %391 = vperm.xlu1 %500, %v319_v19  }
 0x232   : > { %v375_v21 = vpop.permute.xlu0 %374 }
 0x233   : > { %v382_v23 = vmul.f32 %v375_v21, %v346_v20 }
 0x235   : > { %v394_v24 = vadd.f32 %v387_v22, %v382_v23 }
 0x237   : > { %v396_v25 = vmax.f32 %v394_v24, 0.0 }
 0x239   : > { %v398_v26 = vpack.c.bf16 %v396_v25, %v396_v25 }
 0x23a   : > { %v380_v27 = vpop.permute.xlu1 %379 }
 0x23b   : > { %401 = vst.msk [vmem:[%s197_s11] sm:$0xf] %vm400_vm15, %v398_v26  ;;  %v383_v29 = vmul.f32 %v380_v27, %v347_v28 }
 0x242   : > { %v392_v30 = vpop.permute.xlu1 %391 }
 0x243   : > { %v395_v31 = vadd.f32 %v392_v30, %v383_v29 }
 0x245   : > { %v397_v32 = vmax.f32 %v395_v31, 0.0 }
 0x247   : > { %v399_v33 = vpack.c.bf16 %v397_v32, %v397_v32 }
 0x249   : > { %402 = vst.msk [vmem:[%s197_s11 + $0x4] sm:$0xf] %vm400_vm15, %v399_v33 }
 0x24a PF: > { %s14_s15 = sadd.s32 1, %s512_s15  }
 0x24b   : > { %p11_p4 = scmp.ge.s32.totalorder %s14_s15, 4  }
 0x24d   :  { %13 = sbr.rel (!%p11_p4) target bundleno = 1 (0x1), region = 66 }

// kernel: _lambda_.9
= control target key start
LH: loop header
LB: loop body
LE: loop exit
PB: predicated region body
PF: predicated region fallthrough
CT: control target
= control target key end

     0   :  { %s718_s15 = smov 0   ;;  %s846_s0 = inlined_call_operand.vmem [shape: bf16[2,64,25], index: 0, kind: input, shape index: {}]   ;;  %s847_s1 = inlined_call_operand.vmem [shape: bf16[32,256], index: 1, kind: input, shape index: {}]   ;;  %s848_s2 = inlined_call_operand.vmem [shape: f32[32,1], index: 2, kind: input, shape index: {}]   ;;  %s849_s3 = inlined_call_operand.vmem [shape: f32[32,1], index: 3, kind: input, shape index: {}]   ;;  %s850_s4 = inlined_call_operand.vmem [shape: bf16[2,32,25], index: 4, kind: output, shape index: {}]  }
   0x1 LB: > { %s587_s16 = sadd.s32 4294967295, %s686_s15   ;;  %p591_p0 = scmp.ge.s32.totalorder %s686_s15, 1  ;;  %s686_s15 = sphi %s718_s15, %s14_s15  }
   0x2   : > { %p162_p1 = scmp.lt.s32.totalorder %s686_s15, 3 }
   0x4   : > { %p163_p2 = pnand %p591_p0, %p162_p1 }
   0x5   : > { %p188_p3 = scmp.lt.s32.totalorder (!%p163_p2), %s587_s16, 1  ;;  %s688_s21 = smov (!%p163_p2), 123  }
   0x6   : > { %166 = sbr.rel (%p163_p2) target bundleno = 600 (0x258), region = 36  ;;  %s689_s22 = smov (!%p163_p2), 122  }
   0x7   : > { %s690_s23 = smov (!%p163_p2), 127  }
   0xb   : > { %s852_s16 = smov (!%p188_p3, %s587_s16), 1  ;;  %vm227_vm0 = vcmask 203776   ;;  %v614_v18 = vld [vmem:[%s847_s1] sm:$0xf]  ;;  %v637_v19 = vld [vmem:[%s847_s1 + $0x4] sm:$0xf0]  ;;  %v343_v32 = vlaneseq }
   0xc   : > { %s630_s17 = sshll.u32 %s852_s16, 5  ;;  %v622_v20 = vld [vmem:[%s847_s1 + $0x10] sm:$0xf]  ;;  %v639_v21 = vld [vmem:[%s847_s1 + $0x14] sm:$0xf0]  ;;  %v615_v23 = vor.u32 %v637_v19, %v614_v18  ;;  %v691_v42 = vmov 0.0  }
   0xd   : > { %s192_s20 = scalar_lea.vmem %s846_s0, %s630_s17  ;;  %v623_v24 = vor.u32 %v639_v21, %v622_v20  ;;  %v636_v26 = vld [vmem:[%s847_s1 + $0x4] sm:$0xf]  ;;  %v616_v27 = vld [vmem:[%s847_s1 + $0x8] sm:$0xf0]  ;;  %v638_v28 = vld [vmem:[%s847_s1 + $0x14] sm:$0xf] }
   0xe   : > { %v633_v0 = vld [vmem:[%s192_s20 + $0x8] sm:$0xff]  ;;  %v635_v2 = vld [vmem:[%s192_s20 + $0x18] sm:$0xff]  ;;  %v634_v4 = vld [vmem:[%s192_s20 + $0x10] sm:$0xff]  ;;  %v619_v30 = vor.u32 %v636_v26, %v616_v27  ;;  %v344_v33 = vand.u32 127, %v343_v32  ;;  %s631_s6 = sshll.u32 %s852_s16, 4 }
   0xf   : > { %v233_v1 = vsel %vm227_vm0, %v633_v0, 0  ;;  %v239_v3 = vsel %vm227_vm0, %v635_v2, 0  ;;  %v632_v5 = vld [vmem:[%s192_s20] sm:$0xff]  ;;  %v735_v6 = vsel %vm227_vm0, %v634_v4, 0  ;;  %v624_v29 = vld [vmem:[%s847_s1 + $0x18] sm:$0xf0]  ;;  %s197_s9 = scalar_lea.vmem %s850_s4, %s631_s6 }
  0x10   : > { %259 = vrot.lane.b32.xlu1 %v233_v1, %s688_s21  ;;  %262 = vrot.lane.b32.xlu0 %v233_v1, %s689_s22  ;;  %v230_v7 = vsel %vm227_vm0, %v632_v5, 0  ;;  %v627_v31 = vor.u32 %v638_v28, %v624_v29  ;;  %v345_v34 = vcvt.s32.f32 %v344_v33 }
  0x11   : > { %256 = vrot.lane.b32.xlu2 %v233_v1, %s690_s23 }
  0x12   : > { %v346_v35 = vadd.f32 0.5, %v345_v34 }
  0x14   : > { %v347_v36 = vmul.f32 0.2, %v346_v35 }
  0x16   : > { %v348_v37 = vfloor.f32 %v347_v36 }
  0x18   : > { %279 = vrot.lane.b32.xlu1 %v239_v3, %s688_s21  ;;  %282 = vrot.lane.b32.xlu0 %v239_v3, %s689_s22  ;;  %v349_v38 = vmul.f32 5.0, %v348_v37  ;;  %vm351_vm1 = vcmp.ge.f32.partialorder %v348_v37, 0.0  ;;  %vm352_vm2 = vcmp.lt.f32.partialorder %v348_v37, 4.0 }
  0x19   : > { %276 = vrot.lane.b32.xlu2 %v239_v3, %s690_s23  ;;  %vm353_vm3 = vmand %vm351_vm1, %vm352_vm2 }
  0x1a   : > { %v350_v39 = vsub.f32 %v345_v34, %v349_v38 }
  0x1c   : > { %vm354_vm4 = vcmp.ge.f32.partialorder %v350_v39, 0.0  ;;  %vm356_vm6 = vcmp.lt.f32.partialorder %v350_v39, 4.0 }
  0x1d   : > { %vm355_vm5 = vmand %vm353_vm3, %vm354_vm4  ;;  %vm527_vm4 = vcmask 199680  }
  0x1e   : > { %vm357_vm7 = vmand %vm355_vm5, %vm356_vm6 }
  0x1f   : > { %v358_v43 = vsel %vm357_vm7, 1.0, %v691_v42 }
  0x20   : > { %272 = vrot.lane.b32.xlu1 %v735_v6, %s689_s22  ;;  %252 = vrot.lane.b32.xlu0 %v230_v7, %s689_s22 }
  0x21   : > { %249 = vrot.lane.b32.xlu2 %v230_v7, %s688_s21 }
  0x28   : > { %246 = vrot.lane.b32.xlu1 %v230_v7, %s690_s23  ;;  %269 = vrot.lane.b32.xlu0 %v735_v6, %s688_s21 }
  0x29   : > { %266 = vrot.lane.b32.xlu2 %v735_v6, %s690_s23 }
  0x6b   : > { %v257_v8 = vpop.permute.xlu2 %256 }
  0x73   : > { %v277_v11 = vpop.permute.xlu2 %276 }
  0x7b   : > { %v250_v16 = vpop.permute.xlu2 %249 }
  0x82   : > { %v260_v9 = vpop.permute.xlu1 %259  ;;  %v263_v10 = vpop.permute.xlu0 %262 }
  0x83   : > { %305 = vmatpush.bf16.msra.mxu0 %v263_v10  ;;  %640 = vmatpush.bf16.msra.mxu2 %v263_v10  ;;  %v267_v25 = vpop.permute.xlu2 %266 }
  0x87   : > { %306 = vmatpush.bf16.msra.mxu0 %v260_v9  ;;  %641 = vmatpush.bf16.msra.mxu2 %v260_v9  ;;  %v363_v9 = vld [vmem:[%s849_s3] sm:$0xff] }
  0x8a   : > { %v280_v12 = vpop.permute.xlu1 %279  ;;  %v283_v13 = vpop.permute.xlu0 %282 }
  0x8b   : > { %307 = vmatpush.bf16.msra.mxu0 %v257_v8  ;;  %642 = vmatpush.bf16.msra.mxu2 %v257_v8  ;;  %v692_v8 = vmov 0  }
  0x8c   : > { %324 = vmatpush.bf16.msra.mxu1 %v283_v13  ;;  %648 = vmatpush.bf16.msra.mxu3 %v283_v13 }
  0x8d   : > { %671 = vset.pattern.permute.xlu2 %v692_v8  ;;  %669 = vset.pattern.permute.xlu1 %v692_v8 }
  0x8e   : > { %670 = vset.pattern.permute.xlu0 %v692_v8 }
  0x8f   : > { %308 = vmatpush.bf16.msra.mxu0 %v233_v1  ;;  %643 = vmatpush.bf16.msra.mxu2 %v233_v1 }
  0x90   : > { %325 = vmatpush.bf16.msra.mxu1 %v280_v12  ;;  %649 = vmatpush.bf16.msra.mxu3 %v280_v12 }
  0x92   : > { %v273_v14 = vpop.permute.xlu1 %272  ;;  %v253_v15 = vpop.permute.xlu0 %252 }
  0x93   : > { %309 = vmatpush.bf16.msra.mxu0 %v253_v15  ;;  %644 = vmatpush.bf16.msra.mxu2 %v253_v15 }
  0x94   : > { %326 = vmatpush.bf16.msra.mxu1 %v277_v11  ;;  %650 = vmatpush.bf16.msra.mxu3 %v277_v11 }
  0x97   : > { %310 = vmatpush.bf16.msra.mxu0 %v250_v16  ;;  %645 = vmatpush.bf16.msra.mxu2 %v250_v16 }
  0x98   : > { %327 = vmatpush.bf16.msra.mxu1 %v239_v3  ;;  %651 = vmatpush.bf16.msra.mxu3 %v239_v3 }
  0x9a   : > { %v247_v17 = vpop.permute.xlu1 %246  ;;  %v270_v22 = vpop.permute.xlu0 %269 }
  0x9b   : > { %311 = vmatpush.bf16.msra.mxu0 %v247_v17  ;;  %646 = vmatpush.bf16.msra.mxu2 %v247_v17 }
  0x9c   : > { %328 = vmatpush.bf16.msra.mxu1 %v273_v14  ;;  %652 = vmatpush.bf16.msra.mxu3 %v273_v14 }
  0x9f   : > { %312 = vmatpush.bf16.msra.mxu0 %v230_v7  ;;  %647 = vmatpush.bf16.msra.mxu2 %v230_v7 }
  0xa0   : > { %329 = vmatpush.bf16.msra.mxu1 %v270_v22  ;;  %653 = vmatpush.bf16.msra.mxu3 %v270_v22 }
  0xa2   : > { %313 = vmatmul.bf16.vlgmr.msra.gmra.mxu0 %v615_v23  ;;  %318 = vmatmul.bf16.vlgmr.msra.gmra.mxu2 %v623_v24 }
  0xa4   : > { %330 = vmatpush.bf16.msra.mxu1 %v267_v25  ;;  %654 = vmatpush.bf16.msra.mxu3 %v267_v25 }
  0xa8   : > { %331 = vmatpush.bf16.msra.mxu1 %v735_v6  ;;  %655 = vmatpush.bf16.msra.mxu3 %v735_v6 }
  0xab   : > { %332 = vmatmul.bf16.vlgmr.msra.gmra.mxu1 %v619_v30  ;;  %337 = vmatmul.bf16.vlgmr.msra.gmra.mxu3 %v627_v31 }
 0x11f   : > { %v314_v40 = vpop.f32.mrf.mxu0 }
 0x125   : > { %v319_v45 = vpop.f32.mrf.mxu2 }
 0x127   : > { %v316_v50 = vpop.f32.mrf.mxu0 }
 0x128   : > { %v333_v41 = vpop.f32.mrf.mxu1 }
 0x129   : > { %v767_v44 = vadd.f32 %v333_v41, %v314_v40 }
 0x12b   : > { %v367_v46 = vmul.f32 %v358_v43, %v767_v44 }
 0x12d   : > { %v371_v47 = vsel %vm227_vm0, %v367_v46, 0.0  ;;  %v383_v54 = vmul.f32 %v367_v46, %v367_v46  ;;  %v321_v57 = vpop.f32.mrf.mxu2 }
 0x12e   : > { %v338_v48 = vpop.f32.mrf.mxu3  ;;  %372 = vadd.xlane.f32.xlu0 %v371_v47 }
 0x12f   : > { %v771_v49 = vadd.f32 %v338_v48, %v319_v45  ;;  %v387_v59 = vsel %vm227_vm0, %v383_v54, 0.0 }
 0x130   : > { %v335_v51 = vpop.f32.mrf.mxu1 }
 0x131   : > { %v773_v52 = vadd.f32 %v335_v51, %v316_v50  ;;  %v369_v53 = vmul.f32 %v358_v43, %v771_v49  ;;  %v359_v50 = vld [vmem:[%s848_s2] sm:$0xff] }
 0x133   : > { %v377_v55 = vsel %vm227_vm0, %v369_v53, 0.0  ;;  %v368_v56 = vmul.f32 %v358_v43, %v773_v52  ;;  %v385_v4 = vmul.f32 %v369_v53, %v369_v53 }
 0x134   : > { %378 = vadd.xlane.f32.xlu2 %v377_v55 }
 0x135   : > { %v374_v58 = vsel %vm227_vm0, %v368_v56, 0.0  ;;  %v384_v63 = vmul.f32 %v368_v56, %v368_v56  ;;  %v393_v5 = vsel %vm227_vm0, %v385_v4, 0.0 }
 0x136   : > { %v340_v60 = vpop.f32.mrf.mxu3  ;;  %375 = vadd.xlane.f32.xlu1 %v374_v58  ;;  %388 = vadd.xlane.f32.xlu0 %v387_v59 }
 0x137   : > { %v780_v61 = vadd.f32 %v340_v60, %v321_v57  ;;  %v390_v2 = vsel %vm227_vm0, %v384_v63, 0.0 }
 0x139   : > { %v370_v62 = vmul.f32 %v358_v43, %v780_v61 }
 0x13b   : > { %v380_v0 = vsel %vm227_vm0, %v370_v62, 0.0  ;;  %v386_v1 = vmul.f32 %v370_v62, %v370_v62 }
 0x13c   : > { %381 = vadd.xlane.f32.xlu2 %v380_v0 }
 0x13d   : > { %v396_v3 = vsel %vm227_vm0, %v386_v1, 0.0 }
 0x13e   : > { %391 = vadd.xlane.f32.xlu1 %v390_v2  ;;  %397 = vadd.xlane.f32.xlu0 %v396_v3  ;;  %v360_v2 = vld [vmem:[%s848_s2 + $0x8] sm:$0xff] }
 0x144   : > { %394 = vadd.xlane.f32.xlu2 %v393_v5 }
 0x15c   : > { %497 = vperm.xlu2 %671, %v363_v9  }
 0x1a1   : > { %v373_v6 = vpop.xlane.xlu0 %372 }
 0x1a2   : > { %v787_v7 = vmul.f32 0.0625, %v373_v6  ;;  %v364_v6 = vld [vmem:[%s849_s3 + $0x8] sm:$0xff] }
 0x1a4   : > { %v407_v13 = vmul.f32 %v787_v7, %v787_v7 }
 0x1a7   : > { %v379_v10 = vpop.xlane.xlu2 %378 }
 0x1a8   : > { %v802_v29 = vmul.f32 0.0625, %v379_v10 }
 0x1a9   : > { %v376_v11 = vpop.xlane.xlu1 %375  ;;  %v389_v12 = vpop.xlane.xlu0 %388 }
 0x1aa   : > { %v403_v14 = vmul.f32 0.0625, %v389_v12  ;;  %v794_v16 = vmul.f32 0.0625, %v376_v11  ;;  %v409_v34 = vmul.f32 %v802_v29, %v802_v29  ;;  %v361_v11 = vld [vmem:[%s848_s2 + $0x10] sm:$0xff] }
 0x1ac   : > { %v411_v15 = vsub.f32 %v403_v14, %v407_v13  ;;  %v408_v23 = vmul.f32 %v794_v16, %v794_v16  ;;  %v362_v14 = vld [vmem:[%s848_s2 + $0x18] sm:$0xff] }
 0x1ae   : > { %v415_v17 = vmax.f32 %v411_v15, 0.0 }
 0x1af   : > { %v382_v18 = vpop.xlane.xlu2 %381 }
 0x1b0   : > { %v423_v19 = vadd.f32 1e-05, %v415_v17  ;;  %v796_v20 = vmul.f32 0.0625, %v382_v18  ;;  %v365_v18 = vld [vmem:[%s849_s3 + $0x10] sm:$0xff] }
 0x1b1   : > { %v392_v21 = vpop.xlane.xlu1 %391  ;;  %v398_v22 = vpop.xlane.xlu0 %397 }
 0x1b2   : > { %672 = vrsqrt.f32 %v423_v19  ;;  %v410_v24 = vmul.f32 %v796_v20, %v796_v20  ;;  %v404_v25 = vmul.f32 0.0625, %v392_v21  ;;  %v406_v26 = vmul.f32 0.0625, %v398_v22  ;;  %v366_v21 = vld [vmem:[%s849_s3 + $0x18] sm:$0xff] }
 0x1b3   : > { %vm433_vm9 = vweird.f32 %v423_v19 }
 0x1b4   : > { %v412_v27 = vsub.f32 %v404_v25, %v408_v23  ;;  %v414_v28 = vsub.f32 %v406_v26, %v410_v24  ;;  %v419_v23 = vsub.f32 %v767_v44, %v787_v7 }
 0x1b6   : > { %v416_v30 = vmax.f32 %v412_v27, 0.0  ;;  %v418_v31 = vmax.f32 %v414_v28, 0.0  ;;  %v420_v28 = vsub.f32 %v773_v52, %v794_v16 }
 0x1b7   : > { %v395_v32 = vpop.xlane.xlu2 %394 }
 0x1b8   : > { %v673_v33 = vpop.eup %672  ;;  %v424_v35 = vadd.f32 1e-05, %v416_v30  ;;  %v405_v36 = vmul.f32 0.0625, %v395_v32  ;;  %v426_v38 = vadd.f32 1e-05, %v418_v31 }
 0x1b9   : > { %v428_v37 = vmul.f32 %v673_v33, %v423_v19  ;;  %vm434_vm8 = vweird.f32 %v673_v33 }
 0x1ba   : > { %674 = vrsqrt.f32 %v424_v35  ;;  %v413_v39 = vsub.f32 %v405_v36, %v409_v34  ;;  %vm435_vm10 = vmor %vm433_vm9, %vm434_vm8  ;;  %vm443_vm12 = vweird.f32 %v424_v35  ;;  %vm463_vm0 = vweird.f32 %v426_v38 }
 0x1bb   : > { %v429_v40 = vmul.f32 %v673_v33, %v428_v37  ;;  %676 = vrsqrt.f32 %v426_v38 }
 0x1bc   : > { %v417_v41 = vmax.f32 %v413_v39, 0.0 }
 0x1bd   : > { %v430_v42 = vmul.f32 0.5, %v429_v40 }
 0x1be   : > { %v425_v43 = vadd.f32 1e-05, %v417_v41  ;;  %v422_v41 = vsub.f32 %v780_v61, %v796_v20 }
 0x1bf   : > { %v431_v45 = vsub.f32 1.5, %v430_v42  ;;  %v498_v22 = vpop.permute.xlu2 %497 }
 0x1c0   : > { %v675_v46 = vpop.eup %674  ;;  %678 = vrsqrt.f32 %v425_v43  ;;  %vm453_vm1 = vweird.f32 %v425_v43 }
 0x1c1   : > { %v677_v47 = vpop.eup %676  ;;  %v438_v48 = vmul.f32 %v675_v46, %v424_v35  ;;  %v432_v51 = vmul.f32 %v673_v33, %v431_v45  ;;  %vm444_vm11 = vweird.f32 %v675_v46  ;;  %v421_v35 = vsub.f32 %v771_v49, %v802_v29 }
 0x1c2   : > { %v458_v53 = vmul.f32 %v677_v47, %v426_v38  ;;  %vm445_vm13 = vmor %vm443_vm12, %vm444_vm11  ;;  %vm464_vm14 = vweird.f32 %v677_v47 }
 0x1c3   : > { %v439_v54 = vmul.f32 %v675_v46, %v438_v48  ;;  %v436_v55 = vsel %vm435_vm10, %v673_v33, %v432_v51  ;;  %vm465_vm2 = vmor %vm463_vm0, %vm464_vm14 }
 0x1c4   : > { %v459_v56 = vmul.f32 %v677_v47, %v458_v53  ;;  %v467_v57 = vmul.f32 %v436_v55, %v359_v50 }
 0x1c5   : > { %v440_v58 = vmul.f32 0.5, %v439_v54 }
 0x1c6   : > { %v679_v59 = vpop.eup %678  ;;  %v460_v60 = vmul.f32 0.5, %v459_v56  ;;  %473 = vperm.xlu1 %669, %v467_v57  }
 0x1c7   : > { %v441_v62 = vsub.f32 1.5, %v440_v58  ;;  %v448_v63 = vmul.f32 %v679_v59, %v425_v43  ;;  %vm454_vm15 = vweird.f32 %v679_v59 }
 0x1c8   : > { %v461_v0 = vsub.f32 1.5, %v460_v60  ;;  %vm455_vm3 = vmor %vm453_vm1, %vm454_vm15 }
 0x1c9   : > { %v449_v1 = vmul.f32 %v679_v59, %v448_v63  ;;  %v442_v3 = vmul.f32 %v675_v46, %v441_v62 }
 0x1ca   : > { %v462_v10 = vmul.f32 %v677_v47, %v461_v0 }
 0x1cb   : > { %v450_v4 = vmul.f32 0.5, %v449_v1  ;;  %v446_v5 = vsel %vm445_vm13, %v675_v46, %v442_v3 }
 0x1cc   : > { %v468_v8 = vmul.f32 %v446_v5, %v360_v2  ;;  %v466_v15 = vsel %vm465_vm2, %v677_v47, %v462_v10 }
 0x1cd   : > { %v451_v9 = vsub.f32 1.5, %v450_v4  ;;  %v470_v19 = vmul.f32 %v466_v15, %v362_v14 }
 0x1ce   : > { %478 = vperm.xlu2 %671, %v468_v8   ;;  %502 = vperm.xlu1 %669, %v364_v6  }
 0x1cf   : > { %v452_v12 = vmul.f32 %v679_v59, %v451_v9 }
 0x1d1   : > { %v456_v13 = vsel %vm455_vm3, %v679_v59, %v452_v12 }
 0x1d2   : > { %v469_v17 = vmul.f32 %v456_v13, %v361_v11 }
 0x1d4   : > { %483 = vperm.xlu0 %670, %v469_v17  }
 0x1d6   : > { %488 = vperm.xlu1 %669, %v470_v19   ;;  %507 = vperm.xlu2 %671, %v365_v18  }
 0x1de   : > { %512 = vperm.xlu1 %669, %v366_v21  }
 0x228   : > { %v479_v27 = vpop.permute.xlu2 %478 }
 0x229   : > { %v492_v31 = vmul.f32 %v479_v27, %v420_v28 }
 0x230   : > { %v508_v16 = vpop.permute.xlu2 %507 }
 0x238   : > { %v474_v24 = vpop.permute.xlu1 %473 }
 0x239   : > { %v491_v25 = vmul.f32 %v474_v24, %v419_v23 }
 0x23b   : > { %v515_v26 = vadd.f32 %v498_v22, %v491_v25 }
 0x23d   : > { %v519_v30 = vmax.f32 %v515_v26, 0.0 }
 0x23f   : > { %v523_v32 = vpack.c.bf16 %v519_v30, %v519_v30 }
 0x240   : > { %v503_v33 = vpop.permute.xlu1 %502 }
 0x241   : > { %528 = vst.msk [vmem:[%s197_s9] sm:$0xf] %vm527_vm4, %v523_v32  ;;  %v516_v44 = vadd.f32 %v503_v33, %v492_v31 }
 0x243   : > { %v520_v7 = vmax.f32 %v516_v44, 0.0 }
 0x245   : > { %v524_v34 = vpack.c.bf16 %v520_v7, %v520_v7 }
 0x246   : > { %v484_v36 = vpop.permute.xlu0 %483 }
 0x247   : > { %529 = vst.msk [vmem:[%s197_s9 + $0x4] sm:$0xf] %vm527_vm4, %v524_v34  ;;  %v493_v52 = vmul.f32 %v484_v36, %v421_v35 }
 0x248   : > { %v489_v37 = vpop.permute.xlu1 %488 }
 0x249   : > { %v517_v38 = vadd.f32 %v508_v16, %v493_v52  ;;  %v494_v42 = vmul.f32 %v489_v37, %v422_v41 }
 0x24b   : > { %v521_v39 = vmax.f32 %v517_v38, 0.0 }
 0x24d   : > { %v525_v40 = vpack.c.bf16 %v521_v39, %v521_v39 }
 0x24f   : > { %530 = vst.msk [vmem:[%s197_s9 + $0x8] sm:$0xf] %vm527_vm4, %v525_v40 }
 0x250   : > { %v513_v43 = vpop.permute.xlu1 %512 }
 0x251   : > { %v518_v45 = vadd.f32 %v513_v43, %v494_v42 }
 0x253   : > { %v522_v46 = vmax.f32 %v518_v45, 0.0 }
 0x255   : > { %v526_v47 = vpack.c.bf16 %v522_v46, %v522_v46 }
 0x257   : > { %531 = vst.msk [vmem:[%s197_s9 + $0xc] sm:$0xf] %vm527_vm4, %v526_v47 }
 0x258 PF: > { %s14_s15 = sadd.s32 1, %s686_s15  }
 0x259   : > { %p11_p4 = scmp.ge.s32.totalorder %s14_s15, 4  }
 0x25b   :  { %13 = sbr.rel (!%p11_p4) target bundleno = 1 (0x1), region = 66 }

// kernel: _lambda_.11
= control target key start
LH: loop header
LB: loop body
LE: loop exit
PB: predicated region body
PF: predicated region fallthrough
CT: control target
= control target key end

     0   :  { %s723_s15 = smov 0   ;;  %s856_s0 = inlined_call_operand.vmem [shape: bf16[2,32,36], index: 0, kind: input, shape index: {}]   ;;  %s857_s1 = inlined_call_operand.vmem [shape: bf16[4,16,128], index: 1, kind: input, shape index: {}]   ;;  %s858_s2 = inlined_call_operand.vmem [shape: f32[16,1], index: 2, kind: input, shape index: {}]   ;;  %s859_s3 = inlined_call_operand.vmem [shape: f32[16,1], index: 3, kind: input, shape index: {}]   ;;  %s860_s4 = inlined_call_operand.vmem [shape: bf16[2,16,144], index: 4, kind: output, shape index: {}]  }
   0x1 LB: > { %s610_s16 = sadd.s32 4294967295, %s688_s15   ;;  %p614_p0 = scmp.ge.s32.totalorder %s688_s15, 1  ;;  %s688_s15 = sphi %s723_s15, %s14_s15  }
   0x2   : > { %p162_p1 = scmp.lt.s32.totalorder %s688_s15, 3 }
   0x4   : > { %p163_p2 = pnand %p614_p0, %p162_p1 }
   0x5   : > { %p188_p3 = scmp.lt.s32.totalorder (!%p163_p2), %s610_s16, 1  ;;  %s690_s21 = smov (!%p163_p2), 121  }
   0x6   : > { %166 = sbr.rel (%p163_p2) target bundleno = 841 (0x349), region = 36  ;;  %s691_s22 = smov (!%p163_p2), 122  }
   0x7   : > { %s692_s23 = smov (!%p163_p2), 127   ;;  %s694_s28 = smov (!%p163_p2), 72  }
   0x8   : > { %s695_s29 = smov (!%p163_p2), 36   ;;  %s696_s8 = smov (!%p163_p2), 108  }
   0xb   : > { %s862_s16 = smov (!%p188_p3, %s610_s16), 1  ;;  %vm213_vm0 = vcmask 293888   ;;  %v655_v23 = vld [vmem:[%s857_s1] sm:$0xff]  ;;  %v418_v24 = vlaneseq  ;;  %v657_v26 = vld [vmem:[%s857_s1 + $0x10] sm:$0xff]  ;;  %v693_v37 = vmov 0.0   ;;  %v658_v40 = vld [vmem:[%s857_s1 + $0x18] sm:$0xff] }
   0xc   : > { %s651_s17 = sshll.u32 %s862_s16, 4  ;;  %v656_v41 = vld [vmem:[%s857_s1 + $0x8] sm:$0xff]  ;;  %vm412_vm8 = vcmask 588800   ;;  %vm415_vm9 = vcmask 883712   ;;  %vm457_vm10 = vcmask 130048  }
   0xd   : > { %s192_s20 = scalar_lea.vmem %s856_s0, %s651_s17  ;;  %v419_v25 = vand.u32 127, %v418_v24 }
   0xe   : > { %v654_v0 = vld [vmem:[%s192_s20 + $0x8] sm:$0xff]  ;;  %v653_v2 = vld [vmem:[%s192_s20] sm:$0xff] }
   0xf   : > { %v219_v1 = vsel %vm213_vm0, %v654_v0, 0  ;;  %v216_v3 = vsel %vm213_vm0, %v653_v2, 0  ;;  %v420_v27 = vcvt.s32.f32 %v419_v25 }
  0x10   : > { %239 = vrot.lane.b32.xlu0 %v219_v1, %s690_s21  ;;  %233 = vrot.lane.b32.xlu1 %v219_v1, %s691_s22 }
  0x11   : > { %227 = vrot.lane.b32.xlu2 %v219_v1, %s692_s23  ;;  %v421_v28 = vadd.f32 0.5, %v420_v27 }
  0x13   : > { %v422_v31 = vmul.f32 0.16666667, %v421_v28 }
  0x15   : > { %v423_v32 = vfloor.f32 %v422_v31 }
  0x17   : > { %v424_v33 = vmul.f32 6.0, %v423_v32  ;;  %vm426_vm1 = vcmp.ge.f32.partialorder %v423_v32, 0.0  ;;  %vm427_vm2 = vcmp.lt.f32.partialorder %v423_v32, 4.0 }
  0x18   : > { %237 = vrot.lane.b32.xlu0 %v216_v3, %s690_s21  ;;  %231 = vrot.lane.b32.xlu1 %v216_v3, %s691_s22  ;;  %vm428_vm3 = vmand %vm426_vm1, %vm427_vm2  ;;  %vm550_vm1 = vcmask 1043456   ;;  %vm551_vm2 = vcmask 130052  }
  0x19   : > { %225 = vrot.lane.b32.xlu2 %v216_v3, %s692_s23  ;;  %v425_v34 = vsub.f32 %v420_v27, %v424_v33 }
  0x1b   : > { %vm429_vm4 = vcmp.ge.f32.partialorder %v425_v34, 0.0  ;;  %vm431_vm5 = vcmp.lt.f32.partialorder %v425_v34, 4.0 }
  0x1c   : > { %vm430_vm6 = vmand %vm428_vm3, %vm429_vm4 }
  0x1d   : > { %vm432_vm7 = vmand %vm430_vm6, %vm431_vm5 }
  0x1e   : > { %v433_v38 = vsel %vm432_vm7, 1.0, %v693_v37  ;;  %vm552_vm3 = vmor %vm551_vm2, %vm550_vm1 }
  0x6b   : > { %v763_v7 = vpop.permute.xlu2 %227 }
  0x73   : > { %v772_v9 = vpop.permute.xlu2 %225 }
  0x82   : > { %v747_v4 = vpop.permute.xlu0 %239  ;;  %v234_v5 = vpop.permute.xlu1 %233 }
  0x83   : > { %249 = vmatpush.bf16.msra.mxu0 %v747_v4  ;;  %364 = vrot.lane.b32.xlu1 %v747_v4, %s690_s21 }
  0x84   : > { %323 = vrot.lane.b32.xlu0 %v747_v4, %s691_s22 }
  0x8a   : > { %v754_v6 = vpop.permute.xlu0 %237  ;;  %v232_v8 = vpop.permute.xlu1 %231 }
  0x8b   : > { %362 = vrot.lane.b32.xlu1 %v754_v6, %s690_s21  ;;  %321 = vrot.lane.b32.xlu2 %v754_v6, %s691_s22 }
  0x8c   : > { %282 = vrot.lane.b32.xlu0 %v747_v4, %s692_s23  ;;  %250 = vmatpush.bf16.msra.mxu0 %v754_v6 }
  0x90   : > { %251 = vmatpush.bf16.msra.mxu0 %v234_v5 }
  0x93   : > { %360 = vrot.lane.b32.xlu1 %v234_v5, %s690_s21  ;;  %319 = vrot.lane.b32.xlu2 %v234_v5, %s691_s22 }
  0x94   : > { %280 = vrot.lane.b32.xlu0 %v754_v6, %s692_s23  ;;  %252 = vmatpush.bf16.msra.mxu0 %v232_v8 }
  0x98   : > { %253 = vmatpush.bf16.msra.mxu0 %v763_v7 }
  0x9b   : > { %358 = vrot.lane.b32.xlu1 %v232_v8, %s690_s21  ;;  %317 = vrot.lane.b32.xlu2 %v232_v8, %s691_s22 }
  0x9c   : > { %278 = vrot.lane.b32.xlu0 %v234_v5, %s692_s23  ;;  %254 = vmatpush.bf16.msra.mxu0 %v772_v9 }
  0xa0   : > { %255 = vmatpush.bf16.msra.mxu0 %v219_v1 }
  0xa3   : > { %356 = vrot.lane.b32.xlu1 %v763_v7, %s690_s21  ;;  %315 = vrot.lane.b32.xlu2 %v763_v7, %s691_s22 }
  0xa4   : > { %276 = vrot.lane.b32.xlu0 %v232_v8, %s692_s23  ;;  %256 = vmatpush.bf16.msra.mxu0 %v216_v3 }
  0xa7   : > { %257 = vmatmul.bf16.vlgmr.msra.gmra.mxu0 %v655_v23 }
  0xab   : > { %354 = vrot.lane.b32.xlu1 %v772_v9, %s690_s21  ;;  %313 = vrot.lane.b32.xlu2 %v772_v9, %s691_s22  ;;  %s197_s22 = scalar_lea.vmem %s860_s4, %s651_s17 }
  0xac   : > { %274 = vrot.lane.b32.xlu0 %v763_v7, %s692_s23 }
  0xb3   : > { %272 = vrot.lane.b32.xlu2 %v772_v9, %s692_s23  ;;  %438 = vrot.lane.b32.xlu1 %v433_v38, %s694_s28 }
  0xb4   : > { %435 = vrot.lane.b32.xlu0 %v433_v38, %s695_s29 }
  0xbb   : > { %441 = vrot.lane.b32.xlu1 %v433_v38, %s696_s8 }
  0xe5   : > { %v322_v10 = vpop.permute.xlu2 %321 }
  0xed   : > { %v320_v11 = vpop.permute.xlu2 %319 }
  0xf5   : > { %v365_v12 = vpop.permute.xlu1 %364  ;;  %v318_v13 = vpop.permute.xlu2 %317 }
  0xf6   : > { %v324_v14 = vpop.permute.xlu0 %323  ;;  %372 = vmatpush.bf16.msra.mxu3 %v365_v12 }
  0xf7   : > { %331 = vmatpush.bf16.msra.mxu2 %v324_v14 }
  0xfb   : > { %332 = vmatpush.bf16.msra.mxu2 %v322_v10 }
  0xfd   : > { %v363_v15 = vpop.permute.xlu1 %362  ;;  %v316_v17 = vpop.permute.xlu2 %315 }
  0xfe   : > { %v283_v16 = vpop.permute.xlu0 %282  ;;  %373 = vmatpush.bf16.msra.mxu3 %v363_v15 }
  0xff   : > { %290 = vmatpush.bf16.msra.mxu1 %v283_v16  ;;  %333 = vmatpush.bf16.msra.mxu2 %v320_v11 }
 0x103   : > { %334 = vmatpush.bf16.msra.mxu2 %v318_v13 }
 0x105   : > { %v361_v18 = vpop.permute.xlu1 %360  ;;  %v314_v20 = vpop.permute.xlu2 %313 }
 0x106   : > { %v281_v19 = vpop.permute.xlu0 %280  ;;  %374 = vmatpush.bf16.msra.mxu3 %v361_v18 }
 0x107   : > { %291 = vmatpush.bf16.msra.mxu1 %v281_v19  ;;  %335 = vmatpush.bf16.msra.mxu2 %v316_v17 }
 0x10b   : > { %336 = vmatpush.bf16.msra.mxu2 %v314_v20 }
 0x10d   : > { %v359_v21 = vpop.permute.xlu1 %358  ;;  %v273_v39 = vpop.permute.xlu2 %272 }
 0x10e   : > { %v279_v22 = vpop.permute.xlu0 %278  ;;  %375 = vmatpush.bf16.msra.mxu3 %v359_v21 }
 0x10f   : > { %292 = vmatpush.bf16.msra.mxu1 %v279_v22  ;;  %337 = vmatpush.bf16.msra.mxu2 %v234_v5  ;;  %v697_v22 = vmov 0  }
 0x110   : > { %675 = vset.pattern.permute.xlu0 %v697_v22  ;;  %676 = vset.pattern.permute.xlu1 %v697_v22 }
 0x111   : > { %677 = vset.pattern.permute.xlu2 %v697_v22 }
 0x113   : > { %338 = vmatpush.bf16.msra.mxu2 %v232_v8 }
 0x115   : > { %v357_v29 = vpop.permute.xlu1 %356 }
 0x116   : > { %v277_v30 = vpop.permute.xlu0 %276  ;;  %376 = vmatpush.bf16.msra.mxu3 %v357_v29  ;;  %339 = vmatmul.bf16.vlgmr.msra.gmra.mxu2 %v657_v26 }
 0x117   : > { %293 = vmatpush.bf16.msra.mxu1 %v277_v30 }
 0x11d   : > { %v355_v35 = vpop.permute.xlu1 %354 }
 0x11e   : > { %v275_v36 = vpop.permute.xlu0 %274  ;;  %377 = vmatpush.bf16.msra.mxu3 %v355_v35 }
 0x11f   : > { %294 = vmatpush.bf16.msra.mxu1 %v275_v36 }
 0x122   : > { %378 = vmatpush.bf16.msra.mxu3 %v747_v4 }
 0x123   : > { %295 = vmatpush.bf16.msra.mxu1 %v273_v39 }
 0x124   : > { %v258_v54 = vpop.f32.mrf.mxu0 }
 0x125   : > { %v439_v48 = vpop.permute.xlu1 %438 }
 0x126   : > { %379 = vmatpush.bf16.msra.mxu3 %v754_v6  ;;  %v436_v50 = vpop.permute.xlu0 %435 }
 0x127   : > { %296 = vmatpush.bf16.msra.mxu1 %v763_v7  ;;  %v444_v51 = vsel %vm213_vm0, %v433_v38, %v436_v50 }
 0x128   : > { %v445_v53 = vsel %vm412_vm8, %v444_v51, %v439_v48 }
 0x129   : > { %380 = vmatmul.bf16.vlgmr.msra.gmra.mxu3 %v658_v40 }
 0x12b   : > { %297 = vmatpush.bf16.msra.mxu1 %v772_v9 }
 0x12c   : > { %v260_v9 = vpop.f32.mrf.mxu0 }
 0x12d   : > { %v442_v52 = vpop.permute.xlu1 %441 }
 0x12e   : > { %298 = vmatmul.bf16.vlgmr.msra.gmra.mxu1 %v656_v41  ;;  %v446_v56 = vsel %vm415_vm9, %v445_v53, %v442_v52  ;;  %v452_v58 = vperm.slane %v442_v52, 0 }
 0x12f   : > { %v451_v61 = vperm.slane %v446_v56, 0 }
 0x199   : > { %v340_v44 = vpop.f32.mrf.mxu2 }
 0x1a1   : > { %v342_v46 = vpop.f32.mrf.mxu2 }
 0x1ab   : > { %v299_v42 = vpop.f32.mrf.mxu1 }
 0x1ac   : > { %388 = vrot.lane.b32.xlu2 %v299_v42, %s695_s29  ;;  %v381_v43 = vpop.f32.mrf.mxu3  ;;  %v449_v42 = vld [vmem:[%s859_s3] sm:$0xff] }
 0x1ad   : > { %404 = vrot.lane.b32.xlu1 %v381_v43, %s696_s8 }
 0x1b3   : > { %v301_v45 = vpop.f32.mrf.mxu1 }
 0x1b4   : > { %396 = vrot.lane.b32.xlu2 %v340_v44, %s694_s28  ;;  %390 = vrot.lane.b32.xlu0 %v301_v45, %s695_s29  ;;  %v383_v47 = vpop.f32.mrf.mxu3  ;;  %v447_v45 = vld [vmem:[%s858_s2] sm:$0xff] }
 0x1bc   : > { %406 = vrot.lane.b32.xlu2 %v383_v47, %s696_s8  ;;  %398 = vrot.lane.b32.xlu0 %v342_v46, %s694_s28 }
 0x206   : > { %v389_v49 = vpop.permute.xlu2 %388 }
 0x207   : > { %v410_v57 = vsel %vm213_vm0, %v258_v54, %v389_v49  ;;  %v448_v54 = vld [vmem:[%s858_s2 + $0x8] sm:$0xff] }
 0x20e   : > { %v397_v55 = vpop.permute.xlu2 %396 }
 0x20f   : > { %v413_v59 = vsel %vm412_vm8, %v410_v57, %v397_v55 }
 0x216   : > { %v820_v8 = vpop.permute.xlu2 %406 }
 0x217   : > { %v456_v10 = vmul.f32 %v452_v58, %v820_v8 }
 0x219   : > { %v469_v15 = vmul.f32 %v456_v10, %v456_v10  ;;  %v462_v17 = vsel %vm457_vm10, %v456_v10, 0.0 }
 0x21b   : > { %v474_v20 = vsel %vm457_vm10, %v469_v15, 0.0 }
 0x21f   : > { %v810_v60 = vpop.permute.xlu1 %404 }
 0x220   : > { %v814_v62 = vsel %vm415_vm9, %v413_v59, %v810_v60  ;;  %v454_v63 = vmul.f32 %v452_v58, %v810_v60  ;;  %v450_v58 = vld [vmem:[%s859_s3 + $0x8] sm:$0xff] }
 0x221   : > { %v453_v0 = vmul.f32 %v451_v61, %v814_v62 }
 0x222   : > { %v458_v1 = vsel %vm457_vm10, %v454_v63, 0.0  ;;  %v467_v2 = vmul.f32 %v454_v63, %v454_v63 }
 0x223   : > { %v459_v3 = vadd.f32 %v458_v1, %v453_v0  ;;  %v466_v4 = vmul.f32 %v453_v0, %v453_v0 }
 0x224   : > { %v470_v5 = vsel %vm457_vm10, %v467_v2, 0.0 }
 0x225   : > { %460 = vadd.xlane.f32.xlu0 %v459_v3  ;;  %v471_v6 = vadd.f32 %v470_v5, %v466_v4 }
 0x226   : > { %v391_v7 = vpop.permute.xlu0 %390 }
 0x227   : > { %472 = vadd.xlane.f32.xlu2 %v471_v6  ;;  %v411_v11 = vsel %vm213_vm0, %v260_v9, %v391_v7 }
 0x22e   : > { %v399_v12 = vpop.permute.xlu0 %398 }
 0x22f   : > { %v414_v13 = vsel %vm412_vm8, %v411_v11, %v399_v12 }
 0x230   : > { %v827_v14 = vsel %vm415_vm9, %v414_v13, %v820_v8 }
 0x231   : > { %v455_v16 = vmul.f32 %v451_v61, %v827_v14 }
 0x233   : > { %v463_v18 = vadd.f32 %v462_v17, %v455_v16  ;;  %v468_v19 = vmul.f32 %v455_v16, %v455_v16 }
 0x235   : > { %464 = vadd.xlane.f32.xlu1 %v463_v18  ;;  %v475_v21 = vadd.f32 %v474_v20, %v468_v19 }
 0x237   : > { %476 = vadd.xlane.f32.xlu2 %v475_v21 }
 0x24f   : > { %532 = vperm.xlu2 %677, %v449_v42  }
 0x298   : > { %v461_v23 = vpop.xlane.xlu0 %460 }
 0x299   : > { %v478_v24 = vmul.f32 0.015625, %v461_v23 }
 0x29a   : > { %v473_v25 = vpop.xlane.xlu2 %472 }
 0x29b   : > { %v480_v26 = vmul.f32 0.015625, %v473_v25  ;;  %v482_v27 = vmul.f32 %v478_v24, %v478_v24  ;;  %v488_v59 = vsub.f32 %v814_v62, %v478_v24  ;;  %v489_v61 = vsub.f32 %v810_v60, %v478_v24 }
 0x29d   : > { %v484_v28 = vsub.f32 %v480_v26, %v482_v27 }
 0x29f   : > { %v486_v29 = vmax.f32 %v484_v28, 0.0 }
 0x2a1   : > { %v492_v30 = vadd.f32 1e-05, %v486_v29 }
 0x2a3   : > { %678 = vrsqrt.f32 %v492_v30  ;;  %vm500_vm12 = vweird.f32 %v492_v30 }
 0x2a8   : > { %v465_v31 = vpop.xlane.xlu1 %464 }
 0x2a9   : > { %v679_v32 = vpop.eup %678  ;;  %v479_v33 = vmul.f32 0.015625, %v465_v31 }
 0x2aa   : > { %v495_v34 = vmul.f32 %v679_v32, %v492_v30  ;;  %v477_v35 = vpop.xlane.xlu2 %476  ;;  %vm501_vm11 = vweird.f32 %v679_v32 }
 0x2ab   : > { %v481_v36 = vmul.f32 0.015625, %v477_v35  ;;  %v483_v37 = vmul.f32 %v479_v33, %v479_v33  ;;  %vm502_vm13 = vmor %vm500_vm12, %vm501_vm11  ;;  %v490_v60 = vsub.f32 %v827_v14, %v479_v33  ;;  %v491_v9 = vsub.f32 %v820_v8, %v479_v33 }
 0x2ac   : > { %v496_v38 = vmul.f32 %v679_v32, %v495_v34 }
 0x2ad   : > { %v485_v39 = vsub.f32 %v481_v36, %v483_v37 }
 0x2ae   : > { %v497_v40 = vmul.f32 0.5, %v496_v38 }
 0x2af   : > { %v487_v41 = vmax.f32 %v485_v39, 0.0 }
 0x2b0   : > { %v498_v43 = vsub.f32 1.5, %v497_v40 }
 0x2b1   : > { %v493_v44 = vadd.f32 1e-05, %v487_v41 }
 0x2b2   : > { %v499_v46 = vmul.f32 %v679_v32, %v498_v43  ;;  %v533_v0 = vpop.permute.xlu2 %532 }
 0x2b3   : > { %680 = vrsqrt.f32 %v493_v44  ;;  %vm510_vm15 = vweird.f32 %v493_v44 }
 0x2b4   : > { %v503_v47 = vsel %vm502_vm13, %v679_v32, %v499_v46 }
 0x2b5   : > { %v514_v48 = vmul.f32 %v503_v47, %v447_v45 }
 0x2b7   : > { %518 = vperm.xlu0 %675, %v514_v48  }
 0x2b9   : > { %v681_v49 = vpop.eup %680 }
 0x2ba   : > { %v505_v50 = vmul.f32 %v681_v49, %v493_v44  ;;  %vm511_vm14 = vweird.f32 %v681_v49 }
 0x2bb   : > { %vm512_vm0 = vmor %vm510_vm15, %vm511_vm14 }
 0x2bc   : > { %v506_v51 = vmul.f32 %v681_v49, %v505_v50 }
 0x2be   : > { %v507_v52 = vmul.f32 0.5, %v506_v51 }
 0x2c0   : > { %v508_v53 = vsub.f32 1.5, %v507_v52 }
 0x2c2   : > { %v509_v55 = vmul.f32 %v681_v49, %v508_v53 }
 0x2c4   : > { %v513_v56 = vsel %vm512_vm0, %v681_v49, %v509_v55 }
 0x2c5   : > { %v515_v57 = vmul.f32 %v513_v56, %v448_v54 }
 0x2c7   : > { %523 = vperm.xlu1 %676, %v515_v57  }
 0x2cf   : > { %537 = vperm.xlu1 %676, %v450_v58  }
 0x329   : > { %v519_v63 = vpop.permute.xlu0 %518 }
 0x32a   : > { %v526_v1 = vmul.f32 %v519_v63, %v488_v59  ;;  %v527_v2 = vmul.f32 %v519_v63, %v489_v61 }
 0x32c   : > { %v540_v3 = vadd.f32 %v533_v0, %v526_v1  ;;  %v541_v4 = vadd.f32 %v533_v0, %v527_v2 }
 0x32e   : > { %v544_v5 = vmax.f32 %v540_v3, 0.0  ;;  %v545_v6 = vmax.f32 %v541_v4, 0.0 }
 0x330   : > { %v548_v7 = vpack.c.bf16 %v545_v6, %v544_v5 }
 0x332   : > { %553 = vst.msk [vmem:[%s197_s22] sm:$0xff] %vm552_vm3, %v548_v7 }
 0x339   : > { %v524_v62 = vpop.permute.xlu1 %523 }
 0x33a   : > { %v528_v10 = vmul.f32 %v524_v62, %v490_v60  ;;  %v529_v11 = vmul.f32 %v524_v62, %v491_v9 }
 0x341   : > { %v538_v12 = vpop.permute.xlu1 %537 }
 0x342   : > { %v542_v13 = vadd.f32 %v538_v12, %v528_v10  ;;  %v543_v15 = vadd.f32 %v538_v12, %v529_v11 }
 0x344   : > { %v546_v16 = vmax.f32 %v542_v13, 0.0  ;;  %v547_v17 = vmax.f32 %v543_v15, 0.0 }
 0x346   : > { %v549_v18 = vpack.c.bf16 %v547_v17, %v546_v16 }
 0x348   : > { %554 = vst.msk [vmem:[%s197_s22 + $0x8] sm:$0xff] %vm552_vm3, %v549_v18 }
 0x349 PF: > { %s14_s15 = sadd.s32 1, %s688_s15  }
 0x34a   : > { %p11_p4 = scmp.ge.s32.totalorder %s14_s15, 4  }
 0x34c   :  { %13 = sbr.rel (!%p11_p4) target bundleno = 1 (0x1), region = 69 }

// kernel: _lambda_.10
= control target key start
LH: loop header
LB: loop body
LE: loop exit
PB: predicated region body
PF: predicated region fallthrough
CT: control target
= control target key end

     0   :  { %s1321_s15 = smov 0   ;;  %s1612_s0 = inlined_call_operand.vmem [shape: bf16[2,32,36], index: 0, kind: input, shape index: {}]   ;;  %s1613_s1 = inlined_call_operand.vmem [shape: bf16[4,32,288], index: 1, kind: input, shape index: {}]   ;;  %s1614_s2 = inlined_call_operand.vmem [shape: f32[4,32,1], index: 2, kind: input, shape index: {}]   ;;  %s1615_s3 = inlined_call_operand.vmem [shape: f32[4,32,1], index: 3, kind: input, shape index: {}]   ;;  %s1616_s4 = inlined_call_operand.vmem [shape: bf16[2,32,36], index: 4, kind: output, shape index: {}]  }
   0x1 LB: > { %s1041_s16 = sadd.s32 4294967295, %s1263_s15   ;;  %p1045_p0 = scmp.ge.s32.totalorder %s1263_s15, 1  ;;  %s1263_s15 = sphi %s1321_s15, %s14_s15  }
   0x2   : > { %p162_p1 = scmp.lt.s32.totalorder %s1263_s15, 3 }
   0x4   : > { %p163_p2 = pnand %p1045_p0, %p162_p1 }
   0x5   : > { %p188_p3 = scmp.lt.s32.totalorder (!%p163_p2), %s1041_s16, 1  ;;  %s1347_s24 = smov (!%p163_p2), 0  }
   0x6   : > { %166 = sbr.rel (%p163_p2) target bundleno = 1488 (0x5d0), region = 36 }
   0xb   : > { %v199_v0 = vlaneseq  ;;  %s1622_s16 = smov (!%p188_p3, %s1041_s16), 1  ;;  %v1285_v14 = vmov 0.0  }
   0xc   : > { %s1130_s17 = sshll.u32 %s1622_s16, 4 }
   0xd   : > { %v200_v1 = vand.u32 127, %v199_v0  ;;  %s192_s20 = scalar_lea.vmem %s1612_s0, %s1130_s17  ;;  %s1335_s23 = scalar_lea.vmem %s1616_s4, %s1130_s17 }
   0xe   : > { %v1149_v4 = vld [vmem:[%s192_s20] sm:$0xff]   ;;  %v1156_v5 = vld [vmem:[%s192_s20 + $0x8] sm:$0xff]  }
   0xf   : > { %v201_v2 = vcvt.s32.f32 %v200_v1  ;;  %v1150_v6 = vunpack.c.l.bf16 %v1149_v4   ;;  %v1151_v7 = vunpack.c.h.bf16 %v1149_v4   ;;  %v1154_v8 = vunpack.c.l.bf16 %v1156_v5  }
  0x10   : > { %v1155_v9 = vunpack.c.h.bf16 %v1156_v5  }
  0x11   : > { %v202_v3 = vadd.f32 0.5, %v201_v2 }
  0x13   : > { %v203_v10 = vmul.f32 0.16666667, %v202_v3 }
  0x15   : > { %v204_v11 = vfloor.f32 %v203_v10 }
  0x17   : > { %v205_v12 = vmul.f32 6.0, %v204_v11  ;;  %vm207_vm0 = vcmp.ge.f32.partialorder %v204_v11, 1.0  ;;  %vm208_vm1 = vcmp.lt.f32.partialorder %v204_v11, 5.0 }
  0x18   : > { %vm209_vm2 = vmand %vm207_vm0, %vm208_vm1 }
  0x19   : > { %v206_v13 = vsub.f32 %v201_v2, %v205_v12 }
  0x1b   : > { %vm210_vm3 = vcmp.ge.f32.partialorder %v206_v13, 1.0  ;;  %vm212_vm4 = vcmp.lt.f32.partialorder %v206_v13, 5.0 }
  0x1c   : > { %vm211_vm5 = vmand %vm209_vm2, %vm210_vm3 }
  0x1d   : > { %vm213_vm6 = vmand %vm211_vm5, %vm212_vm4 }
  0x1e   : > { %v1337_v15 = vsel %vm213_vm6, 1.0, %v1285_v14 }
  0x1f LB: >> { %v247_v16 = vpack.c.bf16 %v1271_v8, %v1271_v8  ;;  %v248_v17 = vpack.c.bf16 %v1267_v9, %v1267_v9  ;;  %v245_v20 = vpack.c.bf16 %v1279_v6, %v1279_v6  ;;  %v246_v21 = vpack.c.bf16 %v1275_v7, %v1275_v7  ;;  %s1286_s25 = smov 7   ;;  %s1287_s26 = smov 126   ;;  %s1283_s24 = sphi %s1347_s24, %s228_s24   ;;  %v1279_v6 = vphi %v1150_v6, %v1620_v6   ;;  %v1275_v7 = vphi %v1151_v7, %v1619_v7   ;;  %v1271_v8 = vphi %v1154_v8, %v1618_v8   ;;  %v1267_v9 = vphi %v1155_v9, %v1617_v9  }
  0x20   : >> { %vm263_vm7 = vcmask 56320   ;;  %vm269_vm8 = vcmask 351232   ;;  %s1288_s27 = smov 122   ;;  %s1289_s28 = smov 115   ;;  %vm354_vm9 = vcmask 261120   ;;  %vm433_vm10 = vcmask 293888  }
  0x21   : >> { %v255_v18 = vunpack.c.l.b16 %v247_v16  ;;  %v256_v19 = vunpack.c.l.b16 %v248_v17  ;;  %v253_v23 = vunpack.c.l.b16 %v245_v20  ;;  %v254_v24 = vunpack.c.l.b16 %v246_v21  ;;  %s1290_s29 = smov 116   ;;  %s1291_s30 = smov 127  }
  0x22   : >> { %s1292_s5 = smov 121   ;;  %s1293_s6 = smov 120  }
  0x23   : >> { %v258_v22 = vpack.c.b16 %v256_v19, %v255_v18  ;;  %v257_v25 = vpack.c.b16 %v254_v24, %v253_v23  ;;  %s1294_s7 = smov 114   ;;  %s1132_s8 = smul.u32 96, %s1283_s24 }
  0x24   : >> { %s1139_s12 = sshll.u32 %s1283_s24, 6  ;;  %s228_s24 = sadd.s32 1, %s1283_s24  }
  0x25   : >> { %261 = vrot.lane.b32.xlu0 %v258_v22, %s1286_s25  ;;  %s1398_s11 = scalar_lea.vmem %s1613_s1, %s1132_s8  ;;  %s1444_s16 = scalar_lea.vmem %s1615_s3, %s1139_s12 }
  0x26   : >> { %v1055_v45 = vld [vmem:[%s1398_s11] sm:$0xf]  ;;  %v1134_v46 = vld [vmem:[%s1398_s11 + $0x8] sm:$0xf0]  ;;  %v1133_v49 = vld [vmem:[%s1398_s11 + $0x4] sm:$0xf]  ;;  %s1473_s19 = scalar_lea.vmem %s1614_s2, %s1139_s12 }
  0x27   : >> { %v1056_v48 = vor.u32 %v1134_v46, %v1055_v45  ;;  %v1057_v50 = vld [vmem:[%s1398_s11 + $0xc] sm:$0xf0]  ;;  %v1063_v51 = vld [vmem:[%s1398_s11 + $0x8] sm:$0xf]  ;;  %v1135_v52 = vld [vmem:[%s1398_s11 + $0x10] sm:$0xf0] }
  0x28   : >> { %v1060_v55 = vor.u32 %v1133_v49, %v1057_v50  ;;  %v1064_v56 = vor.u32 %v1135_v52, %v1063_v51  ;;  %v1067_v57 = vld [vmem:[%s1398_s11 + $0x18] sm:$0xf]  ;;  %v1137_v58 = vld [vmem:[%s1398_s11 + $0x20] sm:$0xf0]  ;;  %v1136_v60 = vld [vmem:[%s1398_s11 + $0x1c] sm:$0xf] }
  0x29   : >> { %v1068_v59 = vor.u32 %v1137_v58, %v1067_v57  ;;  %v1069_v61 = vld [vmem:[%s1398_s11 + $0x24] sm:$0xf0]  ;;  %v1075_v62 = vld [vmem:[%s1398_s11 + $0x20] sm:$0xf]  ;;  %v1138_v63 = vld [vmem:[%s1398_s11 + $0x28] sm:$0xf0] }
  0x2a   : >> { %v1072_v0 = vor.u32 %v1136_v60, %v1069_v61  ;;  %v1076_v1 = vor.u32 %v1138_v63, %v1075_v62  ;;  %v1295_v46 = vmov 0   ;;  %p225_p4 = scmp.ge.s32.totalorder %s228_s24, 2  }
  0x2b   : >> { %1219 = vset.pattern.permute.xlu1 %v1295_v46  ;;  %1220 = vset.pattern.permute.xlu2 %v1295_v46 }
  0x2c   : >> { %1218 = vset.pattern.permute.xlu0 %v1295_v46  ;;  %v420_v46 = vld [vmem:[%s1473_s19] sm:$0xff] }
  0x2d   : >> { %259 = vrot.lane.b32.xlu0 %v257_v25, %s1286_s25 }
  0x97   : >> { %v262_v26 = vpop.permute.xlu0 %261 }
  0x98   : >> { %v268_v27 = vsel %vm263_vm7, 0, %v262_v26 }
  0x99   : >> { %v272_v28 = vsel %vm269_vm8, %v268_v27, 0 }
  0x9a   : >> { %284 = vrot.lane.b32.xlu0 %v272_v28, %s1287_s26  ;;  %290 = vrot.lane.b32.xlu1 %v272_v28, %s1288_s27 }
  0x9f   : >> { %v260_v29 = vpop.permute.xlu0 %259 }
  0xa0   : >> { %v266_v30 = vsel %vm263_vm7, 0, %v260_v29 }
  0xa1   : >> { %v270_v31 = vsel %vm269_vm8, %v266_v30, 0 }
  0xa2   : >> { %314 = vrot.lane.b32.xlu1 %v272_v28, %s1289_s28  ;;  %306 = vrot.lane.b32.xlu0 %v270_v31, %s1290_s29 }
  0xa3   : >> { %288 = vrot.lane.b32.xlu2 %v270_v31, %s1288_s27 }
  0xaa   : >> { %308 = vrot.lane.b32.xlu1 %v272_v28, %s1290_s29  ;;  %276 = vrot.lane.b32.xlu0 %v270_v31, %s1291_s30 }
  0xab   : >> { %312 = vrot.lane.b32.xlu2 %v270_v31, %s1289_s28 }
  0xb2   : >> { %278 = vrot.lane.b32.xlu1 %v272_v28, %s1291_s30  ;;  %296 = vrot.lane.b32.xlu0 %v272_v28, %s1292_s5 }
  0xb3   : >> { %282 = vrot.lane.b32.xlu2 %v270_v31, %s1287_s26 }
  0xba   : >> { %300 = vrot.lane.b32.xlu1 %v270_v31, %s1293_s6 }
  0xbb   : >> { %302 = vrot.lane.b32.xlu2 %v272_v28, %s1293_s6 }
  0xc2   : >> { %318 = vrot.lane.b32.xlu1 %v270_v31, %s1294_s7 }
  0xc3   : >> { %320 = vrot.lane.b32.xlu2 %v272_v28, %s1294_s7 }
  0xcb   : >> { %294 = vrot.lane.b32.xlu2 %v270_v31, %s1292_s5 }
  0xfd   : >> { %v289_v32 = vpop.permute.xlu2 %288 }
 0x105   : >> { %v313_v33 = vpop.permute.xlu2 %312 }
 0x10c   : >> { %v291_v34 = vpop.permute.xlu1 %290  ;;  %v285_v36 = vpop.permute.xlu0 %284 }
 0x10d   : >> { %v283_v35 = vpop.permute.xlu2 %282  ;;  %361 = vmatpush.bf16.msra.mxu0 %v291_v34 }
 0x111   : >> { %362 = vmatpush.bf16.msra.mxu0 %v289_v32 }
 0x114   : >> { %v315_v37 = vpop.permute.xlu1 %314  ;;  %v307_v39 = vpop.permute.xlu0 %306 }
 0x115   : >> { %v303_v38 = vpop.permute.xlu2 %302  ;;  %363 = vmatpush.bf16.msra.mxu0 %v285_v36  ;;  %380 = vmatpush.bf16.msra.mxu1 %v315_v37 }
 0x119   : >> { %364 = vmatpush.bf16.msra.mxu0 %v283_v35  ;;  %381 = vmatpush.bf16.msra.mxu1 %v313_v33 }
 0x11c   : >> { %v309_v40 = vpop.permute.xlu1 %308  ;;  %v277_v43 = vpop.permute.xlu0 %276 }
 0x11d   : >> { %v321_v41 = vpop.permute.xlu2 %320  ;;  %382 = vmatpush.bf16.msra.mxu1 %v309_v40 }
 0x11e   : >> { %405 = vmatpush.bf16.msra.mxu2 %v321_v41 }
 0x121   : >> { %383 = vmatpush.bf16.msra.mxu1 %v307_v39 }
 0x124   : >> { %v279_v42 = vpop.permute.xlu1 %278  ;;  %v297_v47 = vpop.permute.xlu0 %296 }
 0x125   : >> { %365 = vmatpush.bf16.msra.mxu0 %v279_v42  ;;  %384 = vmatpush.bf16.msra.mxu1 %v303_v38  ;;  %v295_v53 = vpop.permute.xlu2 %294 }
 0x129   : >> { %366 = vmatpush.bf16.msra.mxu0 %v277_v43 }
 0x12c   : >> { %v301_v44 = vpop.permute.xlu1 %300 }
 0x12d   : >> { %367 = vmatpush.bf16.msra.mxu0 %v272_v28  ;;  %385 = vmatpush.bf16.msra.mxu1 %v301_v44 }
 0x131   : >> { %368 = vmatpush.bf16.msra.mxu0 %v270_v31  ;;  %386 = vmatpush.bf16.msra.mxu1 %v297_v47  ;;  %v428_v47 = vld [vmem:[%s1444_s16 + $0x18] sm:$0xff] }
 0x134   : >> { %v319_v54 = vpop.permute.xlu1 %318  ;;  %369 = vmatmul.bf16.vlgmr.msra.gmra.mxu0 %v1056_v48 }
 0x135   : >> { %387 = vmatpush.bf16.msra.mxu1 %v295_v53  ;;  %406 = vmatpush.bf16.msra.mxu2 %v319_v54 }
 0x138   : >> { %388 = vmatmul.bf16.vlgmr.msra.gmra.mxu1 %v1060_v55  ;;  %1077 = vmatmul.msk.bf16.vlgmr.msra.gmra.mxu2 %vm354_vm9, %v1064_v56 }
 0x144   : >> { %374 = vmatmul.bf16.gmra.mxu0 %v1068_v59 }
 0x148   : >> { %393 = vmatmul.bf16.gmra.mxu1 %v1072_v0  ;;  %1078 = vmatmul.msk.bf16.gmra.mxu2 %vm354_vm9, %v1076_v1 }
 0x1b1   : >> { %v370_v2 = vpop.f32.mrf.mxu0 }
 0x1b5   : >> { %v389_v3 = vpop.f32.mrf.mxu1 }
 0x1b6   : >> { %v390_v4 = vadd.f32 %v389_v3, %v370_v2 }
 0x1b9   : >> { %v372_v11 = vpop.f32.mrf.mxu0 }
 0x1bb   : >> { %v408_v5 = vpop.f32.mrf.mxu2 }
 0x1bc   : >> { %v1414_v10 = vadd.f32 %v408_v5, %v390_v4 }
 0x1bd   : >> { %v391_v12 = vpop.f32.mrf.mxu1 }
 0x1be   : >> { %v429_v13 = vmul.f32 %v1414_v10, %v1337_v15  ;;  %v392_v20 = vadd.f32 %v391_v12, %v372_v11 }
 0x1c0   : >> { %v434_v14 = vsel %vm433_vm10, %v429_v13, 0.0  ;;  %v446_v40 = vmul.f32 %v429_v13, %v429_v13 }
 0x1c1   : >> { %435 = vadd.xlane.f32.xlu0 %v434_v14  ;;  %v375_v18 = vpop.f32.mrf.mxu0 }
 0x1c2   : >> { %v450_v42 = vsel %vm433_vm10, %v446_v40, 0.0 }
 0x1c3   : >> { %v410_v16 = vpop.f32.mrf.mxu2 }
 0x1c4   : >> { %v1419_v22 = vadd.f32 %v410_v16, %v392_v20 }
 0x1c5   : >> { %v394_v17 = vpop.f32.mrf.mxu1 }
 0x1c6   : >> { %v395_v19 = vadd.f32 %v394_v17, %v375_v18  ;;  %v430_v26 = vmul.f32 %v1419_v22, %v1337_v15  ;;  %v427_v17 = vld [vmem:[%s1444_s16 + $0x10] sm:$0xff] }
 0x1c8   : >> { %v447_v34 = vmul.f32 %v430_v26, %v430_v26  ;;  %v437_v41 = vsel %vm433_vm10, %v430_v26, 0.0 }
 0x1c9   : >> { %v377_v29 = vpop.f32.mrf.mxu0 }
 0x1ca   : >> { %v453_v37 = vsel %vm433_vm10, %v447_v34, 0.0 }
 0x1cb   : >> { %v413_v21 = vpop.f32.mrf.mxu2 }
 0x1cc   : >> { %v1421_v23 = vadd.f32 %v413_v21, %v395_v19 }
 0x1cd   : >> { %v396_v25 = vpop.f32.mrf.mxu1 }
 0x1ce   : >> { %v431_v24 = vmul.f32 %v1421_v23, %v1337_v15  ;;  %v397_v30 = vadd.f32 %v396_v25, %v377_v29 }
 0x1d0   : >> { %v440_v27 = vsel %vm433_vm10, %v431_v24, 0.0  ;;  %v448_v28 = vmul.f32 %v431_v24, %v431_v24 }
 0x1d1   : >> { %441 = vadd.xlane.f32.xlu0 %v440_v27 }
 0x1d2   : >> { %v456_v31 = vsel %vm433_vm10, %v448_v28, 0.0 }
 0x1d3   : >> { %v415_v32 = vpop.f32.mrf.mxu2  ;;  %457 = vadd.xlane.f32.xlu2 %v456_v31 }
 0x1d4   : >> { %v1429_v33 = vadd.f32 %v415_v32, %v397_v30 }
 0x1d6   : >> { %v432_v35 = vmul.f32 %v1429_v33, %v1337_v15 }
 0x1d8   : >> { %v443_v36 = vsel %vm433_vm10, %v432_v35, 0.0  ;;  %v449_v38 = vmul.f32 %v432_v35, %v432_v35 }
 0x1d9   : >> { %444 = vadd.xlane.f32.xlu1 %v443_v36  ;;  %454 = vadd.xlane.f32.xlu0 %v453_v37 }
 0x1da   : >> { %v459_v39 = vsel %vm433_vm10, %v449_v38, 0.0 }
 0x1db   : >> { %460 = vadd.xlane.f32.xlu2 %v459_v39 }
 0x1e1   : >> { %438 = vadd.xlane.f32.xlu1 %v437_v41 }
 0x1e3   : >> { %451 = vadd.xlane.f32.xlu2 %v450_v42  ;;  %v421_v42 = vld [vmem:[%s1473_s19 + $0x8] sm:$0xff] }
 0x1ed   : >> { %570 = vperm.xlu0 %1218, %v427_v17  }
 0x1fa   : >> { %575 = vperm.xlu1 %1219, %v428_v47  }
 0x234   : >> { %v436_v43 = vpop.xlane.xlu0 %435 }
 0x235   : >> { %v1455_v59 = vmul.f32 0.0625, %v436_v43 }
 0x237   : >> { %v470_v3 = vmul.f32 %v1455_v59, %v1455_v59 }
 0x244   : >> { %v442_v44 = vpop.xlane.xlu0 %441 }
 0x245   : >> { %v1446_v45 = vmul.f32 0.0625, %v442_v44 }
 0x246   : >> { %v458_v48 = vpop.xlane.xlu2 %457 }
 0x247   : >> { %v472_v49 = vmul.f32 %v1446_v45, %v1446_v45  ;;  %v468_v50 = vmul.f32 0.0625, %v458_v48 }
 0x249   : >> { %v476_v52 = vsub.f32 %v468_v50, %v472_v49 }
 0x24b   : >> { %v480_v57 = vmax.f32 %v476_v52, 0.0 }
 0x24c   : >> { %v445_v51 = vpop.xlane.xlu1 %444  ;;  %v455_v61 = vpop.xlane.xlu0 %454 }
 0x24d   : >> { %v1451_v53 = vmul.f32 0.0625, %v445_v51  ;;  %v1457_v63 = vadd.f32 1e-05, %v480_v57  ;;  %v467_v4 = vmul.f32 0.0625, %v455_v61  ;;  %v423_v57 = vld [vmem:[%s1473_s19 + $0x18] sm:$0xff] }
 0x24e   : >> { %v461_v54 = vpop.xlane.xlu2 %460 }
 0x24f   : >> { %v473_v55 = vmul.f32 %v1451_v53, %v1451_v53  ;;  %v469_v56 = vmul.f32 0.0625, %v461_v54  ;;  %1221 = vrsqrt.f32 %v1457_v63  ;;  %vm516_vm3 = vweird.f32 %v1457_v63 }
 0x251   : >> { %v477_v58 = vsub.f32 %v469_v56, %v473_v55  ;;  %v422_v55 = vld [vmem:[%s1473_s19 + $0x10] sm:$0xff] }
 0x253   : >> { %v481_v60 = vmax.f32 %v477_v58, 0.0 }
 0x254   : >> { %v439_v62 = vpop.xlane.xlu1 %438 }
 0x255   : >> { %v1459_v0 = vmul.f32 0.0625, %v439_v62  ;;  %v489_v1 = vadd.f32 1e-05, %v481_v60  ;;  %v1222_v20 = vpop.eup %1221  ;;  %v426_v62 = vld [vmem:[%s1444_s16 + $0x8] sm:$0xff] }
 0x256   : >> { %v452_v2 = vpop.xlane.xlu2 %451  ;;  %v511_v24 = vmul.f32 %v1222_v20, %v1457_v63  ;;  %vm517_vm1 = vweird.f32 %v1222_v20  ;;  %v485_v63 = vsub.f32 %v1429_v33, %v1451_v53 }
 0x257   : >> { %v471_v5 = vmul.f32 %v1459_v0, %v1459_v0  ;;  %v466_v11 = vmul.f32 0.0625, %v452_v2  ;;  %1223 = vrsqrt.f32 %v489_v1  ;;  %vm526_vm4 = vweird.f32 %v489_v1  ;;  %vm518_vm5 = vmor %vm516_vm3, %vm517_vm1  ;;  %v425_v2 = vld [vmem:[%s1444_s16] sm:$0xff] }
 0x258   : >> { %v512_v28 = vmul.f32 %v1222_v20, %v511_v24  ;;  %v483_v53 = vsub.f32 %v1419_v22, %v1459_v0  ;;  %vm946_vm3 = vcmask (%p225_p4), 289792  }
 0x259   : >> { %v475_v12 = vsub.f32 %v467_v4, %v471_v5  ;;  %v474_v13 = vsub.f32 %v466_v11, %v470_v3 }
 0x25a   : >> { %v513_v35 = vmul.f32 0.5, %v512_v28 }
 0x25b   : >> { %v479_v14 = vmax.f32 %v475_v12, 0.0  ;;  %v478_v16 = vmax.f32 %v474_v13, 0.0  ;;  %v482_v13 = vsub.f32 %v1414_v10, %v1455_v59 }
 0x25c   : >> { %v514_v41 = vsub.f32 1.5, %v513_v35 }
 0x25d   : >> { %v487_v18 = vadd.f32 1e-05, %v479_v14  ;;  %v486_v19 = vadd.f32 1e-05, %v478_v16  ;;  %v1224_v21 = vpop.eup %1223 }
 0x25e   : >> { %v521_v25 = vmul.f32 %v1224_v21, %v489_v1  ;;  %v515_v52 = vmul.f32 %v1222_v20, %v514_v41  ;;  %vm527_vm2 = vweird.f32 %v1224_v21 }
 0x25f   : >> { %1225 = vrsqrt.f32 %v487_v18  ;;  %vm506_vm13 = vweird.f32 %v487_v18  ;;  %vm496_vm14 = vweird.f32 %v486_v19  ;;  %vm528_vm6 = vmor %vm526_vm4, %vm527_vm2 }
 0x260   : >> { %1227 = vrsqrt.f32 %v486_v19  ;;  %v522_v30 = vmul.f32 %v1224_v21, %v521_v25  ;;  %v519_v56 = vsel %vm518_vm5, %v1222_v20, %v515_v52  ;;  %v571_v20 = vpop.permute.xlu0 %570 }
 0x261   : >> { %v532_v60 = vmul.f32 %v519_v56, %v422_v55 }
 0x262   : >> { %v523_v37 = vmul.f32 0.5, %v522_v30 }
 0x264   : >> { %v524_v44 = vsub.f32 1.5, %v523_v37 }
 0x265   : >> { %v1226_v26 = vpop.eup %1225 }
 0x266   : >> { %v1228_v27 = vpop.eup %1227  ;;  %v501_v29 = vmul.f32 %v1226_v26, %v487_v18  ;;  %vm507_vm11 = vweird.f32 %v1226_v26  ;;  %v525_v54 = vmul.f32 %v1224_v21, %v524_v44  ;;  %v484_v18 = vsub.f32 %v1421_v23, %v1446_v45 }
 0x267   : >> { %v491_v31 = vmul.f32 %v1228_v27, %v486_v19  ;;  %vm497_vm12 = vweird.f32 %v1228_v27  ;;  %vm508_vm15 = vmor %vm506_vm13, %vm507_vm11 }
 0x268   : >> { %v502_v32 = vmul.f32 %v1226_v26, %v501_v29  ;;  %vm498_vm0 = vmor %vm496_vm14, %vm497_vm12  ;;  %v529_v58 = vsel %vm528_vm6, %v1224_v21, %v525_v54 }
 0x269   : >> { %v492_v34 = vmul.f32 %v1228_v27, %v491_v31  ;;  %v533_v61 = vmul.f32 %v529_v58, %v423_v57 }
 0x26a   : >> { %v503_v36 = vmul.f32 0.5, %v502_v32 }
 0x26b   : >> { %v493_v38 = vmul.f32 0.5, %v492_v34 }
 0x26c   : >> { %v504_v39 = vsub.f32 1.5, %v503_v36  ;;  %v576_v4 = vpop.permute.xlu1 %575 }
 0x26d   : >> { %v494_v40 = vsub.f32 1.5, %v493_v38 }
 0x26e   : >> { %v505_v43 = vmul.f32 %v1226_v26, %v504_v39 }
 0x26f   : >> { %v495_v47 = vmul.f32 %v1228_v27, %v494_v40 }
 0x270   : >> { %v509_v48 = vsel %vm508_vm15, %v1226_v26, %v505_v43 }
 0x271   : >> { %v499_v49 = vsel %vm498_vm0, %v1228_v27, %v495_v47  ;;  %v531_v50 = vmul.f32 %v509_v48, %v421_v42 }
 0x272   : >> { %v530_v51 = vmul.f32 %v499_v49, %v420_v46 }
 0x273   : >> { %541 = vperm.xlu1 %1219, %v531_v50  }
 0x274   : >> { %536 = vperm.xlu2 %1220, %v530_v51  }
 0x27b   : >> { %546 = vperm.xlu1 %1219, %v532_v60  }
 0x27c   : >> { %551 = vperm.xlu2 %1220, %v533_v61  }
 0x283   : >> { %565 = vperm.xlu1 %1219, %v426_v62   ;;  %v1092_v62 = vld [vmem:[%s1398_s11 + $0x30] sm:$0xf] }
 0x284   : >> { %560 = vperm.xlu2 %1220, %v425_v2  }
 0x2ce   : >> { %v537_v3 = vpop.permute.xlu2 %536 }
 0x2cf   : >> { %v554_v16 = vmul.f32 %v537_v3, %v482_v13  ;;  %v1141_v3 = vld [vmem:[%s1398_s11 + $0x38] sm:$0xf0]  ;;  %v1142_v13 = vld [vmem:[%s1398_s11 + $0x40] sm:$0xf0] }
 0x2d6   : >> { %v552_v5 = vpop.permute.xlu2 %551 }
 0x2d7   : >> { %v557_v1 = vmul.f32 %v552_v5, %v485_v63  ;;  %v1094_v5 = vld [vmem:[%s1398_s11 + $0x3c] sm:$0xf0] }
 0x2d9   : >> { %v581_v12 = vadd.f32 %v576_v4, %v557_v1  ;;  %v1140_v4 = vld [vmem:[%s1398_s11 + $0x34] sm:$0xf]  ;;  %v1093_v1 = vor.u32 %v1141_v3, %v1092_v62 }
 0x2db   : >> { %v585_v17 = vmax.f32 %v581_v12, 0.0  ;;  %v1100_v12 = vld [vmem:[%s1398_s11 + $0x38] sm:$0xf] }
 0x2dd   : >> { %v589_v25 = vmul.f32 %v585_v17, %v1337_v15 }
 0x2de   : >> { %v561_v14 = vpop.permute.xlu2 %560 }
 0x2df   : >> { %v578_v21 = vadd.f32 %v561_v14, %v554_v16  ;;  %v605_v28 = vpack.c.bf16 %v589_v25, %v589_v25  ;;  %v1112_v14 = vld [vmem:[%s1398_s11 + $0x50] sm:$0xf]  ;;  %v1145_v16 = vld [vmem:[%s1398_s11 + $0x58] sm:$0xf0]  ;;  %v1106_v25 = vld [vmem:[%s1398_s11 + $0x54] sm:$0xf0] }
 0x2e1   : >> { %v582_v33 = vmax.f32 %v578_v21, 0.0  ;;  %v613_v31 = vunpack.c.l.b16 %v605_v28  ;;  %v1144_v21 = vld [vmem:[%s1398_s11 + $0x50] sm:$0xf0] }
 0x2e3   : >> { %v586_v30 = vmul.f32 %v582_v33, %v1337_v15 }
 0x2e5   : >> { %v542_v11 = vpop.permute.xlu1 %541  ;;  %v602_v35 = vpack.c.bf16 %v586_v30, %v586_v30 }
 0x2e6   : >> { %v555_v10 = vmul.f32 %v542_v11, %v483_v53  ;;  %v1097_v11 = vor.u32 %v1140_v4, %v1094_v5 }
 0x2e7   : >> { %v610_v22 = vunpack.c.l.b16 %v602_v35 }
 0x2ed   : >> { %v547_v19 = vpop.permute.xlu1 %546 }
 0x2ee   : >> { %v556_v24 = vmul.f32 %v547_v19, %v484_v18  ;;  %v1101_v18 = vor.u32 %v1142_v13, %v1100_v12  ;;  %v1113_v19 = vor.u32 %v1145_v16, %v1112_v14 }
 0x2f0   : >> { %v580_v26 = vadd.f32 %v571_v20, %v556_v24  ;;  %v1104_v20 = vld [vmem:[%s1398_s11 + $0x48] sm:$0xf]  ;;  %v1143_v24 = vld [vmem:[%s1398_s11 + $0x4c] sm:$0xf] }
 0x2f1   : >> { %v1109_v33 = vor.u32 %v1143_v24, %v1106_v25 }
 0x2f2   : >> { %v584_v27 = vmax.f32 %v580_v26, 0.0  ;;  %v1105_v26 = vor.u32 %v1144_v21, %v1104_v20 }
 0x2f4   : >> { %v588_v59 = vmul.f32 %v584_v27, %v1337_v15 }
 0x2f5   : >> { %v566_v29 = vpop.permute.xlu1 %565 }
 0x2f6   : >> { %v604_v23 = vpack.c.bf16 %v588_v59, %v588_v59  ;;  %v579_v45 = vadd.f32 %v566_v29, %v555_v10 }
 0x2f8   : >> { %v612_v32 = vunpack.c.l.b16 %v604_v23  ;;  %v583_v34 = vmax.f32 %v579_v45, 0.0 }
 0x2fa   : >> { %v587_v36 = vmul.f32 %v583_v34, %v1337_v15  ;;  %v615_v37 = vpack.c.b16 %v613_v31, %v612_v32 }
 0x2fc   : >> { %v603_v38 = vpack.c.bf16 %v587_v36, %v587_v36  ;;  %618 = vrot.lane.b32.xlu2 %v615_v37, %s1286_s25 }
 0x2fe   : >> { %v611_v0 = vunpack.c.l.b16 %v603_v38 }
 0x300   : >> { %v614_v39 = vpack.c.b16 %v611_v0, %v610_v22 }
 0x302   : >> { %616 = vrot.lane.b32.xlu0 %v614_v39, %s1286_s25 }
 0x356   : >> { %v619_v40 = vpop.permute.xlu2 %618 }
 0x357   : >> { %v623_v41 = vsel %vm263_vm7, 0, %v619_v40 }
 0x358   : >> { %v626_v42 = vsel %vm269_vm8, %v623_v41, 0 }
 0x359   : >> { %668 = vrot.lane.b32.xlu2 %v626_v42, %s1289_s28 }
 0x361   : >> { %638 = vrot.lane.b32.xlu2 %v626_v42, %s1287_s26 }
 0x374   : >> { %v617_v43 = vpop.permute.xlu0 %616 }
 0x375   : >> { %v621_v44 = vsel %vm263_vm7, 0, %v617_v43 }
 0x376   : >> { %v624_v46 = vsel %vm269_vm8, %v621_v44, 0 }
 0x377   : >> { %660 = vrot.lane.b32.xlu2 %v624_v46, %s1290_s29  ;;  %666 = vrot.lane.b32.xlu1 %v624_v46, %s1289_s28 }
 0x378   : >> { %642 = vrot.lane.b32.xlu0 %v624_v46, %s1288_s27 }
 0x37f   : >> { %630 = vrot.lane.b32.xlu2 %v624_v46, %s1291_s30  ;;  %644 = vrot.lane.b32.xlu1 %v626_v42, %s1288_s27 }
 0x380   : >> { %662 = vrot.lane.b32.xlu0 %v626_v42, %s1290_s29 }
 0x387   : >> { %648 = vrot.lane.b32.xlu2 %v624_v46, %s1292_s5  ;;  %636 = vrot.lane.b32.xlu1 %v624_v46, %s1287_s26 }
 0x388   : >> { %632 = vrot.lane.b32.xlu0 %v626_v42, %s1291_s30 }
 0x38f   : >> { %656 = vrot.lane.b32.xlu1 %v626_v42, %s1293_s6 }
 0x390   : >> { %654 = vrot.lane.b32.xlu0 %v624_v46, %s1293_s6 }
 0x397   : >> { %650 = vrot.lane.b32.xlu1 %v626_v42, %s1292_s5 }
 0x398   : >> { %674 = vrot.lane.b32.xlu0 %v626_v42, %s1294_s7 }
 0x39f   : >> { %672 = vrot.lane.b32.xlu1 %v624_v46, %s1294_s7 }
 0x3b3   : >> { %v669_v47 = vpop.permute.xlu2 %668 }
 0x3b4   : >> { %733 = vmatpush.bf16.msrb.mxu2 %v669_v47 }
 0x3bb   : >> { %v639_v50 = vpop.permute.xlu2 %638 }
 0x3d1   : >> { %v661_v54 = vpop.permute.xlu2 %660 }
 0x3d9   : >> { %v631_v60 = vpop.permute.xlu2 %630 }
 0x3e1   : >> { %v649_v63 = vpop.permute.xlu2 %648 }
 0x3e9   : >> { %v667_v48 = vpop.permute.xlu1 %666 }
 0x3ea   : >> { %v643_v49 = vpop.permute.xlu0 %642  ;;  %734 = vmatpush.bf16.msrb.mxu2 %v667_v48 }
 0x3f1   : >> { %v645_v51 = vpop.permute.xlu1 %644 }
 0x3f2   : >> { %v663_v52 = vpop.permute.xlu0 %662  ;;  %714 = vmatpush.bf16.msra.mxu3 %v645_v51 }
 0x3f3   : >> { %735 = vmatpush.bf16.msrb.mxu2 %v663_v52 }
 0x3f6   : >> { %715 = vmatpush.bf16.msra.mxu3 %v643_v49 }
 0x3f7   : >> { %736 = vmatpush.bf16.msrb.mxu2 %v661_v54 }
 0x3f9   : >> { %v637_v55 = vpop.permute.xlu1 %636 }
 0x3fa   : >> { %v633_v56 = vpop.permute.xlu0 %632  ;;  %716 = vmatpush.bf16.msra.mxu3 %v639_v50 }
 0x3fe   : >> { %717 = vmatpush.bf16.msra.mxu3 %v637_v55 }
 0x401   : >> { %v657_v57 = vpop.permute.xlu1 %656 }
 0x402   : >> { %v655_v58 = vpop.permute.xlu0 %654  ;;  %718 = vmatpush.bf16.msra.mxu3 %v633_v56  ;;  %737 = vmatpush.bf16.msrb.mxu2 %v657_v57 }
 0x406   : >> { %719 = vmatpush.bf16.msra.mxu3 %v631_v60  ;;  %738 = vmatpush.bf16.msrb.mxu2 %v655_v58  ;;  %v1124_v60 = vld [vmem:[%s1444_s16 + $0x20] sm:$0xff] }
 0x409   : >> { %v651_v61 = vpop.permute.xlu1 %650 }
 0x40a   : >> { %v675_v2 = vpop.permute.xlu0 %674  ;;  %720 = vmatpush.bf16.msra.mxu3 %v626_v42  ;;  %739 = vmatpush.bf16.msrb.mxu2 %v651_v61 }
 0x40b   : >> { %758 = vmatpush.bf16.msrb.mxu0 %v675_v2  ;;  %1157 = vmatpush.bf16.msrb.mxu1 %v675_v2 }
 0x40e   : >> { %721 = vmatpush.bf16.msra.mxu3 %v624_v46  ;;  %740 = vmatpush.bf16.msrb.mxu2 %v649_v63 }
 0x411   : >> { %v673_v17 = vpop.permute.xlu1 %672  ;;  %722 = vmatmul.bf16.vlgmr.msra.gmra.mxu3 %v1093_v1  ;;  %741 = vmatmul.bf16.vlgmr.msrb.gmra.mxu2 %v1097_v11 }
 0x412   : >> { %759 = vmatpush.bf16.msrb.mxu0 %v673_v17  ;;  %1158 = vmatpush.bf16.msrb.mxu1 %v673_v17 }
 0x415   : >> { %1114 = vmatmul.msk.bf16.vlgmr.msrb.gmra.mxu0 %vm354_vm9, %v1101_v18  ;;  %1115 = vmatmul.msk.bf16.vlgmr.msrb.gmra.mxu1 %vm354_vm9, %v1113_v19 }
 0x421   : >> { %727 = vmatmul.bf16.gmra.mxu3 %v1105_v26  ;;  %746 = vmatmul.bf16.gmra.mxu2 %v1109_v33 }
 0x492   : >> { %v761_v53 = vpop.f32.mrf.mxu0  ;;  %v766_v38 = vpop.f32.mrf.mxu1 }
 0x494   : >> { %v723_v27 = vpop.f32.mrf.mxu3  ;;  %v742_v28 = vpop.f32.mrf.mxu2 }
 0x495   : >> { %v743_v10 = vadd.f32 %v742_v28, %v723_v27 }
 0x497   : >> { %v1530_v59 = vadd.f32 %v761_v53, %v743_v10  ;;  %v1118_v53 = vld [vmem:[%s1473_s19 + $0x20] sm:$0xff] }
 0x499   : >> { %v782_v29 = vmul.f32 %v1530_v59, %v1337_v15 }
 0x49a   : >> { %v763_v23 = vpop.f32.mrf.mxu0  ;;  %v768_v48 = vpop.f32.mrf.mxu1 }
 0x49b   : >> { %v786_v30 = vsel %vm433_vm10, %v782_v29, 0.0  ;;  %v798_v45 = vmul.f32 %v782_v29, %v782_v29 }
 0x49c   : >> { %v725_v31 = vpop.f32.mrf.mxu3  ;;  %v744_v32 = vpop.f32.mrf.mxu2  ;;  %787 = vadd.xlane.f32.xlu2 %v786_v30 }
 0x49d   : >> { %v745_v34 = vadd.f32 %v744_v32, %v725_v31  ;;  %v802_v35 = vsel %vm433_vm10, %v798_v45, 0.0 }
 0x49e   : >> { %803 = vadd.xlane.f32.xlu0 %v802_v35 }
 0x49f   : >> { %v1536_v36 = vadd.f32 %v763_v23, %v745_v34 }
 0x4a1   : >> { %v783_v37 = vmul.f32 %v1536_v36, %v1337_v15 }
 0x4a3   : >> { %v789_v40 = vsel %vm433_vm10, %v783_v37, 0.0  ;;  %v799_v50 = vmul.f32 %v783_v37, %v783_v37 }
 0x4a4   : >> { %v728_v22 = vpop.f32.mrf.mxu3  ;;  %v747_v0 = vpop.f32.mrf.mxu2 }
 0x4a5   : >> { %v748_v39 = vadd.f32 %v747_v0, %v728_v22  ;;  %v805_v52 = vsel %vm433_vm10, %v799_v50, 0.0 }
 0x4a6   : >> { %790 = vadd.xlane.f32.xlu0 %v789_v40 }
 0x4a7   : >> { %v1541_v41 = vadd.f32 %v766_v38, %v748_v39 }
 0x4a9   : >> { %v784_v42 = vmul.f32 %v1541_v41, %v1337_v15 }
 0x4ab   : >> { %v792_v43 = vsel %vm433_vm10, %v784_v42, 0.0  ;;  %v800_v57 = vmul.f32 %v784_v42, %v784_v42 }
 0x4ac   : >> { %v730_v44 = vpop.f32.mrf.mxu3  ;;  %v749_v46 = vpop.f32.mrf.mxu2  ;;  %793 = vadd.xlane.f32.xlu1 %v792_v43 }
 0x4ad   : >> { %v750_v47 = vadd.f32 %v749_v46, %v730_v44  ;;  %v808_v58 = vsel %vm433_vm10, %v800_v57, 0.0 }
 0x4af   : >> { %v1546_v49 = vadd.f32 %v768_v48, %v750_v47 }
 0x4b1   : >> { %v785_v51 = vmul.f32 %v1546_v49, %v1337_v15 }
 0x4b3   : >> { %v795_v54 = vsel %vm433_vm10, %v785_v51, 0.0  ;;  %v801_v55 = vmul.f32 %v785_v51, %v785_v51 }
 0x4b4   : >> { %806 = vadd.xlane.f32.xlu1 %v805_v52  ;;  %796 = vadd.xlane.f32.xlu2 %v795_v54 }
 0x4b5   : >> { %v811_v56 = vsel %vm433_vm10, %v801_v55, 0.0 }
 0x4b6   : >> { %812 = vadd.xlane.f32.xlu0 %v811_v56 }
 0x4bc   : >> { %809 = vadd.xlane.f32.xlu2 %v808_v58  ;;  %v1119_v58 = vld [vmem:[%s1473_s19 + $0x28] sm:$0xff] }
 0x4ca   : >> { %912 = vperm.xlu0 %1218, %v1124_v60  }
 0x50f   : >> { %v788_v61 = vpop.xlane.xlu2 %787 }
 0x510   : >> { %v1555_v62 = vmul.f32 0.0625, %v788_v61 }
 0x511   : >> { %v804_v2 = vpop.xlane.xlu0 %803 }
 0x512   : >> { %v822_v3 = vmul.f32 %v1555_v62, %v1555_v62  ;;  %v818_v4 = vmul.f32 0.0625, %v804_v2 }
 0x514   : >> { %v826_v5 = vsub.f32 %v818_v4, %v822_v3  ;;  %v1121_v3 = vld [vmem:[%s1473_s19 + $0x38] sm:$0xff] }
 0x516   : >> { %v830_v63 = vmax.f32 %v826_v5, 0.0 }
 0x518   : >> { %v838_v1 = vadd.f32 1e-05, %v830_v63 }
 0x519   : >> { %v791_v14 = vpop.xlane.xlu0 %790 }
 0x51a   : >> { %1229 = vrsqrt.f32 %v838_v1  ;;  %v1559_v17 = vmul.f32 0.0625, %v791_v14  ;;  %vm848_vm8 = vweird.f32 %v838_v1 }
 0x51c   : >> { %v823_v24 = vmul.f32 %v1559_v17, %v1559_v17 }
 0x51f   : >> { %v794_v11 = vpop.xlane.xlu1 %793 }
 0x520   : >> { %v1230_v12 = vpop.eup %1229  ;;  %v1568_v23 = vmul.f32 0.0625, %v794_v11 }
 0x521   : >> { %v843_v13 = vmul.f32 %v1230_v12, %v838_v1  ;;  %vm849_vm7 = vweird.f32 %v1230_v12 }
 0x522   : >> { %vm850_vm9 = vmor %vm848_vm8, %vm849_vm7  ;;  %v824_v38 = vmul.f32 %v1568_v23, %v1568_v23 }
 0x523   : >> { %v844_v16 = vmul.f32 %v1230_v12, %v843_v13  ;;  %v1120_v13 = vld [vmem:[%s1473_s19 + $0x30] sm:$0xff] }
 0x525   : >> { %v845_v18 = vmul.f32 0.5, %v844_v16  ;;  %v1125_v16 = vld [vmem:[%s1444_s16 + $0x28] sm:$0xff] }
 0x527   : >> { %v846_v19 = vsub.f32 1.5, %v845_v18  ;;  %v807_v20 = vpop.xlane.xlu1 %806  ;;  %v797_v21 = vpop.xlane.xlu2 %796 }
 0x528   : >> { %v819_v25 = vmul.f32 0.0625, %v807_v20  ;;  %v1563_v26 = vmul.f32 0.0625, %v797_v21  ;;  %v1126_v20 = vld [vmem:[%s1444_s16 + $0x30] sm:$0xff]  ;;  %v1127_v21 = vld [vmem:[%s1444_s16 + $0x38] sm:$0xff] }
 0x529   : >> { %v813_v33 = vpop.xlane.xlu0 %812  ;;  %v847_v27 = vmul.f32 %v1230_v12, %v846_v19 }
 0x52a   : >> { %v827_v28 = vsub.f32 %v819_v25, %v823_v24  ;;  %v825_v10 = vmul.f32 %v1563_v26, %v1563_v26  ;;  %v821_v29 = vmul.f32 0.0625, %v813_v33  ;;  %v834_v25 = vsub.f32 %v1530_v59, %v1555_v62 }
 0x52b   : >> { %v851_v30 = vsel %vm850_vm9, %v1230_v12, %v847_v27  ;;  %v836_v59 = vsub.f32 %v1541_v41, %v1568_v23 }
 0x52c   : >> { %v831_v45 = vmax.f32 %v827_v28, 0.0  ;;  %v829_v31 = vsub.f32 %v821_v29, %v825_v10  ;;  %v882_v32 = vmul.f32 %v1118_v53, %v851_v30  ;;  %v835_v28 = vsub.f32 %v1536_v36, %v1559_v17 }
 0x52d   : >> { %v837_v17 = vsub.f32 %v1546_v49, %v1563_v26 }
 0x52e   : >> { %v839_v34 = vadd.f32 1e-05, %v831_v45  ;;  %v833_v35 = vmax.f32 %v829_v31, 0.0  ;;  %888 = vperm.xlu1 %1219, %v882_v32  }
 0x52f   : >> { %v810_v37 = vpop.xlane.xlu2 %809 }
 0x530   : >> { %1231 = vrsqrt.f32 %v839_v34  ;;  %v841_v22 = vadd.f32 1e-05, %v833_v35  ;;  %v820_v0 = vmul.f32 0.0625, %v810_v37  ;;  %vm858_vm11 = vweird.f32 %v839_v34 }
 0x532   : >> { %1233 = vrsqrt.f32 %v841_v22  ;;  %v828_v39 = vsub.f32 %v820_v0, %v824_v38  ;;  %vm878_vm14 = vweird.f32 %v841_v22 }
 0x534   : >> { %v832_v40 = vmax.f32 %v828_v39, 0.0 }
 0x536   : >> { %v1232_v42 = vpop.eup %1231  ;;  %v840_v43 = vadd.f32 1e-05, %v832_v40 }
 0x537   : >> { %v853_v44 = vmul.f32 %v1232_v42, %v839_v34  ;;  %vm859_vm10 = vweird.f32 %v1232_v42 }
 0x538   : >> { %v1234_v46 = vpop.eup %1233  ;;  %1235 = vrsqrt.f32 %v840_v43  ;;  %vm860_vm13 = vmor %vm858_vm11, %vm859_vm10  ;;  %vm868_vm1 = vweird.f32 %v840_v43 }
 0x539   : >> { %v854_v47 = vmul.f32 %v1232_v42, %v853_v44  ;;  %v873_v48 = vmul.f32 %v1234_v46, %v841_v22  ;;  %vm879_vm12 = vweird.f32 %v1234_v46 }
 0x53a   : >> { %vm880_vm15 = vmor %vm878_vm14, %vm879_vm12 }
 0x53b   : >> { %v855_v50 = vmul.f32 0.5, %v854_v47  ;;  %v874_v51 = vmul.f32 %v1234_v46, %v873_v48 }
 0x53c   : >> { %v913_v27 = vpop.permute.xlu0 %912 }
 0x53d   : >> { %v856_v52 = vsub.f32 1.5, %v855_v50  ;;  %v875_v54 = vmul.f32 0.5, %v874_v51 }
 0x53e   : >> { %v1236_v55 = vpop.eup %1235 }
 0x53f   : >> { %v876_v56 = vsub.f32 1.5, %v875_v54  ;;  %v863_v57 = vmul.f32 %v1236_v55, %v840_v43  ;;  %v857_v60 = vmul.f32 %v1232_v42, %v856_v52  ;;  %vm869_vm0 = vweird.f32 %v1236_v55 }
 0x540   : >> { %vm870_vm2 = vmor %vm868_vm1, %vm869_vm0 }
 0x541   : >> { %v864_v61 = vmul.f32 %v1236_v55, %v863_v57  ;;  %v861_v2 = vsel %vm860_vm13, %v1232_v42, %v857_v60  ;;  %v877_v4 = vmul.f32 %v1234_v46, %v876_v56 }
 0x542   : >> { %v883_v5 = vmul.f32 %v1119_v58, %v861_v2 }
 0x543   : >> { %v865_v63 = vmul.f32 0.5, %v864_v61  ;;  %v881_v1 = vsel %vm880_vm15, %v1234_v46, %v877_v4 }
 0x544   : >> { %893 = vperm.xlu2 %1220, %v883_v5   ;;  %v885_v11 = vmul.f32 %v1121_v3, %v881_v1 }
 0x545   : >> { %v866_v12 = vsub.f32 1.5, %v865_v63 }
 0x546   : >> { %903 = vperm.xlu1 %1219, %v885_v11  }
 0x547   : >> { %v867_v14 = vmul.f32 %v1236_v55, %v866_v12 }
 0x549   : >> { %v871_v18 = vsel %vm870_vm2, %v1236_v55, %v867_v14 }
 0x54a   : >> { %v884_v19 = vmul.f32 %v1120_v13, %v871_v18 }
 0x54c   : >> { %917 = vperm.xlu2 %1220, %v1125_v16   ;;  %898 = vperm.xlu0 %1218, %v884_v19  }
 0x54e   : >> { %922 = vperm.xlu1 %1219, %v1126_v20  }
 0x554   : >> { %927 = vperm.xlu0 %1218, %v1127_v21  }
 0x59e   : >> { %v894_v24 = vpop.permute.xlu2 %893 }
 0x59f   : >> { %v907_v29 = vmul.f32 %v894_v24, %v835_v28 }
 0x5a0   : >> { %v889_v33 = vpop.permute.xlu1 %888 }
 0x5a1   : >> { %v906_v53 = vmul.f32 %v889_v33, %v834_v25 }
 0x5a3   : >> { %v930_v10 = vadd.f32 %v913_v27, %v906_v53 }
 0x5a5   : >> { %v934_v30 = vmul.f32 %v930_v10, %v1337_v15 }
 0x5a6   : >> { %v918_v45 = vpop.permute.xlu2 %917 }
 0x5a7   : >> { %v938_v31 = vadd.f32 %v1279_v6, %v934_v30   ;;  %v931_v32 = vadd.f32 %v918_v45, %v907_v29 }
 0x5a9   : >> { %v935_v34 = vmul.f32 %v931_v32, %v1337_v15  ;;  %v942_v41 = vpack.c.bf16 (%p225_p4), %v938_v31, %v938_v31 }
 0x5ab   : >> { %v939_v35 = vadd.f32 %v1275_v7, %v935_v34   ;;  %947 = vst.msk [vmem:[%s1335_s23] sm:$0xf] (%p225_p4), %vm946_vm3, %v942_v41 }
 0x5ad   : > { %v943_v49 = vpack.c.bf16 (%p225_p4), %v939_v35, %v939_v35 }
 0x5af   : > { %948 = vst.msk [vmem:[%s1335_s23 + $0x4] sm:$0xf] (%p225_p4), %vm946_vm3, %v943_v49 }
 0x5b8   : >> { %v904_v37 = vpop.permute.xlu1 %903 }
 0x5b9   : >> { %v909_v39 = vmul.f32 %v904_v37, %v837_v17 }
 0x5be   : >> { %v899_v62 = vpop.permute.xlu0 %898 }
 0x5bf   : >> { %v908_v38 = vmul.f32 %v899_v62, %v836_v59 }
 0x5c0   : >> { %v923_v22 = vpop.permute.xlu1 %922 }
 0x5c1   : >> { %v932_v36 = vadd.f32 %v923_v22, %v908_v38 }
 0x5c3   : >> { %v936_v0 = vmul.f32 %v932_v36, %v1337_v15 }
 0x5c5   : >> { %v940_v40 = vadd.f32 %v1271_v8, %v936_v0  }
 0x5c6   : >> { %v928_v6 = vpop.permute.xlu0 %927 }
 0x5c7   : >> { %v933_v42 = vadd.f32 %v928_v6, %v909_v39  ;;  %v1618_v8 = vmov %v940_v40  ;;  %v1620_v6 = vmov %v938_v31  ;;  %v944_v26 = vpack.c.bf16 (%p225_p4), %v940_v40, %v940_v40 }
 0x5c9   : >> { %v937_v7 = vmul.f32 %v933_v42, %v1337_v15  ;;  %227 = sbr.rel (!%p225_p4) target bundleno = 31 (0x1f), region = 79  ;;  %949 = vst.msk [vmem:[%s1335_s23 + $0x8] sm:$0xf] (%p225_p4), %vm946_vm3, %v944_v26 }
 0x5cb   : >> { %v941_v43 = vadd.f32 %v1267_v9, %v937_v7   ;;  %v1619_v7 = vmov %v939_v35 }
 0x5cd   : >> { %v1617_v9 = vmov %v941_v43  ;;  %v945_v23 = vpack.c.bf16 (%p225_p4), %v941_v43, %v941_v43 }
 0x5cf   : > { %950 = vst.msk [vmem:[%s1335_s23 + $0xc] sm:$0xf] %vm946_vm3, %v945_v23 }
 0x5d0 PF: > { %s14_s15 = sadd.s32 1, %s1263_s15  }
 0x5d1   : > { %p11_p5 = scmp.ge.s32.totalorder %s14_s15, 4  }
 0x5d3   :  { %13 = sbr.rel (!%p11_p5) target bundleno = 1 (0x1), region = 90 }

// kernel: _lambda_.12
= control target key start
LH: loop header
LB: loop body
LE: loop exit
PB: predicated region body
PF: predicated region fallthrough
CT: control target
= control target key end

     0   :  { %s584_s15 = smov 0   ;;  %s637_s0 = inlined_call_operand.vmem [shape: bf16[2,16,100], index: 0, kind: input, shape index: {}]   ;;  %s638_s1 = inlined_call_operand.vmem [shape: bf16[4,8,64], index: 1, kind: input, shape index: {}]   ;;  %s639_s2 = inlined_call_operand.vmem [shape: f32[8,1], index: 2, kind: input, shape index: {}]   ;;  %s640_s3 = inlined_call_operand.vmem [shape: f32[8,1], index: 3, kind: input, shape index: {}]   ;;  %s641_s4 = inlined_call_operand.vmem [shape: bf16[2,8,400], index: 4, kind: output, shape index: {}]  }
   0x1 LB: > { %s498_s16 = sadd.s32 4294967295, %s549_s15   ;;  %p502_p0 = scmp.ge.s32.totalorder %s549_s15, 1  ;;  %s549_s15 = sphi %s584_s15, %s14_s15  }
   0x2   : > { %p162_p1 = scmp.lt.s32.totalorder %s549_s15, 3 }
   0x4   : > { %p163_p2 = pnand %p502_p0, %p162_p1 }
   0x5   : > { %p188_p3 = scmp.lt.s32.totalorder (!%p163_p2), %s498_s16, 1  ;;  %s551_s21 = smov (!%p163_p2), 117  }
   0x6   : > { %166 = sbr.rel (%p163_p2) target bundleno = 771 (0x303), region = 36  ;;  %s552_s22 = smov (!%p163_p2), 127  }
   0x7   : > { %s553_s23 = smov (!%p163_p2), 118   ;;  %s555_s26 = smov (!%p163_p2), 72  }
   0x8   : > { %s556_s29 = smov (!%p163_p2), 100   ;;  %s557_s6 = smov (!%p163_p2), 44  }
   0xb   : > { %s643_s16 = smov (!%p188_p3, %s498_s16), 1  ;;  %vm206_vm0 = vcmask 818176   ;;  %vm222_vm1 = vcmask 523264   ;;  %v211_v7 = vld [vmem:[%s638_s1] sm:$0xf]  ;;  %v337_v8 = vlaneseq  ;;  %v554_v22 = vmov 0.0  }
   0xc   : > { %s520_s17 = sshll.u32 %s643_s16, 3  ;;  %v514_v24 = vld [vmem:[%s638_s1 + $0x8] sm:$0xf]  ;;  %v512_v26 = vld [vmem:[%s638_s1 + $0x4] sm:$0xf]  ;;  %vm335_vm9 = vcmask 359424  }
   0xd   : > { %s192_s20 = scalar_lea.vmem %s637_s0, %s520_s17  ;;  %v338_v9 = vand.u32 127, %v337_v8  ;;  %v516_v27 = vld [vmem:[%s638_s1 + $0xc] sm:$0xf]  ;;  %vm333_vm10 = vcmask 588800   ;;  %vm378_vm11 = vcmask 130048   ;;  %s521_s13 = sshll.u32 %s643_s16, 4 }
   0xe   : > { %v522_v0 = vld [vmem:[%s192_s20] sm:$0xff]  ;;  %vm439_vm15 = vcmask 1043456   ;;  %s197_s18 = scalar_lea.vmem %s641_s4, %s521_s13 }
   0xf   : > { %v209_v1 = vsel %vm206_vm0, %v522_v0, 0  ;;  %v339_v10 = vcvt.s32.f32 %v338_v9 }
  0x10   : > { %219 = vrot.lane.b32.xlu0 %v209_v1, %s551_s21  ;;  %213 = vrot.lane.b32.xlu1 %v209_v1, %s552_s22 }
  0x11   : > { %v340_v11 = vadd.f32 0.5, %v339_v10 }
  0x13   : > { %v341_v14 = vmul.f32 0.1, %v340_v11 }
  0x15   : > { %v342_v16 = vfloor.f32 %v341_v14 }
  0x17   : > { %v343_v17 = vmul.f32 10.0, %v342_v16  ;;  %vm345_vm2 = vcmp.ge.f32.partialorder %v342_v16, 0.0  ;;  %vm346_vm3 = vcmp.lt.f32.partialorder %v342_v16, 8.0 }
  0x18   : > { %216 = vrot.lane.b32.xlu0 %v209_v1, %s553_s23  ;;  %vm347_vm4 = vmand %vm345_vm2, %vm346_vm3 }
  0x19   : > { %v344_v18 = vsub.f32 %v339_v10, %v343_v17 }
  0x1b   : > { %vm348_vm5 = vcmp.ge.f32.partialorder %v344_v18, 0.0  ;;  %vm350_vm6 = vcmp.lt.f32.partialorder %v344_v18, 8.0  ;;  %v366_v18 = vld [vmem:[%s639_s2] sm:$0xff] }
  0x1c   : > { %vm349_vm7 = vmand %vm347_vm4, %vm348_vm5 }
  0x1d   : > { %vm351_vm8 = vmand %vm349_vm7, %vm350_vm6 }
  0x1e   : > { %v352_v23 = vsel %vm351_vm8, 1.0, %v554_v22  ;;  %v367_v22 = vld [vmem:[%s640_s3] sm:$0xff] }
  0x82   : > { %v599_v2 = vpop.permute.xlu0 %219  ;;  %v214_v4 = vpop.permute.xlu1 %213 }
  0x83   : > { %230 = vmatpush.bf16.msra.mxu0 %v599_v2  ;;  %245 = vrot.lane.b32.xlu0 %v599_v2, %s552_s22 }
  0x84   : > { %299 = vrot.lane.b32.xlu2 %v599_v2, %s551_s21  ;;  %272 = vrot.lane.b32.xlu1 %v599_v2, %s553_s23 }
  0x8a   : > { %v217_v3 = vpop.permute.xlu0 %216 }
  0x8b   : > { %243 = vrot.lane.b32.xlu0 %v217_v3, %s552_s22  ;;  %231 = vmatpush.bf16.msra.mxu0 %v217_v3 }
  0x8c   : > { %297 = vrot.lane.b32.xlu1 %v217_v3, %s551_s21  ;;  %270 = vrot.lane.b32.xlu2 %v217_v3, %s553_s23 }
  0x8f   : > { %232 = vmatpush.bf16.msra.mxu0 %v214_v4 }
  0x93   : > { %233 = vmatpush.bf16.msra.mxu0 %v209_v1  ;;  %354 = vrot.lane.b32.xlu0 %v352_v23, %s556_s29 }
  0x94   : > { %295 = vrot.lane.b32.xlu1 %v214_v4, %s551_s21  ;;  %268 = vrot.lane.b32.xlu2 %v214_v4, %s553_s23 }
  0x96   : > { %511 = vmatmul.msk.bf16.vlgmr.msra.gmra.mxu0 %vm222_vm1, %v211_v7 }
  0x9c   : > { %241 = vrot.lane.b32.xlu2 %v214_v4, %s552_s22  ;;  %357 = vrot.lane.b32.xlu1 %v352_v23, %s555_s26 }
  0xa4   : > { %360 = vrot.lane.b32.xlu1 %v352_v23, %s557_s6 }
  0xde   : > { %v300_v5 = vpop.permute.xlu2 %299 }
  0xdf   : > { %311 = vmatpush.bf16.msra.mxu3 %v300_v5 }
  0xe6   : > { %v271_v6 = vpop.permute.xlu2 %270 }
  0xee   : > { %v269_v15 = vpop.permute.xlu2 %268 }
  0xf5   : > { %v246_v12 = vpop.permute.xlu0 %245 }
  0xf6   : > { %v273_v13 = vpop.permute.xlu1 %272  ;;  %257 = vmatpush.bf16.msra.mxu1 %v246_v12  ;;  %v242_v21 = vpop.permute.xlu2 %241 }
  0xf7   : > { %284 = vmatpush.bf16.msra.mxu2 %v273_v13 }
  0xfb   : > { %285 = vmatpush.bf16.msra.mxu2 %v271_v6 }
  0xfd   : > { %v244_v19 = vpop.permute.xlu0 %243 }
  0xfe   : > { %v298_v20 = vpop.permute.xlu1 %297  ;;  %258 = vmatpush.bf16.msra.mxu1 %v244_v19 }
  0xff   : > { %286 = vmatpush.bf16.msra.mxu2 %v269_v15  ;;  %312 = vmatpush.bf16.msra.mxu3 %v298_v20 }
 0x102   : > { %259 = vmatpush.bf16.msra.mxu1 %v242_v21 }
 0x103   : > { %287 = vmatpush.bf16.msra.mxu2 %v217_v3 }
 0x105   : > { %v355_v38 = vpop.permute.xlu0 %354 }
 0x106   : > { %v296_v25 = vpop.permute.xlu1 %295  ;;  %515 = vmatmul.msk.bf16.vlgmr.msra.gmra.mxu2 %vm222_vm1, %v514_v24  ;;  %260 = vmatpush.bf16.msra.mxu1 %v214_v4  ;;  %v363_v39 = vsel %vm206_vm0, %v352_v23, %v355_v38  ;;  %v558_v4 = vmov 0  }
 0x107   : > { %313 = vmatpush.bf16.msra.mxu3 %v296_v25  ;;  %v368_v41 = vperm.slane %v363_v39, 0  ;;  %539 = vset.pattern.permute.xlu2 %v558_v4 }
 0x108   : > { %540 = vset.pattern.permute.xlu0 %v558_v4 }
 0x109   : > { %513 = vmatmul.msk.bf16.vlgmr.msra.gmra.mxu1 %vm222_vm1, %v512_v26 }
 0x10b   : > { %314 = vmatpush.bf16.msra.mxu3 %v599_v2 }
 0x10e   : > { %517 = vmatmul.msk.bf16.vlgmr.msra.gmra.mxu3 %vm222_vm1, %v516_v27  ;;  %v358_v36 = vpop.permute.xlu1 %357 }
 0x10f   : > { %v364_v44 = vsel %vm333_vm10, %v355_v38, %v358_v36 }
 0x110   : > { %v369_v48 = vperm.slane %v364_v44, 0 }
 0x113   : > { %v235_v28 = vpop.f32.mrf.mxu0 }
 0x116   : > { %v361_v40 = vpop.permute.xlu1 %360 }
 0x117   : > { %v365_v42 = vsel %vm335_vm9, %v358_v36, %v361_v40  ;;  %v371_v43 = vperm.slane %v361_v40, 0 }
 0x118   : > { %v370_v47 = vperm.slane %v365_v42, 0 }
 0x11b   : > { %v237_v29 = vpop.f32.mrf.mxu0 }
 0x186   : > { %v262_v30 = vpop.f32.mrf.mxu1 }
 0x187   : > { %321 = vrot.lane.b32.xlu2 %v262_v30, %s556_s29 }
 0x189   : > { %v289_v31 = vpop.f32.mrf.mxu2 }
 0x18a   : > { %325 = vrot.lane.b32.xlu0 %v289_v31, %s555_s26 }
 0x18e   : > { %v264_v32 = vpop.f32.mrf.mxu1 }
 0x191   : > { %v291_v33 = vpop.f32.mrf.mxu2  ;;  %v316_v34 = vpop.f32.mrf.mxu3 }
 0x192   : > { %329 = vrot.lane.b32.xlu2 %v316_v34, %s557_s6 }
 0x199   : > { %v318_v35 = vpop.f32.mrf.mxu3 }
 0x1e1   : > { %v322_v37 = vpop.permute.xlu2 %321 }
 0x1e2   : > { %v332_v45 = vsel %vm206_vm0, %v235_v28, %v322_v37  ;;  %vm440_vm0 = vcmask 130052  }
 0x1e3   : > { %v372_v49 = vmul.f32 %v368_v41, %v332_v45  ;;  %vm441_vm1 = vmor %vm440_vm0, %vm439_vm15 }
 0x1e5   : > { %v383_v56 = vmul.f32 %v372_v49, %v372_v49 }
 0x1ec   : > { %v330_v46 = vpop.permute.xlu2 %329 }
 0x1ed   : > { %v375_v53 = vmul.f32 %v371_v43, %v330_v46 }
 0x1ef   : > { %v386_v59 = vmul.f32 %v375_v53, %v375_v53  ;;  %v379_v63 = vsel %vm378_vm11, %v375_v53, 0.0 }
 0x1f1   : > { %v389_v2 = vsel %vm378_vm11, %v386_v59, 0.0 }
 0x1fc   : > { %v326_v50 = vpop.permute.xlu0 %325 }
 0x1fd   : > { %v334_v51 = vsel %vm333_vm10, %v322_v37, %v326_v50  ;;  %v336_v52 = vsel %vm335_vm9, %v326_v50, %v330_v46 }
 0x1fe   : > { %v373_v54 = vmul.f32 %v369_v48, %v334_v51  ;;  %v374_v55 = vmul.f32 %v370_v47, %v336_v52 }
 0x200   : > { %v376_v57 = vadd.f32 %v373_v54, %v372_v49  ;;  %v384_v58 = vmul.f32 %v373_v54, %v373_v54  ;;  %v385_v61 = vmul.f32 %v374_v55, %v374_v55 }
 0x202   : > { %v377_v60 = vadd.f32 %v376_v57, %v374_v55  ;;  %v387_v62 = vadd.f32 %v384_v58, %v383_v56 }
 0x204   : > { %v380_v0 = vadd.f32 %v379_v63, %v377_v60  ;;  %v388_v1 = vadd.f32 %v387_v62, %v385_v61 }
 0x206   : > { %381 = vadd.xlane.f32.xlu0 %v380_v0  ;;  %v390_v3 = vadd.f32 %v389_v2, %v388_v1 }
 0x208   : > { %391 = vadd.xlane.f32.xlu1 %v390_v3 }
 0x279   : > { %v382_v5 = vpop.xlane.xlu0 %381 }
 0x27a   : > { %v393_v6 = vmul.f32 0.00390625, %v382_v5 }
 0x27b   : > { %v392_v7 = vpop.xlane.xlu1 %391 }
 0x27c   : > { %v394_v8 = vmul.f32 0.00390625, %v392_v7  ;;  %v395_v9 = vmul.f32 %v393_v6, %v393_v6  ;;  %v398_v24 = vsub.f32 %v332_v45, %v393_v6  ;;  %v399_v25 = vsub.f32 %v334_v51, %v393_v6 }
 0x27d   : > { %v400_v26 = vsub.f32 %v336_v52, %v393_v6  ;;  %v401_v27 = vsub.f32 %v330_v46, %v393_v6 }
 0x27e   : > { %v396_v10 = vsub.f32 %v394_v8, %v395_v9 }
 0x280   : > { %v397_v11 = vmax.f32 %v396_v10, 0.0 }
 0x282   : > { %v402_v12 = vadd.f32 1e-05, %v397_v11 }
 0x284   : > { %541 = vrsqrt.f32 %v402_v12  ;;  %vm409_vm13 = vweird.f32 %v402_v12 }
 0x28a   : > { %v542_v13 = vpop.eup %541 }
 0x28b   : > { %v404_v14 = vmul.f32 %v542_v13, %v402_v12  ;;  %vm410_vm12 = vweird.f32 %v542_v13 }
 0x28c   : > { %vm411_vm14 = vmor %vm409_vm13, %vm410_vm12 }
 0x28d   : > { %v405_v15 = vmul.f32 %v542_v13, %v404_v14 }
 0x28f   : > { %v406_v16 = vmul.f32 0.5, %v405_v15 }
 0x291   : > { %v407_v17 = vsub.f32 1.5, %v406_v16 }
 0x293   : > { %v408_v19 = vmul.f32 %v542_v13, %v407_v17 }
 0x295   : > { %v412_v20 = vsel %vm411_vm14, %v542_v13, %v408_v19 }
 0x296   : > { %v413_v21 = vmul.f32 %v412_v20, %v366_v18 }
 0x298   : > { %416 = vperm.xlu2 %539, %v413_v21  }
 0x2a0   : > { %425 = vperm.xlu2 %539, %v367_v22  }
 0x2f2   : > { %v417_v23 = vpop.permute.xlu2 %416 }
 0x2f3   : > { %v419_v28 = vmul.f32 %v417_v23, %v398_v24  ;;  %v420_v29 = vmul.f32 %v417_v23, %v399_v25  ;;  %v421_v30 = vmul.f32 %v417_v23, %v400_v26  ;;  %v422_v31 = vmul.f32 %v417_v23, %v401_v27 }
 0x2fa   : > { %v426_v32 = vpop.permute.xlu2 %425 }
 0x2fb   : > { %v428_v33 = vadd.f32 %v426_v32, %v419_v28  ;;  %v429_v34 = vadd.f32 %v426_v32, %v420_v29  ;;  %v430_v35 = vadd.f32 %v426_v32, %v421_v30  ;;  %v431_v36 = vadd.f32 %v426_v32, %v422_v31 }
 0x2fd   : > { %v432_v37 = vmax.f32 %v428_v33, 0.0  ;;  %v433_v38 = vmax.f32 %v429_v34, 0.0  ;;  %v434_v39 = vmax.f32 %v430_v35, 0.0  ;;  %v435_v40 = vmax.f32 %v431_v36, 0.0 }
 0x2ff   : > { %v436_v41 = vpack.c.bf16 %v433_v38, %v432_v37  ;;  %v437_v42 = vpack.c.bf16 %v435_v40, %v434_v39 }
 0x301   : > { %438 = vst [vmem:[%s197_s18] sm:$0xff] %v436_v41 }
 0x302   : > { %442 = vst.msk [vmem:[%s197_s18 + $0x8] sm:$0xff] %vm441_vm1, %v437_v42 }
 0x303 PF: > { %s14_s15 = sadd.s32 1, %s549_s15  }
 0x304   : > { %p11_p4 = scmp.ge.s32.totalorder %s14_s15, 4  }
 0x306   :  { %13 = sbr.rel (!%p11_p4) target bundleno = 1 (0x1), region = 69 }

// kernel: _lambda_.13
= control target key start
LH: loop header
LB: loop body
LE: loop exit
PB: predicated region body
PF: predicated region fallthrough
CT: control target
= control target key end

     0   :  { %s1519_s9 = smov 0   ;;  %s2726_s0 = inlined_call_operand.vmem [shape: bf16[2,8,484], index: 0, kind: input, shape index: {}]   ;;  %s2727_s1 = inlined_call_operand.vmem [shape: bf16[3,392], index: 1, kind: input, shape index: {}]   ;;  %s2728_s2 = inlined_call_operand.vmem [shape: f32[2,3,484], index: 2, kind: output, shape index: {}]  }
   0x1 LB: > { %s1409_s10 = sadd.s32 4294967295, %s1475_s9   ;;  %p1413_p0 = scmp.ge.s32.totalorder %s1475_s9, 1  ;;  %s1475_s9 = sphi %s1519_s9, %s12_s9  }
   0x2   : > { %p112_p1 = scmp.lt.s32.totalorder %s1475_s9, 3 }
   0x4   : > { %p113_p2 = pnand %p1413_p0, %p112_p1 }
   0x6   : > { %116 = sbr.rel (%p113_p2) target bundleno = 975 (0x3cf), region = 28 }
   0xb   : > { %p134_p3 = scmp.lt.s32.totalorder %s1409_s10, 1  ;;  %s1477_s15 = smov 69   ;;  %vm165_vm0 = vcmask 564224   ;;  %vm173_vm1 = vcmask 334848   ;;  %vm370_vm2 = vcmask 1043456   ;;  %vm2759_vm3 = vcmask 826368  }
   0xc   : > { %s1478_s16 = smov 126   ;;  %s1479_s17 = smov 124   ;;  %vm334_vm4 = vcmask 818176   ;;  %vm349_vm5 = vcmask 687104   ;;  %vm365_vm6 = vcmask 678912   ;;  %vm310_vm7 = vcmask 834560  }
   0xd   : > { %s2828_s10 = smov (!%p134_p3, %s1409_s10), 1  ;;  %s1480_s18 = smov 122   ;;  %vm298_vm8 = vcmask 842752   ;;  %vm286_vm9 = vcmask 850944   ;;  %vm274_vm10 = vcmask 859136   ;;  %vm262_vm11 = vcmask 867328  }
   0xe   : > { %s1424_s11 = sshll.u32 %s2828_s10, 4  ;;  %s1481_s19 = smov 105   ;;  %vm2758_vm12 = vcmask 998400   ;;  %vm2757_vm13 = vcmask 1006592   ;;  %vm226_vm14 = vcmask 1014784   ;;  %vm214_vm15 = vcmask 1022976  }
   0xf   : > { %s138_s14 = scalar_lea.vmem %s2726_s0, %s1424_s11  ;;  %s1482_s20 = smov 103  }
  0x10   : > { %v146_v0 = vld [vmem:[%s138_s14 + $0x8] sm:$0xff]  ;;  %v145_v1 = vld [vmem:[%s138_s14] sm:$0xff]  ;;  %s1483_s21 = smov 101   ;;  %s1484_s22 = smov 127  }
  0x11   : > { %v151_v2 = vunpack.c.l.b16 %v146_v0  ;;  %v149_v3 = vunpack.c.l.b16 %v145_v1  ;;  %v152_v6 = vunpack.c.h.b16 %v146_v0  ;;  %v150_v7 = vunpack.c.h.b16 %v145_v1  ;;  %s1485_s23 = smov 125   ;;  %s1486_s24 = smov 123  }
  0x12   : > { %s1487_s25 = smov 106   ;;  %s1488_s26 = smov 104  }
  0x13   : > { %v155_v4 = vpack.c.b16 %v151_v2, %v151_v2  ;;  %v153_v5 = vpack.c.b16 %v149_v3, %v149_v3  ;;  %v156_v8 = vpack.c.b16 %v152_v6, %v152_v6  ;;  %v154_v9 = vpack.c.b16 %v150_v7, %v150_v7  ;;  %s1489_s27 = smov 102   ;;  %s1490_s28 = smov 100  }
  0x14   : > { %s1491_s29 = smov 84   ;;  %s1492_s30 = smov 83  }
  0x15   : > { %161 = vrot.lane.b32.xlu1 %v155_v4, %s1477_s15  ;;  %157 = vrot.lane.b32.xlu0 %v153_v5, %s1477_s15  ;;  %s1493_s3 = smov 108   ;;  %s1494_s4 = smov 107  }
  0x16   : > { %s1495_s5 = smov 86   ;;  %s1496_s6 = smov 85  }
  0x17   : > { %s1497_s7 = smov 110   ;;  %s1498_s8 = smov 87  }
  0x18   : > { %s1499_s12 = smov 88   ;;  %s1500_s13 = smov 109  }
  0x19   : > { %s1501_s14 = smov 36  }
  0x1d   : > { %163 = vrot.lane.b32.xlu1 %v156_v8, %s1477_s15  ;;  %159 = vrot.lane.b32.xlu0 %v154_v9, %s1477_s15  ;;  %s1502_s15 = smov 82  }
  0x87   : > { %v162_v10 = vpop.permute.xlu1 %161  ;;  %v158_v11 = vpop.permute.xlu0 %157 }
  0x88   : > { %v1535_v12 = vsel %vm165_vm0, 0, %v158_v11 }
  0x89   : > { %194 = vrot.lane.b32.xlu2 %v1535_v12, %s1478_s16  ;;  %v1587_v18 = vrot.slane %v1535_v12, 4 }
  0x8f   : > { %v1539_v13 = vpop.permute.xlu1 %163  ;;  %v160_v14 = vpop.permute.xlu0 %159 }
  0x90   : > { %v1542_v15 = vsel %vm165_vm0, %v162_v10, %v1539_v13  ;;  %v1544_v16 = vsel %vm165_vm0, %v158_v11, %v160_v14  ;;  %v1546_v17 = vsel %vm165_vm0, %v160_v14, %v162_v10  ;;  %v1686_v38 = vsel %vm173_vm1, %v1539_v13, 0 }
  0x91   : > { %2760 = vst [vmem:[#allocation2_spill] sm:$0xff] %v1542_v15  ;;  %200 = vrot.lane.b32.xlu2 %v1542_v15, %s1478_s16  ;;  %198 = vrot.lane.b32.xlu1 %v1546_v17, %s1478_s16  ;;  %v1590_v19 = vrot.slane %v1546_v17, 4  ;;  %v1599_v20 = vrot.slane %v1542_v15, 4  ;;  %v1602_v21 = vrot.slane %v1544_v16, 4  ;;  %v1707_v45 = vrot.slane %v1686_v38, 4 }
  0x92   : > { %196 = vrot.lane.b32.xlu0 %v1544_v16, %s1478_s16  ;;  %vm202_vm0 = vcmask 1031168   ;;  %vm520_vm1 = vcmask 883712  }
  0x99   : > { %218 = vrot.lane.b32.xlu1 %v1535_v12, %s1479_s17  ;;  %220 = vrot.lane.b32.xlu2 %v1544_v16, %s1479_s17 }
  0x9a   : > { %222 = vrot.lane.b32.xlu0 %v1546_v17, %s1479_s17 }
  0xa1   : > { %224 = vrot.lane.b32.xlu1 %v1542_v15, %s1479_s17  ;;  %246 = vrot.lane.b32.xlu2 %v1546_v17, %s1480_s18 }
  0xa2   : > { %242 = vrot.lane.b32.xlu0 %v1535_v12, %s1480_s18 }
  0xa9   : > { %244 = vrot.lane.b32.xlu1 %v1544_v16, %s1480_s18  ;;  %266 = vrot.lane.b32.xlu2 %v1535_v12, %s1481_s19 }
  0xaa   : > { %248 = vrot.lane.b32.xlu0 %v1542_v15, %s1480_s18 }
  0xb1   : > { %270 = vrot.lane.b32.xlu1 %v1546_v17, %s1481_s19  ;;  %272 = vrot.lane.b32.xlu2 %v1542_v15, %s1481_s19 }
  0xb2   : > { %268 = vrot.lane.b32.xlu0 %v1544_v16, %s1481_s19 }
  0xb9   : > { %290 = vrot.lane.b32.xlu1 %v1535_v12, %s1482_s20  ;;  %292 = vrot.lane.b32.xlu2 %v1544_v16, %s1482_s20 }
  0xba   : > { %294 = vrot.lane.b32.xlu0 %v1546_v17, %s1482_s20 }
  0xc1   : > { %296 = vrot.lane.b32.xlu1 %v1542_v15, %s1482_s20  ;;  %318 = vrot.lane.b32.xlu2 %v1546_v17, %s1483_s21 }
  0xc2   : > { %314 = vrot.lane.b32.xlu0 %v1535_v12, %s1483_s21 }
  0xc9   : > { %316 = vrot.lane.b32.xlu1 %v1544_v16, %s1483_s21  ;;  %182 = vrot.lane.b32.xlu2 %v1587_v18, %s1484_s22 }
  0xca   : > { %186 = vrot.lane.b32.xlu0 %v1590_v19, %s1484_s22 }
  0xd1   : > { %188 = vrot.lane.b32.xlu1 %v1599_v20, %s1484_s22  ;;  %184 = vrot.lane.b32.xlu2 %v1602_v21, %s1484_s22 }
  0xd2   : > { %206 = vrot.lane.b32.xlu0 %v1587_v18, %s1485_s23 }
  0xd9   : > { %208 = vrot.lane.b32.xlu1 %v1602_v21, %s1485_s23  ;;  %210 = vrot.lane.b32.xlu2 %v1590_v19, %s1485_s23 }
  0xda   : > { %212 = vrot.lane.b32.xlu0 %v1599_v20, %s1485_s23 }
  0xe1   : > { %234 = vrot.lane.b32.xlu1 %v1590_v19, %s1486_s24  ;;  %230 = vrot.lane.b32.xlu2 %v1587_v18, %s1486_s24 }
  0xe2   : > { %232 = vrot.lane.b32.xlu0 %v1602_v21, %s1486_s24 }
  0xe3   : > { %v1619_v22 = vpop.permute.xlu2 %194 }
  0xe9   : > { %254 = vrot.lane.b32.xlu1 %v1587_v18, %s1487_s25  ;;  %236 = vrot.lane.b32.xlu2 %v1599_v20, %s1486_s24 }
  0xea   : > { %258 = vrot.lane.b32.xlu0 %v1590_v19, %s1487_s25 }
  0xeb   : > { %v1626_v23 = vpop.permute.xlu2 %200 }
  0xec   : > { %2761 = vst [vmem:[#allocation3_spill] sm:$0xff] %v1626_v23 }
  0xf1   : > { %260 = vrot.lane.b32.xlu1 %v1599_v20, %s1487_s25  ;;  %256 = vrot.lane.b32.xlu2 %v1602_v21, %s1487_s25 }
  0xf2   : > { %278 = vrot.lane.b32.xlu0 %v1587_v18, %s1488_s26 }
  0xf3   : > { %v1634_v24 = vpop.permute.xlu2 %220 }
  0xf9   : > { %280 = vrot.lane.b32.xlu1 %v1602_v21, %s1488_s26  ;;  %282 = vrot.lane.b32.xlu2 %v1590_v19, %s1488_s26 }
  0xfa   : > { %284 = vrot.lane.b32.xlu0 %v1599_v20, %s1488_s26 }
  0xfb   : > { %v1642_v25 = vpop.permute.xlu2 %246 }
  0xfc   : > { %2762 = vst [vmem:[#allocation4_spill] sm:$0xff] %v1642_v25 }
 0x101   : > { %306 = vrot.lane.b32.xlu1 %v1590_v19, %s1489_s27  ;;  %302 = vrot.lane.b32.xlu2 %v1587_v18, %s1489_s27 }
 0x102   : > { %304 = vrot.lane.b32.xlu0 %v1602_v21, %s1489_s27 }
 0x103   : > { %v1650_v26 = vpop.permute.xlu1 %198  ;;  %v1652_v27 = vpop.permute.xlu2 %266 }
 0x104   : > { %v1654_v28 = vpop.permute.xlu0 %196 }
 0x109   : > { %326 = vrot.lane.b32.xlu1 %v1587_v18, %s1490_s28  ;;  %308 = vrot.lane.b32.xlu2 %v1599_v20, %s1489_s27 }
 0x10a   : > { %320 = vrot.lane.b32.xlu0 %v1542_v15, %s1483_s21  ;;  %s2717_s21 = scalar_lea.vmem %s2728_s2, %s1424_s11 }
 0x10b   : > { %v1661_v29 = vpop.permute.xlu1 %218  ;;  %v1663_v30 = vpop.permute.xlu2 %272 }
 0x10c   : > { %v1665_v31 = vpop.permute.xlu0 %222 }
 0x111   : > { %332 = vrot.lane.b32.xlu1 %v1599_v20, %s1490_s28  ;;  %328 = vrot.lane.b32.xlu2 %v1602_v21, %s1490_s28 }
 0x112   : > { %330 = vrot.lane.b32.xlu0 %v1590_v19, %s1490_s28 }
 0x113   : > { %v1670_v32 = vpop.permute.xlu1 %224  ;;  %v1672_v33 = vpop.permute.xlu2 %292 }
 0x114   : > { %2763 = vst [vmem:[#allocation5_spill] sm:$0xff] %v1670_v32  ;;  %v1674_v34 = vpop.permute.xlu0 %242 }
 0x119   : > { %343 = vrot.lane.b32.xlu1 %v1546_v17, %s1491_s29  ;;  %339 = vrot.lane.b32.xlu2 %v1535_v12, %s1491_s29 }
 0x11a   : > { %341 = vrot.lane.b32.xlu0 %v1544_v16, %s1491_s29 }
 0x11b   : > { %v1679_v35 = vpop.permute.xlu1 %244  ;;  %v1681_v36 = vpop.permute.xlu2 %318 }
 0x11c   : > { %2764 = vst [vmem:[#allocation6_spill] sm:$0xff] %v1679_v35  ;;  %v1683_v37 = vpop.permute.xlu0 %248 }
 0x11d   : > { %2765 = vst [vmem:[#allocation7_spill] sm:$0xff] %v1681_v36 }
 0x11e   : > { %2766 = vst [vmem:[#allocation8_spill] sm:$0xff] %v1683_v37 }
 0x121   : > { %355 = vrot.lane.b32.xlu1 %v1587_v18, %s1492_s30  ;;  %345 = vrot.lane.b32.xlu2 %v1542_v15, %s1491_s29 }
 0x122   : > { %347 = vrot.lane.b32.xlu0 %v1686_v38, %s1491_s29 }
 0x123   : > { %v1691_v39 = vpop.permute.xlu1 %270  ;;  %v1693_v40 = vpop.permute.xlu2 %182 }
 0x124   : > { %v1695_v41 = vpop.permute.xlu0 %268 }
 0x129   : > { %361 = vrot.lane.b32.xlu1 %v1599_v20, %s1492_s30  ;;  %357 = vrot.lane.b32.xlu2 %v1602_v21, %s1492_s30 }
 0x12a   : > { %359 = vrot.lane.b32.xlu0 %v1590_v19, %s1492_s30 }
 0x12b   : > { %v1700_v42 = vpop.permute.xlu1 %290  ;;  %v1702_v43 = vpop.permute.xlu2 %184 }
 0x12c   : > { %v1704_v44 = vpop.permute.xlu0 %294 }
 0x131   : > { %501 = vrot.lane.b32.xlu1 %v1686_v38, %s1478_s16  ;;  %363 = vrot.lane.b32.xlu2 %v1707_v45, %s1492_s30  ;;  %s1503_s16 = smov 118  }
 0x132   : > { %498 = vrot.lane.b32.xlu0 %v1707_v45, %s1484_s22 }
 0x133   : > { %v1714_v46 = vpop.permute.xlu1 %296  ;;  %v1716_v47 = vpop.permute.xlu2 %210 }
 0x134   : > { %v1718_v48 = vpop.permute.xlu0 %314 }
 0x139   : > { %510 = vrot.lane.b32.xlu1 %v1587_v18, %s1493_s3  ;;  %504 = vrot.lane.b32.xlu2 %v1707_v45, %s1485_s23 }
 0x13a   : > { %507 = vrot.lane.b32.xlu0 %v1686_v38, %s1479_s17 }
 0x13b   : > { %v1725_v49 = vpop.permute.xlu1 %316  ;;  %v1727_v50 = vpop.permute.xlu2 %230 }
 0x13c   : > { %2767 = vst [vmem:[#allocation9_spill] sm:$0xff] %v1725_v49  ;;  %v1729_v51 = vpop.permute.xlu0 %186 }
 0x141   : > { %516 = vrot.lane.b32.xlu1 %v1599_v20, %s1493_s3  ;;  %512 = vrot.lane.b32.xlu2 %v1602_v21, %s1493_s3 }
 0x142   : > { %514 = vrot.lane.b32.xlu0 %v1590_v19, %s1493_s3 }
 0x143   : > { %v1734_v52 = vpop.permute.xlu1 %188  ;;  %v1736_v53 = vpop.permute.xlu2 %236 }
 0x144   : > { %2768 = vst [vmem:[#allocation10_spill] sm:$0xff] %v1734_v52  ;;  %v1738_v54 = vpop.permute.xlu0 %206 }
 0x145   : > { %2769 = vst [vmem:[#allocation11_spill] sm:$0xff] %v1736_v53 }
 0x149   : > { %527 = vrot.lane.b32.xlu1 %v1544_v16, %s1494_s4  ;;  %518 = vrot.lane.b32.xlu2 %v1707_v45, %s1493_s3 }
 0x14a   : > { %525 = vrot.lane.b32.xlu0 %v1535_v12, %s1494_s4 }
 0x14b   : > { %v1743_v55 = vpop.permute.xlu1 %208  ;;  %v1745_v56 = vpop.permute.xlu2 %256 }
 0x14c   : > { %v1747_v57 = vpop.permute.xlu0 %212 }
 0x14d   : > { %2770 = vst [vmem:[#allocation12_spill] sm:$0xff] %v1747_v57 }
 0x151   : > { %533 = vrot.lane.b32.xlu1 %v1686_v38, %s1494_s4  ;;  %529 = vrot.lane.b32.xlu2 %v1546_v17, %s1494_s4 }
 0x152   : > { %531 = vrot.lane.b32.xlu0 %v1542_v15, %s1494_s4 }
 0x153   : > { %v1752_v58 = vpop.permute.xlu1 %234  ;;  %v1754_v59 = vpop.permute.xlu2 %282 }
 0x154   : > { %2771 = vst [vmem:[#allocation13_spill] sm:$0xff] %v1752_v58  ;;  %v1756_v60 = vpop.permute.xlu0 %232 }
 0x155   : > { %2772 = vst [vmem:[#allocation14_spill] sm:$0xff] %v1756_v60 }
 0x159   : > { %546 = vrot.lane.b32.xlu1 %v1707_v45, %s1488_s26  ;;  %540 = vrot.lane.b32.xlu2 %v1707_v45, %s1487_s25 }
 0x15a   : > { %543 = vrot.lane.b32.xlu0 %v1686_v38, %s1481_s19 }
 0x15b   : > { %v1764_v61 = vpop.permute.xlu1 %254  ;;  %v1766_v62 = vpop.permute.xlu2 %302 }
 0x15c   : > { %v1768_v63 = vpop.permute.xlu0 %258 }
 0x161   : > { %555 = vrot.lane.b32.xlu1 %v1535_v12, %s1495_s5  ;;  %549 = vrot.lane.b32.xlu2 %v1686_v38, %s1482_s20 }
 0x162   : > { %552 = vrot.lane.b32.xlu0 %v1707_v45, %s1489_s27 }
 0x163   : > { %v1775_v0 = vpop.permute.xlu1 %260  ;;  %v1777_v1 = vpop.permute.xlu2 %308 }
 0x164   : > { %v1779_v2 = vpop.permute.xlu0 %278 }
 0x169   : > { %561 = vrot.lane.b32.xlu1 %v1542_v15, %s1495_s5  ;;  %557 = vrot.lane.b32.xlu2 %v1544_v16, %s1495_s5 }
 0x16a   : > { %559 = vrot.lane.b32.xlu0 %v1546_v17, %s1495_s5 }
 0x16b   : > { %v1784_v3 = vpop.permute.xlu1 %280  ;;  %v329_v4 = vpop.permute.xlu2 %328 }
 0x16c   : > { %v1786_v5 = vpop.permute.xlu0 %284 }
 0x171   : > { %572 = vrot.lane.b32.xlu1 %v1602_v21, %s1496_s6  ;;  %563 = vrot.lane.b32.xlu2 %v1686_v38, %s1495_s5 }
 0x172   : > { %570 = vrot.lane.b32.xlu0 %v1587_v18, %s1496_s6 }
 0x173   : > { %v1791_v6 = vpop.permute.xlu1 %306  ;;  %v340_v7 = vpop.permute.xlu2 %339 }
 0x174   : > { %v1793_v8 = vpop.permute.xlu0 %304 }
 0x179   : > { %578 = vrot.lane.b32.xlu1 %v1707_v45, %s1496_s6  ;;  %574 = vrot.lane.b32.xlu2 %v1590_v19, %s1496_s6 }
 0x17a   : > { %576 = vrot.lane.b32.xlu0 %v1599_v20, %s1496_s6 }
 0x17b   : > { %v327_v9 = vpop.permute.xlu1 %326  ;;  %v346_v10 = vpop.permute.xlu2 %345 }
 0x17c   : > { %v321_v11 = vpop.permute.xlu0 %320  ;;  %v335_v57 = vsel %vm334_vm4, %v327_v9, %v329_v4  ;;  %v299_v9 = vsel %vm298_vm8, %v1700_v42, %v1672_v33 }
 0x17d   : > { %v325_v58 = vsel %vm2759_vm3, %v1681_v36, %v321_v11 }
 0x181   : > { %653 = vrot.lane.b32.xlu1 %v1590_v19, %s1497_s7  ;;  %649 = vrot.lane.b32.xlu2 %v1587_v18, %s1497_s7 }
 0x182   : > { %651 = vrot.lane.b32.xlu0 %v1602_v21, %s1497_s7 }
 0x183   : > { %v333_v13 = vpop.permute.xlu1 %332  ;;  %v1804_v14 = vpop.permute.xlu2 %357 }
 0x184   : > { %v331_v53 = vpop.permute.xlu0 %330  ;;  %v1807_v37 = vsel %vm370_vm2, %v321_v11, %v333_v13 }
 0x185   : > { %2773 = vst [vmem:[#allocation15_spill] sm:$0xff] %v1807_v37  ;;  %v1812_v25 = vsel %vm334_vm4, %v329_v4, %v331_v53  ;;  %v337_v18 = vsel %vm334_vm4, %v331_v53, %v333_v13  ;;  %vm190_vm4 = vcmask 1039360  }
 0x186   : > { %2774 = vst [vmem:[#allocation16_spill] sm:$0xff] %v1812_v25  ;;  %v1816_v52 = vsel %vm370_vm2, %v325_v58, %v337_v18 }
 0x187   : > { %2775 = vst [vmem:[#allocation17_spill] sm:$0xff] %v1816_v52 }
 0x189   : > { %691 = vrot.lane.b32.xlu1 %v1602_v21, %s1498_s8  ;;  %679 = vrot.lane.b32.xlu2 %v1544_v16, %s1499_s12 }
 0x18a   : > { %681 = vrot.lane.b32.xlu0 %v1546_v17, %s1499_s12 }
 0x18b   : > { %v1824_v11 = vpop.permute.xlu1 %343  ;;  %v364_v37 = vpop.permute.xlu2 %363 }
 0x18c   : > { %v342_v25 = vpop.permute.xlu0 %341  ;;  %v352_v53 = vsel %vm349_vm5, %v1824_v11, %v346_v10 }
 0x18d   : > { %v350_v52 = vsel %vm349_vm5, %v340_v7, %v342_v25 }
 0x191   : > { %666 = vrot.lane.b32.xlu1 %v1544_v16, %s1500_s13  ;;  %693 = vrot.lane.b32.xlu2 %v1590_v19, %s1498_s8 }
 0x192   : > { %664 = vrot.lane.b32.xlu0 %v1535_v12, %s1500_s13 }
 0x193   : > { %v356_v21 = vpop.permute.xlu1 %355  ;;  %v1834_v58 = vpop.permute.xlu2 %504 }
 0x194   : > { %2776 = vst [vmem:[#allocation18_spill] sm:$0xff] %v1834_v58  ;;  %v348_v13 = vpop.permute.xlu0 %347  ;;  %v366_v18 = vsel %vm365_vm6, %v356_v21, %v1804_v14  ;;  %v323_v58 = vsel %vm2759_vm3, %v1718_v48, %v1725_v49  ;;  %vm1026_vm3 = vcmask 293888  }
 0x195   : > { %v353_v36 = vsel %vm349_vm5, %v346_v10, %v348_v13  ;;  %v1841_v23 = vsel %vm370_vm2, %v348_v13, %v364_v37  ;;  %v484_v19 = vsel %vm370_vm2, %v350_v52, %v366_v18  ;;  %v468_v7 = vsel %vm370_vm2, %v323_v58, %v335_v57 }
 0x196   : > { %2777 = vst [vmem:[#allocation19_spill] sm:$0xff] %v1841_v23  ;;  %1127 = vmatpush.bf16.msra.mxu0 %v484_v19  ;;  %v311_v52 = vsel %vm310_vm7, %v1766_v62, %v1793_v8  ;;  %v287_v62 = vsel %vm286_vm9, %v1779_v2, %v1784_v3  ;;  %v1891_v2 = vsel %vm262_vm11, %v1764_v61, %v1745_v56 }
 0x197   : > { %v1866_v58 = vsel %vm370_vm2, %v299_v9, %v311_v52  ;;  %v239_v52 = vsel %vm2757_vm13, %v1727_v50, %v1756_v60  ;;  %v743_v9 = vsel %vm370_vm2, %v342_v25, %v1804_v14  ;;  %vm659_vm13 = vcmask 900096  }
 0x199   : > { %695 = vrot.lane.b32.xlu1 %v1599_v20, %s1498_s8  ;;  %668 = vrot.lane.b32.xlu2 %v1546_v17, %s1500_s13 }
 0x19a   : > { %683 = vrot.lane.b32.xlu0 %v1542_v15, %s1499_s12  ;;  %1128 = vmatpush.bf16.msra.mxu0 %v468_v7 }
 0x19b   : > { %v362_v4 = vpop.permute.xlu1 %361  ;;  %v1858_v48 = vpop.permute.xlu2 %512 }
 0x19c   : > { %v360_v10 = vpop.permute.xlu0 %359  ;;  %v369_v21 = vsel %vm365_vm6, %v362_v4, %v364_v37  ;;  %v275_v37 = vsel %vm274_vm10, %v1652_v27, %v1695_v41 }
 0x19d   : > { %v368_v57 = vsel %vm365_vm6, %v360_v10, %v362_v4  ;;  %v1869_v13 = vsel %vm370_vm2, %v353_v36, %v369_v21  ;;  %v1886_v36 = vsel %vm370_vm2, %v275_v37, %v287_v62  ;;  %v367_v7 = vsel %vm365_vm6, %v1804_v14, %v360_v10 }
 0x19e   : > { %1129 = vmatpush.bf16.msra.mxu0 %v1866_v58  ;;  %v1876_v42 = vsel %vm370_vm2, %v352_v53, %v368_v57  ;;  %v1915_v4 = vsel %vm226_vm14, %v1661_v29, %v1634_v24  ;;  %v1942_v21 = vsel %vm202_vm0, %v1619_v22, %v1654_v28  ;;  %vm565_vm6 = vcmask 703488  }
 0x19f   : > { %v404_v29 = vsel %vm370_vm2, %v1915_v4, %v239_v52 }
 0x1a1   : > { %670 = vrot.lane.b32.xlu1 %v1542_v15, %s1500_s13  ;;  %655 = vrot.lane.b32.xlu2 %v1599_v20, %s1497_s7  ;;  %v251_v20 = vsel %vm2758_vm12, %v1674_v34, %v1679_v35  ;;  %v351_v34 = vsel %vm349_vm5, %v342_v25, %v1824_v11  ;;  %v215_v25 = vsel %vm214_vm15, %v1738_v54, %v1743_v55  ;;  %vm535_vm5 = vcmask 875520  }
 0x1a2   : > { %657 = vrot.lane.b32.xlu0 %v1707_v45, %s1497_s7  ;;  %1130 = vmatpush.bf16.msra.mxu0 %v1886_v36  ;;  %v420_v61 = vsel %vm370_vm2, %v251_v20, %v1891_v2  ;;  %v1923_v10 = vsel %vm370_vm2, %v351_v34, %v367_v7  ;;  %v1946_v57 = vsel %vm370_vm2, %v1942_v21, %v215_v25  ;;  %vm864_vm12 = vcmask 670720  }
 0x1a3   : > { %v1896_v27 = vpop.permute.xlu1 %501  ;;  %v1898_v53 = vpop.permute.xlu2 %518  ;;  %2781 = vst [vmem:[#allocation23_spill] sm:$0xff] %v1923_v10  ;;  %v191_v54 = vsel %vm190_vm4, %v1693_v40, %v1702_v43 }
 0x1a4   : > { %2778 = vst [vmem:[#allocation20_spill] sm:$0xff] %v1896_v27  ;;  %v1900_v18 = vpop.permute.xlu0 %498  ;;  %v1956_v62 = vsel %vm370_vm2, %v1535_v12, %v191_v54 }
 0x1a5   : > { %2779 = vst [vmem:[#allocation21_spill] sm:$0xff] %v1898_v53 }
 0x1a6   : > { %2780 = vst [vmem:[#allocation22_spill] sm:$0xff] %v1900_v18  ;;  %1131 = vmatpush.bf16.msra.mxu0 %v420_v61 }
 0x1a9   : > { %1016 = vrot.lane.b32.xlu2 %v743_v9, %s1501_s14  ;;  %854 = vrot.lane.b32.xlu1 %v484_v19, %s1502_s15 }
 0x1aa   : > { %1018 = vrot.lane.b32.xlu0 %v1923_v10, %s1501_s14  ;;  %1132 = vmatpush.bf16.msra.mxu0 %v404_v29 }
 0x1ab   : > { %v511_v50 = vpop.permute.xlu1 %510  ;;  %v530_v14 = vpop.permute.xlu2 %529 }
 0x1ac   : > { %v1933_v11 = vpop.permute.xlu0 %507  ;;  %v1937_v19 = vsel %vm520_vm1, %v511_v50, %v1858_v48 }
 0x1ad   : > { %2782 = vst [vmem:[#allocation24_spill] sm:$0xff] %v1933_v11  ;;  %v509_v20 = vsel %vm226_vm14, %v1670_v32, %v1933_v11 }
 0x1ae   : > { %1133 = vmatpush.bf16.msra.mxu0 %v1946_v57 }
 0x1b1   : > { %856 = vrot.lane.b32.xlu2 %v1923_v10, %s1502_s15 }
 0x1b2   : > { %1134 = vmatpush.bf16.msra.mxu0 %v1956_v62 }
 0x1b3   : > { %v517_v22 = vpop.permute.xlu1 %516  ;;  %v541_v37 = vpop.permute.xlu2 %540 }
 0x1b4   : > { %v515_v61 = vpop.permute.xlu0 %514  ;;  %v1964_v40 = vsel %vm520_vm1, %v517_v22, %v1898_v53 }
 0x1b5   : > { %2783 = vst [vmem:[#allocation25_spill] sm:$0xff] %v1964_v40  ;;  %v1968_v7 = vsel %vm520_vm1, %v1858_v48, %v515_v61  ;;  %v1971_v12 = vsel %vm520_vm1, %v515_v61, %v517_v22  ;;  %v1975_v52 = vsel %vm370_vm2, %v509_v20, %v1964_v40  ;;  %v542_v20 = vsel %vm262_vm11, %v1775_v0, %v541_v37 }
 0x1b6   : > { %2784 = vst [vmem:[#allocation26_spill] sm:$0xff] %v1975_v52  ;;  %vm580_vm1 = vcmask 695296  }
 0x1b9   : > { %685 = vrot.lane.b32.xlu2 %v1686_v38, %s1499_s12 }
 0x1bb   : > { %v1979_v34 = vpop.permute.xlu1 %527  ;;  %v550_v9 = vpop.permute.xlu2 %549 }
 0x1bc   : > { %v1981_v29 = vpop.permute.xlu0 %525  ;;  %v1985_v48 = vsel %vm535_vm5, %v1979_v34, %v530_v14 }
 0x1c3   : > { %v534_v25 = vpop.permute.xlu1 %533  ;;  %v558_v50 = vpop.permute.xlu2 %557 }
 0x1c4   : > { %v532_v54 = vpop.permute.xlu0 %531  ;;  %v1988_v22 = vsel %vm370_vm2, %v534_v25, %v541_v37 }
 0x1c5   : > { %2785 = vst [vmem:[#allocation27_spill] sm:$0xff] %v1988_v22  ;;  %v1993_v61 = vsel %vm535_vm5, %v530_v14, %v532_v54  ;;  %v539_v60 = vsel %vm535_vm5, %v532_v54, %v534_v25 }
 0x1c6   : > { %v1997_v11 = vsel %vm370_vm2, %v539_v60, %v542_v20  ;;  %v551_v60 = vsel %vm298_vm8, %v1714_v46, %v550_v9 }
 0x1c7   : > { %2786 = vst [vmem:[#allocation28_spill] sm:$0xff] %v1997_v11 }
 0x1cb   : > { %v547_v35 = vpop.permute.xlu1 %546  ;;  %v564_v49 = vpop.permute.xlu2 %563 }
 0x1cc   : > { %v544_v10 = vpop.permute.xlu0 %543  ;;  %v548_v53 = vsel %vm286_vm9, %v1786_v5, %v547_v35 }
 0x1cd   : > { %v545_v40 = vsel %vm274_vm10, %v1663_v30, %v544_v10  ;;  %v2004_v22 = vsel %vm370_vm2, %v544_v10, %v547_v35 }
 0x1ce   : > { %2787 = vst [vmem:[#allocation29_spill] sm:$0xff] %v2004_v22  ;;  %v2007_v14 = vsel %vm370_vm2, %v545_v40, %v548_v53 }
 0x1cf   : > { %2788 = vst [vmem:[#allocation30_spill] sm:$0xff] %v2007_v14 }
 0x1d3   : > { %v556_v37 = vpop.permute.xlu1 %555  ;;  %v575_v25 = vpop.permute.xlu2 %574 }
 0x1d4   : > { %v553_v54 = vpop.permute.xlu0 %552 }
 0x1d5   : > { %v554_v20 = vsel %vm310_vm7, %v1777_v1, %v553_v54  ;;  %v2014_v18 = vsel %vm370_vm2, %v550_v9, %v553_v54 }
 0x1d6   : > { %2789 = vst [vmem:[#allocation31_spill] sm:$0xff] %v2014_v18  ;;  %v2017_v27 = vsel %vm370_vm2, %v551_v60, %v554_v20 }
 0x1d7   : > { %2790 = vst [vmem:[#allocation32_spill] sm:$0xff] %v2017_v27 }
 0x1db   : > { %v562_v35 = vpop.permute.xlu1 %561  ;;  %v2019_v10 = vpop.permute.xlu2 %649 }
 0x1dc   : > { %v560_v53 = vpop.permute.xlu0 %559  ;;  %v569_v40 = vsel %vm565_vm6, %v562_v35, %v564_v49 }
 0x1dd   : > { %v568_v22 = vsel %vm565_vm6, %v560_v53, %v562_v35  ;;  %v567_v52 = vsel %vm565_vm6, %v558_v50, %v560_v53  ;;  %v566_v53 = vsel %vm565_vm6, %v556_v37, %v558_v50  ;;  %vm699_vm6 = vcmask 711680  }
 0x1e3   : > { %v573_v23 = vpop.permute.xlu1 %572  ;;  %v680_v11 = vpop.permute.xlu2 %679 }
 0x1e4   : > { %v571_v32 = vpop.permute.xlu0 %570  ;;  %v582_v9 = vsel %vm580_vm1, %v573_v23, %v575_v25  ;;  %v740_v54 = vsel %vm370_vm2, %v558_v50, %v573_v23 }
 0x1e5   : > { %1006 = vrot.lane.b32.xlu0 %v740_v54, %s1501_s14  ;;  %v636_v60 = vsel %vm370_vm2, %v567_v52, %v582_v9  ;;  %v581_v20 = vsel %vm580_vm1, %v571_v32, %v573_v23 }
 0x1e6   : > { %846 = vrot.lane.b32.xlu2 %v636_v60, %s1502_s15  ;;  %1008 = vrot.lane.b32.xlu1 %v636_v60, %s1501_s14  ;;  %v633_v52 = vsel %vm370_vm2, %v566_v53, %v581_v20  ;;  %v312_v20 = vsel %vm310_vm7, %v1793_v8, %v1791_v6 }
 0x1eb   : > { %v579_v35 = vpop.permute.xlu1 %578  ;;  %v2031_v18 = vpop.permute.xlu2 %693 }
 0x1ec   : > { %v577_v15 = vpop.permute.xlu0 %576  ;;  %v2035_v27 = vsel %vm370_vm2, %v564_v49, %v579_v35 }
 0x1ed   : > { %v583_v14 = vsel %vm580_vm1, %v575_v25, %v577_v15  ;;  %v584_v54 = vsel %vm580_vm1, %v577_v15, %v579_v35  ;;  %697 = vrot.lane.b32.xlu0 %v1707_v45, %s1498_s8  ;;  %v288_v15 = vsel %vm286_vm9, %v1784_v3, %v1754_v59  ;;  %v276_v45 = vsel %vm274_vm10, %v1695_v41, %v1691_v39 }
 0x1ee   : > { %834 = vrot.lane.b32.xlu2 %v1866_v58, %s1502_s15  ;;  %844 = vrot.lane.b32.xlu1 %v633_v52, %s1502_s15  ;;  %v2046_v23 = vsel %vm370_vm2, %v568_v22, %v583_v14  ;;  %v2049_v32 = vsel %vm370_vm2, %v569_v40, %v584_v54  ;;  %v2060_v58 = vsel %vm370_vm2, %v276_v45, %v288_v15  ;;  %vm687_vm1 = vcmask 719872  }
 0x1ef   : > { %v536_v22 = vsel %vm535_vm5, %v1981_v29, %v1979_v34  ;;  %v300_v35 = vsel %vm298_vm8, %v1672_v33, %v1704_v44  ;;  %vm674_vm5 = vcmask 891904  }
 0x1f0   : > { %v608_v34 = vsel %vm370_vm2, %v536_v22, %v1891_v2  ;;  %v2090_v52 = vsel %vm370_vm2, %v300_v35, %v312_v20  ;;  %v2112_v22 = vsel %vm262_vm11, %v1745_v56, %v1768_v63 }
 0x1f1   : > { %v610_v56 = vsel %vm370_vm2, %v1985_v48, %v2112_v22 }
 0x1f3   : > { %v654_v49 = vpop.permute.xlu1 %653  ;;  %v669_v50 = vpop.permute.xlu2 %668 }
 0x1f4   : > { %v2057_v37 = vpop.permute.xlu0 %651 }
 0x1f5   : > { %v661_v48 = vsel %vm659_vm13, %v2057_v37, %v654_v49 }
 0x1f6   : > { %988 = vrot.lane.b32.xlu2 %v2060_v58, %s1501_s14 }
 0x1fb   : > { %v692_v3 = vpop.permute.xlu1 %691  ;;  %v656_v14 = vpop.permute.xlu2 %655 }
 0x1fc   : > { %v2067_v25 = vpop.permute.xlu0 %681  ;;  %v700_v41 = vsel %vm699_vm6, %v692_v3, %v2031_v18  ;;  %v2072_v40 = vsel %vm659_vm13, %v654_v49, %v656_v14  ;;  %v725_v9 = vsel %vm370_vm2, %v680_v11, %v692_v3 }
 0x1fd   : > { %v688_v60 = vsel %vm687_vm1, %v680_v11, %v2067_v25  ;;  %996 = vrot.lane.b32.xlu0 %v725_v9, %s1501_s14 }
 0x1fe   : > { %976 = vrot.lane.b32.xlu2 %v608_v34, %s1501_s14  ;;  %v728_v29 = vsel %vm370_vm2, %v688_v60, %v700_v41 }
 0x1ff   : > { %998 = vrot.lane.b32.xlu1 %v728_v29, %s1501_s14 }
 0x203   : > { %v667_v11 = vpop.permute.xlu1 %666  ;;  %v1017_v53 = vpop.permute.xlu2 %1016 }
 0x204   : > { %v665_v54 = vpop.permute.xlu0 %664  ;;  %v676_v8 = vsel %vm674_vm5, %v667_v11, %v669_v50 }
 0x205   : > { %836 = vrot.lane.b32.xlu0 %v2090_v52, %s1502_s15  ;;  %v716_v45 = vsel %vm370_vm2, %v676_v8, %v1968_v7 }
 0x206   : > { %814 = vrot.lane.b32.xlu2 %v608_v34, %s1502_s15 }
 0x207   : > { %986 = vrot.lane.b32.xlu1 %v1886_v36, %s1501_s14 }
 0x20b   : > { %v2098_v2 = vpop.permute.xlu1 %695  ;;  %v2100_v33 = vpop.permute.xlu2 %856 }
 0x20c   : > { %v684_v15 = vpop.permute.xlu0 %683 }
 0x20d   : > { %824 = vrot.lane.b32.xlu0 %v1886_v36, %s1502_s15  ;;  %v2121_v36 = vsel %vm226_vm14, %v1634_v24, %v1665_v31 }
 0x20e   : > { %968 = vrot.lane.b32.xlu2 %v716_v45, %s1501_s14  ;;  %v598_v24 = vsel %vm370_vm2, %v2121_v36, %v1968_v7  ;;  %v204_v7 = vsel %vm202_vm0, %v1654_v28, %v1650_v26  ;;  %v596_v28 = vsel %vm370_vm2, %v1915_v4, %v1937_v19  ;;  %v689_v4 = vsel %vm687_vm1, %v2067_v25, %v684_v15 }
 0x20f   : > { %826 = vrot.lane.b32.xlu1 %v2060_v58, %s1502_s15  ;;  %v706_v49 = vsel %vm370_vm2, %v204_v7, %v661_v48 }
 0x213   : > { %v2114_v3 = vpop.permute.xlu1 %670  ;;  %v2116_v41 = vpop.permute.xlu2 %685 }
 0x214   : > { %v2123_v9 = vpop.permute.xlu0 %657  ;;  %v677_v60 = vsel %vm674_vm5, %v669_v50, %v2114_v3  ;;  %v2129_v34 = vsel %vm687_vm1, %v684_v15, %v2116_v41 }
 0x215   : > { %v2136_v29 = vsel %vm659_vm13, %v656_v14, %v2123_v9  ;;  %978 = vrot.lane.b32.xlu0 %v610_v56, %s1501_s14  ;;  %v2144_v50 = vsel %vm370_vm2, %v677_v60, %v1971_v12  ;;  %v675_v14 = vsel %vm674_vm5, %v665_v54, %v667_v11 }
 0x216   : > { %806 = vrot.lane.b32.xlu2 %v598_v24, %s1502_s15  ;;  %v714_v11 = vsel %vm370_vm2, %v675_v14, %v1937_v19  ;;  %v701_v19 = vsel %vm699_vm6, %v2031_v18, %v2098_v2  ;;  %v301_v18 = vsel %vm298_vm8, %v1704_v44, %v1714_v46  ;;  %v289_v44 = vsel %vm286_vm9, %v1754_v59, %v1786_v5  ;;  %v2791_v24 = vld [vmem:[#allocation30_spill] sm:$0xff] }
 0x217   : > { %672 = vrot.lane.b32.xlu1 %v1686_v38, %s1500_s13  ;;  %vm1112_vm8 = vcmask 64512   ;;  %vm2812_vm9 = vcmask 826368  }
 0x21b   : > { %v855_v20 = vpop.permute.xlu1 %854 }
 0x21c   : > { %v2155_v35 = vpop.permute.xlu0 %1018  ;;  %v893_v8 = vsel %vm864_vm12, %v855_v20, %v2100_v33 }
 0x21d   : > { %816 = vrot.lane.b32.xlu0 %v610_v56, %s1502_s15  ;;  %1140 = vmatpush.bf16.msra.mxu1 %v893_v8  ;;  %v1055_v45 = vsel %vm1026_vm3, %v1017_v53, %v2155_v35  ;;  %v660_v53 = vsel %vm659_vm13, %v2019_v10, %v2057_v37  ;;  %v731_v10 = vsel %vm370_vm2, %v689_v4, %v701_v19  ;;  %v2796_v4 = vld [vmem:[#allocation5_spill] sm:$0xff] }
 0x21e   : > { %1153 = vmatpush.bf16.msra.mxu2 %v1055_v45  ;;  %958 = vrot.lane.b32.xlu2 %v706_v49, %s1501_s14  ;;  %v704_v54 = vsel %vm370_vm2, %v1942_v21, %v660_v53  ;;  %v313_v21 = vsel %vm310_vm7, %v1791_v6, %v1777_v1  ;;  %v216_v37 = vsel %vm214_vm15, %v1743_v55, %v1716_v47  ;;  %v2793_v45 = vld [vmem:[#allocation3_spill] sm:$0xff]  ;;  %vm1099_vm7 = vcmask 965632  }
 0x21f   : > { %966 = vrot.lane.b32.xlu1 %v714_v11, %s1501_s14  ;;  %v2211_v25 = vsel %vm370_vm2, %v204_v7, %v216_v37  ;;  %v192_v6 = vsel %vm190_vm4, %v1702_v43, %v1729_v51  ;;  %v2792_v7 = vld [vmem:[#allocation12_spill] sm:$0xff]  ;;  %v205_v49 = vsel %vm202_vm0, %v1650_v26, %v2793_v45  ;;  %v2300_v19 = vsel %vm226_vm14, %v1665_v31, %v2796_v4 }
 0x220   : > { %v2235_v60 = vsel %vm370_vm2, %v1544_v16, %v192_v6  ;;  %v217_v8 = vsel %vm214_vm15, %v1716_v47, %v2792_v7  ;;  %v2794_v11 = vld [vmem:[#allocation32_spill] sm:$0xff]  ;;  %v2795_v47 = vld [vmem:[#allocation2_spill] sm:$0xff] }
 0x225   : > { %1020 = vrot.lane.b32.xlu0 %v1876_v42, %s1501_s14 }
 0x226   : > { %1093 = vrot.lane.b32.xlu2 %v1546_v17, %s1503_s16 }
 0x227   : > { %804 = vrot.lane.b32.xlu1 %v596_v28, %s1502_s15  ;;  %v2282_v28 = vsel %vm370_vm2, %v205_v49, %v217_v8  ;;  %v2800_v8 = vld [vmem:[#allocation19_spill] sm:$0xff] }
 0x22d   : > { %858 = vrot.lane.b32.xlu0 %v1876_v42, %s1502_s15 }
 0x22e   : > { %848 = vrot.lane.b32.xlu2 %v2046_v23, %s1502_s15 }
 0x22f   : > { %956 = vrot.lane.b32.xlu1 %v704_v54, %s1501_s14 }
 0x235   : > { %1010 = vrot.lane.b32.xlu0 %v2046_v23, %s1501_s14  ;;  %v2208_v23 = vsel %vm370_vm2, %v301_v18, %v313_v21 }
 0x236   : > { %1000 = vrot.lane.b32.xlu2 %v731_v10, %s1501_s14 }
 0x237   : > { %1091 = vrot.lane.b32.xlu1 %v1544_v16, %s1503_s16 }
 0x23d   : > { %794 = vrot.lane.b32.xlu0 %v1946_v57, %s1502_s15  ;;  %v277_v57 = vsel %vm274_vm10, %v1691_v39, %v1663_v30  ;;  %v2244_v39 = vsel %vm262_vm11, %v1768_v63, %v1775_v0  ;;  %vm2816_vm10 = vcmask 998400   ;;  %vm2820_vm11 = vcmask 1006592  }
 0x23e   : > { %838 = vrot.lane.b32.xlu2 %v2208_v23, %s1502_s15  ;;  %v2231_v15 = vsel %vm370_vm2, %v277_v57, %v289_v44  ;;  %v612_v16 = vsel %vm370_vm2, %v1993_v61, %v2244_v39  ;;  %vm2823_vm13 = vmmov %vm2816_vm10 }
 0x23f   : > { %796 = vrot.lane.b32.xlu1 %v2211_v25, %s1502_s15  ;;  %vm2825_vm14 = vmmov %vm2820_vm11 }
 0x240   : > { %v2217_v55 = vpop.permute.xlu2 %846 }
 0x245   : > { %946 = vrot.lane.b32.xlu0 %v1956_v62, %s1501_s14 }
 0x246   : > { %828 = vrot.lane.b32.xlu2 %v2231_v15, %s1502_s15 }
 0x247   : > { %948 = vrot.lane.b32.xlu1 %v2235_v60, %s1501_s14 }
 0x248   : > { %v835_v43 = vpop.permute.xlu2 %834 }
 0x24d   : > { %784 = vrot.lane.b32.xlu0 %v1956_v62, %s1502_s15 }
 0x24e   : > { %818 = vrot.lane.b32.xlu2 %v612_v16, %s1502_s15 }
 0x24f   : > { %786 = vrot.lane.b32.xlu1 %v2235_v60, %s1502_s15 }
 0x250   : > { %v2254_v59 = vpop.permute.xlu2 %988 }
 0x255   : > { %860 = vrot.lane.b32.xlu0 %v1869_v13, %s1502_s15 }
 0x256   : > { %1022 = vrot.lane.b32.xlu2 %v1869_v13, %s1501_s14 }
 0x257   : > { %990 = vrot.lane.b32.xlu1 %v2231_v15, %s1501_s14  ;;  %v1007_v63 = vpop.permute.xlu0 %1006 }
 0x258   : > { %v2262_v62 = vpop.permute.xlu1 %1008  ;;  %v977_v61 = vpop.permute.xlu2 %976 }
 0x259   : > { %v1051_v56 = vsel %vm1026_vm3, %v1007_v63, %v2262_v62 }
 0x25a   : > { %1154 = vmatpush.bf16.msra.mxu2 %v1051_v56  ;;  %v2799_v56 = vld [vmem:[#allocation28_spill] sm:$0xff] }
 0x25d   : > { %850 = vrot.lane.b32.xlu0 %v2049_v32, %s1502_s15 }
 0x25e   : > { %830 = vrot.lane.b32.xlu2 %v2791_v24, %s1502_s15 }
 0x25f   : > { %980 = vrot.lane.b32.xlu1 %v612_v16, %s1501_s14  ;;  %v2286_v53 = vpop.permute.xlu0 %697  ;;  %v2798_v16 = vld [vmem:[#allocation10_spill] sm:$0xff] }
 0x260   : > { %v845_v48 = vpop.permute.xlu1 %844  ;;  %v815_v14 = vpop.permute.xlu2 %814  ;;  %v702_v26 = vsel %vm699_vm6, %v2098_v2, %v2286_v53  ;;  %v193_v63 = vsel %vm190_vm4, %v1729_v51, %v2798_v16 }
 0x261   : > { %v889_v20 = vsel %vm864_vm12, %v845_v48, %v2217_v55  ;;  %v734_v10 = vsel %vm370_vm2, %v2129_v34, %v702_v26  ;;  %v708_v34 = vsel %vm370_vm2, %v205_v49, %v2072_v40 }
 0x262   : > { %1141 = vmatpush.bf16.msra.mxu1 %v889_v20 }
 0x265   : > { %840 = vrot.lane.b32.xlu0 %v2794_v11, %s1502_s15 }
 0x266   : > { %798 = vrot.lane.b32.xlu2 %v2282_v28, %s1502_s15 }
 0x267   : > { %970 = vrot.lane.b32.xlu1 %v2144_v50, %s1501_s14  ;;  %v600_v50 = vsel %vm370_vm2, %v2300_v19, %v1971_v12  ;;  %v2797_v12 = vld [vmem:[#allocation26_spill] sm:$0xff] }
 0x268   : > { %v2290_v54 = vpop.permute.xlu2 %968 }
 0x26d   : > { %1095 = vrot.lane.b32.xlu0 %v2795_v47, %s1503_s16 }
 0x26e   : > { %1002 = vrot.lane.b32.xlu2 %v734_v10, %s1501_s14  ;;  %v2801_v10 = vld [vmem:[#allocation31_spill] sm:$0xff] }
 0x26f   : > { %808 = vrot.lane.b32.xlu1 %v600_v50, %s1502_s15  ;;  %v997_v2 = vpop.permute.xlu0 %996 }
 0x270   : > { %v2309_v21 = vpop.permute.xlu2 %806 }
 0x271   : > { %v2311_v37 = vpop.permute.xlu1 %998 }
 0x272   : > { %v1047_v31 = vsel %vm1026_vm3, %v997_v2, %v2311_v37 }
 0x273   : > { %1155 = vmatpush.bf16.msra.mxu2 %v1047_v31 }
 0x275   : > { %960 = vrot.lane.b32.xlu0 %v708_v34, %s1501_s14  ;;  %v2802_v34 = vld [vmem:[#allocation20_spill] sm:$0xff] }
 0x276   : > { %810 = vrot.lane.b32.xlu2 %v2797_v12, %s1502_s15 }
 0x277   : > { %1012 = vrot.lane.b32.xlu1 %v2049_v32, %s1501_s14  ;;  %v2322_v18 = vpop.permute.xlu0 %836  ;;  %v2337_v32 = vsel %vm370_vm2, %v1546_v17, %v193_v63 }
 0x278   : > { %v2324_v44 = vpop.permute.xlu2 %958  ;;  %v885_v6 = vsel %vm864_vm12, %v835_v43, %v2322_v18 }
 0x279   : > { %v987_v57 = vpop.permute.xlu1 %986  ;;  %1142 = vmatpush.bf16.msra.mxu1 %v885_v6 }
 0x27a   : > { %v1043_v40 = vsel %vm1026_vm3, %v987_v57, %v2254_v59  ;;  %v2803_v57 = vld [vmem:[#allocation18_spill] sm:$0xff] }
 0x27b   : > { %1156 = vmatpush.bf16.msra.mxu2 %v1043_v40 }
 0x27d   : > { %820 = vrot.lane.b32.xlu0 %v2799_v56, %s1502_s15 }
 0x27e   : > { %1014 = vrot.lane.b32.xlu2 %v2035_v27, %s1501_s14 }
 0x27f   : > { %950 = vrot.lane.b32.xlu1 %v2337_v32, %s1501_s14  ;;  %v825_v43 = vpop.permute.xlu0 %824 }
 0x280   : > { %v2343_v48 = vpop.permute.xlu2 %1093 }
 0x281   : > { %v2345_v20 = vpop.permute.xlu1 %826 }
 0x282   : > { %v881_v51 = vsel %vm864_vm12, %v825_v43, %v2345_v20 }
 0x283   : > { %1143 = vmatpush.bf16.msra.mxu1 %v881_v51  ;;  %v2804_v51 = vld [vmem:[#allocation22_spill] sm:$0xff] }
 0x285   : > { %1024 = vrot.lane.b32.xlu0 %v2800_v8, %s1501_s14 }
 0x286   : > { %982 = vrot.lane.b32.xlu2 %v2799_v56, %s1501_s14 }
 0x287   : > { %788 = vrot.lane.b32.xlu1 %v2337_v32, %s1502_s15  ;;  %v2355_v17 = vpop.permute.xlu0 %978 }
 0x288   : > { %v2357_v49 = vpop.permute.xlu2 %848  ;;  %v1039_v11 = vsel %vm1026_vm3, %v977_v61, %v2355_v17  ;;  %v503_v61 = vsel %vm202_vm0, %v2793_v45, %v2802_v34 }
 0x289   : > { %v673_v26 = vpop.permute.xlu1 %672  ;;  %1157 = vmatpush.bf16.msra.mxu2 %v1039_v11  ;;  %v737_v11 = vsel %vm370_vm2, %v2116_v41, %v2286_v53 }
 0x28a   : > { %v678_v41 = vsel %vm674_vm5, %v2114_v3, %v673_v26 }
 0x28d   : > { %862 = vrot.lane.b32.xlu0 %v2800_v8, %s1502_s15  ;;  %v500_v8 = vsel %vm190_vm4, %v2798_v16, %v2804_v51 }
 0x28e   : > { %842 = vrot.lane.b32.xlu2 %v2801_v10, %s1502_s15  ;;  %v2805_v10 = vld [vmem:[#allocation27_spill] sm:$0xff] }
 0x28f   : > { %992 = vrot.lane.b32.xlu1 %v2791_v24, %s1501_s14  ;;  %v2367_v50 = vpop.permute.xlu0 %816  ;;  %v506_v24 = vsel %vm214_vm15, %v2792_v7, %v2803_v57 }
 0x290   : > { %v2369_v2 = vpop.permute.xlu2 %1000  ;;  %v877_v31 = vsel %vm864_vm12, %v815_v14, %v2367_v50  ;;  %v591_v40 = vsel %vm370_vm2, %v503_v61, %v506_v24  ;;  %v176_v24 = vld [vmem:[%s2727_s1] sm:$0xff] }
 0x291   : > { %v967_v12 = vpop.permute.xlu1 %966  ;;  %1144 = vmatpush.bf16.msra.mxu1 %v877_v31  ;;  %1104 = vst [vmem:[#allocation1] ss:$4 sm:$0xff] %v176_v24 }
 0x292   : > { %v1035_v6 = vsel %vm1026_vm3, %v967_v12, %v2290_v54 }
 0x293   : > { %1158 = vmatpush.bf16.msra.mxu2 %v1035_v6 }
 0x295   : > { %800 = vrot.lane.b32.xlu0 %v591_v40, %s1502_s15 }
 0x296   : > { %1097 = vrot.lane.b32.xlu2 %v1686_v38, %s1503_s16 }
 0x297   : > { %852 = vrot.lane.b32.xlu1 %v2035_v27, %s1502_s15  ;;  %v2387_v14 = vpop.permute.xlu0 %1020  ;;  %v586_v27 = vsel %vm370_vm2, %v2795_v47, %v500_v8  ;;  %v2807_v8 = vld [vmem:[#allocation21_spill] sm:$0xff] }
 0x298   : > { %v2389_v63 = vpop.permute.xlu2 %838  ;;  %v722_v3 = vsel %vm370_vm2, %v673_v26, %v2807_v8 }
 0x299   : > { %v805_v56 = vpop.permute.xlu1 %804 }
 0x29a   : > { %v873_v43 = vsel %vm864_vm12, %v805_v56, %v2309_v21  ;;  %v2806_v56 = vld [vmem:[#allocation25_spill] sm:$0xff] }
 0x29b   : > { %1145 = vmatpush.bf16.msra.mxu1 %v873_v43  ;;  %v720_v43 = vsel %vm370_vm2, %v678_v41, %v2806_v56  ;;  %v2809_v56 = vld [vmem:[#allocation23_spill] sm:$0xff] }
 0x29d   : > { %1004 = vrot.lane.b32.xlu0 %v737_v11, %s1501_s14  ;;  %v2808_v11 = vld [vmem:[#allocation29_spill] sm:$0xff] }
 0x29e   : > { %984 = vrot.lane.b32.xlu2 %v2805_v10, %s1501_s14 }
 0x29f   : > { %790 = vrot.lane.b32.xlu1 %v586_v27, %s1502_s15  ;;  %v2405_v31 = vpop.permute.xlu0 %858 }
 0x2a0   : > { %v2407_v12 = vpop.permute.xlu2 %828  ;;  %v894_v6 = vsel %vm864_vm12, %v2100_v33, %v2405_v31  ;;  %v890_v33 = vsel %vm864_vm12, %v2217_v55, %v2357_v49  ;;  %v886_v55 = vsel %vm864_vm12, %v2322_v18, %v2389_v63 }
 0x2a1   : > { %v957_v53 = vpop.permute.xlu1 %956  ;;  %1192 = vmatpush.bf16.msrb.mxu0 %v894_v6  ;;  %v882_v18 = vsel %vm864_vm12, %v2345_v20, %v2407_v12  ;;  %v2813_v20 = vld [vmem:[#allocation16_spill] sm:$0xff] }
 0x2a2   : > { %v1031_v40 = vsel %vm1026_vm3, %v957_v53, %v2324_v44 }
 0x2a3   : > { %1159 = vmatpush.bf16.msra.mxu2 %v1031_v40  ;;  %v2440_v40 = vld.sshfl [vmem:[#allocation1 + $0x18] sm:$0xff pattern:$0x73625140] }
 0x2a5   : > { %972 = vrot.lane.b32.xlu0 %v720_v43, %s1501_s14  ;;  %1193 = vmatpush.bf16.msrb.mxu0 %v890_v33  ;;  %v594_v43 = vsel %vm370_vm2, %v2802_v34, %v2803_v57  ;;  %v710_v33 = vsel %vm370_vm2, %v503_v61, %v2136_v29 }
 0x2a6   : > { %974 = vrot.lane.b32.xlu2 %v722_v3, %s1501_s14 }
 0x2a7   : > { %994 = vrot.lane.b32.xlu1 %v2808_v11, %s1501_s14  ;;  %v2430_v6 = vpop.permute.xlu0 %1010 }
 0x2a8   : > { %v2432_v53 = vpop.permute.xlu2 %818 }
 0x2a9   : > { %v1092_v41 = vpop.permute.xlu1 %1091  ;;  %1194 = vmatpush.bf16.msrb.mxu0 %v886_v55  ;;  %v2810_v55 = vld [vmem:[#allocation7_spill] sm:$0xff]  ;;  %v878_v29 = vsel %vm864_vm12, %v2367_v50, %v2432_v53 }
 0x2aa   : > { %v1100_v26 = vsel %vm1099_vm7, %v1092_v41, %v2343_v48  ;;  %v2811_v41 = vld [vmem:[#allocation9_spill] sm:$0xff] }
 0x2ab   : > { %v1116_v24 = vsel %vm370_vm2, %v1100_v26, 0 }
 0x2ac   : > { %1173 = vmatpush.bf16.msra.mxu3 %v1116_v24 }
 0x2ad   : > { %832 = vrot.lane.b32.xlu0 %v2808_v11, %s1502_s15  ;;  %1195 = vmatpush.bf16.msrb.mxu0 %v882_v18  ;;  %v324_v11 = vsel %vm2812_vm9, %v2811_v41, %v2810_v55  ;;  %v2817_v55 = vld [vmem:[#allocation24_spill] sm:$0xff]  ;;  %v2818_v41 = vld [vmem:[#allocation13_spill] sm:$0xff] }
 0x2ae   : > { %802 = vrot.lane.b32.xlu2 %v594_v43, %s1502_s15  ;;  %v472_v26 = vsel %vm370_vm2, %v324_v11, %v2813_v20  ;;  %v712_v20 = vsel %vm370_vm2, %v2802_v34, %v2123_v9  ;;  %v2509_v9 = vld.sshfl [vmem:[#allocation1 + $0x10] sm:$0xff pattern:$0x73625140]  ;;  %v588_v34 = vsel %vm370_vm2, %v1686_v38, %v2804_v51 }
 0x2af   : > { %962 = vrot.lane.b32.xlu1 %v710_v33, %s1501_s14  ;;  %v795_v3 = vpop.permute.xlu0 %794  ;;  %1418 = vmatmul.msk.bf16.vlgmr.msra.gmra.mxu3 %vm1112_vm8, %v2440_v40  ;;  %v2814_v33 = vld [vmem:[#allocation4_spill] sm:$0xff] }
 0x2b0   : > { %1179 = vmatpush.bf16.msrb.mxu3 %v2809_v56  ;;  %v2462_v57 = vpop.permute.xlu2 %1022 }
 0x2b1   : > { %v2464_v24 = vpop.permute.xlu1 %796  ;;  %1196 = vmatpush.bf16.msrb.mxu0 %v878_v29 }
 0x2b2   : > { %v869_v61 = vsel %vm864_vm12, %v795_v3, %v2464_v24  ;;  %v2815_v3 = vld [vmem:[#allocation6_spill] sm:$0xff] }
 0x2b3   : > { %1146 = vmatpush.bf16.msra.mxu1 %v869_v61 }
 0x2b4   : > { %1180 = vmatpush.bf16.msrb.mxu3 %v472_v26 }
 0x2b5   : > { %822 = vrot.lane.b32.xlu0 %v2805_v10, %s1502_s15  ;;  %v606_v10 = vsel %vm370_vm2, %v2817_v55, %v2807_v8 }
 0x2b7   : > { %952 = vrot.lane.b32.xlu1 %v586_v27, %s1501_s14  ;;  %v947_v56 = vpop.permute.xlu0 %946 }
 0x2b8   : > { %1181 = vmatpush.bf16.msrb.mxu3 %v2090_v52  ;;  %v2475_v18 = vpop.permute.xlu2 %830  ;;  %v252_v52 = vsel %vm2816_vm10, %v2815_v3, %v2814_v33  ;;  %v2821_v3 = vld [vmem:[#allocation17_spill] sm:$0xff] }
 0x2b9   : > { %v2477_v43 = vpop.permute.xlu1 %948  ;;  %v424_v27 = vsel %vm370_vm2, %v252_v52, %v2112_v22 }
 0x2ba   : > { %v1027_v50 = vsel %vm1026_vm3, %v947_v56, %v2477_v43  ;;  %v1056_v56 = vsel %vm1026_vm3, %v2155_v35, %v2387_v14  ;;  %v1052_v35 = vsel %vm1026_vm3, %v2262_v62, %v2430_v6 }
 0x2bb   : > { %1160 = vmatpush.bf16.msra.mxu2 %v1027_v50 }
 0x2bc   : > { %1182 = vmatpush.bf16.msrb.mxu3 %v2060_v58  ;;  %v2819_v58 = vld [vmem:[#allocation14_spill] sm:$0xff] }
 0x2bd   : > { %812 = vrot.lane.b32.xlu0 %v606_v10, %s1502_s15  ;;  %v240_v11 = vsel %vm2820_vm11, %v2819_v58, %v2818_v41 }
 0x2be   : > { %v408_v8 = vsel %vm370_vm2, %v2121_v36, %v240_v11  ;;  %1161 = vmatmul.bf16.vlgmr.msra.gmra.mxu2 %v2509_v9  ;;  %v2517_v36 = vld.sshfl [vmem:[#allocation1] sm:$0xff pattern:$0x73625140] }
 0x2bf   : > { %964 = vrot.lane.b32.xlu1 %v712_v20, %s1501_s14  ;;  %v785_v26 = vpop.permute.xlu0 %784  ;;  %1135 = vmatmul.bf16.vlgmr.msra.gmra.mxu0 %v2517_v36  ;;  %v2824_v20 = vld [vmem:[#allocation11_spill] sm:$0xff] }
 0x2c0   : > { %1183 = vmatpush.bf16.msrb.mxu3 %v424_v27  ;;  %v2500_v29 = vpop.permute.xlu2 %798 }
 0x2c1   : > { %v2502_v22 = vpop.permute.xlu1 %786 }
 0x2c2   : > { %v865_v61 = vsel %vm864_vm12, %v785_v26, %v2502_v22 }
 0x2c3   : > { %1147 = vmatpush.bf16.msra.mxu1 %v865_v61 }
 0x2c4   : > { %1184 = vmatpush.bf16.msrb.mxu3 %v408_v8 }
 0x2c5   : > { %954 = vrot.lane.b32.xlu0 %v588_v34, %s1501_s14 }
 0x2c7   : > { %1205 = vmatpush.bf16.msrb.mxu1 %v1056_v56  ;;  %792 = vrot.lane.b32.xlu1 %v588_v34, %s1502_s15  ;;  %v2520_v50 = vpop.permute.xlu0 %860 }
 0x2c8   : > { %1185 = vmatpush.bf16.msrb.mxu3 %v2211_v25  ;;  %v2526_v38 = vpop.permute.xlu2 %1002  ;;  %v1048_v25 = vsel %vm1026_vm3, %v2311_v37, %v2369_v2 }
 0x2c9   : > { %v2528_v51 = vpop.permute.xlu1 %990 }
 0x2ca   : > { %v1044_v52 = vsel %vm1026_vm3, %v2254_v59, %v2528_v51  ;;  %v2822_v59 = vld [vmem:[#allocation8_spill] sm:$0xff] }
 0x2cb   : > { %1206 = vmatpush.bf16.msrb.mxu1 %v1052_v35  ;;  %v253_v27 = vsel %vm2823_vm13, %v2814_v33, %v2822_v59 }
 0x2cc   : > { %1186 = vmatpush.bf16.msrb.mxu3 %v2235_v60  ;;  %v2544_v60 = vld.sshfl [vmem:[#allocation1 + $0x8] sm:$0xff pattern:$0x73625140] }
 0x2cd   : > { %1148 = vmatmul.bf16.vlgmr.msra.gmra.mxu1 %v2544_v60 }
 0x2cf   : > { %1207 = vmatpush.bf16.msrb.mxu1 %v1048_v25  ;;  %1187 = vmatmul.bf16.vlgmr.msrb.gmra.mxu3 %v2517_v36  ;;  %v2537_v62 = vpop.permute.xlu0 %850 }
 0x2d0   : > { %1231 = vmatpush.bf16.msra.mxu3 %v1876_v42  ;;  %v2542_v55 = vpop.permute.xlu2 %810 }
 0x2d1   : > { %v2546_v42 = vpop.permute.xlu1 %980 }
 0x2d2   : > { %v1040_v37 = vsel %vm1026_vm3, %v2355_v17, %v2546_v42  ;;  %v241_v17 = vsel %vm2825_vm14, %v2818_v41, %v2824_v20  ;;  %v895_v41 = vsel %vm864_vm12, %v2405_v31, %v2520_v50 }
 0x2d3   : > { %1208 = vmatpush.bf16.msrb.mxu1 %v1044_v52  ;;  %v412_v33 = vsel %vm370_vm2, %v2300_v19, %v241_v17  ;;  %v870_v19 = vsel %vm864_vm12, %v2464_v24, %v2500_v29  ;;  %v2826_v24 = vld [vmem:[#allocation15_spill] sm:$0xff]  ;;  %v432_v52 = vsel %vm370_vm2, %v2822_v59, %v1775_v0  ;;  %v1057_v0 = vsel %vm1026_vm3, %v2387_v14, %v2462_v57 }
 0x2d4   : > { %1232 = vmatpush.bf16.msra.mxu3 %v2821_v3  ;;  %v400_v59 = vsel %vm370_vm2, %v2793_v45, %v2792_v7  ;;  %v1049_v7 = vsel %vm1026_vm3, %v2369_v2, %v2526_v38 }
 0x2d7   : > { %1209 = vmatpush.bf16.msrb.mxu1 %v1040_v37  ;;  %v2554_v10 = vpop.permute.xlu0 %840 }
 0x2d8   : > { %1233 = vmatpush.bf16.msra.mxu3 %v2208_v23  ;;  %v2559_v58 = vpop.permute.xlu2 %1014  ;;  %v428_v23 = vsel %vm370_vm2, %v253_v27, %v2244_v39 }
 0x2d9   : > { %v2561_v11 = vpop.permute.xlu1 %970 }
 0x2dc   : > { %1234 = vmatpush.bf16.msra.mxu3 %v2231_v15  ;;  %v1036_v15 = vsel %vm1026_vm3, %v2290_v54, %v2561_v11 }
 0x2dd   : > { %1210 = vmatpush.bf16.msrb.mxu1 %v1036_v15 }
 0x2df   : > { %v1096_v26 = vpop.permute.xlu0 %1095 }
 0x2e0   : > { %1235 = vmatpush.bf16.msra.mxu3 %v428_v23  ;;  %v2573_v8 = vpop.permute.xlu2 %982  ;;  %v1101_v39 = vsel %vm1099_vm7, %v2343_v48, %v1096_v26  ;;  %v384_v23 = vsel %vm370_vm2, %v2795_v47, %v2798_v16 }
 0x2e1   : > { %v809_v61 = vpop.permute.xlu1 %808  ;;  %v1119_v56 = vsel %vm370_vm2, %v1101_v39, 0  ;;  %v1041_v2 = vsel %vm1026_vm3, %v2546_v42, %v2573_v8 }
 0x2e2   : > { %v874_v54 = vsel %vm864_vm12, %v2309_v21, %v809_v61  ;;  %1225 = vmatpush.bf16.msrb.mxu2 %v1119_v56  ;;  %v875_v37 = vsel %vm864_vm12, %v809_v61, %v2542_v55 }
 0x2e3   : > { %1197 = vmatpush.bf16.msrb.mxu0 %v874_v54 }
 0x2e4   : > { %1236 = vmatpush.bf16.msra.mxu3 %v412_v33 }
 0x2e5   : > { %1419 = vmatmul.msk.bf16.vlgmr.msrb.gmra.mxu2 %vm1112_vm8, %v2440_v40 }
 0x2e6   : > { %1244 = vmatpush.bf16.msra.mxu2 %v895_v41 }
 0x2e7   : > { %1198 = vmatpush.bf16.msrb.mxu0 %v870_v19  ;;  %v2591_v48 = vpop.permute.xlu0 %960 }
 0x2e8   : > { %1237 = vmatpush.bf16.msra.mxu3 %v2282_v28  ;;  %v891_v28 = vsel %vm864_vm12, %v2357_v49, %v2537_v62  ;;  %v2596_v21 = vpop.permute.xlu2 %842  ;;  %v464_v49 = vsel %vm370_vm2, %v1714_v46, %v1777_v1  ;;  %v448_v1 = vsel %vm370_vm2, %v1663_v30, %v1786_v5 }
 0x2e9   : > { %v2601_v31 = vpop.permute.xlu1 %1012 }
 0x2ea   : > { %1245 = vmatpush.bf16.msra.mxu2 %v891_v28  ;;  %v1054_v42 = vsel %vm1026_vm3, %v2601_v31, %v2559_v58 }
 0x2ec   : > { %1238 = vmatpush.bf16.msra.mxu3 %v2337_v32  ;;  %v1032_v32 = vsel %vm1026_vm3, %v2324_v44, %v2591_v48  ;;  %v883_v44 = vsel %vm864_vm12, %v2407_v12, %v2475_v18 }
 0x2ed   : > { %1211 = vmatpush.bf16.msrb.mxu1 %v1032_v32 }
 0x2ef   : > { %1239 = vmatmul.bf16.vlgmr.msra.gmra.mxu3 %v2517_v36  ;;  %v2611_v34 = vpop.permute.xlu0 %820 }
 0x2f0   : > { %1283 = vmatpush.bf16.msrb.mxu3 %v1869_v13  ;;  %v887_v13 = vsel %vm864_vm12, %v2389_v63, %v2554_v10  ;;  %v2616_v35 = vpop.permute.xlu2 %1097  ;;  %v879_v12 = vsel %vm864_vm12, %v2432_v53, %v2611_v34  ;;  %v416_v53 = vsel %vm370_vm2, %v2796_v4, %v2824_v20 }
 0x2f1   : > { %1246 = vmatpush.bf16.msra.mxu2 %v887_v13  ;;  %v2618_v25 = vpop.permute.xlu1 %950  ;;  %v1102_v63 = vsel %vm1099_vm7, %v1096_v26, %v2616_v35 }
 0x2f2   : > { %v1122_v3 = vsel %vm370_vm2, %v1102_v63, 0  ;;  %v1028_v46 = vsel %vm1026_vm3, %v2477_v43, %v2618_v25 }
 0x2f3   : > { %1212 = vmatpush.bf16.msrb.mxu1 %v1028_v46 }
 0x2f4   : > { %1284 = vmatpush.bf16.msrb.mxu3 %v2826_v24 }
 0x2f5   : > { %1247 = vmatpush.bf16.msra.mxu2 %v883_v44 }
 0x2f6   : > { %1213 = vmatmul.bf16.vlgmr.msrb.gmra.mxu1 %v2509_v9 }
 0x2f7   : > { %1277 = vmatpush.bf16.msra.mxu1 %v1122_v3  ;;  %v1025_v43 = vpop.permute.xlu0 %1024 }
 0x2f8   : > { %1285 = vmatpush.bf16.msrb.mxu3 %v464_v49  ;;  %v1058_v17 = vsel %vm1026_vm3, %v2462_v57, %v1025_v43  ;;  %v985_v26 = vpop.permute.xlu2 %984 }
 0x2f9   : > { %1248 = vmatpush.bf16.msra.mxu2 %v879_v12  ;;  %v789_v30 = vpop.permute.xlu1 %788 }
 0x2fa   : > { %v866_v5 = vsel %vm864_vm12, %v2502_v22, %v789_v30  ;;  %v1053_v22 = vsel %vm1026_vm3, %v2430_v6, %v2601_v31 }
 0x2fb   : > { %1199 = vmatpush.bf16.msrb.mxu0 %v866_v5 }
 0x2fc   : > { %1286 = vmatpush.bf16.msrb.mxu3 %v448_v1 }
 0x2fd   : > { %1249 = vmatpush.bf16.msra.mxu2 %v875_v37 }
 0x2fe   : > { %1200 = vmatmul.bf16.vlgmr.msrb.gmra.mxu0 %v2544_v60 }
 0x2ff   : > { %1257 = vmatpush.bf16.msra.mxu0 %v1057_v0  ;;  %v863_v27 = vpop.permute.xlu0 %862 }
 0x300   : > { %1287 = vmatpush.bf16.msrb.mxu3 %v432_v52  ;;  %v896_v4 = vsel %vm864_vm12, %v2520_v50, %v863_v27 }
 0x301   : > { %v993_v14 = vpop.permute.xlu1 %992  ;;  %1296 = vmatpush.bf16.msrb.mxu1 %v896_v4 }
 0x302   : > { %v1045_v6 = vsel %vm1026_vm3, %v2528_v51, %v993_v14 }
 0x303   : > { %1258 = vmatpush.bf16.msra.mxu0 %v1053_v22 }
 0x304   : > { %1288 = vmatpush.bf16.msrb.mxu3 %v416_v53 }
 0x306   : > { %1420 = vmatmul.msk.bf16.vlgmr.msra.gmra.mxu1 %vm1112_vm8, %v2440_v40 }
 0x307   : > { %1259 = vmatpush.bf16.msra.mxu0 %v1049_v7  ;;  %v801_v45 = vpop.permute.xlu0 %800 }
 0x308   : > { %1289 = vmatpush.bf16.msrb.mxu3 %v400_v59  ;;  %v871_v50 = vsel %vm864_vm12, %v2500_v29, %v801_v45 }
 0x309   : > { %v853_v47 = vpop.permute.xlu1 %852  ;;  %1250 = vmatpush.bf16.msra.mxu2 %v871_v50 }
 0x30a   : > { %v892_v16 = vsel %vm864_vm12, %v2537_v62, %v853_v47 }
 0x30b   : > { %1260 = vmatpush.bf16.msra.mxu0 %v1045_v6  ;;  %1297 = vmatpush.bf16.msrb.mxu1 %v892_v16 }
 0x30c   : > { %1290 = vmatpush.bf16.msrb.mxu3 %v384_v23 }
 0x30f   : > { %1291 = vmatmul.bf16.vlgmr.msrb.gmra.mxu3 %v2517_v36  ;;  %1261 = vmatpush.bf16.msra.mxu0 %v1041_v2  ;;  %v888_v36 = vsel %vm864_vm12, %v2554_v10, %v2596_v21  ;;  %v1005_v51 = vpop.permute.xlu0 %1004 }
 0x310   : > { %1298 = vmatpush.bf16.msrb.mxu1 %v888_v36  ;;  %v1050_v33 = vsel %vm1026_vm3, %v2526_v38, %v1005_v51  ;;  %v975_v38 = vpop.permute.xlu2 %974 }
 0x311   : > { %v791_v20 = vpop.permute.xlu1 %790 }
 0x312   : > { %v867_v29 = vsel %vm864_vm12, %v789_v30, %v791_v20 }
 0x313   : > { %1251 = vmatpush.bf16.msra.mxu2 %v867_v29 }
 0x316   : > { %1252 = vmatmul.bf16.vlgmr.msra.gmra.mxu2 %v2544_v60 }
 0x317   : > { %1309 = vmatpush.bf16.msrb.mxu2 %v1058_v17  ;;  %v973_v62 = vpop.permute.xlu0 %972 }
 0x318   : > { %v1037_v10 = vsel %vm1026_vm3, %v2561_v11, %v973_v62  ;;  %v1042_v11 = vsel %vm1026_vm3, %v2573_v8, %v985_v26  ;;  %v1038_v54 = vsel %vm1026_vm3, %v973_v62, %v975_v38  ;;  %v803_v32 = vpop.permute.xlu2 %802 }
 0x319   : > { %v995_v15 = vpop.permute.xlu1 %994  ;;  %1262 = vmatpush.bf16.msra.mxu0 %v1037_v10  ;;  %v872_v49 = vsel %vm864_vm12, %v801_v45, %v803_v32 }
 0x31a   : > { %v1046_v39 = vsel %vm1026_vm3, %v993_v14, %v995_v15 }
 0x31b   : > { %1310 = vmatpush.bf16.msrb.mxu2 %v1054_v42 }
 0x31f   : > { %1311 = vmatpush.bf16.msrb.mxu2 %v1050_v33  ;;  %v833_v57 = vpop.permute.xlu0 %832 }
 0x320   : > { %v884_v61 = vsel %vm864_vm12, %v2475_v18, %v833_v57 }
 0x321   : > { %v963_v56 = vpop.permute.xlu1 %962  ;;  %1299 = vmatpush.bf16.msrb.mxu1 %v884_v61 }
 0x322   : > { %v1033_v58 = vsel %vm1026_vm3, %v2591_v48, %v963_v56  ;;  %v1125_v48 = vsel %vm370_vm2, %v2616_v35, 0 }
 0x323   : > { %1312 = vmatpush.bf16.msrb.mxu2 %v1046_v39  ;;  %1263 = vmatpush.bf16.msra.mxu0 %v1033_v58 }
 0x327   : > { %1313 = vmatpush.bf16.msrb.mxu2 %v1042_v11  ;;  %v823_v41 = vpop.permute.xlu0 %822 }
 0x328   : > { %v880_v19 = vsel %vm864_vm12, %v2611_v34, %v823_v41 }
 0x329   : > { %v953_v28 = vpop.permute.xlu1 %952  ;;  %1300 = vmatpush.bf16.msrb.mxu1 %v880_v19 }
 0x32a   : > { %v1029_v18 = vsel %vm1026_vm3, %v2618_v25, %v953_v28 }
 0x32b   : > { %1314 = vmatpush.bf16.msrb.mxu2 %v1038_v54  ;;  %1264 = vmatpush.bf16.msra.mxu0 %v1029_v18 }
 0x32e   : > { %1265 = vmatmul.bf16.vlgmr.msra.gmra.mxu0 %v2509_v9 }
 0x32f   : > { %1329 = vmatpush.bf16.msrb.mxu0 %v1125_v48  ;;  %v813_v8 = vpop.permute.xlu0 %812 }
 0x330   : > { %v876_v21 = vsel %vm864_vm12, %v2542_v55, %v813_v8 }
 0x331   : > { %v965_v31 = vpop.permute.xlu1 %964  ;;  %1301 = vmatpush.bf16.msrb.mxu1 %v876_v21 }
 0x332   : > { %v1034_v24 = vsel %vm1026_vm3, %v963_v56, %v965_v31  ;;  %v1175_v13 = vpop.f32.mrf.mxu3 }
 0x333   : > { %1315 = vmatpush.bf16.msrb.mxu2 %v1034_v24 }
 0x335   : > { %1302 = vmatpush.bf16.msrb.mxu1 %v872_v49 }
 0x337   : > { %v955_v34 = vpop.permute.xlu0 %954 }
 0x338   : > { %v1030_v44 = vsel %vm1026_vm3, %v953_v28, %v955_v34  ;;  %vm1350_vm3 = vcmask 1042432  }
 0x339   : > { %v793_v35 = vpop.permute.xlu1 %792  ;;  %1316 = vmatpush.bf16.msrb.mxu2 %v1030_v44 }
 0x33a   : > { %v868_v25 = vsel %vm864_vm12, %v791_v20, %v793_v35  ;;  %v1177_v63 = vpop.f32.mrf.mxu3  ;;  %vm1351_vm12 = vcmask 817156  }
 0x33b   : > { %1303 = vmatpush.bf16.msrb.mxu1 %v868_v25  ;;  %vm1352_vm15 = vmor %vm1351_vm12, %vm1350_vm3 }
 0x33c   : > { %1317 = vmatmul.bf16.vlgmr.msrb.gmra.mxu2 %v2509_v9  ;;  %v1136_v55 = vpop.f32.mrf.mxu0 }
 0x33e   : > { %1304 = vmatmul.bf16.vlgmr.msrb.gmra.mxu1 %v2544_v60  ;;  %1421 = vmatmul.msk.bf16.vlgmr.msrb.gmra.mxu0 %vm1112_vm8, %v2440_v40 }
 0x341   : > { %v1162_v3 = vpop.f32.mrf.mxu2 }
 0x344   : > { %v1138_v46 = vpop.f32.mrf.mxu0 }
 0x349   : > { %v1164_v12 = vpop.f32.mrf.mxu2 }
 0x34a   : > { %v1149_v1 = vpop.f32.mrf.mxu1 }
 0x34b   : > { %v1150_v9 = vadd.f32 %v1149_v1, %v1136_v55 }
 0x34d   : > { %v1163_v27 = vadd.f32 %v1162_v3, %v1150_v9 }
 0x34f   : > { %v1176_v40 = vadd.f32 %v1175_v13, %v1163_v27 }
 0x351   : > { %1461 = vtanh.f32 %v1176_v40 }
 0x352   : > { %v1188_v52 = vpop.f32.mrf.mxu3  ;;  %v1151_v43 = vpop.f32.mrf.mxu1 }
 0x357   : > { %v1462_v6 = vpop.eup %1461 }
 0x35a   : > { %v1190_v37 = vpop.f32.mrf.mxu3 }
 0x368   : > { %v1227_v30 = vpop.f32.mrf.mxu2 }
 0x370   : > { %v1229_v53 = vpop.f32.mrf.mxu2 }
 0x372   : > { %v1240_v5 = vpop.f32.mrf.mxu3 }
 0x373   : > { %v1214_v0 = vpop.f32.mrf.mxu1 }
 0x37a   : > { %v1242_v59 = vpop.f32.mrf.mxu3 }
 0x37b   : > { %v1201_v60 = vpop.f32.mrf.mxu0  ;;  %v1216_v22 = vpop.f32.mrf.mxu1 }
 0x37c   : > { %v1202_v4 = vadd.f32 %v1201_v60, %v1188_v52 }
 0x37e   : > { %v1215_v14 = vadd.f32 %v1214_v0, %v1202_v4 }
 0x380   : > { %v1228_v23 = vadd.f32 %v1227_v30, %v1215_v14 }
 0x382   : > { %1463 = vtanh.f32 %v1228_v23 }
 0x383   : > { %v1203_v7 = vpop.f32.mrf.mxu0  ;;  %v1279_v45 = vpop.f32.mrf.mxu1 }
 0x388   : > { %v1464_v50 = vpop.eup %1463 }
 0x389   : > { %v1343_v47 = vrot.slane %v1464_v50, 4 }
 0x38b   : > { %v1345_v16 = vsel %vm370_vm2, %v1462_v6, %v1343_v47  ;;  %v1281_v2 = vpop.f32.mrf.mxu1 }
 0x38c   : > { %1349 = vst [vmem:[%s2717_s21] sm:$0x77] %v1345_v16 }
 0x392   : > { %v1292_v36 = vpop.f32.mrf.mxu3 }
 0x399   : > { %v1253_v51 = vpop.f32.mrf.mxu2 }
 0x39a   : > { %v1294_v20 = vpop.f32.mrf.mxu3  ;;  %v1254_v17 = vadd.f32 %v1253_v51, %v1240_v5 }
 0x3a1   : > { %v1255_v29 = vpop.f32.mrf.mxu2 }
 0x3ab   : > { %v1266_v62 = vpop.f32.mrf.mxu0 }
 0x3ac   : > { %v1267_v42 = vadd.f32 %v1266_v62, %v1254_v17 }
 0x3ae   : > { %v1280_v10 = vadd.f32 %v1279_v45, %v1267_v42 }
 0x3b3   : > { %v1268_v15 = vpop.f32.mrf.mxu0 }
 0x3bb   : > { %v1305_v33 = vpop.f32.mrf.mxu1  ;;  %v1331_v26 = vpop.f32.mrf.mxu0 }
 0x3bc   : > { %v1306_v57 = vadd.f32 %v1305_v33, %v1292_v36 }
 0x3bf   : > { %v1318_v39 = vpop.f32.mrf.mxu2 }
 0x3c0   : > { %v1319_v61 = vadd.f32 %v1318_v39, %v1306_v57 }
 0x3c2   : > { %v1332_v56 = vadd.f32 %v1331_v26, %v1319_v61 }
 0x3c3   : > { %v1307_v58 = vpop.f32.mrf.mxu1  ;;  %v1333_v11 = vpop.f32.mrf.mxu0 }
 0x3c4   : > { %1465 = vtanh.f32 %v1332_v56 }
 0x3c5   : > { %1467 = vtanh.f32 %v1280_v10 }
 0x3c7   : > { %v1320_v38 = vpop.f32.mrf.mxu2 }
 0x3ca   : > { %v1466_v41 = vpop.eup %1465 }
 0x3cb   : > { %v1344_v54 = vrot.slane %v1466_v41, 4  ;;  %v1468_v19 = vpop.eup %1467 }
 0x3cd   : > { %v1346_v28 = vsel %vm370_vm2, %v1468_v19, %v1344_v54 }
 0x3ce   : > { %1353 = vst.msk [vmem:[%s2717_s21 + $0x8] sm:$0x77] %vm1352_vm15, %v1346_v28 }
 0x3cf PF: > { %s12_s9 = sadd.s32 1, %s1475_s9  }
 0x3d0   : > { %p9_p4 = scmp.ge.s32.totalorder %s12_s9, 4  }
 0x3d2   :  { %11 = sbr.rel (!%p9_p4) target bundleno = 1 (0x1), region = 58 }

</bundles_post_ra>
